<compile_context>
chip_gen: v7x
topology: tpu7x:2x2x1
jax: 0.10.0
libtpu: 0.0.40
codegen_flags: <defaults>
</compile_context>

<pallas_src>
from functools import partial

import numpy as np
import jax
import jax.numpy as jnp
from jax import lax
from jax.experimental import pallas as pl
from jax.experimental.pallas import tpu as pltpu


def _round_up(n, m):
    return ((n + m - 1) // m) * m


def _vmem_limit_bytes():
    # Raise the scoped-VMEM ceiling per generation: ~3/4 of physical capacity,
    # capped at 100 MiB (v5e/v6e: 128 MiB physical, v7x: 64 MiB).
    try:
        cap = int(pltpu.get_tpu_info().vmem_capacity_bytes)
        return min(cap * 3 // 4, 100 * 1024 * 1024)
    except Exception:
        return 48 * 1024 * 1024


VMEM_LIMIT = _vmem_limit_bytes()
MAX_CHUNK = 1024  # in-kernel pixel-chunk size (multiple of 128)


# -----------------------------------------------------------------------------
# Fused conv (+ instance-norm) (+ activation) kernel: in-kernel tap accumulation
# -----------------------------------------------------------------------------
def conv_in_act_kernel(x_ref, w_ref, mask_ref, gamma_ref, beta_ref, o_ref, acc_ref,
                       *, offsets, n_chunks, tile_m, n_valid, use_norm, act):
    # x_ref:    (Cin, L)            bf16  flat reflect-padded (phase-split) image
    # w_ref:    (n_taps, Cout, Cin) bf16  per-tap weight matrices
    # mask_ref: (1, M_pad)          f32   1.0 on valid output pixels
    # gamma_ref, beta_ref: (Cout,1) f32   (beta doubles as conv bias when !norm)
    # o_ref:    (Cout, M_pad)             layer output (bf16 / f32)
    # acc_ref:  (Cout, M_pad)       f32   scratch: pre-norm conv result
    c_out = o_ref.shape[0]
    n_taps = len(offsets)

    def conv_chunk(m0):
        acc = jnp.zeros((c_out, tile_m), jnp.float32)
        for t in range(n_taps):                      # static shifted-window taps
            xs = x_ref[:, pl.ds(offsets[t] + m0, tile_m)]
            acc = acc + jnp.dot(w_ref[t], xs, preferred_element_type=jnp.float32)
        return acc

    def activate(y):
        if act == "relu":
            return jnp.maximum(y, 0.0)
        if act == "tanh":
            return jnp.tanh(y)
        return y

    if not use_norm:
        bias = beta_ref[...]
        for c in range(n_chunks):
            m0 = c * tile_m
            o_ref[:, pl.ds(m0, tile_m)] = activate(conv_chunk(m0) + bias).astype(o_ref.dtype)
        return

    # Instance norm (two-pass mean/var over the VMEM-resident scratch for
    # better precision than E[x^2]-mean^2), then affine + activation + cast.
    inv_n = 1.0 / float(n_valid)
    total = jnp.zeros((c_out, 1), jnp.float32)
    for c in range(n_chunks):
        m0 = c * tile_m
        tile = conv_chunk(m0)
        acc_ref[:, pl.ds(m0, tile_m)] = tile
        total = total + jnp.sum(tile * mask_ref[:, pl.ds(m0, tile_m)],
                                axis=-1, keepdims=True)
    mean = total * inv_n

    ssq = jnp.zeros((c_out, 1), jnp.float32)
    for c in range(n_chunks):
        m0 = c * tile_m
        d = (acc_ref[:, pl.ds(m0, tile_m)] - mean) * mask_ref[:, pl.ds(m0, tile_m)]
        ssq = ssq + jnp.sum(d * d, axis=-1, keepdims=True)
    inv_std = lax.rsqrt(ssq * inv_n + 1e-5)

    g = gamma_ref[...] * inv_std
    b = beta_ref[...] - mean * g
    for c in range(n_chunks):
        m0 = c * tile_m
        y = activate(acc_ref[:, pl.ds(m0, tile_m)] * g + b)
        o_ref[:, pl.ds(m0, tile_m)] = y.astype(o_ref.dtype)


def conv_block(h, wtaps, gamma, beta, *, ksize, stride, pad, upsample,
               use_norm, act, out_dtype):
    # h: (B, Cin_pad, H, W) bf16 -> out: (B, Cout_pad, M_pad) "wide" layout
    B, cin, H, W = h.shape
    if upsample:  # nearest x2 (gather-free XLA repeat)
        h = jnp.repeat(jnp.repeat(h, 2, axis=-2), 2, axis=-1)
        H, W = 2 * H, 2 * W

    hp = jnp.pad(h, ((0, 0), (0, 0), (pad, pad), (pad, pad)), mode="reflect")
    Hp, Wp = H + 2 * pad, W + 2 * pad
    Ho = (Hp - ksize) // stride + 1
    Wo = (Wp - ksize) // stride + 1

    if stride == 1:
        xflat = hp.reshape(B, cin, Hp * Wp)
        wrow = Wp
        offsets = tuple(dy * Wp + dx for dy in range(ksize) for dx in range(ksize))
    else:  # stride == 2: phase-split so every tap is a contiguous shift
        assert stride == 2 and Hp % 2 == 0 and Wp % 2 == 0
        Hph, Wph = Hp // 2, Wp // 2
        ph = hp.reshape(B, cin, Hph, 2, Wph, 2).transpose(0, 1, 3, 5, 2, 4)
        xflat = ph.reshape(B, cin, 4 * Hph * Wph)
        wrow = Wph
        offsets = tuple(((dy % 2) * 2 + (dx % 2)) * Hph * Wph
                        + (dy // 2) * Wph + (dx // 2)
                        for dy in range(ksize) for dx in range(ksize))

    m_wide = Ho * wrow                      # wide pixel axis (valid cols = Wo)
    tile_m = m_wide if m_wide <= MAX_CHUNK else MAX_CHUNK
    n_chunks = -(-m_wide // tile_m)
    m_pad = n_chunks * tile_m

    l_need = max(offsets) + m_pad
    l_pad = _round_up(max(l_need, xflat.shape[-1]), 128)
    if l_pad > xflat.shape[-1]:
        xflat = jnp.pad(xflat, ((0, 0), (0, 0), (0, l_pad - xflat.shape[-1])))

    j = jnp.arange(m_pad)
    mask = (((j % wrow) < Wo) & (j < m_wide)).astype(jnp.float32).reshape(1, m_pad)

    n_taps, cout_pad, _ = wtaps.shape
    kern = partial(conv_in_act_kernel, offsets=offsets, n_chunks=n_chunks,
                   tile_m=tile_m, n_valid=Ho * Wo, use_norm=use_norm, act=act)

    out = pl.pallas_call(
        kern,
        out_shape=jax.ShapeDtypeStruct((B, cout_pad, m_pad), out_dtype),
        grid=(B,),
        in_specs=[
            pl.BlockSpec((None, cin, l_pad), lambda b: (b, 0, 0)),
            pl.BlockSpec((n_taps, cout_pad, cin), lambda b: (0, 0, 0)),
            pl.BlockSpec((1, m_pad), lambda b: (0, 0)),
            pl.BlockSpec((cout_pad, 1), lambda b: (0, 0)),
            pl.BlockSpec((cout_pad, 1), lambda b: (0, 0)),
        ],
        out_specs=pl.BlockSpec((None, cout_pad, m_pad), lambda b: (b, 0, 0)),
        scratch_shapes=[pltpu.VMEM((cout_pad, m_pad), jnp.float32)],
        compiler_params=pltpu.CompilerParams(
            dimension_semantics=("parallel",),
            vmem_limit_bytes=VMEM_LIMIT),
    )(xflat, wtaps, mask, gamma, beta)
    return out, Ho, Wo, wrow, m_wide


# -----------------------------------------------------------------------------
# Region-wise (instance-id) average pooling: tiled stats pass + broadcast pass
# -----------------------------------------------------------------------------
def region_stats_kernel(ids_ref, x_ref, inst_ref, means_ref, sums_ref):
    # x: (C, T) f32 (last channel is all-ones on valid pixels -> counts)
    # inst: (1, T) i32, ids: (NID, 1) i32, means out: (C, NID)
    t = pl.program_id(1)

    @pl.when(t == 0)
    def _():
        sums_ref[...] = jnp.zeros_like(sums_ref)

    onehot = (inst_ref[...] == ids_ref[...]).astype(jnp.float32)       # (NID, T)
    sums_ref[...] += lax.dot_general(x_ref[...], onehot,
                                     (((1,), (1,)), ((), ())),
                                     preferred_element_type=jnp.float32)  # (C, NID)

    @pl.when(t == pl.num_programs(1) - 1)
    def _():
        s = sums_ref[...]
        counts = jnp.maximum(s[-1:, :], 1.0)       # exact division (no approx)
        means_ref[...] = s / counts


def region_bcast_kernel(ids_ref, means_ref, inst_ref, o_ref):
    onehot = (inst_ref[...] == ids_ref[...]).astype(jnp.float32)       # (NID, T)
    o_ref[...] = jnp.dot(means_ref[...], onehot, preferred_element_type=jnp.float32)


def _pick_tile(n, cands=(2048, 1024, 512, 256, 128)):
    for c in cands:
        if n % c == 0:
            return c
    return n


def region_pool(feat_wide, inst_wide, ids_arr):
    # feat_wide: (B, C, M) f32, inst_wide: (B, 1, M) i32, ids_arr: (NID, 1) i32
    B, C, M = feat_wide.shape
    nid = ids_arr.shape[0]
    T = _pick_tile(M)
    n_t = M // T
    cparams = pltpu.CompilerParams(dimension_semantics=("parallel", "arbitrary"),
                                   vmem_limit_bytes=VMEM_LIMIT)

    means = pl.pallas_call(
        region_stats_kernel,
        out_shape=jax.ShapeDtypeStruct((B, C, nid), jnp.float32),
        grid=(B, n_t),
        in_specs=[
            pl.BlockSpec((nid, 1), lambda b, t: (0, 0)),
            pl.BlockSpec((None, C, T), lambda b, t: (b, 0, t)),
            pl.BlockSpec((None, 1, T), lambda b, t: (b, 0, t)),
        ],
        out_specs=pl.BlockSpec((None, C, nid), lambda b, t: (b, 0, 0)),
        scratch_shapes=[pltpu.VMEM((C, nid), jnp.float32)],
        compiler_params=cparams,
    )(ids_arr, feat_wide, inst_wide)

    out = pl.pallas_call(
        region_bcast_kernel,
        out_shape=jax.ShapeDtypeStruct((B, C, M), jnp.float32),
        grid=(B, n_t),
        in_specs=[
            pl.BlockSpec((nid, 1), lambda b, t: (0, 0)),
            pl.BlockSpec((None, C, nid), lambda b, t: (b, 0, 0)),
            pl.BlockSpec((None, 1, T), lambda b, t: (b, 0, t)),
        ],
        out_specs=pl.BlockSpec((None, C, T), lambda b, t: (b, 0, t)),
        compiler_params=cparams,
    )(ids_arr, means, inst_wide)
    return out


# -----------------------------------------------------------------------------
# Encoder model (small synthetic config)
#   num_img_channels=3, num_filters=8, num_downsamples=2, num_feat_channels=3
# -----------------------------------------------------------------------------
NUM_IMG_CHANNELS = 3
NUM_FILTERS = 8
NUM_DOWNSAMPLES = 2
NUM_FEAT_CHANNELS = 3

# (cin, cout, kernel, stride, pad, use_norm, act, upsample_before)
LAYER_CFGS = []
LAYER_CFGS.append((NUM_IMG_CHANNELS, NUM_FILTERS, 7, 1, 3, True, "relu", False))
for i in range(NUM_DOWNSAMPLES):
    ch = NUM_FILTERS * 2 ** i
    LAYER_CFGS.append((ch, ch * 2, 3, 2, 1, True, "relu", False))
for i in reversed(range(NUM_DOWNSAMPLES)):
    ch = NUM_FILTERS * 2 ** i
    LAYER_CFGS.append((ch * 2, ch, 3, 1, 1, True, "relu", True))
LAYER_CFGS.append((NUM_FILTERS, NUM_FEAT_CHANNELS, 7, 1, 3, False, "tanh", False))


def init_params(key):
    params = []
    for (cin, cout, k, _s, _p, use_norm, _a, _u) in LAYER_CFGS:
        key, wk, bk = jax.random.split(key, 3)
        w = jax.random.normal(wk, (cout, cin, k, k), jnp.float32) * (
            1.0 / np.sqrt(cin * k * k))
        cout_pad = _round_up(cout, 8)
        cin_pad = _round_up(cin, 8)
        w_p = jnp.pad(w, ((0, cout_pad - cout), (0, cin_pad - cin), (0, 0), (0, 0)))
        # taps enumerated (dy, dx) row-major -> (k*k, Cout_pad, Cin_pad)
        wtaps = w_p.transpose(2, 3, 0, 1).reshape(k * k, cout_pad, cin_pad)
        wtaps = wtaps.astype(jnp.bfloat16)
        gamma = jnp.ones((cout_pad, 1), jnp.float32)       # instance-norm gamma
        if use_norm:
            beta = jnp.zeros((cout_pad, 1), jnp.float32)   # instance-norm beta
        else:
            bias = jax.random.normal(bk, (cout,), jnp.float32) * 0.01
            beta = jnp.zeros((cout_pad, 1), jnp.float32).at[:cout, 0].set(bias)
        params.append((wtaps, gamma, beta))
    return params


def encoder_forward(x, instance_map, params, ids_arr):
    B = x.shape[0]
    cin0_pad = params[0][0].shape[-1]
    h = jnp.pad(x, ((0, 0), (0, cin0_pad - x.shape[1]), (0, 0), (0, 0)))
    h = h.astype(jnp.bfloat16)

    n_layers = len(LAYER_CFGS)
    out = wrow = m_wide = None
    for idx, (cfg, prm) in enumerate(zip(LAYER_CFGS, params)):
        (_cin, _cout, k, stride, pad, use_norm, act, upsample) = cfg
        (wtaps, gamma, beta) = prm
        last = idx == n_layers - 1
        out, Ho, Wo, wrow, m_wide = conv_block(
            h, wtaps, gamma, beta, ksize=k, stride=stride, pad=pad,
            upsample=upsample, use_norm=use_norm, act=act,
            out_dtype=jnp.float32 if last else jnp.bfloat16)
        if not last:
            cout_pad = wtaps.shape[1]
            h = out[:, :, :m_wide].reshape(B, cout_pad, Ho, wrow)[:, :, :, :Wo]

    # Region pooling directly on the "wide" layout of the last layer.
    feat = out                                           # (B, 8, M_pad) f32
    feat = feat.at[:, -1, :].set(1.0)                    # ones channel -> counts
    H, W = instance_map.shape[-2:]
    m_pad = feat.shape[-1]
    inst = instance_map.astype(jnp.int32)
    inst_wide = jnp.pad(inst, ((0, 0), (0, 0), (0, 0), (0, wrow - W)),
                        constant_values=-1).reshape(B, 1, H * wrow)
    if m_pad > H * wrow:
        inst_wide = jnp.pad(inst_wide, ((0, 0), (0, 0), (0, m_pad - H * wrow)),
                            constant_values=-1)

    pooled = region_pool(feat, inst_wide, ids_arr)       # (B, 8, M_pad)
    pooled = pooled[:, :NUM_FEAT_CHANNELS, :H * wrow]
    return pooled.reshape(B, NUM_FEAT_CHANNELS, H, wrow)[..., :W]


if __name__ == "__main__":
    key = jax.random.PRNGKey(0)
    key, xk = jax.random.split(key)

    B, H, W = 2, 16, 16
    x = jax.random.normal(xk, (B, NUM_IMG_CHANNELS, H, W), jnp.float32)

    # Deterministic instance map: quadrant regions; batch 1 ids shifted by 1
    # so one id is empty in one batch element (matches torch's "no write" case).
    hh = jnp.arange(H).reshape(H, 1)
    ww = jnp.arange(W).reshape(1, W)
    base = (hh >= H // 2).astype(jnp.int32) * 2 + (ww >= W // 2).astype(jnp.int32)
    instance_map = jnp.stack([base, base + 1])[:, None, :, :].astype(jnp.int32)

    # Unique instance ids computed host-side (mirrors np.unique in the torch code).
    ids = np.unique(np.asarray(instance_map).astype(np.int32))
    nid_pad = _round_up(len(ids), 8)
    ids_np = np.full((nid_pad, 1), -1, np.int32)
    ids_np[: len(ids), 0] = ids
    ids_arr = jnp.asarray(ids_np)

    params = init_params(key)

    fwd = jax.jit(encoder_forward)
    out = fwd(x, instance_map, params, ids_arr)
    out = jax.block_until_ready(out)

    assert out.shape == (B, NUM_FEAT_CHANNELS, H, W)
    assert bool(jnp.all(jnp.isfinite(out)))
    print("KERNEL_OK")
</pallas_src>

<mosaic_0001>
module attributes {stable_mosaic.version = 11 : i64} {
  func.func @conv_in_act_kernel(%arg0: i32, %arg1: memref<1x8x512xbf16, #tpu.memory_space<vmem>>, %arg2: memref<49x8x8xbf16, #tpu.memory_space<vmem>>, %arg3: memref<1x352xf32, #tpu.memory_space<vmem>>, %arg4: memref<8x1xf32, #tpu.memory_space<vmem>>, %arg5: memref<8x1xf32, #tpu.memory_space<vmem>>, %arg6: memref<1x8x352xbf16, #tpu.memory_space<vmem>>, %arg7: memref<8x352xf32, #tpu.memory_space<vmem>>) attributes {dimension_semantics = [#tpu.dimension_semantics<parallel>], iteration_bounds = array<i64: 2>, scalar_prefetch = 0 : i64, scratch_operands = 1 : i64, tpu.core_type = #tpu.core_type<tc>, window_params = [{transform_indices = @transform_0, window_bounds = array<i64: 1, 8, 512>}, {pipeline_mode = #tpu.pipeline_mode<synchronous>, transform_indices = @transform_1, window_bounds = array<i64: 49, 8, 8>}, {pipeline_mode = #tpu.pipeline_mode<synchronous>, transform_indices = @transform_2, window_bounds = array<i64: 1, 352>}, {pipeline_mode = #tpu.pipeline_mode<synchronous>, transform_indices = @transform_3, window_bounds = array<i64: 8, 1>}, {pipeline_mode = #tpu.pipeline_mode<synchronous>, transform_indices = @transform_4, window_bounds = array<i64: 8, 1>}, {transform_indices = @transform_5, window_bounds = array<i64: 1, 8, 352>}]} {
    %cst = arith.constant 0.000000e+00 : f32
    %0 = vector.broadcast %cst : f32 to vector<8x1xf32>
    %cst_0 = arith.constant 0.000000e+00 : f32
    %1 = vector.broadcast %cst_0 : f32 to vector<8x352xf32>
    %c0 = arith.constant 0 : index
    %c0_1 = arith.constant 0 : index
    %c0_2 = arith.constant 0 : index
    %2 = vector.load %arg1[%c0, %c0_1, %c0_2] : memref<1x8x512xbf16, #tpu.memory_space<vmem>>, vector<1x8x352xbf16>
    %3 = vector.shape_cast %2 : vector<1x8x352xbf16> to vector<8x352xbf16>
    %c0_3 = arith.constant 0 : index
    %c0_4 = arith.constant 0 : index
    %c0_5 = arith.constant 0 : index
    %4 = vector.load %arg2[%c0_3, %c0_4, %c0_5] : memref<49x8x8xbf16, #tpu.memory_space<vmem>>, vector<1x8x8xbf16>
    %5 = vector.shape_cast %4 : vector<1x8x8xbf16> to vector<8x8xbf16>
    %cst_6 = arith.constant dense<0.000000e+00> : vector<8x352xf32>
    %6 = tpu.matmul %5, %3, %cst_6 {dimension_numbers = #tpu.dot_dimension_numbers<[1], [0], [0], [1], [0, 0, 1, 1], [], []>} : vector<8x8xbf16>, vector<8x352xbf16>, vector<8x352xf32> -> vector<8x352xf32>
    %7 = arith.addf %1, %6 : vector<8x352xf32>
    %c0_7 = arith.constant 0 : index
    %c0_8 = arith.constant 0 : index
    %c1 = arith.constant 1 : index
    %8 = vector.load %arg1[%c0_7, %c0_8, %c1] : memref<1x8x512xbf16, #tpu.memory_space<vmem>>, vector<1x8x352xbf16>
    %9 = vector.shape_cast %8 : vector<1x8x352xbf16> to vector<8x352xbf16>
    %c1_9 = arith.constant 1 : index
    %c0_10 = arith.constant 0 : index
    %c0_11 = arith.constant 0 : index
    %10 = vector.load %arg2[%c1_9, %c0_10, %c0_11] : memref<49x8x8xbf16, #tpu.memory_space<vmem>>, vector<1x8x8xbf16>
    %11 = vector.shape_cast %10 : vector<1x8x8xbf16> to vector<8x8xbf16>
    %cst_12 = arith.constant dense<0.000000e+00> : vector<8x352xf32>
    %12 = tpu.matmul %11, %9, %cst_12 {dimension_numbers = #tpu.dot_dimension_numbers<[1], [0], [0], [1], [0, 0, 1, 1], [], []>} : vector<8x8xbf16>, vector<8x352xbf16>, vector<8x352xf32> -> vector<8x352xf32>
    %13 = arith.addf %7, %12 : vector<8x352xf32>
    %c0_13 = arith.constant 0 : index
    %c0_14 = arith.constant 0 : index
    %c2 = arith.constant 2 : index
    %14 = vector.load %arg1[%c0_13, %c0_14, %c2] : memref<1x8x512xbf16, #tpu.memory_space<vmem>>, vector<1x8x352xbf16>
    %15 = vector.shape_cast %14 : vector<1x8x352xbf16> to vector<8x352xbf16>
    %c2_15 = arith.constant 2 : index
    %c0_16 = arith.constant 0 : index
    %c0_17 = arith.constant 0 : index
    %16 = vector.load %arg2[%c2_15, %c0_16, %c0_17] : memref<49x8x8xbf16, #tpu.memory_space<vmem>>, vector<1x8x8xbf16>
    %17 = vector.shape_cast %16 : vector<1x8x8xbf16> to vector<8x8xbf16>
    %cst_18 = arith.constant dense<0.000000e+00> : vector<8x352xf32>
    %18 = tpu.matmul %17, %15, %cst_18 {dimension_numbers = #tpu.dot_dimension_numbers<[1], [0], [0], [1], [0, 0, 1, 1], [], []>} : vector<8x8xbf16>, vector<8x352xbf16>, vector<8x352xf32> -> vector<8x352xf32>
    %19 = arith.addf %13, %18 : vector<8x352xf32>
    %c0_19 = arith.constant 0 : index
    %c0_20 = arith.constant 0 : index
    %c3 = arith.constant 3 : index
    %20 = vector.load %arg1[%c0_19, %c0_20, %c3] : memref<1x8x512xbf16, #tpu.memory_space<vmem>>, vector<1x8x352xbf16>
    %21 = vector.shape_cast %20 : vector<1x8x352xbf16> to vector<8x352xbf16>
    %c3_21 = arith.constant 3 : index
    %c0_22 = arith.constant 0 : index
    %c0_23 = arith.constant 0 : index
    %22 = vector.load %arg2[%c3_21, %c0_22, %c0_23] : memref<49x8x8xbf16, #tpu.memory_space<vmem>>, vector<1x8x8xbf16>
    %23 = vector.shape_cast %22 : vector<1x8x8xbf16> to vector<8x8xbf16>
    %cst_24 = arith.constant dense<0.000000e+00> : vector<8x352xf32>
    %24 = tpu.matmul %23, %21, %cst_24 {dimension_numbers = #tpu.dot_dimension_numbers<[1], [0], [0], [1], [0, 0, 1, 1], [], []>} : vector<8x8xbf16>, vector<8x352xbf16>, vector<8x352xf32> -> vector<8x352xf32>
    %25 = arith.addf %19, %24 : vector<8x352xf32>
    %c0_25 = arith.constant 0 : index
    %c0_26 = arith.constant 0 : index
    %c4 = arith.constant 4 : index
    %26 = vector.load %arg1[%c0_25, %c0_26, %c4] : memref<1x8x512xbf16, #tpu.memory_space<vmem>>, vector<1x8x352xbf16>
    %27 = vector.shape_cast %26 : vector<1x8x352xbf16> to vector<8x352xbf16>
    %c4_27 = arith.constant 4 : index
    %c0_28 = arith.constant 0 : index
    %c0_29 = arith.constant 0 : index
    %28 = vector.load %arg2[%c4_27, %c0_28, %c0_29] : memref<49x8x8xbf16, #tpu.memory_space<vmem>>, vector<1x8x8xbf16>
    %29 = vector.shape_cast %28 : vector<1x8x8xbf16> to vector<8x8xbf16>
    %cst_30 = arith.constant dense<0.000000e+00> : vector<8x352xf32>
    %30 = tpu.matmul %29, %27, %cst_30 {dimension_numbers = #tpu.dot_dimension_numbers<[1], [0], [0], [1], [0, 0, 1, 1], [], []>} : vector<8x8xbf16>, vector<8x352xbf16>, vector<8x352xf32> -> vector<8x352xf32>
    %31 = arith.addf %25, %30 : vector<8x352xf32>
    %c0_31 = arith.constant 0 : index
    %c0_32 = arith.constant 0 : index
    %c5 = arith.constant 5 : index
    %32 = vector.load %arg1[%c0_31, %c0_32, %c5] : memref<1x8x512xbf16, #tpu.memory_space<vmem>>, vector<1x8x352xbf16>
    %33 = vector.shape_cast %32 : vector<1x8x352xbf16> to vector<8x352xbf16>
    %c5_33 = arith.constant 5 : index
    %c0_34 = arith.constant 0 : index
    %c0_35 = arith.constant 0 : index
    %34 = vector.load %arg2[%c5_33, %c0_34, %c0_35] : memref<49x8x8xbf16, #tpu.memory_space<vmem>>, vector<1x8x8xbf16>
    %35 = vector.shape_cast %34 : vector<1x8x8xbf16> to vector<8x8xbf16>
    %cst_36 = arith.constant dense<0.000000e+00> : vector<8x352xf32>
    %36 = tpu.matmul %35, %33, %cst_36 {dimension_numbers = #tpu.dot_dimension_numbers<[1], [0], [0], [1], [0, 0, 1, 1], [], []>} : vector<8x8xbf16>, vector<8x352xbf16>, vector<8x352xf32> -> vector<8x352xf32>
    %37 = arith.addf %31, %36 : vector<8x352xf32>
    %c0_37 = arith.constant 0 : index
    %c0_38 = arith.constant 0 : index
    %c6 = arith.constant 6 : index
    %38 = vector.load %arg1[%c0_37, %c0_38, %c6] : memref<1x8x512xbf16, #tpu.memory_space<vmem>>, vector<1x8x352xbf16>
    %39 = vector.shape_cast %38 : vector<1x8x352xbf16> to vector<8x352xbf16>
    %c6_39 = arith.constant 6 : index
    %c0_40 = arith.constant 0 : index
    %c0_41 = arith.constant 0 : index
    %40 = vector.load %arg2[%c6_39, %c0_40, %c0_41] : memref<49x8x8xbf16, #tpu.memory_space<vmem>>, vector<1x8x8xbf16>
    %41 = vector.shape_cast %40 : vector<1x8x8xbf16> to vector<8x8xbf16>
    %cst_42 = arith.constant dense<0.000000e+00> : vector<8x352xf32>
    %42 = tpu.matmul %41, %39, %cst_42 {dimension_numbers = #tpu.dot_dimension_numbers<[1], [0], [0], [1], [0, 0, 1, 1], [], []>} : vector<8x8xbf16>, vector<8x352xbf16>, vector<8x352xf32> -> vector<8x352xf32>
    %43 = arith.addf %37, %42 : vector<8x352xf32>
    %c0_43 = arith.constant 0 : index
    %c0_44 = arith.constant 0 : index
    %c22 = arith.constant 22 : index
    %44 = vector.load %arg1[%c0_43, %c0_44, %c22] : memref<1x8x512xbf16, #tpu.memory_space<vmem>>, vector<1x8x352xbf16>
    %45 = vector.shape_cast %44 : vector<1x8x352xbf16> to vector<8x352xbf16>
    %c7 = arith.constant 7 : index
    %c0_45 = arith.constant 0 : index
    %c0_46 = arith.constant 0 : index
    %46 = vector.load %arg2[%c7, %c0_45, %c0_46] : memref<49x8x8xbf16, #tpu.memory_space<vmem>>, vector<1x8x8xbf16>
    %47 = vector.shape_cast %46 : vector<1x8x8xbf16> to vector<8x8xbf16>
    %cst_47 = arith.constant dense<0.000000e+00> : vector<8x352xf32>
    %48 = tpu.matmul %47, %45, %cst_47 {dimension_numbers = #tpu.dot_dimension_numbers<[1], [0], [0], [1], [0, 0, 1, 1], [], []>} : vector<8x8xbf16>, vector<8x352xbf16>, vector<8x352xf32> -> vector<8x352xf32>
    %49 = arith.addf %43, %48 : vector<8x352xf32>
    %c0_48 = arith.constant 0 : index
    %c0_49 = arith.constant 0 : index
    %c23 = arith.constant 23 : index
    %50 = vector.load %arg1[%c0_48, %c0_49, %c23] : memref<1x8x512xbf16, #tpu.memory_space<vmem>>, vector<1x8x352xbf16>
    %51 = vector.shape_cast %50 : vector<1x8x352xbf16> to vector<8x352xbf16>
    %c8 = arith.constant 8 : index
    %c0_50 = arith.constant 0 : index
    %c0_51 = arith.constant 0 : index
    %52 = vector.load %arg2[%c8, %c0_50, %c0_51] : memref<49x8x8xbf16, #tpu.memory_space<vmem>>, vector<1x8x8xbf16>
    %53 = vector.shape_cast %52 : vector<1x8x8xbf16> to vector<8x8xbf16>
    %cst_52 = arith.constant dense<0.000000e+00> : vector<8x352xf32>
    %54 = tpu.matmul %53, %51, %cst_52 {dimension_numbers = #tpu.dot_dimension_numbers<[1], [0], [0], [1], [0, 0, 1, 1], [], []>} : vector<8x8xbf16>, vector<8x352xbf16>, vector<8x352xf32> -> vector<8x352xf32>
    %55 = arith.addf %49, %54 : vector<8x352xf32>
    %c0_53 = arith.constant 0 : index
    %c0_54 = arith.constant 0 : index
    %c24 = arith.constant 24 : index
    %56 = vector.load %arg1[%c0_53, %c0_54, %c24] : memref<1x8x512xbf16, #tpu.memory_space<vmem>>, vector<1x8x352xbf16>
    %57 = vector.shape_cast %56 : vector<1x8x352xbf16> to vector<8x352xbf16>
    %c9 = arith.constant 9 : index
    %c0_55 = arith.constant 0 : index
    %c0_56 = arith.constant 0 : index
    %58 = vector.load %arg2[%c9, %c0_55, %c0_56] : memref<49x8x8xbf16, #tpu.memory_space<vmem>>, vector<1x8x8xbf16>
    %59 = vector.shape_cast %58 : vector<1x8x8xbf16> to vector<8x8xbf16>
    %cst_57 = arith.constant dense<0.000000e+00> : vector<8x352xf32>
    %60 = tpu.matmul %59, %57, %cst_57 {dimension_numbers = #tpu.dot_dimension_numbers<[1], [0], [0], [1], [0, 0, 1, 1], [], []>} : vector<8x8xbf16>, vector<8x352xbf16>, vector<8x352xf32> -> vector<8x352xf32>
    %61 = arith.addf %55, %60 : vector<8x352xf32>
    %c0_58 = arith.constant 0 : index
    %c0_59 = arith.constant 0 : index
    %c25 = arith.constant 25 : index
    %62 = vector.load %arg1[%c0_58, %c0_59, %c25] : memref<1x8x512xbf16, #tpu.memory_space<vmem>>, vector<1x8x352xbf16>
    %63 = vector.shape_cast %62 : vector<1x8x352xbf16> to vector<8x352xbf16>
    %c10 = arith.constant 10 : index
    %c0_60 = arith.constant 0 : index
    %c0_61 = arith.constant 0 : index
    %64 = vector.load %arg2[%c10, %c0_60, %c0_61] : memref<49x8x8xbf16, #tpu.memory_space<vmem>>, vector<1x8x8xbf16>
    %65 = vector.shape_cast %64 : vector<1x8x8xbf16> to vector<8x8xbf16>
    %cst_62 = arith.constant dense<0.000000e+00> : vector<8x352xf32>
    %66 = tpu.matmul %65, %63, %cst_62 {dimension_numbers = #tpu.dot_dimension_numbers<[1], [0], [0], [1], [0, 0, 1, 1], [], []>} : vector<8x8xbf16>, vector<8x352xbf16>, vector<8x352xf32> -> vector<8x352xf32>
    %67 = arith.addf %61, %66 : vector<8x352xf32>
    %c0_63 = arith.constant 0 : index
    %c0_64 = arith.constant 0 : index
    %c26 = arith.constant 26 : index
    %68 = vector.load %arg1[%c0_63, %c0_64, %c26] : memref<1x8x512xbf16, #tpu.memory_space<vmem>>, vector<1x8x352xbf16>
    %69 = vector.shape_cast %68 : vector<1x8x352xbf16> to vector<8x352xbf16>
    %c11 = arith.constant 11 : index
    %c0_65 = arith.constant 0 : index
    %c0_66 = arith.constant 0 : index
    %70 = vector.load %arg2[%c11, %c0_65, %c0_66] : memref<49x8x8xbf16, #tpu.memory_space<vmem>>, vector<1x8x8xbf16>
    %71 = vector.shape_cast %70 : vector<1x8x8xbf16> to vector<8x8xbf16>
    %cst_67 = arith.constant dense<0.000000e+00> : vector<8x352xf32>
    %72 = tpu.matmul %71, %69, %cst_67 {dimension_numbers = #tpu.dot_dimension_numbers<[1], [0], [0], [1], [0, 0, 1, 1], [], []>} : vector<8x8xbf16>, vector<8x352xbf16>, vector<8x352xf32> -> vector<8x352xf32>
    %73 = arith.addf %67, %72 : vector<8x352xf32>
    %c0_68 = arith.constant 0 : index
    %c0_69 = arith.constant 0 : index
    %c27 = arith.constant 27 : index
    %74 = vector.load %arg1[%c0_68, %c0_69, %c27] : memref<1x8x512xbf16, #tpu.memory_space<vmem>>, vector<1x8x352xbf16>
    %75 = vector.shape_cast %74 : vector<1x8x352xbf16> to vector<8x352xbf16>
    %c12 = arith.constant 12 : index
    %c0_70 = arith.constant 0 : index
    %c0_71 = arith.constant 0 : index
    %76 = vector.load %arg2[%c12, %c0_70, %c0_71] : memref<49x8x8xbf16, #tpu.memory_space<vmem>>, vector<1x8x8xbf16>
    %77 = vector.shape_cast %76 : vector<1x8x8xbf16> to vector<8x8xbf16>
    %cst_72 = arith.constant dense<0.000000e+00> : vector<8x352xf32>
    %78 = tpu.matmul %77, %75, %cst_72 {dimension_numbers = #tpu.dot_dimension_numbers<[1], [0], [0], [1], [0, 0, 1, 1], [], []>} : vector<8x8xbf16>, vector<8x352xbf16>, vector<8x352xf32> -> vector<8x352xf32>
    %79 = arith.addf %73, %78 : vector<8x352xf32>
    %c0_73 = arith.constant 0 : index
    %c0_74 = arith.constant 0 : index
    %c28 = arith.constant 28 : index
    %80 = vector.load %arg1[%c0_73, %c0_74, %c28] : memref<1x8x512xbf16, #tpu.memory_space<vmem>>, vector<1x8x352xbf16>
    %81 = vector.shape_cast %80 : vector<1x8x352xbf16> to vector<8x352xbf16>
    %c13 = arith.constant 13 : index
    %c0_75 = arith.constant 0 : index
    %c0_76 = arith.constant 0 : index
    %82 = vector.load %arg2[%c13, %c0_75, %c0_76] : memref<49x8x8xbf16, #tpu.memory_space<vmem>>, vector<1x8x8xbf16>
    %83 = vector.shape_cast %82 : vector<1x8x8xbf16> to vector<8x8xbf16>
    %cst_77 = arith.constant dense<0.000000e+00> : vector<8x352xf32>
    %84 = tpu.matmul %83, %81, %cst_77 {dimension_numbers = #tpu.dot_dimension_numbers<[1], [0], [0], [1], [0, 0, 1, 1], [], []>} : vector<8x8xbf16>, vector<8x352xbf16>, vector<8x352xf32> -> vector<8x352xf32>
    %85 = arith.addf %79, %84 : vector<8x352xf32>
    %c0_78 = arith.constant 0 : index
    %c0_79 = arith.constant 0 : index
    %c44 = arith.constant 44 : index
    %86 = vector.load %arg1[%c0_78, %c0_79, %c44] : memref<1x8x512xbf16, #tpu.memory_space<vmem>>, vector<1x8x352xbf16>
    %87 = vector.shape_cast %86 : vector<1x8x352xbf16> to vector<8x352xbf16>
    %c14 = arith.constant 14 : index
    %c0_80 = arith.constant 0 : index
    %c0_81 = arith.constant 0 : index
    %88 = vector.load %arg2[%c14, %c0_80, %c0_81] : memref<49x8x8xbf16, #tpu.memory_space<vmem>>, vector<1x8x8xbf16>
    %89 = vector.shape_cast %88 : vector<1x8x8xbf16> to vector<8x8xbf16>
    %cst_82 = arith.constant dense<0.000000e+00> : vector<8x352xf32>
    %90 = tpu.matmul %89, %87, %cst_82 {dimension_numbers = #tpu.dot_dimension_numbers<[1], [0], [0], [1], [0, 0, 1, 1], [], []>} : vector<8x8xbf16>, vector<8x352xbf16>, vector<8x352xf32> -> vector<8x352xf32>
    %91 = arith.addf %85, %90 : vector<8x352xf32>
    %c0_83 = arith.constant 0 : index
    %c0_84 = arith.constant 0 : index
    %c45 = arith.constant 45 : index
    %92 = vector.load %arg1[%c0_83, %c0_84, %c45] : memref<1x8x512xbf16, #tpu.memory_space<vmem>>, vector<1x8x352xbf16>
    %93 = vector.shape_cast %92 : vector<1x8x352xbf16> to vector<8x352xbf16>
    %c15 = arith.constant 15 : index
    %c0_85 = arith.constant 0 : index
    %c0_86 = arith.constant 0 : index
    %94 = vector.load %arg2[%c15, %c0_85, %c0_86] : memref<49x8x8xbf16, #tpu.memory_space<vmem>>, vector<1x8x8xbf16>
    %95 = vector.shape_cast %94 : vector<1x8x8xbf16> to vector<8x8xbf16>
    %cst_87 = arith.constant dense<0.000000e+00> : vector<8x352xf32>
    %96 = tpu.matmul %95, %93, %cst_87 {dimension_numbers = #tpu.dot_dimension_numbers<[1], [0], [0], [1], [0, 0, 1, 1], [], []>} : vector<8x8xbf16>, vector<8x352xbf16>, vector<8x352xf32> -> vector<8x352xf32>
    %97 = arith.addf %91, %96 : vector<8x352xf32>
    %c0_88 = arith.constant 0 : index
    %c0_89 = arith.constant 0 : index
    %c46 = arith.constant 46 : index
    %98 = vector.load %arg1[%c0_88, %c0_89, %c46] : memref<1x8x512xbf16, #tpu.memory_space<vmem>>, vector<1x8x352xbf16>
    %99 = vector.shape_cast %98 : vector<1x8x352xbf16> to vector<8x352xbf16>
    %c16 = arith.constant 16 : index
    %c0_90 = arith.constant 0 : index
    %c0_91 = arith.constant 0 : index
    %100 = vector.load %arg2[%c16, %c0_90, %c0_91] : memref<49x8x8xbf16, #tpu.memory_space<vmem>>, vector<1x8x8xbf16>
    %101 = vector.shape_cast %100 : vector<1x8x8xbf16> to vector<8x8xbf16>
    %cst_92 = arith.constant dense<0.000000e+00> : vector<8x352xf32>
    %102 = tpu.matmul %101, %99, %cst_92 {dimension_numbers = #tpu.dot_dimension_numbers<[1], [0], [0], [1], [0, 0, 1, 1], [], []>} : vector<8x8xbf16>, vector<8x352xbf16>, vector<8x352xf32> -> vector<8x352xf32>
    %103 = arith.addf %97, %102 : vector<8x352xf32>
    %c0_93 = arith.constant 0 : index
    %c0_94 = arith.constant 0 : index
    %c47 = arith.constant 47 : index
    %104 = vector.load %arg1[%c0_93, %c0_94, %c47] : memref<1x8x512xbf16, #tpu.memory_space<vmem>>, vector<1x8x352xbf16>
    %105 = vector.shape_cast %104 : vector<1x8x352xbf16> to vector<8x352xbf16>
    %c17 = arith.constant 17 : index
    %c0_95 = arith.constant 0 : index
    %c0_96 = arith.constant 0 : index
    %106 = vector.load %arg2[%c17, %c0_95, %c0_96] : memref<49x8x8xbf16, #tpu.memory_space<vmem>>, vector<1x8x8xbf16>
    %107 = vector.shape_cast %106 : vector<1x8x8xbf16> to vector<8x8xbf16>
    %cst_97 = arith.constant dense<0.000000e+00> : vector<8x352xf32>
    %108 = tpu.matmul %107, %105, %cst_97 {dimension_numbers = #tpu.dot_dimension_numbers<[1], [0], [0], [1], [0, 0, 1, 1], [], []>} : vector<8x8xbf16>, vector<8x352xbf16>, vector<8x352xf32> -> vector<8x352xf32>
    %109 = arith.addf %103, %108 : vector<8x352xf32>
    %c0_98 = arith.constant 0 : index
    %c0_99 = arith.constant 0 : index
    %c48 = arith.constant 48 : index
    %110 = vector.load %arg1[%c0_98, %c0_99, %c48] : memref<1x8x512xbf16, #tpu.memory_space<vmem>>, vector<1x8x352xbf16>
    %111 = vector.shape_cast %110 : vector<1x8x352xbf16> to vector<8x352xbf16>
    %c18 = arith.constant 18 : index
    %c0_100 = arith.constant 0 : index
    %c0_101 = arith.constant 0 : index
    %112 = vector.load %arg2[%c18, %c0_100, %c0_101] : memref<49x8x8xbf16, #tpu.memory_space<vmem>>, vector<1x8x8xbf16>
    %113 = vector.shape_cast %112 : vector<1x8x8xbf16> to vector<8x8xbf16>
    %cst_102 = arith.constant dense<0.000000e+00> : vector<8x352xf32>
    %114 = tpu.matmul %113, %111, %cst_102 {dimension_numbers = #tpu.dot_dimension_numbers<[1], [0], [0], [1], [0, 0, 1, 1], [], []>} : vector<8x8xbf16>, vector<8x352xbf16>, vector<8x352xf32> -> vector<8x352xf32>
    %115 = arith.addf %109, %114 : vector<8x352xf32>
    %c0_103 = arith.constant 0 : index
    %c0_104 = arith.constant 0 : index
    %c49 = arith.constant 49 : index
    %116 = vector.load %arg1[%c0_103, %c0_104, %c49] : memref<1x8x512xbf16, #tpu.memory_space<vmem>>, vector<1x8x352xbf16>
    %117 = vector.shape_cast %116 : vector<1x8x352xbf16> to vector<8x352xbf16>
    %c19 = arith.constant 19 : index
    %c0_105 = arith.constant 0 : index
    %c0_106 = arith.constant 0 : index
    %118 = vector.load %arg2[%c19, %c0_105, %c0_106] : memref<49x8x8xbf16, #tpu.memory_space<vmem>>, vector<1x8x8xbf16>
    %119 = vector.shape_cast %118 : vector<1x8x8xbf16> to vector<8x8xbf16>
    %cst_107 = arith.constant dense<0.000000e+00> : vector<8x352xf32>
    %120 = tpu.matmul %119, %117, %cst_107 {dimension_numbers = #tpu.dot_dimension_numbers<[1], [0], [0], [1], [0, 0, 1, 1], [], []>} : vector<8x8xbf16>, vector<8x352xbf16>, vector<8x352xf32> -> vector<8x352xf32>
    %121 = arith.addf %115, %120 : vector<8x352xf32>
    %c0_108 = arith.constant 0 : index
    %c0_109 = arith.constant 0 : index
    %c50 = arith.constant 50 : index
    %122 = vector.load %arg1[%c0_108, %c0_109, %c50] : memref<1x8x512xbf16, #tpu.memory_space<vmem>>, vector<1x8x352xbf16>
    %123 = vector.shape_cast %122 : vector<1x8x352xbf16> to vector<8x352xbf16>
    %c20 = arith.constant 20 : index
    %c0_110 = arith.constant 0 : index
    %c0_111 = arith.constant 0 : index
    %124 = vector.load %arg2[%c20, %c0_110, %c0_111] : memref<49x8x8xbf16, #tpu.memory_space<vmem>>, vector<1x8x8xbf16>
    %125 = vector.shape_cast %124 : vector<1x8x8xbf16> to vector<8x8xbf16>
    %cst_112 = arith.constant dense<0.000000e+00> : vector<8x352xf32>
    %126 = tpu.matmul %125, %123, %cst_112 {dimension_numbers = #tpu.dot_dimension_numbers<[1], [0], [0], [1], [0, 0, 1, 1], [], []>} : vector<8x8xbf16>, vector<8x352xbf16>, vector<8x352xf32> -> vector<8x352xf32>
    %127 = arith.addf %121, %126 : vector<8x352xf32>
    %c0_113 = arith.constant 0 : index
    %c0_114 = arith.constant 0 : index
    %c66 = arith.constant 66 : index
    %128 = vector.load %arg1[%c0_113, %c0_114, %c66] : memref<1x8x512xbf16, #tpu.memory_space<vmem>>, vector<1x8x352xbf16>
    %129 = vector.shape_cast %128 : vector<1x8x352xbf16> to vector<8x352xbf16>
    %c21 = arith.constant 21 : index
    %c0_115 = arith.constant 0 : index
    %c0_116 = arith.constant 0 : index
    %130 = vector.load %arg2[%c21, %c0_115, %c0_116] : memref<49x8x8xbf16, #tpu.memory_space<vmem>>, vector<1x8x8xbf16>
    %131 = vector.shape_cast %130 : vector<1x8x8xbf16> to vector<8x8xbf16>
    %cst_117 = arith.constant dense<0.000000e+00> : vector<8x352xf32>
    %132 = tpu.matmul %131, %129, %cst_117 {dimension_numbers = #tpu.dot_dimension_numbers<[1], [0], [0], [1], [0, 0, 1, 1], [], []>} : vector<8x8xbf16>, vector<8x352xbf16>, vector<8x352xf32> -> vector<8x352xf32>
    %133 = arith.addf %127, %132 : vector<8x352xf32>
    %c0_118 = arith.constant 0 : index
    %c0_119 = arith.constant 0 : index
    %c67 = arith.constant 67 : index
    %134 = vector.load %arg1[%c0_118, %c0_119, %c67] : memref<1x8x512xbf16, #tpu.memory_space<vmem>>, vector<1x8x352xbf16>
    %135 = vector.shape_cast %134 : vector<1x8x352xbf16> to vector<8x352xbf16>
    %c22_120 = arith.constant 22 : index
    %c0_121 = arith.constant 0 : index
    %c0_122 = arith.constant 0 : index
    %136 = vector.load %arg2[%c22_120, %c0_121, %c0_122] : memref<49x8x8xbf16, #tpu.memory_space<vmem>>, vector<1x8x8xbf16>
    %137 = vector.shape_cast %136 : vector<1x8x8xbf16> to vector<8x8xbf16>
    %cst_123 = arith.constant dense<0.000000e+00> : vector<8x352xf32>
    %138 = tpu.matmul %137, %135, %cst_123 {dimension_numbers = #tpu.dot_dimension_numbers<[1], [0], [0], [1], [0, 0, 1, 1], [], []>} : vector<8x8xbf16>, vector<8x352xbf16>, vector<8x352xf32> -> vector<8x352xf32>
    %139 = arith.addf %133, %138 : vector<8x352xf32>
    %c0_124 = arith.constant 0 : index
    %c0_125 = arith.constant 0 : index
    %c68 = arith.constant 68 : index
    %140 = vector.load %arg1[%c0_124, %c0_125, %c68] : memref<1x8x512xbf16, #tpu.memory_space<vmem>>, vector<1x8x352xbf16>
    %141 = vector.shape_cast %140 : vector<1x8x352xbf16> to vector<8x352xbf16>
    %c23_126 = arith.constant 23 : index
    %c0_127 = arith.constant 0 : index
    %c0_128 = arith.constant 0 : index
    %142 = vector.load %arg2[%c23_126, %c0_127, %c0_128] : memref<49x8x8xbf16, #tpu.memory_space<vmem>>, vector<1x8x8xbf16>
    %143 = vector.shape_cast %142 : vector<1x8x8xbf16> to vector<8x8xbf16>
    %cst_129 = arith.constant dense<0.000000e+00> : vector<8x352xf32>
    %144 = tpu.matmul %143, %141, %cst_129 {dimension_numbers = #tpu.dot_dimension_numbers<[1], [0], [0], [1], [0, 0, 1, 1], [], []>} : vector<8x8xbf16>, vector<8x352xbf16>, vector<8x352xf32> -> vector<8x352xf32>
    %145 = arith.addf %139, %144 : vector<8x352xf32>
    %c0_130 = arith.constant 0 : index
    %c0_131 = arith.constant 0 : index
    %c69 = arith.constant 69 : index
    %146 = vector.load %arg1[%c0_130, %c0_131, %c69] : memref<1x8x512xbf16, #tpu.memory_space<vmem>>, vector<1x8x352xbf16>
    %147 = vector.shape_cast %146 : vector<1x8x352xbf16> to vector<8x352xbf16>
    %c24_132 = arith.constant 24 : index
    %c0_133 = arith.constant 0 : index
    %c0_134 = arith.constant 0 : index
    %148 = vector.load %arg2[%c24_132, %c0_133, %c0_134] : memref<49x8x8xbf16, #tpu.memory_space<vmem>>, vector<1x8x8xbf16>
    %149 = vector.shape_cast %148 : vector<1x8x8xbf16> to vector<8x8xbf16>
    %cst_135 = arith.constant dense<0.000000e+00> : vector<8x352xf32>
    %150 = tpu.matmul %149, %147, %cst_135 {dimension_numbers = #tpu.dot_dimension_numbers<[1], [0], [0], [1], [0, 0, 1, 1], [], []>} : vector<8x8xbf16>, vector<8x352xbf16>, vector<8x352xf32> -> vector<8x352xf32>
    %151 = arith.addf %145, %150 : vector<8x352xf32>
    %c0_136 = arith.constant 0 : index
    %c0_137 = arith.constant 0 : index
    %c70 = arith.constant 70 : index
    %152 = vector.load %arg1[%c0_136, %c0_137, %c70] : memref<1x8x512xbf16, #tpu.memory_space<vmem>>, vector<1x8x352xbf16>
    %153 = vector.shape_cast %152 : vector<1x8x352xbf16> to vector<8x352xbf16>
    %c25_138 = arith.constant 25 : index
    %c0_139 = arith.constant 0 : index
    %c0_140 = arith.constant 0 : index
    %154 = vector.load %arg2[%c25_138, %c0_139, %c0_140] : memref<49x8x8xbf16, #tpu.memory_space<vmem>>, vector<1x8x8xbf16>
    %155 = vector.shape_cast %154 : vector<1x8x8xbf16> to vector<8x8xbf16>
    %cst_141 = arith.constant dense<0.000000e+00> : vector<8x352xf32>
    %156 = tpu.matmul %155, %153, %cst_141 {dimension_numbers = #tpu.dot_dimension_numbers<[1], [0], [0], [1], [0, 0, 1, 1], [], []>} : vector<8x8xbf16>, vector<8x352xbf16>, vector<8x352xf32> -> vector<8x352xf32>
    %157 = arith.addf %151, %156 : vector<8x352xf32>
    %c0_142 = arith.constant 0 : index
    %c0_143 = arith.constant 0 : index
    %c71 = arith.constant 71 : index
    %158 = vector.load %arg1[%c0_142, %c0_143, %c71] : memref<1x8x512xbf16, #tpu.memory_space<vmem>>, vector<1x8x352xbf16>
    %159 = vector.shape_cast %158 : vector<1x8x352xbf16> to vector<8x352xbf16>
    %c26_144 = arith.constant 26 : index
    %c0_145 = arith.constant 0 : index
    %c0_146 = arith.constant 0 : index
    %160 = vector.load %arg2[%c26_144, %c0_145, %c0_146] : memref<49x8x8xbf16, #tpu.memory_space<vmem>>, vector<1x8x8xbf16>
    %161 = vector.shape_cast %160 : vector<1x8x8xbf16> to vector<8x8xbf16>
    %cst_147 = arith.constant dense<0.000000e+00> : vector<8x352xf32>
    %162 = tpu.matmul %161, %159, %cst_147 {dimension_numbers = #tpu.dot_dimension_numbers<[1], [0], [0], [1], [0, 0, 1, 1], [], []>} : vector<8x8xbf16>, vector<8x352xbf16>, vector<8x352xf32> -> vector<8x352xf32>
    %163 = arith.addf %157, %162 : vector<8x352xf32>
    %c0_148 = arith.constant 0 : index
    %c0_149 = arith.constant 0 : index
    %c72 = arith.constant 72 : index
    %164 = vector.load %arg1[%c0_148, %c0_149, %c72] : memref<1x8x512xbf16, #tpu.memory_space<vmem>>, vector<1x8x352xbf16>
    %165 = vector.shape_cast %164 : vector<1x8x352xbf16> to vector<8x352xbf16>
    %c27_150 = arith.constant 27 : index
    %c0_151 = arith.constant 0 : index
    %c0_152 = arith.constant 0 : index
    %166 = vector.load %arg2[%c27_150, %c0_151, %c0_152] : memref<49x8x8xbf16, #tpu.memory_space<vmem>>, vector<1x8x8xbf16>
    %167 = vector.shape_cast %166 : vector<1x8x8xbf16> to vector<8x8xbf16>
    %cst_153 = arith.constant dense<0.000000e+00> : vector<8x352xf32>
    %168 = tpu.matmul %167, %165, %cst_153 {dimension_numbers = #tpu.dot_dimension_numbers<[1], [0], [0], [1], [0, 0, 1, 1], [], []>} : vector<8x8xbf16>, vector<8x352xbf16>, vector<8x352xf32> -> vector<8x352xf32>
    %169 = arith.addf %163, %168 : vector<8x352xf32>
    %c0_154 = arith.constant 0 : index
    %c0_155 = arith.constant 0 : index
    %c88 = arith.constant 88 : index
    %170 = vector.load %arg1[%c0_154, %c0_155, %c88] : memref<1x8x512xbf16, #tpu.memory_space<vmem>>, vector<1x8x352xbf16>
    %171 = vector.shape_cast %170 : vector<1x8x352xbf16> to vector<8x352xbf16>
    %c28_156 = arith.constant 28 : index
    %c0_157 = arith.constant 0 : index
    %c0_158 = arith.constant 0 : index
    %172 = vector.load %arg2[%c28_156, %c0_157, %c0_158] : memref<49x8x8xbf16, #tpu.memory_space<vmem>>, vector<1x8x8xbf16>
    %173 = vector.shape_cast %172 : vector<1x8x8xbf16> to vector<8x8xbf16>
    %cst_159 = arith.constant dense<0.000000e+00> : vector<8x352xf32>
    %174 = tpu.matmul %173, %171, %cst_159 {dimension_numbers = #tpu.dot_dimension_numbers<[1], [0], [0], [1], [0, 0, 1, 1], [], []>} : vector<8x8xbf16>, vector<8x352xbf16>, vector<8x352xf32> -> vector<8x352xf32>
    %175 = arith.addf %169, %174 : vector<8x352xf32>
    %c0_160 = arith.constant 0 : index
    %c0_161 = arith.constant 0 : index
    %c89 = arith.constant 89 : index
    %176 = vector.load %arg1[%c0_160, %c0_161, %c89] : memref<1x8x512xbf16, #tpu.memory_space<vmem>>, vector<1x8x352xbf16>
    %177 = vector.shape_cast %176 : vector<1x8x352xbf16> to vector<8x352xbf16>
    %c29 = arith.constant 29 : index
    %c0_162 = arith.constant 0 : index
    %c0_163 = arith.constant 0 : index
    %178 = vector.load %arg2[%c29, %c0_162, %c0_163] : memref<49x8x8xbf16, #tpu.memory_space<vmem>>, vector<1x8x8xbf16>
    %179 = vector.shape_cast %178 : vector<1x8x8xbf16> to vector<8x8xbf16>
    %cst_164 = arith.constant dense<0.000000e+00> : vector<8x352xf32>
    %180 = tpu.matmul %179, %177, %cst_164 {dimension_numbers = #tpu.dot_dimension_numbers<[1], [0], [0], [1], [0, 0, 1, 1], [], []>} : vector<8x8xbf16>, vector<8x352xbf16>, vector<8x352xf32> -> vector<8x352xf32>
    %181 = arith.addf %175, %180 : vector<8x352xf32>
    %c0_165 = arith.constant 0 : index
    %c0_166 = arith.constant 0 : index
    %c90 = arith.constant 90 : index
    %182 = vector.load %arg1[%c0_165, %c0_166, %c90] : memref<1x8x512xbf16, #tpu.memory_space<vmem>>, vector<1x8x352xbf16>
    %183 = vector.shape_cast %182 : vector<1x8x352xbf16> to vector<8x352xbf16>
    %c30 = arith.constant 30 : index
    %c0_167 = arith.constant 0 : index
    %c0_168 = arith.constant 0 : index
    %184 = vector.load %arg2[%c30, %c0_167, %c0_168] : memref<49x8x8xbf16, #tpu.memory_space<vmem>>, vector<1x8x8xbf16>
    %185 = vector.shape_cast %184 : vector<1x8x8xbf16> to vector<8x8xbf16>
    %cst_169 = arith.constant dense<0.000000e+00> : vector<8x352xf32>
    %186 = tpu.matmul %185, %183, %cst_169 {dimension_numbers = #tpu.dot_dimension_numbers<[1], [0], [0], [1], [0, 0, 1, 1], [], []>} : vector<8x8xbf16>, vector<8x352xbf16>, vector<8x352xf32> -> vector<8x352xf32>
    %187 = arith.addf %181, %186 : vector<8x352xf32>
    %c0_170 = arith.constant 0 : index
    %c0_171 = arith.constant 0 : index
    %c91 = arith.constant 91 : index
    %188 = vector.load %arg1[%c0_170, %c0_171, %c91] : memref<1x8x512xbf16, #tpu.memory_space<vmem>>, vector<1x8x352xbf16>
    %189 = vector.shape_cast %188 : vector<1x8x352xbf16> to vector<8x352xbf16>
    %c31 = arith.constant 31 : index
    %c0_172 = arith.constant 0 : index
    %c0_173 = arith.constant 0 : index
    %190 = vector.load %arg2[%c31, %c0_172, %c0_173] : memref<49x8x8xbf16, #tpu.memory_space<vmem>>, vector<1x8x8xbf16>
    %191 = vector.shape_cast %190 : vector<1x8x8xbf16> to vector<8x8xbf16>
    %cst_174 = arith.constant dense<0.000000e+00> : vector<8x352xf32>
    %192 = tpu.matmul %191, %189, %cst_174 {dimension_numbers = #tpu.dot_dimension_numbers<[1], [0], [0], [1], [0, 0, 1, 1], [], []>} : vector<8x8xbf16>, vector<8x352xbf16>, vector<8x352xf32> -> vector<8x352xf32>
    %193 = arith.addf %187, %192 : vector<8x352xf32>
    %c0_175 = arith.constant 0 : index
    %c0_176 = arith.constant 0 : index
    %c92 = arith.constant 92 : index
    %194 = vector.load %arg1[%c0_175, %c0_176, %c92] : memref<1x8x512xbf16, #tpu.memory_space<vmem>>, vector<1x8x352xbf16>
    %195 = vector.shape_cast %194 : vector<1x8x352xbf16> to vector<8x352xbf16>
    %c32 = arith.constant 32 : index
    %c0_177 = arith.constant 0 : index
    %c0_178 = arith.constant 0 : index
    %196 = vector.load %arg2[%c32, %c0_177, %c0_178] : memref<49x8x8xbf16, #tpu.memory_space<vmem>>, vector<1x8x8xbf16>
    %197 = vector.shape_cast %196 : vector<1x8x8xbf16> to vector<8x8xbf16>
    %cst_179 = arith.constant dense<0.000000e+00> : vector<8x352xf32>
    %198 = tpu.matmul %197, %195, %cst_179 {dimension_numbers = #tpu.dot_dimension_numbers<[1], [0], [0], [1], [0, 0, 1, 1], [], []>} : vector<8x8xbf16>, vector<8x352xbf16>, vector<8x352xf32> -> vector<8x352xf32>
    %199 = arith.addf %193, %198 : vector<8x352xf32>
    %c0_180 = arith.constant 0 : index
    %c0_181 = arith.constant 0 : index
    %c93 = arith.constant 93 : index
    %200 = vector.load %arg1[%c0_180, %c0_181, %c93] : memref<1x8x512xbf16, #tpu.memory_space<vmem>>, vector<1x8x352xbf16>
    %201 = vector.shape_cast %200 : vector<1x8x352xbf16> to vector<8x352xbf16>
    %c33 = arith.constant 33 : index
    %c0_182 = arith.constant 0 : index
    %c0_183 = arith.constant 0 : index
    %202 = vector.load %arg2[%c33, %c0_182, %c0_183] : memref<49x8x8xbf16, #tpu.memory_space<vmem>>, vector<1x8x8xbf16>
    %203 = vector.shape_cast %202 : vector<1x8x8xbf16> to vector<8x8xbf16>
    %cst_184 = arith.constant dense<0.000000e+00> : vector<8x352xf32>
    %204 = tpu.matmul %203, %201, %cst_184 {dimension_numbers = #tpu.dot_dimension_numbers<[1], [0], [0], [1], [0, 0, 1, 1], [], []>} : vector<8x8xbf16>, vector<8x352xbf16>, vector<8x352xf32> -> vector<8x352xf32>
    %205 = arith.addf %199, %204 : vector<8x352xf32>
    %c0_185 = arith.constant 0 : index
    %c0_186 = arith.constant 0 : index
    %c94 = arith.constant 94 : index
    %206 = vector.load %arg1[%c0_185, %c0_186, %c94] : memref<1x8x512xbf16, #tpu.memory_space<vmem>>, vector<1x8x352xbf16>
    %207 = vector.shape_cast %206 : vector<1x8x352xbf16> to vector<8x352xbf16>
    %c34 = arith.constant 34 : index
    %c0_187 = arith.constant 0 : index
    %c0_188 = arith.constant 0 : index
    %208 = vector.load %arg2[%c34, %c0_187, %c0_188] : memref<49x8x8xbf16, #tpu.memory_space<vmem>>, vector<1x8x8xbf16>
    %209 = vector.shape_cast %208 : vector<1x8x8xbf16> to vector<8x8xbf16>
    %cst_189 = arith.constant dense<0.000000e+00> : vector<8x352xf32>
    %210 = tpu.matmul %209, %207, %cst_189 {dimension_numbers = #tpu.dot_dimension_numbers<[1], [0], [0], [1], [0, 0, 1, 1], [], []>} : vector<8x8xbf16>, vector<8x352xbf16>, vector<8x352xf32> -> vector<8x352xf32>
    %211 = arith.addf %205, %210 : vector<8x352xf32>
    %c0_190 = arith.constant 0 : index
    %c0_191 = arith.constant 0 : index
    %c110 = arith.constant 110 : index
    %212 = vector.load %arg1[%c0_190, %c0_191, %c110] : memref<1x8x512xbf16, #tpu.memory_space<vmem>>, vector<1x8x352xbf16>
    %213 = vector.shape_cast %212 : vector<1x8x352xbf16> to vector<8x352xbf16>
    %c35 = arith.constant 35 : index
    %c0_192 = arith.constant 0 : index
    %c0_193 = arith.constant 0 : index
    %214 = vector.load %arg2[%c35, %c0_192, %c0_193] : memref<49x8x8xbf16, #tpu.memory_space<vmem>>, vector<1x8x8xbf16>
    %215 = vector.shape_cast %214 : vector<1x8x8xbf16> to vector<8x8xbf16>
    %cst_194 = arith.constant dense<0.000000e+00> : vector<8x352xf32>
    %216 = tpu.matmul %215, %213, %cst_194 {dimension_numbers = #tpu.dot_dimension_numbers<[1], [0], [0], [1], [0, 0, 1, 1], [], []>} : vector<8x8xbf16>, vector<8x352xbf16>, vector<8x352xf32> -> vector<8x352xf32>
    %217 = arith.addf %211, %216 : vector<8x352xf32>
    %c0_195 = arith.constant 0 : index
    %c0_196 = arith.constant 0 : index
    %c111 = arith.constant 111 : index
    %218 = vector.load %arg1[%c0_195, %c0_196, %c111] : memref<1x8x512xbf16, #tpu.memory_space<vmem>>, vector<1x8x352xbf16>
    %219 = vector.shape_cast %218 : vector<1x8x352xbf16> to vector<8x352xbf16>
    %c36 = arith.constant 36 : index
    %c0_197 = arith.constant 0 : index
    %c0_198 = arith.constant 0 : index
    %220 = vector.load %arg2[%c36, %c0_197, %c0_198] : memref<49x8x8xbf16, #tpu.memory_space<vmem>>, vector<1x8x8xbf16>
    %221 = vector.shape_cast %220 : vector<1x8x8xbf16> to vector<8x8xbf16>
    %cst_199 = arith.constant dense<0.000000e+00> : vector<8x352xf32>
    %222 = tpu.matmul %221, %219, %cst_199 {dimension_numbers = #tpu.dot_dimension_numbers<[1], [0], [0], [1], [0, 0, 1, 1], [], []>} : vector<8x8xbf16>, vector<8x352xbf16>, vector<8x352xf32> -> vector<8x352xf32>
    %223 = arith.addf %217, %222 : vector<8x352xf32>
    %c0_200 = arith.constant 0 : index
    %c0_201 = arith.constant 0 : index
    %c112 = arith.constant 112 : index
    %224 = vector.load %arg1[%c0_200, %c0_201, %c112] : memref<1x8x512xbf16, #tpu.memory_space<vmem>>, vector<1x8x352xbf16>
    %225 = vector.shape_cast %224 : vector<1x8x352xbf16> to vector<8x352xbf16>
    %c37 = arith.constant 37 : index
    %c0_202 = arith.constant 0 : index
    %c0_203 = arith.constant 0 : index
    %226 = vector.load %arg2[%c37, %c0_202, %c0_203] : memref<49x8x8xbf16, #tpu.memory_space<vmem>>, vector<1x8x8xbf16>
    %227 = vector.shape_cast %226 : vector<1x8x8xbf16> to vector<8x8xbf16>
    %cst_204 = arith.constant dense<0.000000e+00> : vector<8x352xf32>
    %228 = tpu.matmul %227, %225, %cst_204 {dimension_numbers = #tpu.dot_dimension_numbers<[1], [0], [0], [1], [0, 0, 1, 1], [], []>} : vector<8x8xbf16>, vector<8x352xbf16>, vector<8x352xf32> -> vector<8x352xf32>
    %229 = arith.addf %223, %228 : vector<8x352xf32>
    %c0_205 = arith.constant 0 : index
    %c0_206 = arith.constant 0 : index
    %c113 = arith.constant 113 : index
    %230 = vector.load %arg1[%c0_205, %c0_206, %c113] : memref<1x8x512xbf16, #tpu.memory_space<vmem>>, vector<1x8x352xbf16>
    %231 = vector.shape_cast %230 : vector<1x8x352xbf16> to vector<8x352xbf16>
    %c38 = arith.constant 38 : index
    %c0_207 = arith.constant 0 : index
    %c0_208 = arith.constant 0 : index
    %232 = vector.load %arg2[%c38, %c0_207, %c0_208] : memref<49x8x8xbf16, #tpu.memory_space<vmem>>, vector<1x8x8xbf16>
    %233 = vector.shape_cast %232 : vector<1x8x8xbf16> to vector<8x8xbf16>
    %cst_209 = arith.constant dense<0.000000e+00> : vector<8x352xf32>
    %234 = tpu.matmul %233, %231, %cst_209 {dimension_numbers = #tpu.dot_dimension_numbers<[1], [0], [0], [1], [0, 0, 1, 1], [], []>} : vector<8x8xbf16>, vector<8x352xbf16>, vector<8x352xf32> -> vector<8x352xf32>
    %235 = arith.addf %229, %234 : vector<8x352xf32>
    %c0_210 = arith.constant 0 : index
    %c0_211 = arith.constant 0 : index
    %c114 = arith.constant 114 : index
    %236 = vector.load %arg1[%c0_210, %c0_211, %c114] : memref<1x8x512xbf16, #tpu.memory_space<vmem>>, vector<1x8x352xbf16>
    %237 = vector.shape_cast %236 : vector<1x8x352xbf16> to vector<8x352xbf16>
    %c39 = arith.constant 39 : index
    %c0_212 = arith.constant 0 : index
    %c0_213 = arith.constant 0 : index
    %238 = vector.load %arg2[%c39, %c0_212, %c0_213] : memref<49x8x8xbf16, #tpu.memory_space<vmem>>, vector<1x8x8xbf16>
    %239 = vector.shape_cast %238 : vector<1x8x8xbf16> to vector<8x8xbf16>
    %cst_214 = arith.constant dense<0.000000e+00> : vector<8x352xf32>
    %240 = tpu.matmul %239, %237, %cst_214 {dimension_numbers = #tpu.dot_dimension_numbers<[1], [0], [0], [1], [0, 0, 1, 1], [], []>} : vector<8x8xbf16>, vector<8x352xbf16>, vector<8x352xf32> -> vector<8x352xf32>
    %241 = arith.addf %235, %240 : vector<8x352xf32>
    %c0_215 = arith.constant 0 : index
    %c0_216 = arith.constant 0 : index
    %c115 = arith.constant 115 : index
    %242 = vector.load %arg1[%c0_215, %c0_216, %c115] : memref<1x8x512xbf16, #tpu.memory_space<vmem>>, vector<1x8x352xbf16>
    %243 = vector.shape_cast %242 : vector<1x8x352xbf16> to vector<8x352xbf16>
    %c40 = arith.constant 40 : index
    %c0_217 = arith.constant 0 : index
    %c0_218 = arith.constant 0 : index
    %244 = vector.load %arg2[%c40, %c0_217, %c0_218] : memref<49x8x8xbf16, #tpu.memory_space<vmem>>, vector<1x8x8xbf16>
    %245 = vector.shape_cast %244 : vector<1x8x8xbf16> to vector<8x8xbf16>
    %cst_219 = arith.constant dense<0.000000e+00> : vector<8x352xf32>
    %246 = tpu.matmul %245, %243, %cst_219 {dimension_numbers = #tpu.dot_dimension_numbers<[1], [0], [0], [1], [0, 0, 1, 1], [], []>} : vector<8x8xbf16>, vector<8x352xbf16>, vector<8x352xf32> -> vector<8x352xf32>
    %247 = arith.addf %241, %246 : vector<8x352xf32>
    %c0_220 = arith.constant 0 : index
    %c0_221 = arith.constant 0 : index
    %c116 = arith.constant 116 : index
    %248 = vector.load %arg1[%c0_220, %c0_221, %c116] : memref<1x8x512xbf16, #tpu.memory_space<vmem>>, vector<1x8x352xbf16>
    %249 = vector.shape_cast %248 : vector<1x8x352xbf16> to vector<8x352xbf16>
    %c41 = arith.constant 41 : index
    %c0_222 = arith.constant 0 : index
    %c0_223 = arith.constant 0 : index
    %250 = vector.load %arg2[%c41, %c0_222, %c0_223] : memref<49x8x8xbf16, #tpu.memory_space<vmem>>, vector<1x8x8xbf16>
    %251 = vector.shape_cast %250 : vector<1x8x8xbf16> to vector<8x8xbf16>
    %cst_224 = arith.constant dense<0.000000e+00> : vector<8x352xf32>
    %252 = tpu.matmul %251, %249, %cst_224 {dimension_numbers = #tpu.dot_dimension_numbers<[1], [0], [0], [1], [0, 0, 1, 1], [], []>} : vector<8x8xbf16>, vector<8x352xbf16>, vector<8x352xf32> -> vector<8x352xf32>
    %253 = arith.addf %247, %252 : vector<8x352xf32>
    %c0_225 = arith.constant 0 : index
    %c0_226 = arith.constant 0 : index
    %c132 = arith.constant 132 : index
    %254 = vector.load %arg1[%c0_225, %c0_226, %c132] : memref<1x8x512xbf16, #tpu.memory_space<vmem>>, vector<1x8x352xbf16>
    %255 = vector.shape_cast %254 : vector<1x8x352xbf16> to vector<8x352xbf16>
    %c42 = arith.constant 42 : index
    %c0_227 = arith.constant 0 : index
    %c0_228 = arith.constant 0 : index
    %256 = vector.load %arg2[%c42, %c0_227, %c0_228] : memref<49x8x8xbf16, #tpu.memory_space<vmem>>, vector<1x8x8xbf16>
    %257 = vector.shape_cast %256 : vector<1x8x8xbf16> to vector<8x8xbf16>
    %cst_229 = arith.constant dense<0.000000e+00> : vector<8x352xf32>
    %258 = tpu.matmul %257, %255, %cst_229 {dimension_numbers = #tpu.dot_dimension_numbers<[1], [0], [0], [1], [0, 0, 1, 1], [], []>} : vector<8x8xbf16>, vector<8x352xbf16>, vector<8x352xf32> -> vector<8x352xf32>
    %259 = arith.addf %253, %258 : vector<8x352xf32>
    %c0_230 = arith.constant 0 : index
    %c0_231 = arith.constant 0 : index
    %c133 = arith.constant 133 : index
    %260 = vector.load %arg1[%c0_230, %c0_231, %c133] : memref<1x8x512xbf16, #tpu.memory_space<vmem>>, vector<1x8x352xbf16>
    %261 = vector.shape_cast %260 : vector<1x8x352xbf16> to vector<8x352xbf16>
    %c43 = arith.constant 43 : index
    %c0_232 = arith.constant 0 : index
    %c0_233 = arith.constant 0 : index
    %262 = vector.load %arg2[%c43, %c0_232, %c0_233] : memref<49x8x8xbf16, #tpu.memory_space<vmem>>, vector<1x8x8xbf16>
    %263 = vector.shape_cast %262 : vector<1x8x8xbf16> to vector<8x8xbf16>
    %cst_234 = arith.constant dense<0.000000e+00> : vector<8x352xf32>
    %264 = tpu.matmul %263, %261, %cst_234 {dimension_numbers = #tpu.dot_dimension_numbers<[1], [0], [0], [1], [0, 0, 1, 1], [], []>} : vector<8x8xbf16>, vector<8x352xbf16>, vector<8x352xf32> -> vector<8x352xf32>
    %265 = arith.addf %259, %264 : vector<8x352xf32>
    %c0_235 = arith.constant 0 : index
    %c0_236 = arith.constant 0 : index
    %c134 = arith.constant 134 : index
    %266 = vector.load %arg1[%c0_235, %c0_236, %c134] : memref<1x8x512xbf16, #tpu.memory_space<vmem>>, vector<1x8x352xbf16>
    %267 = vector.shape_cast %266 : vector<1x8x352xbf16> to vector<8x352xbf16>
    %c44_237 = arith.constant 44 : index
    %c0_238 = arith.constant 0 : index
    %c0_239 = arith.constant 0 : index
    %268 = vector.load %arg2[%c44_237, %c0_238, %c0_239] : memref<49x8x8xbf16, #tpu.memory_space<vmem>>, vector<1x8x8xbf16>
    %269 = vector.shape_cast %268 : vector<1x8x8xbf16> to vector<8x8xbf16>
    %cst_240 = arith.constant dense<0.000000e+00> : vector<8x352xf32>
    %270 = tpu.matmul %269, %267, %cst_240 {dimension_numbers = #tpu.dot_dimension_numbers<[1], [0], [0], [1], [0, 0, 1, 1], [], []>} : vector<8x8xbf16>, vector<8x352xbf16>, vector<8x352xf32> -> vector<8x352xf32>
    %271 = arith.addf %265, %270 : vector<8x352xf32>
    %c0_241 = arith.constant 0 : index
    %c0_242 = arith.constant 0 : index
    %c135 = arith.constant 135 : index
    %272 = vector.load %arg1[%c0_241, %c0_242, %c135] : memref<1x8x512xbf16, #tpu.memory_space<vmem>>, vector<1x8x352xbf16>
    %273 = vector.shape_cast %272 : vector<1x8x352xbf16> to vector<8x352xbf16>
    %c45_243 = arith.constant 45 : index
    %c0_244 = arith.constant 0 : index
    %c0_245 = arith.constant 0 : index
    %274 = vector.load %arg2[%c45_243, %c0_244, %c0_245] : memref<49x8x8xbf16, #tpu.memory_space<vmem>>, vector<1x8x8xbf16>
    %275 = vector.shape_cast %274 : vector<1x8x8xbf16> to vector<8x8xbf16>
    %cst_246 = arith.constant dense<0.000000e+00> : vector<8x352xf32>
    %276 = tpu.matmul %275, %273, %cst_246 {dimension_numbers = #tpu.dot_dimension_numbers<[1], [0], [0], [1], [0, 0, 1, 1], [], []>} : vector<8x8xbf16>, vector<8x352xbf16>, vector<8x352xf32> -> vector<8x352xf32>
    %277 = arith.addf %271, %276 : vector<8x352xf32>
    %c0_247 = arith.constant 0 : index
    %c0_248 = arith.constant 0 : index
    %c136 = arith.constant 136 : index
    %278 = vector.load %arg1[%c0_247, %c0_248, %c136] : memref<1x8x512xbf16, #tpu.memory_space<vmem>>, vector<1x8x352xbf16>
    %279 = vector.shape_cast %278 : vector<1x8x352xbf16> to vector<8x352xbf16>
    %c46_249 = arith.constant 46 : index
    %c0_250 = arith.constant 0 : index
    %c0_251 = arith.constant 0 : index
    %280 = vector.load %arg2[%c46_249, %c0_250, %c0_251] : memref<49x8x8xbf16, #tpu.memory_space<vmem>>, vector<1x8x8xbf16>
    %281 = vector.shape_cast %280 : vector<1x8x8xbf16> to vector<8x8xbf16>
    %cst_252 = arith.constant dense<0.000000e+00> : vector<8x352xf32>
    %282 = tpu.matmul %281, %279, %cst_252 {dimension_numbers = #tpu.dot_dimension_numbers<[1], [0], [0], [1], [0, 0, 1, 1], [], []>} : vector<8x8xbf16>, vector<8x352xbf16>, vector<8x352xf32> -> vector<8x352xf32>
    %283 = arith.addf %277, %282 : vector<8x352xf32>
    %c0_253 = arith.constant 0 : index
    %c0_254 = arith.constant 0 : index
    %c137 = arith.constant 137 : index
    %284 = vector.load %arg1[%c0_253, %c0_254, %c137] : memref<1x8x512xbf16, #tpu.memory_space<vmem>>, vector<1x8x352xbf16>
    %285 = vector.shape_cast %284 : vector<1x8x352xbf16> to vector<8x352xbf16>
    %c47_255 = arith.constant 47 : index
    %c0_256 = arith.constant 0 : index
    %c0_257 = arith.constant 0 : index
    %286 = vector.load %arg2[%c47_255, %c0_256, %c0_257] : memref<49x8x8xbf16, #tpu.memory_space<vmem>>, vector<1x8x8xbf16>
    %287 = vector.shape_cast %286 : vector<1x8x8xbf16> to vector<8x8xbf16>
    %cst_258 = arith.constant dense<0.000000e+00> : vector<8x352xf32>
    %288 = tpu.matmul %287, %285, %cst_258 {dimension_numbers = #tpu.dot_dimension_numbers<[1], [0], [0], [1], [0, 0, 1, 1], [], []>} : vector<8x8xbf16>, vector<8x352xbf16>, vector<8x352xf32> -> vector<8x352xf32>
    %289 = arith.addf %283, %288 : vector<8x352xf32>
    %c0_259 = arith.constant 0 : index
    %c0_260 = arith.constant 0 : index
    %c138 = arith.constant 138 : index
    %290 = vector.load %arg1[%c0_259, %c0_260, %c138] : memref<1x8x512xbf16, #tpu.memory_space<vmem>>, vector<1x8x352xbf16>
    %291 = vector.shape_cast %290 : vector<1x8x352xbf16> to vector<8x352xbf16>
    %c48_261 = arith.constant 48 : index
    %c0_262 = arith.constant 0 : index
    %c0_263 = arith.constant 0 : index
    %292 = vector.load %arg2[%c48_261, %c0_262, %c0_263] : memref<49x8x8xbf16, #tpu.memory_space<vmem>>, vector<1x8x8xbf16>
    %293 = vector.shape_cast %292 : vector<1x8x8xbf16> to vector<8x8xbf16>
    %cst_264 = arith.constant dense<0.000000e+00> : vector<8x352xf32>
    %294 = tpu.matmul %293, %291, %cst_264 {dimension_numbers = #tpu.dot_dimension_numbers<[1], [0], [0], [1], [0, 0, 1, 1], [], []>} : vector<8x8xbf16>, vector<8x352xbf16>, vector<8x352xf32> -> vector<8x352xf32>
    %295 = arith.addf %289, %294 : vector<8x352xf32>
    %c0_265 = arith.constant 0 : index
    %c0_266 = arith.constant 0 : index
    %296 = vector.load %arg7[%c0_265, %c0_266] : memref<8x352xf32, #tpu.memory_space<vmem>>, vector<8x352xf32>
    tpu.vector_store %arg7[%c0_265, %c0_266], %295 {strides = array<i32>} : memref<8x352xf32, #tpu.memory_space<vmem>>, vector<8x352xf32>,
    %c0_267 = arith.constant 0 : index
    %c0_268 = arith.constant 0 : index
    %297 = vector.load %arg3[%c0_267, %c0_268] : memref<1x352xf32, #tpu.memory_space<vmem>>, vector<1x352xf32>
    %298 = vector.broadcast %297 : vector<1x352xf32> to vector<8x352xf32>
    %299 = arith.mulf %295, %298 : vector<8x352xf32>
    %cst_269 = arith.constant dense<0.000000e+00> : vector<8xf32>
    %300 = vector.multi_reduction <add>, %299, %cst_269 [1] : vector<8x352xf32> to vector<8xf32>
    %301 = vector.shape_cast %300 : vector<8xf32> to vector<8x1xf32>
    %302 = arith.addf %0, %301 : vector<8x1xf32>
    %cst_270 = arith.constant 3.906250e-03 : f32
    %303 = vector.broadcast %cst_270 : f32 to vector<8x1xf32>
    %304 = arith.mulf %302, %303 : vector<8x1xf32>
    %cst_271 = arith.constant 0.000000e+00 : f32
    %305 = vector.broadcast %cst_271 : f32 to vector<8x1xf32>
    %c0_272 = arith.constant 0 : index
    %c0_273 = arith.constant 0 : index
    %306 = vector.load %arg7[%c0_272, %c0_273] : memref<8x352xf32, #tpu.memory_space<vmem>>, vector<8x352xf32>
    %307 = vector.broadcast %304 : vector<8x1xf32> to vector<8x352xf32>
    %308 = arith.subf %306, %307 : vector<8x352xf32>
    %c0_274 = arith.constant 0 : index
    %c0_275 = arith.constant 0 : index
    %309 = vector.load %arg3[%c0_274, %c0_275] : memref<1x352xf32, #tpu.memory_space<vmem>>, vector<1x352xf32>
    %310 = vector.broadcast %309 : vector<1x352xf32> to vector<8x352xf32>
    %311 = arith.mulf %308, %310 : vector<8x352xf32>
    %312 = arith.mulf %311, %311 : vector<8x352xf32>
    %cst_276 = arith.constant dense<0.000000e+00> : vector<8xf32>
    %313 = vector.multi_reduction <add>, %312, %cst_276 [1] : vector<8x352xf32> to vector<8xf32>
    %314 = vector.shape_cast %313 : vector<8xf32> to vector<8x1xf32>
    %315 = arith.addf %305, %314 : vector<8x1xf32>
    %cst_277 = arith.constant 3.906250e-03 : f32
    %316 = vector.broadcast %cst_277 : f32 to vector<8x1xf32>
    %317 = arith.mulf %315, %316 : vector<8x1xf32>
    %cst_278 = arith.constant 9.99999974E-6 : f32
    %318 = vector.broadcast %cst_278 : f32 to vector<8x1xf32>
    %319 = arith.addf %317, %318 : vector<8x1xf32>
    %320 = math.rsqrt %319 : vector<8x1xf32>
    %c0_279 = arith.constant 0 : index
    %c0_280 = arith.constant 0 : index
    %321 = vector.load %arg4[%c0_279, %c0_280] : memref<8x1xf32, #tpu.memory_space<vmem>>, vector<8x1xf32>
    %322 = arith.mulf %321, %320 : vector<8x1xf32>
    %c0_281 = arith.constant 0 : index
    %c0_282 = arith.constant 0 : index
    %323 = vector.load %arg5[%c0_281, %c0_282] : memref<8x1xf32, #tpu.memory_space<vmem>>, vector<8x1xf32>
    %324 = arith.mulf %304, %322 : vector<8x1xf32>
    %325 = arith.subf %323, %324 : vector<8x1xf32>
    %c0_283 = arith.constant 0 : index
    %c0_284 = arith.constant 0 : index
    %326 = vector.load %arg7[%c0_283, %c0_284] : memref<8x352xf32, #tpu.memory_space<vmem>>, vector<8x352xf32>
    %327 = vector.broadcast %322 : vector<8x1xf32> to vector<8x352xf32>
    %328 = arith.mulf %326, %327 : vector<8x352xf32>
    %329 = vector.broadcast %325 : vector<8x1xf32> to vector<8x352xf32>
    %330 = arith.addf %328, %329 : vector<8x352xf32>
    %cst_285 = arith.constant 0.000000e+00 : f32
    %331 = vector.broadcast %cst_285 : f32 to vector<8x352xf32>
    %332 = arith.maximumf %330, %331 : vector<8x352xf32>
    %333 = arith.truncf %332 : vector<8x352xf32> to vector<8x352xbf16>
    %c0_286 = arith.constant 0 : index
    %c0_287 = arith.constant 0 : index
    %c0_288 = arith.constant 0 : index
    %334 = vector.load %arg6[%c0_286, %c0_287, %c0_288] : memref<1x8x352xbf16, #tpu.memory_space<vmem>>, vector<1x8x352xbf16>
    %335 = vector.shape_cast %334 : vector<1x8x352xbf16> to vector<8x352xbf16>
    %336 = vector.shape_cast %333 : vector<8x352xbf16> to vector<1x8x352xbf16>
    tpu.vector_store %arg6[%c0_286, %c0_287, %c0_288], %336 {strides = array<i32>} : memref<1x8x352xbf16, #tpu.memory_space<vmem>>, vector<1x8x352xbf16>,
    return
  }
  func.func @transform_0(%arg0: i32) -> (i32, i32, i32) {
    %c0_i32 = arith.constant 0 : i32
    %c0_i32_0 = arith.constant 0 : i32
    %c0_i32_1 = arith.constant 0 : i32
    return %arg0, %c0_i32, %c0_i32_0 : i32, i32, i32
  }
  func.func @transform_1(%arg0: i32) -> (i32, i32, i32) {
    %c0_i32 = arith.constant 0 : i32
    %c0_i32_0 = arith.constant 0 : i32
    %c0_i32_1 = arith.constant 0 : i32
    %c0_i32_2 = arith.constant 0 : i32
    return %c0_i32, %c0_i32_0, %c0_i32_1 : i32, i32, i32
  }
  func.func @transform_2(%arg0: i32) -> (i32, i32) {
    %c0_i32 = arith.constant 0 : i32
    %c0_i32_0 = arith.constant 0 : i32
    %c0_i32_1 = arith.constant 0 : i32
    return %c0_i32, %c0_i32_0 : i32, i32
  }
  func.func @transform_3(%arg0: i32) -> (i32, i32) {
    %c0_i32 = arith.constant 0 : i32
    %c0_i32_0 = arith.constant 0 : i32
    %c0_i32_1 = arith.constant 0 : i32
    return %c0_i32, %c0_i32_0 : i32, i32
  }
  func.func @transform_4(%arg0: i32) -> (i32, i32) {
    %c0_i32 = arith.constant 0 : i32
    %c0_i32_0 = arith.constant 0 : i32
    %c0_i32_1 = arith.constant 0 : i32
    return %c0_i32, %c0_i32_0 : i32, i32
  }
  func.func @transform_5(%arg0: i32) -> (i32, i32, i32) {
    %c0_i32 = arith.constant 0 : i32
    %c0_i32_0 = arith.constant 0 : i32
    %c0_i32_1 = arith.constant 0 : i32
    return %arg0, %c0_i32, %c0_i32_0 : i32, i32, i32
  }
}

module attributes {stable_mosaic.version = 11 : i64} {
  func.func @conv_in_act_kernel(%arg0: i32, %arg1: memref<1x8x384xbf16, #tpu.memory_space<vmem>>, %arg2: memref<9x16x8xbf16, #tpu.memory_space<vmem>>, %arg3: memref<1x72xf32, #tpu.memory_space<vmem>>, %arg4: memref<16x1xf32, #tpu.memory_space<vmem>>, %arg5: memref<16x1xf32, #tpu.memory_space<vmem>>, %arg6: memref<1x16x72xbf16, #tpu.memory_space<vmem>>, %arg7: memref<16x72xf32, #tpu.memory_space<vmem>>) attributes {dimension_semantics = [#tpu.dimension_semantics<parallel>], iteration_bounds = array<i64: 2>, scalar_prefetch = 0 : i64, scratch_operands = 1 : i64, tpu.core_type = #tpu.core_type<tc>, window_params = [{transform_indices = @transform_0, window_bounds = array<i64: 1, 8, 384>}, {pipeline_mode = #tpu.pipeline_mode<synchronous>, transform_indices = @transform_1, window_bounds = array<i64: 9, 16, 8>}, {pipeline_mode = #tpu.pipeline_mode<synchronous>, transform_indices = @transform_2, window_bounds = array<i64: 1, 72>}, {pipeline_mode = #tpu.pipeline_mode<synchronous>, transform_indices = @transform_3, window_bounds = array<i64: 16, 1>}, {pipeline_mode = #tpu.pipeline_mode<synchronous>, transform_indices = @transform_4, window_bounds = array<i64: 16, 1>}, {transform_indices = @transform_5, window_bounds = array<i64: 1, 16, 72>}]} {
    %cst = arith.constant 0.000000e+00 : f32
    %0 = vector.broadcast %cst : f32 to vector<16x1xf32>
    %cst_0 = arith.constant 0.000000e+00 : f32
    %1 = vector.broadcast %cst_0 : f32 to vector<16x72xf32>
    %c0 = arith.constant 0 : index
    %c0_1 = arith.constant 0 : index
    %c0_2 = arith.constant 0 : index
    %2 = vector.load %arg1[%c0, %c0_1, %c0_2] : memref<1x8x384xbf16, #tpu.memory_space<vmem>>, vector<1x8x72xbf16>
    %3 = vector.shape_cast %2 : vector<1x8x72xbf16> to vector<8x72xbf16>
    %c0_3 = arith.constant 0 : index
    %c0_4 = arith.constant 0 : index
    %c0_5 = arith.constant 0 : index
    %4 = vector.load %arg2[%c0_3, %c0_4, %c0_5] : memref<9x16x8xbf16, #tpu.memory_space<vmem>>, vector<1x16x8xbf16>
    %5 = vector.shape_cast %4 : vector<1x16x8xbf16> to vector<16x8xbf16>
    %cst_6 = arith.constant dense<0.000000e+00> : vector<16x72xf32>
    %6 = tpu.matmul %5, %3, %cst_6 {dimension_numbers = #tpu.dot_dimension_numbers<[1], [0], [0], [1], [0, 0, 1, 1], [], []>} : vector<16x8xbf16>, vector<8x72xbf16>, vector<16x72xf32> -> vector<16x72xf32>
    %7 = arith.addf %1, %6 : vector<16x72xf32>
    %c0_7 = arith.constant 0 : index
    %c0_8 = arith.constant 0 : index
    %c81 = arith.constant 81 : index
    %8 = vector.load %arg1[%c0_7, %c0_8, %c81] : memref<1x8x384xbf16, #tpu.memory_space<vmem>>, vector<1x8x72xbf16>
    %9 = vector.shape_cast %8 : vector<1x8x72xbf16> to vector<8x72xbf16>
    %c1 = arith.constant 1 : index
    %c0_9 = arith.constant 0 : index
    %c0_10 = arith.constant 0 : index
    %10 = vector.load %arg2[%c1, %c0_9, %c0_10] : memref<9x16x8xbf16, #tpu.memory_space<vmem>>, vector<1x16x8xbf16>
    %11 = vector.shape_cast %10 : vector<1x16x8xbf16> to vector<16x8xbf16>
    %cst_11 = arith.constant dense<0.000000e+00> : vector<16x72xf32>
    %12 = tpu.matmul %11, %9, %cst_11 {dimension_numbers = #tpu.dot_dimension_numbers<[1], [0], [0], [1], [0, 0, 1, 1], [], []>} : vector<16x8xbf16>, vector<8x72xbf16>, vector<16x72xf32> -> vector<16x72xf32>
    %13 = arith.addf %7, %12 : vector<16x72xf32>
    %c0_12 = arith.constant 0 : index
    %c0_13 = arith.constant 0 : index
    %c1_14 = arith.constant 1 : index
    %14 = vector.load %arg1[%c0_12, %c0_13, %c1_14] : memref<1x8x384xbf16, #tpu.memory_space<vmem>>, vector<1x8x72xbf16>
    %15 = vector.shape_cast %14 : vector<1x8x72xbf16> to vector<8x72xbf16>
    %c2 = arith.constant 2 : index
    %c0_15 = arith.constant 0 : index
    %c0_16 = arith.constant 0 : index
    %16 = vector.load %arg2[%c2, %c0_15, %c0_16] : memref<9x16x8xbf16, #tpu.memory_space<vmem>>, vector<1x16x8xbf16>
    %17 = vector.shape_cast %16 : vector<1x16x8xbf16> to vector<16x8xbf16>
    %cst_17 = arith.constant dense<0.000000e+00> : vector<16x72xf32>
    %18 = tpu.matmul %17, %15, %cst_17 {dimension_numbers = #tpu.dot_dimension_numbers<[1], [0], [0], [1], [0, 0, 1, 1], [], []>} : vector<16x8xbf16>, vector<8x72xbf16>, vector<16x72xf32> -> vector<16x72xf32>
    %19 = arith.addf %13, %18 : vector<16x72xf32>
    %c0_18 = arith.constant 0 : index
    %c0_19 = arith.constant 0 : index
    %c162 = arith.constant 162 : index
    %20 = vector.load %arg1[%c0_18, %c0_19, %c162] : memref<1x8x384xbf16, #tpu.memory_space<vmem>>, vector<1x8x72xbf16>
    %21 = vector.shape_cast %20 : vector<1x8x72xbf16> to vector<8x72xbf16>
    %c3 = arith.constant 3 : index
    %c0_20 = arith.constant 0 : index
    %c0_21 = arith.constant 0 : index
    %22 = vector.load %arg2[%c3, %c0_20, %c0_21] : memref<9x16x8xbf16, #tpu.memory_space<vmem>>, vector<1x16x8xbf16>
    %23 = vector.shape_cast %22 : vector<1x16x8xbf16> to vector<16x8xbf16>
    %cst_22 = arith.constant dense<0.000000e+00> : vector<16x72xf32>
    %24 = tpu.matmul %23, %21, %cst_22 {dimension_numbers = #tpu.dot_dimension_numbers<[1], [0], [0], [1], [0, 0, 1, 1], [], []>} : vector<16x8xbf16>, vector<8x72xbf16>, vector<16x72xf32> -> vector<16x72xf32>
    %25 = arith.addf %19, %24 : vector<16x72xf32>
    %c0_23 = arith.constant 0 : index
    %c0_24 = arith.constant 0 : index
    %c243 = arith.constant 243 : index
    %26 = vector.load %arg1[%c0_23, %c0_24, %c243] : memref<1x8x384xbf16, #tpu.memory_space<vmem>>, vector<1x8x72xbf16>
    %27 = vector.shape_cast %26 : vector<1x8x72xbf16> to vector<8x72xbf16>
    %c4 = arith.constant 4 : index
    %c0_25 = arith.constant 0 : index
    %c0_26 = arith.constant 0 : index
    %28 = vector.load %arg2[%c4, %c0_25, %c0_26] : memref<9x16x8xbf16, #tpu.memory_space<vmem>>, vector<1x16x8xbf16>
    %29 = vector.shape_cast %28 : vector<1x16x8xbf16> to vector<16x8xbf16>
    %cst_27 = arith.constant dense<0.000000e+00> : vector<16x72xf32>
    %30 = tpu.matmul %29, %27, %cst_27 {dimension_numbers = #tpu.dot_dimension_numbers<[1], [0], [0], [1], [0, 0, 1, 1], [], []>} : vector<16x8xbf16>, vector<8x72xbf16>, vector<16x72xf32> -> vector<16x72xf32>
    %31 = arith.addf %25, %30 : vector<16x72xf32>
    %c0_28 = arith.constant 0 : index
    %c0_29 = arith.constant 0 : index
    %c163 = arith.constant 163 : index
    %32 = vector.load %arg1[%c0_28, %c0_29, %c163] : memref<1x8x384xbf16, #tpu.memory_space<vmem>>, vector<1x8x72xbf16>
    %33 = vector.shape_cast %32 : vector<1x8x72xbf16> to vector<8x72xbf16>
    %c5 = arith.constant 5 : index
    %c0_30 = arith.constant 0 : index
    %c0_31 = arith.constant 0 : index
    %34 = vector.load %arg2[%c5, %c0_30, %c0_31] : memref<9x16x8xbf16, #tpu.memory_space<vmem>>, vector<1x16x8xbf16>
    %35 = vector.shape_cast %34 : vector<1x16x8xbf16> to vector<16x8xbf16>
    %cst_32 = arith.constant dense<0.000000e+00> : vector<16x72xf32>
    %36 = tpu.matmul %35, %33, %cst_32 {dimension_numbers = #tpu.dot_dimension_numbers<[1], [0], [0], [1], [0, 0, 1, 1], [], []>} : vector<16x8xbf16>, vector<8x72xbf16>, vector<16x72xf32> -> vector<16x72xf32>
    %37 = arith.addf %31, %36 : vector<16x72xf32>
    %c0_33 = arith.constant 0 : index
    %c0_34 = arith.constant 0 : index
    %c9 = arith.constant 9 : index
    %38 = vector.load %arg1[%c0_33, %c0_34, %c9] : memref<1x8x384xbf16, #tpu.memory_space<vmem>>, vector<1x8x72xbf16>
    %39 = vector.shape_cast %38 : vector<1x8x72xbf16> to vector<8x72xbf16>
    %c6 = arith.constant 6 : index
    %c0_35 = arith.constant 0 : index
    %c0_36 = arith.constant 0 : index
    %40 = vector.load %arg2[%c6, %c0_35, %c0_36] : memref<9x16x8xbf16, #tpu.memory_space<vmem>>, vector<1x16x8xbf16>
    %41 = vector.shape_cast %40 : vector<1x16x8xbf16> to vector<16x8xbf16>
    %cst_37 = arith.constant dense<0.000000e+00> : vector<16x72xf32>
    %42 = tpu.matmul %41, %39, %cst_37 {dimension_numbers = #tpu.dot_dimension_numbers<[1], [0], [0], [1], [0, 0, 1, 1], [], []>} : vector<16x8xbf16>, vector<8x72xbf16>, vector<16x72xf32> -> vector<16x72xf32>
    %43 = arith.addf %37, %42 : vector<16x72xf32>
    %c0_38 = arith.constant 0 : index
    %c0_39 = arith.constant 0 : index
    %c90 = arith.constant 90 : index
    %44 = vector.load %arg1[%c0_38, %c0_39, %c90] : memref<1x8x384xbf16, #tpu.memory_space<vmem>>, vector<1x8x72xbf16>
    %45 = vector.shape_cast %44 : vector<1x8x72xbf16> to vector<8x72xbf16>
    %c7 = arith.constant 7 : index
    %c0_40 = arith.constant 0 : index
    %c0_41 = arith.constant 0 : index
    %46 = vector.load %arg2[%c7, %c0_40, %c0_41] : memref<9x16x8xbf16, #tpu.memory_space<vmem>>, vector<1x16x8xbf16>
    %47 = vector.shape_cast %46 : vector<1x16x8xbf16> to vector<16x8xbf16>
    %cst_42 = arith.constant dense<0.000000e+00> : vector<16x72xf32>
    %48 = tpu.matmul %47, %45, %cst_42 {dimension_numbers = #tpu.dot_dimension_numbers<[1], [0], [0], [1], [0, 0, 1, 1], [], []>} : vector<16x8xbf16>, vector<8x72xbf16>, vector<16x72xf32> -> vector<16x72xf32>
    %49 = arith.addf %43, %48 : vector<16x72xf32>
    %c0_43 = arith.constant 0 : index
    %c0_44 = arith.constant 0 : index
    %c10 = arith.constant 10 : index
    %50 = vector.load %arg1[%c0_43, %c0_44, %c10] : memref<1x8x384xbf16, #tpu.memory_space<vmem>>, vector<1x8x72xbf16>
    %51 = vector.shape_cast %50 : vector<1x8x72xbf16> to vector<8x72xbf16>
    %c8 = arith.constant 8 : index
    %c0_45 = arith.constant 0 : index
    %c0_46 = arith.constant 0 : index
    %52 = vector.load %arg2[%c8, %c0_45, %c0_46] : memref<9x16x8xbf16, #tpu.memory_space<vmem>>, vector<1x16x8xbf16>
    %53 = vector.shape_cast %52 : vector<1x16x8xbf16> to vector<16x8xbf16>
    %cst_47 = arith.constant dense<0.000000e+00> : vector<16x72xf32>
    %54 = tpu.matmul %53, %51, %cst_47 {dimension_numbers = #tpu.dot_dimension_numbers<[1], [0], [0], [1], [0, 0, 1, 1], [], []>} : vector<16x8xbf16>, vector<8x72xbf16>, vector<16x72xf32> -> vector<16x72xf32>
    %55 = arith.addf %49, %54 : vector<16x72xf32>
    %c0_48 = arith.constant 0 : index
    %c0_49 = arith.constant 0 : index
    %56 = vector.load %arg7[%c0_48, %c0_49] : memref<16x72xf32, #tpu.memory_space<vmem>>, vector<16x72xf32>
    tpu.vector_store %arg7[%c0_48, %c0_49], %55 {strides = array<i32>} : memref<16x72xf32, #tpu.memory_space<vmem>>, vector<16x72xf32>,
    %c0_50 = arith.constant 0 : index
    %c0_51 = arith.constant 0 : index
    %57 = vector.load %arg3[%c0_50, %c0_51] : memref<1x72xf32, #tpu.memory_space<vmem>>, vector<1x72xf32>
    %58 = vector.broadcast %57 : vector<1x72xf32> to vector<16x72xf32>
    %59 = arith.mulf %55, %58 : vector<16x72xf32>
    %cst_52 = arith.constant dense<0.000000e+00> : vector<16xf32>
    %60 = vector.multi_reduction <add>, %59, %cst_52 [1] : vector<16x72xf32> to vector<16xf32>
    %61 = vector.shape_cast %60 : vector<16xf32> to vector<16x1xf32>
    %62 = arith.addf %0, %61 : vector<16x1xf32>
    %cst_53 = arith.constant 1.562500e-02 : f32
    %63 = vector.broadcast %cst_53 : f32 to vector<16x1xf32>
    %64 = arith.mulf %62, %63 : vector<16x1xf32>
    %cst_54 = arith.constant 0.000000e+00 : f32
    %65 = vector.broadcast %cst_54 : f32 to vector<16x1xf32>
    %c0_55 = arith.constant 0 : index
    %c0_56 = arith.constant 0 : index
    %66 = vector.load %arg7[%c0_55, %c0_56] : memref<16x72xf32, #tpu.memory_space<vmem>>, vector<16x72xf32>
    %67 = vector.broadcast %64 : vector<16x1xf32> to vector<16x72xf32>
    %68 = arith.subf %66, %67 : vector<16x72xf32>
    %c0_57 = arith.constant 0 : index
    %c0_58 = arith.constant 0 : index
    %69 = vector.load %arg3[%c0_57, %c0_58] : memref<1x72xf32, #tpu.memory_space<vmem>>, vector<1x72xf32>
    %70 = vector.broadcast %69 : vector<1x72xf32> to vector<16x72xf32>
    %71 = arith.mulf %68, %70 : vector<16x72xf32>
    %72 = arith.mulf %71, %71 : vector<16x72xf32>
    %cst_59 = arith.constant dense<0.000000e+00> : vector<16xf32>
    %73 = vector.multi_reduction <add>, %72, %cst_59 [1] : vector<16x72xf32> to vector<16xf32>
    %74 = vector.shape_cast %73 : vector<16xf32> to vector<16x1xf32>
    %75 = arith.addf %65, %74 : vector<16x1xf32>
    %cst_60 = arith.constant 1.562500e-02 : f32
    %76 = vector.broadcast %cst_60 : f32 to vector<16x1xf32>
    %77 = arith.mulf %75, %76 : vector<16x1xf32>
    %cst_61 = arith.constant 9.99999974E-6 : f32
    %78 = vector.broadcast %cst_61 : f32 to vector<16x1xf32>
    %79 = arith.addf %77, %78 : vector<16x1xf32>
    %80 = math.rsqrt %79 : vector<16x1xf32>
    %c0_62 = arith.constant 0 : index
    %c0_63 = arith.constant 0 : index
    %81 = vector.load %arg4[%c0_62, %c0_63] : memref<16x1xf32, #tpu.memory_space<vmem>>, vector<16x1xf32>
    %82 = arith.mulf %81, %80 : vector<16x1xf32>
    %c0_64 = arith.constant 0 : index
    %c0_65 = arith.constant 0 : index
    %83 = vector.load %arg5[%c0_64, %c0_65] : memref<16x1xf32, #tpu.memory_space<vmem>>, vector<16x1xf32>
    %84 = arith.mulf %64, %82 : vector<16x1xf32>
    %85 = arith.subf %83, %84 : vector<16x1xf32>
    %c0_66 = arith.constant 0 : index
    %c0_67 = arith.constant 0 : index
    %86 = vector.load %arg7[%c0_66, %c0_67] : memref<16x72xf32, #tpu.memory_space<vmem>>, vector<16x72xf32>
    %87 = vector.broadcast %82 : vector<16x1xf32> to vector<16x72xf32>
    %88 = arith.mulf %86, %87 : vector<16x72xf32>
    %89 = vector.broadcast %85 : vector<16x1xf32> to vector<16x72xf32>
    %90 = arith.addf %88, %89 : vector<16x72xf32>
    %cst_68 = arith.constant 0.000000e+00 : f32
    %91 = vector.broadcast %cst_68 : f32 to vector<16x72xf32>
    %92 = arith.maximumf %90, %91 : vector<16x72xf32>
    %93 = arith.truncf %92 : vector<16x72xf32> to vector<16x72xbf16>
    %c0_69 = arith.constant 0 : index
    %c0_70 = arith.constant 0 : index
    %c0_71 = arith.constant 0 : index
    %94 = vector.load %arg6[%c0_69, %c0_70, %c0_71] : memref<1x16x72xbf16, #tpu.memory_space<vmem>>, vector<1x16x72xbf16>
    %95 = vector.shape_cast %94 : vector<1x16x72xbf16> to vector<16x72xbf16>
    %96 = vector.shape_cast %93 : vector<16x72xbf16> to vector<1x16x72xbf16>
    tpu.vector_store %arg6[%c0_69, %c0_70, %c0_71], %96 {strides = array<i32>} : memref<1x16x72xbf16, #tpu.memory_space<vmem>>, vector<1x16x72xbf16>,
    return
  }
  func.func @transform_0(%arg0: i32) -> (i32, i32, i32) {
    %c0_i32 = arith.constant 0 : i32
    %c0_i32_0 = arith.constant 0 : i32
    %c0_i32_1 = arith.constant 0 : i32
    return %arg0, %c0_i32, %c0_i32_0 : i32, i32, i32
  }
  func.func @transform_1(%arg0: i32) -> (i32, i32, i32) {
    %c0_i32 = arith.constant 0 : i32
    %c0_i32_0 = arith.constant 0 : i32
    %c0_i32_1 = arith.constant 0 : i32
    %c0_i32_2 = arith.constant 0 : i32
    return %c0_i32, %c0_i32_0, %c0_i32_1 : i32, i32, i32
  }
  func.func @transform_2(%arg0: i32) -> (i32, i32) {
    %c0_i32 = arith.constant 0 : i32
    %c0_i32_0 = arith.constant 0 : i32
    %c0_i32_1 = arith.constant 0 : i32
    return %c0_i32, %c0_i32_0 : i32, i32
  }
  func.func @transform_3(%arg0: i32) -> (i32, i32) {
    %c0_i32 = arith.constant 0 : i32
    %c0_i32_0 = arith.constant 0 : i32
    %c0_i32_1 = arith.constant 0 : i32
    return %c0_i32, %c0_i32_0 : i32, i32
  }
  func.func @transform_4(%arg0: i32) -> (i32, i32) {
    %c0_i32 = arith.constant 0 : i32
    %c0_i32_0 = arith.constant 0 : i32
    %c0_i32_1 = arith.constant 0 : i32
    return %c0_i32, %c0_i32_0 : i32, i32
  }
  func.func @transform_5(%arg0: i32) -> (i32, i32, i32) {
    %c0_i32 = arith.constant 0 : i32
    %c0_i32_0 = arith.constant 0 : i32
    %c0_i32_1 = arith.constant 0 : i32
    return %arg0, %c0_i32, %c0_i32_0 : i32, i32, i32
  }
}

module attributes {stable_mosaic.version = 11 : i64} {
  func.func @conv_in_act_kernel(%arg0: i32, %arg1: memref<1x16x128xbf16, #tpu.memory_space<vmem>>, %arg2: memref<9x32x16xbf16, #tpu.memory_space<vmem>>, %arg3: memref<1x20xf32, #tpu.memory_space<vmem>>, %arg4: memref<32x1xf32, #tpu.memory_space<vmem>>, %arg5: memref<32x1xf32, #tpu.memory_space<vmem>>, %arg6: memref<1x32x20xbf16, #tpu.memory_space<vmem>>, %arg7: memref<32x20xf32, #tpu.memory_space<vmem>>) attributes {dimension_semantics = [#tpu.dimension_semantics<parallel>], iteration_bounds = array<i64: 2>, scalar_prefetch = 0 : i64, scratch_operands = 1 : i64, tpu.core_type = #tpu.core_type<tc>, window_params = [{transform_indices = @transform_0, window_bounds = array<i64: 1, 16, 128>}, {pipeline_mode = #tpu.pipeline_mode<synchronous>, transform_indices = @transform_1, window_bounds = array<i64: 9, 32, 16>}, {pipeline_mode = #tpu.pipeline_mode<synchronous>, transform_indices = @transform_2, window_bounds = array<i64: 1, 20>}, {pipeline_mode = #tpu.pipeline_mode<synchronous>, transform_indices = @transform_3, window_bounds = array<i64: 32, 1>}, {pipeline_mode = #tpu.pipeline_mode<synchronous>, transform_indices = @transform_4, window_bounds = array<i64: 32, 1>}, {transform_indices = @transform_5, window_bounds = array<i64: 1, 32, 20>}]} {
    %cst = arith.constant 0.000000e+00 : f32
    %0 = vector.broadcast %cst : f32 to vector<32x1xf32>
    %cst_0 = arith.constant 0.000000e+00 : f32
    %1 = vector.broadcast %cst_0 : f32 to vector<32x20xf32>
    %c0 = arith.constant 0 : index
    %c0_1 = arith.constant 0 : index
    %c0_2 = arith.constant 0 : index
    %2 = vector.load %arg1[%c0, %c0_1, %c0_2] : memref<1x16x128xbf16, #tpu.memory_space<vmem>>, vector<1x16x20xbf16>
    %3 = vector.shape_cast %2 : vector<1x16x20xbf16> to vector<16x20xbf16>
    %c0_3 = arith.constant 0 : index
    %c0_4 = arith.constant 0 : index
    %c0_5 = arith.constant 0 : index
    %4 = vector.load %arg2[%c0_3, %c0_4, %c0_5] : memref<9x32x16xbf16, #tpu.memory_space<vmem>>, vector<1x32x16xbf16>
    %5 = vector.shape_cast %4 : vector<1x32x16xbf16> to vector<32x16xbf16>
    %cst_6 = arith.constant dense<0.000000e+00> : vector<32x20xf32>
    %6 = tpu.matmul %5, %3, %cst_6 {dimension_numbers = #tpu.dot_dimension_numbers<[1], [0], [0], [1], [0, 0, 1, 1], [], []>} : vector<32x16xbf16>, vector<16x20xbf16>, vector<32x20xf32> -> vector<32x20xf32>
    %7 = arith.addf %1, %6 : vector<32x20xf32>
    %c0_7 = arith.constant 0 : index
    %c0_8 = arith.constant 0 : index
    %c25 = arith.constant 25 : index
    %8 = vector.load %arg1[%c0_7, %c0_8, %c25] : memref<1x16x128xbf16, #tpu.memory_space<vmem>>, vector<1x16x20xbf16>
    %9 = vector.shape_cast %8 : vector<1x16x20xbf16> to vector<16x20xbf16>
    %c1 = arith.constant 1 : index
    %c0_9 = arith.constant 0 : index
    %c0_10 = arith.constant 0 : index
    %10 = vector.load %arg2[%c1, %c0_9, %c0_10] : memref<9x32x16xbf16, #tpu.memory_space<vmem>>, vector<1x32x16xbf16>
    %11 = vector.shape_cast %10 : vector<1x32x16xbf16> to vector<32x16xbf16>
    %cst_11 = arith.constant dense<0.000000e+00> : vector<32x20xf32>
    %12 = tpu.matmul %11, %9, %cst_11 {dimension_numbers = #tpu.dot_dimension_numbers<[1], [0], [0], [1], [0, 0, 1, 1], [], []>} : vector<32x16xbf16>, vector<16x20xbf16>, vector<32x20xf32> -> vector<32x20xf32>
    %13 = arith.addf %7, %12 : vector<32x20xf32>
    %c0_12 = arith.constant 0 : index
    %c0_13 = arith.constant 0 : index
    %c1_14 = arith.constant 1 : index
    %14 = vector.load %arg1[%c0_12, %c0_13, %c1_14] : memref<1x16x128xbf16, #tpu.memory_space<vmem>>, vector<1x16x20xbf16>
    %15 = vector.shape_cast %14 : vector<1x16x20xbf16> to vector<16x20xbf16>
    %c2 = arith.constant 2 : index
    %c0_15 = arith.constant 0 : index
    %c0_16 = arith.constant 0 : index
    %16 = vector.load %arg2[%c2, %c0_15, %c0_16] : memref<9x32x16xbf16, #tpu.memory_space<vmem>>, vector<1x32x16xbf16>
    %17 = vector.shape_cast %16 : vector<1x32x16xbf16> to vector<32x16xbf16>
    %cst_17 = arith.constant dense<0.000000e+00> : vector<32x20xf32>
    %18 = tpu.matmul %17, %15, %cst_17 {dimension_numbers = #tpu.dot_dimension_numbers<[1], [0], [0], [1], [0, 0, 1, 1], [], []>} : vector<32x16xbf16>, vector<16x20xbf16>, vector<32x20xf32> -> vector<32x20xf32>
    %19 = arith.addf %13, %18 : vector<32x20xf32>
    %c0_18 = arith.constant 0 : index
    %c0_19 = arith.constant 0 : index
    %c50 = arith.constant 50 : index
    %20 = vector.load %arg1[%c0_18, %c0_19, %c50] : memref<1x16x128xbf16, #tpu.memory_space<vmem>>, vector<1x16x20xbf16>
    %21 = vector.shape_cast %20 : vector<1x16x20xbf16> to vector<16x20xbf16>
    %c3 = arith.constant 3 : index
    %c0_20 = arith.constant 0 : index
    %c0_21 = arith.constant 0 : index
    %22 = vector.load %arg2[%c3, %c0_20, %c0_21] : memref<9x32x16xbf16, #tpu.memory_space<vmem>>, vector<1x32x16xbf16>
    %23 = vector.shape_cast %22 : vector<1x32x16xbf16> to vector<32x16xbf16>
    %cst_22 = arith.constant dense<0.000000e+00> : vector<32x20xf32>
    %24 = tpu.matmul %23, %21, %cst_22 {dimension_numbers = #tpu.dot_dimension_numbers<[1], [0], [0], [1], [0, 0, 1, 1], [], []>} : vector<32x16xbf16>, vector<16x20xbf16>, vector<32x20xf32> -> vector<32x20xf32>
    %25 = arith.addf %19, %24 : vector<32x20xf32>
    %c0_23 = arith.constant 0 : index
    %c0_24 = arith.constant 0 : index
    %c75 = arith.constant 75 : index
    %26 = vector.load %arg1[%c0_23, %c0_24, %c75] : memref<1x16x128xbf16, #tpu.memory_space<vmem>>, vector<1x16x20xbf16>
    %27 = vector.shape_cast %26 : vector<1x16x20xbf16> to vector<16x20xbf16>
    %c4 = arith.constant 4 : index
    %c0_25 = arith.constant 0 : index
    %c0_26 = arith.constant 0 : index
    %28 = vector.load %arg2[%c4, %c0_25, %c0_26] : memref<9x32x16xbf16, #tpu.memory_space<vmem>>, vector<1x32x16xbf16>
    %29 = vector.shape_cast %28 : vector<1x32x16xbf16> to vector<32x16xbf16>
    %cst_27 = arith.constant dense<0.000000e+00> : vector<32x20xf32>
    %30 = tpu.matmul %29, %27, %cst_27 {dimension_numbers = #tpu.dot_dimension_numbers<[1], [0], [0], [1], [0, 0, 1, 1], [], []>} : vector<32x16xbf16>, vector<16x20xbf16>, vector<32x20xf32> -> vector<32x20xf32>
    %31 = arith.addf %25, %30 : vector<32x20xf32>
    %c0_28 = arith.constant 0 : index
    %c0_29 = arith.constant 0 : index
    %c51 = arith.constant 51 : index
    %32 = vector.load %arg1[%c0_28, %c0_29, %c51] : memref<1x16x128xbf16, #tpu.memory_space<vmem>>, vector<1x16x20xbf16>
    %33 = vector.shape_cast %32 : vector<1x16x20xbf16> to vector<16x20xbf16>
    %c5 = arith.constant 5 : index
    %c0_30 = arith.constant 0 : index
    %c0_31 = arith.constant 0 : index
    %34 = vector.load %arg2[%c5, %c0_30, %c0_31] : memref<9x32x16xbf16, #tpu.memory_space<vmem>>, vector<1x32x16xbf16>
    %35 = vector.shape_cast %34 : vector<1x32x16xbf16> to vector<32x16xbf16>
    %cst_32 = arith.constant dense<0.000000e+00> : vector<32x20xf32>
    %36 = tpu.matmul %35, %33, %cst_32 {dimension_numbers = #tpu.dot_dimension_numbers<[1], [0], [0], [1], [0, 0, 1, 1], [], []>} : vector<32x16xbf16>, vector<16x20xbf16>, vector<32x20xf32> -> vector<32x20xf32>
    %37 = arith.addf %31, %36 : vector<32x20xf32>
    %c0_33 = arith.constant 0 : index
    %c0_34 = arith.constant 0 : index
    %c5_35 = arith.constant 5 : index
    %38 = vector.load %arg1[%c0_33, %c0_34, %c5_35] : memref<1x16x128xbf16, #tpu.memory_space<vmem>>, vector<1x16x20xbf16>
    %39 = vector.shape_cast %38 : vector<1x16x20xbf16> to vector<16x20xbf16>
    %c6 = arith.constant 6 : index
    %c0_36 = arith.constant 0 : index
    %c0_37 = arith.constant 0 : index
    %40 = vector.load %arg2[%c6, %c0_36, %c0_37] : memref<9x32x16xbf16, #tpu.memory_space<vmem>>, vector<1x32x16xbf16>
    %41 = vector.shape_cast %40 : vector<1x32x16xbf16> to vector<32x16xbf16>
    %cst_38 = arith.constant dense<0.000000e+00> : vector<32x20xf32>
    %42 = tpu.matmul %41, %39, %cst_38 {dimension_numbers = #tpu.dot_dimension_numbers<[1], [0], [0], [1], [0, 0, 1, 1], [], []>} : vector<32x16xbf16>, vector<16x20xbf16>, vector<32x20xf32> -> vector<32x20xf32>
    %43 = arith.addf %37, %42 : vector<32x20xf32>
    %c0_39 = arith.constant 0 : index
    %c0_40 = arith.constant 0 : index
    %c30 = arith.constant 30 : index
    %44 = vector.load %arg1[%c0_39, %c0_40, %c30] : memref<1x16x128xbf16, #tpu.memory_space<vmem>>, vector<1x16x20xbf16>
    %45 = vector.shape_cast %44 : vector<1x16x20xbf16> to vector<16x20xbf16>
    %c7 = arith.constant 7 : index
    %c0_41 = arith.constant 0 : index
    %c0_42 = arith.constant 0 : index
    %46 = vector.load %arg2[%c7, %c0_41, %c0_42] : memref<9x32x16xbf16, #tpu.memory_space<vmem>>, vector<1x32x16xbf16>
    %47 = vector.shape_cast %46 : vector<1x32x16xbf16> to vector<32x16xbf16>
    %cst_43 = arith.constant dense<0.000000e+00> : vector<32x20xf32>
    %48 = tpu.matmul %47, %45, %cst_43 {dimension_numbers = #tpu.dot_dimension_numbers<[1], [0], [0], [1], [0, 0, 1, 1], [], []>} : vector<32x16xbf16>, vector<16x20xbf16>, vector<32x20xf32> -> vector<32x20xf32>
    %49 = arith.addf %43, %48 : vector<32x20xf32>
    %c0_44 = arith.constant 0 : index
    %c0_45 = arith.constant 0 : index
    %c6_46 = arith.constant 6 : index
    %50 = vector.load %arg1[%c0_44, %c0_45, %c6_46] : memref<1x16x128xbf16, #tpu.memory_space<vmem>>, vector<1x16x20xbf16>
    %51 = vector.shape_cast %50 : vector<1x16x20xbf16> to vector<16x20xbf16>
    %c8 = arith.constant 8 : index
    %c0_47 = arith.constant 0 : index
    %c0_48 = arith.constant 0 : index
    %52 = vector.load %arg2[%c8, %c0_47, %c0_48] : memref<9x32x16xbf16, #tpu.memory_space<vmem>>, vector<1x32x16xbf16>
    %53 = vector.shape_cast %52 : vector<1x32x16xbf16> to vector<32x16xbf16>
    %cst_49 = arith.constant dense<0.000000e+00> : vector<32x20xf32>
    %54 = tpu.matmul %53, %51, %cst_49 {dimension_numbers = #tpu.dot_dimension_numbers<[1], [0], [0], [1], [0, 0, 1, 1], [], []>} : vector<32x16xbf16>, vector<16x20xbf16>, vector<32x20xf32> -> vector<32x20xf32>
    %55 = arith.addf %49, %54 : vector<32x20xf32>
    %c0_50 = arith.constant 0 : index
    %c0_51 = arith.constant 0 : index
    %56 = vector.load %arg7[%c0_50, %c0_51] : memref<32x20xf32, #tpu.memory_space<vmem>>, vector<32x20xf32>
    tpu.vector_store %arg7[%c0_50, %c0_51], %55 {strides = array<i32>} : memref<32x20xf32, #tpu.memory_space<vmem>>, vector<32x20xf32>,
    %c0_52 = arith.constant 0 : index
    %c0_53 = arith.constant 0 : index
    %57 = vector.load %arg3[%c0_52, %c0_53] : memref<1x20xf32, #tpu.memory_space<vmem>>, vector<1x20xf32>
    %58 = vector.broadcast %57 : vector<1x20xf32> to vector<32x20xf32>
    %59 = arith.mulf %55, %58 : vector<32x20xf32>
    %cst_54 = arith.constant dense<0.000000e+00> : vector<32xf32>
    %60 = vector.multi_reduction <add>, %59, %cst_54 [1] : vector<32x20xf32> to vector<32xf32>
    %61 = vector.shape_cast %60 : vector<32xf32> to vector<32x1xf32>
    %62 = arith.addf %0, %61 : vector<32x1xf32>
    %cst_55 = arith.constant 6.250000e-02 : f32
    %63 = vector.broadcast %cst_55 : f32 to vector<32x1xf32>
    %64 = arith.mulf %62, %63 : vector<32x1xf32>
    %cst_56 = arith.constant 0.000000e+00 : f32
    %65 = vector.broadcast %cst_56 : f32 to vector<32x1xf32>
    %c0_57 = arith.constant 0 : index
    %c0_58 = arith.constant 0 : index
    %66 = vector.load %arg7[%c0_57, %c0_58] : memref<32x20xf32, #tpu.memory_space<vmem>>, vector<32x20xf32>
    %67 = vector.broadcast %64 : vector<32x1xf32> to vector<32x20xf32>
    %68 = arith.subf %66, %67 : vector<32x20xf32>
    %c0_59 = arith.constant 0 : index
    %c0_60 = arith.constant 0 : index
    %69 = vector.load %arg3[%c0_59, %c0_60] : memref<1x20xf32, #tpu.memory_space<vmem>>, vector<1x20xf32>
    %70 = vector.broadcast %69 : vector<1x20xf32> to vector<32x20xf32>
    %71 = arith.mulf %68, %70 : vector<32x20xf32>
    %72 = arith.mulf %71, %71 : vector<32x20xf32>
    %cst_61 = arith.constant dense<0.000000e+00> : vector<32xf32>
    %73 = vector.multi_reduction <add>, %72, %cst_61 [1] : vector<32x20xf32> to vector<32xf32>
    %74 = vector.shape_cast %73 : vector<32xf32> to vector<32x1xf32>
    %75 = arith.addf %65, %74 : vector<32x1xf32>
    %cst_62 = arith.constant 6.250000e-02 : f32
    %76 = vector.broadcast %cst_62 : f32 to vector<32x1xf32>
    %77 = arith.mulf %75, %76 : vector<32x1xf32>
    %cst_63 = arith.constant 9.99999974E-6 : f32
    %78 = vector.broadcast %cst_63 : f32 to vector<32x1xf32>
    %79 = arith.addf %77, %78 : vector<32x1xf32>
    %80 = math.rsqrt %79 : vector<32x1xf32>
    %c0_64 = arith.constant 0 : index
    %c0_65 = arith.constant 0 : index
    %81 = vector.load %arg4[%c0_64, %c0_65] : memref<32x1xf32, #tpu.memory_space<vmem>>, vector<32x1xf32>
    %82 = arith.mulf %81, %80 : vector<32x1xf32>
    %c0_66 = arith.constant 0 : index
    %c0_67 = arith.constant 0 : index
    %83 = vector.load %arg5[%c0_66, %c0_67] : memref<32x1xf32, #tpu.memory_space<vmem>>, vector<32x1xf32>
    %84 = arith.mulf %64, %82 : vector<32x1xf32>
    %85 = arith.subf %83, %84 : vector<32x1xf32>
    %c0_68 = arith.constant 0 : index
    %c0_69 = arith.constant 0 : index
    %86 = vector.load %arg7[%c0_68, %c0_69] : memref<32x20xf32, #tpu.memory_space<vmem>>, vector<32x20xf32>
    %87 = vector.broadcast %82 : vector<32x1xf32> to vector<32x20xf32>
    %88 = arith.mulf %86, %87 : vector<32x20xf32>
    %89 = vector.broadcast %85 : vector<32x1xf32> to vector<32x20xf32>
    %90 = arith.addf %88, %89 : vector<32x20xf32>
    %cst_70 = arith.constant 0.000000e+00 : f32
    %91 = vector.broadcast %cst_70 : f32 to vector<32x20xf32>
    %92 = arith.maximumf %90, %91 : vector<32x20xf32>
    %93 = arith.truncf %92 : vector<32x20xf32> to vector<32x20xbf16>
    %c0_71 = arith.constant 0 : index
    %c0_72 = arith.constant 0 : index
    %c0_73 = arith.constant 0 : index
    %94 = vector.load %arg6[%c0_71, %c0_72, %c0_73] : memref<1x32x20xbf16, #tpu.memory_space<vmem>>, vector<1x32x20xbf16>
    %95 = vector.shape_cast %94 : vector<1x32x20xbf16> to vector<32x20xbf16>
    %96 = vector.shape_cast %93 : vector<32x20xbf16> to vector<1x32x20xbf16>
    tpu.vector_store %arg6[%c0_71, %c0_72, %c0_73], %96 {strides = array<i32>} : memref<1x32x20xbf16, #tpu.memory_space<vmem>>, vector<1x32x20xbf16>,
    return
  }
  func.func @transform_0(%arg0: i32) -> (i32, i32, i32) {
    %c0_i32 = arith.constant 0 : i32
    %c0_i32_0 = arith.constant 0 : i32
    %c0_i32_1 = arith.constant 0 : i32
    return %arg0, %c0_i32, %c0_i32_0 : i32, i32, i32
  }
  func.func @transform_1(%arg0: i32) -> (i32, i32, i32) {
    %c0_i32 = arith.constant 0 : i32
    %c0_i32_0 = arith.constant 0 : i32
    %c0_i32_1 = arith.constant 0 : i32
    %c0_i32_2 = arith.constant 0 : i32
    return %c0_i32, %c0_i32_0, %c0_i32_1 : i32, i32, i32
  }
  func.func @transform_2(%arg0: i32) -> (i32, i32) {
    %c0_i32 = arith.constant 0 : i32
    %c0_i32_0 = arith.constant 0 : i32
    %c0_i32_1 = arith.constant 0 : i32
    return %c0_i32, %c0_i32_0 : i32, i32
  }
  func.func @transform_3(%arg0: i32) -> (i32, i32) {
    %c0_i32 = arith.constant 0 : i32
    %c0_i32_0 = arith.constant 0 : i32
    %c0_i32_1 = arith.constant 0 : i32
    return %c0_i32, %c0_i32_0 : i32, i32
  }
  func.func @transform_4(%arg0: i32) -> (i32, i32) {
    %c0_i32 = arith.constant 0 : i32
    %c0_i32_0 = arith.constant 0 : i32
    %c0_i32_1 = arith.constant 0 : i32
    return %c0_i32, %c0_i32_0 : i32, i32
  }
  func.func @transform_5(%arg0: i32) -> (i32, i32, i32) {
    %c0_i32 = arith.constant 0 : i32
    %c0_i32_0 = arith.constant 0 : i32
    %c0_i32_1 = arith.constant 0 : i32
    return %arg0, %c0_i32, %c0_i32_0 : i32, i32, i32
  }
}

module attributes {stable_mosaic.version = 11 : i64} {
  func.func @conv_in_act_kernel(%arg0: i32, %arg1: memref<1x32x128xbf16, #tpu.memory_space<vmem>>, %arg2: memref<9x16x32xbf16, #tpu.memory_space<vmem>>, %arg3: memref<1x80xf32, #tpu.memory_space<vmem>>, %arg4: memref<16x1xf32, #tpu.memory_space<vmem>>, %arg5: memref<16x1xf32, #tpu.memory_space<vmem>>, %arg6: memref<1x16x80xbf16, #tpu.memory_space<vmem>>, %arg7: memref<16x80xf32, #tpu.memory_space<vmem>>) attributes {dimension_semantics = [#tpu.dimension_semantics<parallel>], iteration_bounds = array<i64: 2>, scalar_prefetch = 0 : i64, scratch_operands = 1 : i64, tpu.core_type = #tpu.core_type<tc>, window_params = [{transform_indices = @transform_0, window_bounds = array<i64: 1, 32, 128>}, {pipeline_mode = #tpu.pipeline_mode<synchronous>, transform_indices = @transform_1, window_bounds = array<i64: 9, 16, 32>}, {pipeline_mode = #tpu.pipeline_mode<synchronous>, transform_indices = @transform_2, window_bounds = array<i64: 1, 80>}, {pipeline_mode = #tpu.pipeline_mode<synchronous>, transform_indices = @transform_3, window_bounds = array<i64: 16, 1>}, {pipeline_mode = #tpu.pipeline_mode<synchronous>, transform_indices = @transform_4, window_bounds = array<i64: 16, 1>}, {transform_indices = @transform_5, window_bounds = array<i64: 1, 16, 80>}]} {
    %cst = arith.constant 0.000000e+00 : f32
    %0 = vector.broadcast %cst : f32 to vector<16x1xf32>
    %cst_0 = arith.constant 0.000000e+00 : f32
    %1 = vector.broadcast %cst_0 : f32 to vector<16x80xf32>
    %c0 = arith.constant 0 : index
    %c0_1 = arith.constant 0 : index
    %c0_2 = arith.constant 0 : index
    %2 = vector.load %arg1[%c0, %c0_1, %c0_2] : memref<1x32x128xbf16, #tpu.memory_space<vmem>>, vector<1x32x80xbf16>
    %3 = vector.shape_cast %2 : vector<1x32x80xbf16> to vector<32x80xbf16>
    %c0_3 = arith.constant 0 : index
    %c0_4 = arith.constant 0 : index
    %c0_5 = arith.constant 0 : index
    %4 = vector.load %arg2[%c0_3, %c0_4, %c0_5] : memref<9x16x32xbf16, #tpu.memory_space<vmem>>, vector<1x16x32xbf16>
    %5 = vector.shape_cast %4 : vector<1x16x32xbf16> to vector<16x32xbf16>
    %cst_6 = arith.constant dense<0.000000e+00> : vector<16x80xf32>
    %6 = tpu.matmul %5, %3, %cst_6 {dimension_numbers = #tpu.dot_dimension_numbers<[1], [0], [0], [1], [0, 0, 1, 1], [], []>} : vector<16x32xbf16>, vector<32x80xbf16>, vector<16x80xf32> -> vector<16x80xf32>
    %7 = arith.addf %1, %6 : vector<16x80xf32>
    %c0_7 = arith.constant 0 : index
    %c0_8 = arith.constant 0 : index
    %c1 = arith.constant 1 : index
    %8 = vector.load %arg1[%c0_7, %c0_8, %c1] : memref<1x32x128xbf16, #tpu.memory_space<vmem>>, vector<1x32x80xbf16>
    %9 = vector.shape_cast %8 : vector<1x32x80xbf16> to vector<32x80xbf16>
    %c1_9 = arith.constant 1 : index
    %c0_10 = arith.constant 0 : index
    %c0_11 = arith.constant 0 : index
    %10 = vector.load %arg2[%c1_9, %c0_10, %c0_11] : memref<9x16x32xbf16, #tpu.memory_space<vmem>>, vector<1x16x32xbf16>
    %11 = vector.shape_cast %10 : vector<1x16x32xbf16> to vector<16x32xbf16>
    %cst_12 = arith.constant dense<0.000000e+00> : vector<16x80xf32>
    %12 = tpu.matmul %11, %9, %cst_12 {dimension_numbers = #tpu.dot_dimension_numbers<[1], [0], [0], [1], [0, 0, 1, 1], [], []>} : vector<16x32xbf16>, vector<32x80xbf16>, vector<16x80xf32> -> vector<16x80xf32>
    %13 = arith.addf %7, %12 : vector<16x80xf32>
    %c0_13 = arith.constant 0 : index
    %c0_14 = arith.constant 0 : index
    %c2 = arith.constant 2 : index
    %14 = vector.load %arg1[%c0_13, %c0_14, %c2] : memref<1x32x128xbf16, #tpu.memory_space<vmem>>, vector<1x32x80xbf16>
    %15 = vector.shape_cast %14 : vector<1x32x80xbf16> to vector<32x80xbf16>
    %c2_15 = arith.constant 2 : index
    %c0_16 = arith.constant 0 : index
    %c0_17 = arith.constant 0 : index
    %16 = vector.load %arg2[%c2_15, %c0_16, %c0_17] : memref<9x16x32xbf16, #tpu.memory_space<vmem>>, vector<1x16x32xbf16>
    %17 = vector.shape_cast %16 : vector<1x16x32xbf16> to vector<16x32xbf16>
    %cst_18 = arith.constant dense<0.000000e+00> : vector<16x80xf32>
    %18 = tpu.matmul %17, %15, %cst_18 {dimension_numbers = #tpu.dot_dimension_numbers<[1], [0], [0], [1], [0, 0, 1, 1], [], []>} : vector<16x32xbf16>, vector<32x80xbf16>, vector<16x80xf32> -> vector<16x80xf32>
    %19 = arith.addf %13, %18 : vector<16x80xf32>
    %c0_19 = arith.constant 0 : index
    %c0_20 = arith.constant 0 : index
    %c10 = arith.constant 10 : index
    %20 = vector.load %arg1[%c0_19, %c0_20, %c10] : memref<1x32x128xbf16, #tpu.memory_space<vmem>>, vector<1x32x80xbf16>
    %21 = vector.shape_cast %20 : vector<1x32x80xbf16> to vector<32x80xbf16>
    %c3 = arith.constant 3 : index
    %c0_21 = arith.constant 0 : index
    %c0_22 = arith.constant 0 : index
    %22 = vector.load %arg2[%c3, %c0_21, %c0_22] : memref<9x16x32xbf16, #tpu.memory_space<vmem>>, vector<1x16x32xbf16>
    %23 = vector.shape_cast %22 : vector<1x16x32xbf16> to vector<16x32xbf16>
    %cst_23 = arith.constant dense<0.000000e+00> : vector<16x80xf32>
    %24 = tpu.matmul %23, %21, %cst_23 {dimension_numbers = #tpu.dot_dimension_numbers<[1], [0], [0], [1], [0, 0, 1, 1], [], []>} : vector<16x32xbf16>, vector<32x80xbf16>, vector<16x80xf32> -> vector<16x80xf32>
    %25 = arith.addf %19, %24 : vector<16x80xf32>
    %c0_24 = arith.constant 0 : index
    %c0_25 = arith.constant 0 : index
    %c11 = arith.constant 11 : index
    %26 = vector.load %arg1[%c0_24, %c0_25, %c11] : memref<1x32x128xbf16, #tpu.memory_space<vmem>>, vector<1x32x80xbf16>
    %27 = vector.shape_cast %26 : vector<1x32x80xbf16> to vector<32x80xbf16>
    %c4 = arith.constant 4 : index
    %c0_26 = arith.constant 0 : index
    %c0_27 = arith.constant 0 : index
    %28 = vector.load %arg2[%c4, %c0_26, %c0_27] : memref<9x16x32xbf16, #tpu.memory_space<vmem>>, vector<1x16x32xbf16>
    %29 = vector.shape_cast %28 : vector<1x16x32xbf16> to vector<16x32xbf16>
    %cst_28 = arith.constant dense<0.000000e+00> : vector<16x80xf32>
    %30 = tpu.matmul %29, %27, %cst_28 {dimension_numbers = #tpu.dot_dimension_numbers<[1], [0], [0], [1], [0, 0, 1, 1], [], []>} : vector<16x32xbf16>, vector<32x80xbf16>, vector<16x80xf32> -> vector<16x80xf32>
    %31 = arith.addf %25, %30 : vector<16x80xf32>
    %c0_29 = arith.constant 0 : index
    %c0_30 = arith.constant 0 : index
    %c12 = arith.constant 12 : index
    %32 = vector.load %arg1[%c0_29, %c0_30, %c12] : memref<1x32x128xbf16, #tpu.memory_space<vmem>>, vector<1x32x80xbf16>
    %33 = vector.shape_cast %32 : vector<1x32x80xbf16> to vector<32x80xbf16>
    %c5 = arith.constant 5 : index
    %c0_31 = arith.constant 0 : index
    %c0_32 = arith.constant 0 : index
    %34 = vector.load %arg2[%c5, %c0_31, %c0_32] : memref<9x16x32xbf16, #tpu.memory_space<vmem>>, vector<1x16x32xbf16>
    %35 = vector.shape_cast %34 : vector<1x16x32xbf16> to vector<16x32xbf16>
    %cst_33 = arith.constant dense<0.000000e+00> : vector<16x80xf32>
    %36 = tpu.matmul %35, %33, %cst_33 {dimension_numbers = #tpu.dot_dimension_numbers<[1], [0], [0], [1], [0, 0, 1, 1], [], []>} : vector<16x32xbf16>, vector<32x80xbf16>, vector<16x80xf32> -> vector<16x80xf32>
    %37 = arith.addf %31, %36 : vector<16x80xf32>
    %c0_34 = arith.constant 0 : index
    %c0_35 = arith.constant 0 : index
    %c20 = arith.constant 20 : index
    %38 = vector.load %arg1[%c0_34, %c0_35, %c20] : memref<1x32x128xbf16, #tpu.memory_space<vmem>>, vector<1x32x80xbf16>
    %39 = vector.shape_cast %38 : vector<1x32x80xbf16> to vector<32x80xbf16>
    %c6 = arith.constant 6 : index
    %c0_36 = arith.constant 0 : index
    %c0_37 = arith.constant 0 : index
    %40 = vector.load %arg2[%c6, %c0_36, %c0_37] : memref<9x16x32xbf16, #tpu.memory_space<vmem>>, vector<1x16x32xbf16>
    %41 = vector.shape_cast %40 : vector<1x16x32xbf16> to vector<16x32xbf16>
    %cst_38 = arith.constant dense<0.000000e+00> : vector<16x80xf32>
    %42 = tpu.matmul %41, %39, %cst_38 {dimension_numbers = #tpu.dot_dimension_numbers<[1], [0], [0], [1], [0, 0, 1, 1], [], []>} : vector<16x32xbf16>, vector<32x80xbf16>, vector<16x80xf32> -> vector<16x80xf32>
    %43 = arith.addf %37, %42 : vector<16x80xf32>
    %c0_39 = arith.constant 0 : index
    %c0_40 = arith.constant 0 : index
    %c21 = arith.constant 21 : index
    %44 = vector.load %arg1[%c0_39, %c0_40, %c21] : memref<1x32x128xbf16, #tpu.memory_space<vmem>>, vector<1x32x80xbf16>
    %45 = vector.shape_cast %44 : vector<1x32x80xbf16> to vector<32x80xbf16>
    %c7 = arith.constant 7 : index
    %c0_41 = arith.constant 0 : index
    %c0_42 = arith.constant 0 : index
    %46 = vector.load %arg2[%c7, %c0_41, %c0_42] : memref<9x16x32xbf16, #tpu.memory_space<vmem>>, vector<1x16x32xbf16>
    %47 = vector.shape_cast %46 : vector<1x16x32xbf16> to vector<16x32xbf16>
    %cst_43 = arith.constant dense<0.000000e+00> : vector<16x80xf32>
    %48 = tpu.matmul %47, %45, %cst_43 {dimension_numbers = #tpu.dot_dimension_numbers<[1], [0], [0], [1], [0, 0, 1, 1], [], []>} : vector<16x32xbf16>, vector<32x80xbf16>, vector<16x80xf32> -> vector<16x80xf32>
    %49 = arith.addf %43, %48 : vector<16x80xf32>
    %c0_44 = arith.constant 0 : index
    %c0_45 = arith.constant 0 : index
    %c22 = arith.constant 22 : index
    %50 = vector.load %arg1[%c0_44, %c0_45, %c22] : memref<1x32x128xbf16, #tpu.memory_space<vmem>>, vector<1x32x80xbf16>
    %51 = vector.shape_cast %50 : vector<1x32x80xbf16> to vector<32x80xbf16>
    %c8 = arith.constant 8 : index
    %c0_46 = arith.constant 0 : index
    %c0_47 = arith.constant 0 : index
    %52 = vector.load %arg2[%c8, %c0_46, %c0_47] : memref<9x16x32xbf16, #tpu.memory_space<vmem>>, vector<1x16x32xbf16>
    %53 = vector.shape_cast %52 : vector<1x16x32xbf16> to vector<16x32xbf16>
    %cst_48 = arith.constant dense<0.000000e+00> : vector<16x80xf32>
    %54 = tpu.matmul %53, %51, %cst_48 {dimension_numbers = #tpu.dot_dimension_numbers<[1], [0], [0], [1], [0, 0, 1, 1], [], []>} : vector<16x32xbf16>, vector<32x80xbf16>, vector<16x80xf32> -> vector<16x80xf32>
    %55 = arith.addf %49, %54 : vector<16x80xf32>
    %c0_49 = arith.constant 0 : index
    %c0_50 = arith.constant 0 : index
    %56 = vector.load %arg7[%c0_49, %c0_50] : memref<16x80xf32, #tpu.memory_space<vmem>>, vector<16x80xf32>
    tpu.vector_store %arg7[%c0_49, %c0_50], %55 {strides = array<i32>} : memref<16x80xf32, #tpu.memory_space<vmem>>, vector<16x80xf32>,
    %c0_51 = arith.constant 0 : index
    %c0_52 = arith.constant 0 : index
    %57 = vector.load %arg3[%c0_51, %c0_52] : memref<1x80xf32, #tpu.memory_space<vmem>>, vector<1x80xf32>
    %58 = vector.broadcast %57 : vector<1x80xf32> to vector<16x80xf32>
    %59 = arith.mulf %55, %58 : vector<16x80xf32>
    %cst_53 = arith.constant dense<0.000000e+00> : vector<16xf32>
    %60 = vector.multi_reduction <add>, %59, %cst_53 [1] : vector<16x80xf32> to vector<16xf32>
    %61 = vector.shape_cast %60 : vector<16xf32> to vector<16x1xf32>
    %62 = arith.addf %0, %61 : vector<16x1xf32>
    %cst_54 = arith.constant 1.562500e-02 : f32
    %63 = vector.broadcast %cst_54 : f32 to vector<16x1xf32>
    %64 = arith.mulf %62, %63 : vector<16x1xf32>
    %cst_55 = arith.constant 0.000000e+00 : f32
    %65 = vector.broadcast %cst_55 : f32 to vector<16x1xf32>
    %c0_56 = arith.constant 0 : index
    %c0_57 = arith.constant 0 : index
    %66 = vector.load %arg7[%c0_56, %c0_57] : memref<16x80xf32, #tpu.memory_space<vmem>>, vector<16x80xf32>
    %67 = vector.broadcast %64 : vector<16x1xf32> to vector<16x80xf32>
    %68 = arith.subf %66, %67 : vector<16x80xf32>
    %c0_58 = arith.constant 0 : index
    %c0_59 = arith.constant 0 : index
    %69 = vector.load %arg3[%c0_58, %c0_59] : memref<1x80xf32, #tpu.memory_space<vmem>>, vector<1x80xf32>
    %70 = vector.broadcast %69 : vector<1x80xf32> to vector<16x80xf32>
    %71 = arith.mulf %68, %70 : vector<16x80xf32>
    %72 = arith.mulf %71, %71 : vector<16x80xf32>
    %cst_60 = arith.constant dense<0.000000e+00> : vector<16xf32>
    %73 = vector.multi_reduction <add>, %72, %cst_60 [1] : vector<16x80xf32> to vector<16xf32>
    %74 = vector.shape_cast %73 : vector<16xf32> to vector<16x1xf32>
    %75 = arith.addf %65, %74 : vector<16x1xf32>
    %cst_61 = arith.constant 1.562500e-02 : f32
    %76 = vector.broadcast %cst_61 : f32 to vector<16x1xf32>
    %77 = arith.mulf %75, %76 : vector<16x1xf32>
    %cst_62 = arith.constant 9.99999974E-6 : f32
    %78 = vector.broadcast %cst_62 : f32 to vector<16x1xf32>
    %79 = arith.addf %77, %78 : vector<16x1xf32>
    %80 = math.rsqrt %79 : vector<16x1xf32>
    %c0_63 = arith.constant 0 : index
    %c0_64 = arith.constant 0 : index
    %81 = vector.load %arg4[%c0_63, %c0_64] : memref<16x1xf32, #tpu.memory_space<vmem>>, vector<16x1xf32>
    %82 = arith.mulf %81, %80 : vector<16x1xf32>
    %c0_65 = arith.constant 0 : index
    %c0_66 = arith.constant 0 : index
    %83 = vector.load %arg5[%c0_65, %c0_66] : memref<16x1xf32, #tpu.memory_space<vmem>>, vector<16x1xf32>
    %84 = arith.mulf %64, %82 : vector<16x1xf32>
    %85 = arith.subf %83, %84 : vector<16x1xf32>
    %c0_67 = arith.constant 0 : index
    %c0_68 = arith.constant 0 : index
    %86 = vector.load %arg7[%c0_67, %c0_68] : memref<16x80xf32, #tpu.memory_space<vmem>>, vector<16x80xf32>
    %87 = vector.broadcast %82 : vector<16x1xf32> to vector<16x80xf32>
    %88 = arith.mulf %86, %87 : vector<16x80xf32>
    %89 = vector.broadcast %85 : vector<16x1xf32> to vector<16x80xf32>
    %90 = arith.addf %88, %89 : vector<16x80xf32>
    %cst_69 = arith.constant 0.000000e+00 : f32
    %91 = vector.broadcast %cst_69 : f32 to vector<16x80xf32>
    %92 = arith.maximumf %90, %91 : vector<16x80xf32>
    %93 = arith.truncf %92 : vector<16x80xf32> to vector<16x80xbf16>
    %c0_70 = arith.constant 0 : index
    %c0_71 = arith.constant 0 : index
    %c0_72 = arith.constant 0 : index
    %94 = vector.load %arg6[%c0_70, %c0_71, %c0_72] : memref<1x16x80xbf16, #tpu.memory_space<vmem>>, vector<1x16x80xbf16>
    %95 = vector.shape_cast %94 : vector<1x16x80xbf16> to vector<16x80xbf16>
    %96 = vector.shape_cast %93 : vector<16x80xbf16> to vector<1x16x80xbf16>
    tpu.vector_store %arg6[%c0_70, %c0_71, %c0_72], %96 {strides = array<i32>} : memref<1x16x80xbf16, #tpu.memory_space<vmem>>, vector<1x16x80xbf16>,
    return
  }
  func.func @transform_0(%arg0: i32) -> (i32, i32, i32) {
    %c0_i32 = arith.constant 0 : i32
    %c0_i32_0 = arith.constant 0 : i32
    %c0_i32_1 = arith.constant 0 : i32
    return %arg0, %c0_i32, %c0_i32_0 : i32, i32, i32
  }
  func.func @transform_1(%arg0: i32) -> (i32, i32, i32) {
    %c0_i32 = arith.constant 0 : i32
    %c0_i32_0 = arith.constant 0 : i32
    %c0_i32_1 = arith.constant 0 : i32
    %c0_i32_2 = arith.constant 0 : i32
    return %c0_i32, %c0_i32_0, %c0_i32_1 : i32, i32, i32
  }
  func.func @transform_2(%arg0: i32) -> (i32, i32) {
    %c0_i32 = arith.constant 0 : i32
    %c0_i32_0 = arith.constant 0 : i32
    %c0_i32_1 = arith.constant 0 : i32
    return %c0_i32, %c0_i32_0 : i32, i32
  }
  func.func @transform_3(%arg0: i32) -> (i32, i32) {
    %c0_i32 = arith.constant 0 : i32
    %c0_i32_0 = arith.constant 0 : i32
    %c0_i32_1 = arith.constant 0 : i32
    return %c0_i32, %c0_i32_0 : i32, i32
  }
  func.func @transform_4(%arg0: i32) -> (i32, i32) {
    %c0_i32 = arith.constant 0 : i32
    %c0_i32_0 = arith.constant 0 : i32
    %c0_i32_1 = arith.constant 0 : i32
    return %c0_i32, %c0_i32_0 : i32, i32
  }
  func.func @transform_5(%arg0: i32) -> (i32, i32, i32) {
    %c0_i32 = arith.constant 0 : i32
    %c0_i32_0 = arith.constant 0 : i32
    %c0_i32_1 = arith.constant 0 : i32
    return %arg0, %c0_i32, %c0_i32_0 : i32, i32, i32
  }
}

module attributes {stable_mosaic.version = 11 : i64} {
  func.func @conv_in_act_kernel(%arg0: i32, %arg1: memref<1x16x384xbf16, #tpu.memory_space<vmem>>, %arg2: memref<9x8x16xbf16, #tpu.memory_space<vmem>>, %arg3: memref<1x288xf32, #tpu.memory_space<vmem>>, %arg4: memref<8x1xf32, #tpu.memory_space<vmem>>, %arg5: memref<8x1xf32, #tpu.memory_space<vmem>>, %arg6: memref<1x8x288xbf16, #tpu.memory_space<vmem>>, %arg7: memref<8x288xf32, #tpu.memory_space<vmem>>) attributes {dimension_semantics = [#tpu.dimension_semantics<parallel>], iteration_bounds = array<i64: 2>, scalar_prefetch = 0 : i64, scratch_operands = 1 : i64, tpu.core_type = #tpu.core_type<tc>, window_params = [{transform_indices = @transform_0, window_bounds = array<i64: 1, 16, 384>}, {pipeline_mode = #tpu.pipeline_mode<synchronous>, transform_indices = @transform_1, window_bounds = array<i64: 9, 8, 16>}, {pipeline_mode = #tpu.pipeline_mode<synchronous>, transform_indices = @transform_2, window_bounds = array<i64: 1, 288>}, {pipeline_mode = #tpu.pipeline_mode<synchronous>, transform_indices = @transform_3, window_bounds = array<i64: 8, 1>}, {pipeline_mode = #tpu.pipeline_mode<synchronous>, transform_indices = @transform_4, window_bounds = array<i64: 8, 1>}, {transform_indices = @transform_5, window_bounds = array<i64: 1, 8, 288>}]} {
    %cst = arith.constant 0.000000e+00 : f32
    %0 = vector.broadcast %cst : f32 to vector<8x1xf32>
    %cst_0 = arith.constant 0.000000e+00 : f32
    %1 = vector.broadcast %cst_0 : f32 to vector<8x288xf32>
    %c0 = arith.constant 0 : index
    %c0_1 = arith.constant 0 : index
    %c0_2 = arith.constant 0 : index
    %2 = vector.load %arg1[%c0, %c0_1, %c0_2] : memref<1x16x384xbf16, #tpu.memory_space<vmem>>, vector<1x16x288xbf16>
    %3 = vector.shape_cast %2 : vector<1x16x288xbf16> to vector<16x288xbf16>
    %c0_3 = arith.constant 0 : index
    %c0_4 = arith.constant 0 : index
    %c0_5 = arith.constant 0 : index
    %4 = vector.load %arg2[%c0_3, %c0_4, %c0_5] : memref<9x8x16xbf16, #tpu.memory_space<vmem>>, vector<1x8x16xbf16>
    %5 = vector.shape_cast %4 : vector<1x8x16xbf16> to vector<8x16xbf16>
    %cst_6 = arith.constant dense<0.000000e+00> : vector<8x288xf32>
    %6 = tpu.matmul %5, %3, %cst_6 {dimension_numbers = #tpu.dot_dimension_numbers<[1], [0], [0], [1], [0, 0, 1, 1], [], []>} : vector<8x16xbf16>, vector<16x288xbf16>, vector<8x288xf32> -> vector<8x288xf32>
    %7 = arith.addf %1, %6 : vector<8x288xf32>
    %c0_7 = arith.constant 0 : index
    %c0_8 = arith.constant 0 : index
    %c1 = arith.constant 1 : index
    %8 = vector.load %arg1[%c0_7, %c0_8, %c1] : memref<1x16x384xbf16, #tpu.memory_space<vmem>>, vector<1x16x288xbf16>
    %9 = vector.shape_cast %8 : vector<1x16x288xbf16> to vector<16x288xbf16>
    %c1_9 = arith.constant 1 : index
    %c0_10 = arith.constant 0 : index
    %c0_11 = arith.constant 0 : index
    %10 = vector.load %arg2[%c1_9, %c0_10, %c0_11] : memref<9x8x16xbf16, #tpu.memory_space<vmem>>, vector<1x8x16xbf16>
    %11 = vector.shape_cast %10 : vector<1x8x16xbf16> to vector<8x16xbf16>
    %cst_12 = arith.constant dense<0.000000e+00> : vector<8x288xf32>
    %12 = tpu.matmul %11, %9, %cst_12 {dimension_numbers = #tpu.dot_dimension_numbers<[1], [0], [0], [1], [0, 0, 1, 1], [], []>} : vector<8x16xbf16>, vector<16x288xbf16>, vector<8x288xf32> -> vector<8x288xf32>
    %13 = arith.addf %7, %12 : vector<8x288xf32>
    %c0_13 = arith.constant 0 : index
    %c0_14 = arith.constant 0 : index
    %c2 = arith.constant 2 : index
    %14 = vector.load %arg1[%c0_13, %c0_14, %c2] : memref<1x16x384xbf16, #tpu.memory_space<vmem>>, vector<1x16x288xbf16>
    %15 = vector.shape_cast %14 : vector<1x16x288xbf16> to vector<16x288xbf16>
    %c2_15 = arith.constant 2 : index
    %c0_16 = arith.constant 0 : index
    %c0_17 = arith.constant 0 : index
    %16 = vector.load %arg2[%c2_15, %c0_16, %c0_17] : memref<9x8x16xbf16, #tpu.memory_space<vmem>>, vector<1x8x16xbf16>
    %17 = vector.shape_cast %16 : vector<1x8x16xbf16> to vector<8x16xbf16>
    %cst_18 = arith.constant dense<0.000000e+00> : vector<8x288xf32>
    %18 = tpu.matmul %17, %15, %cst_18 {dimension_numbers = #tpu.dot_dimension_numbers<[1], [0], [0], [1], [0, 0, 1, 1], [], []>} : vector<8x16xbf16>, vector<16x288xbf16>, vector<8x288xf32> -> vector<8x288xf32>
    %19 = arith.addf %13, %18 : vector<8x288xf32>
    %c0_19 = arith.constant 0 : index
    %c0_20 = arith.constant 0 : index
    %c18 = arith.constant 18 : index
    %20 = vector.load %arg1[%c0_19, %c0_20, %c18] : memref<1x16x384xbf16, #tpu.memory_space<vmem>>, vector<1x16x288xbf16>
    %21 = vector.shape_cast %20 : vector<1x16x288xbf16> to vector<16x288xbf16>
    %c3 = arith.constant 3 : index
    %c0_21 = arith.constant 0 : index
    %c0_22 = arith.constant 0 : index
    %22 = vector.load %arg2[%c3, %c0_21, %c0_22] : memref<9x8x16xbf16, #tpu.memory_space<vmem>>, vector<1x8x16xbf16>
    %23 = vector.shape_cast %22 : vector<1x8x16xbf16> to vector<8x16xbf16>
    %cst_23 = arith.constant dense<0.000000e+00> : vector<8x288xf32>
    %24 = tpu.matmul %23, %21, %cst_23 {dimension_numbers = #tpu.dot_dimension_numbers<[1], [0], [0], [1], [0, 0, 1, 1], [], []>} : vector<8x16xbf16>, vector<16x288xbf16>, vector<8x288xf32> -> vector<8x288xf32>
    %25 = arith.addf %19, %24 : vector<8x288xf32>
    %c0_24 = arith.constant 0 : index
    %c0_25 = arith.constant 0 : index
    %c19 = arith.constant 19 : index
    %26 = vector.load %arg1[%c0_24, %c0_25, %c19] : memref<1x16x384xbf16, #tpu.memory_space<vmem>>, vector<1x16x288xbf16>
    %27 = vector.shape_cast %26 : vector<1x16x288xbf16> to vector<16x288xbf16>
    %c4 = arith.constant 4 : index
    %c0_26 = arith.constant 0 : index
    %c0_27 = arith.constant 0 : index
    %28 = vector.load %arg2[%c4, %c0_26, %c0_27] : memref<9x8x16xbf16, #tpu.memory_space<vmem>>, vector<1x8x16xbf16>
    %29 = vector.shape_cast %28 : vector<1x8x16xbf16> to vector<8x16xbf16>
    %cst_28 = arith.constant dense<0.000000e+00> : vector<8x288xf32>
    %30 = tpu.matmul %29, %27, %cst_28 {dimension_numbers = #tpu.dot_dimension_numbers<[1], [0], [0], [1], [0, 0, 1, 1], [], []>} : vector<8x16xbf16>, vector<16x288xbf16>, vector<8x288xf32> -> vector<8x288xf32>
    %31 = arith.addf %25, %30 : vector<8x288xf32>
    %c0_29 = arith.constant 0 : index
    %c0_30 = arith.constant 0 : index
    %c20 = arith.constant 20 : index
    %32 = vector.load %arg1[%c0_29, %c0_30, %c20] : memref<1x16x384xbf16, #tpu.memory_space<vmem>>, vector<1x16x288xbf16>
    %33 = vector.shape_cast %32 : vector<1x16x288xbf16> to vector<16x288xbf16>
    %c5 = arith.constant 5 : index
    %c0_31 = arith.constant 0 : index
    %c0_32 = arith.constant 0 : index
    %34 = vector.load %arg2[%c5, %c0_31, %c0_32] : memref<9x8x16xbf16, #tpu.memory_space<vmem>>, vector<1x8x16xbf16>
    %35 = vector.shape_cast %34 : vector<1x8x16xbf16> to vector<8x16xbf16>
    %cst_33 = arith.constant dense<0.000000e+00> : vector<8x288xf32>
    %36 = tpu.matmul %35, %33, %cst_33 {dimension_numbers = #tpu.dot_dimension_numbers<[1], [0], [0], [1], [0, 0, 1, 1], [], []>} : vector<8x16xbf16>, vector<16x288xbf16>, vector<8x288xf32> -> vector<8x288xf32>
    %37 = arith.addf %31, %36 : vector<8x288xf32>
    %c0_34 = arith.constant 0 : index
    %c0_35 = arith.constant 0 : index
    %c36 = arith.constant 36 : index
    %38 = vector.load %arg1[%c0_34, %c0_35, %c36] : memref<1x16x384xbf16, #tpu.memory_space<vmem>>, vector<1x16x288xbf16>
    %39 = vector.shape_cast %38 : vector<1x16x288xbf16> to vector<16x288xbf16>
    %c6 = arith.constant 6 : index
    %c0_36 = arith.constant 0 : index
    %c0_37 = arith.constant 0 : index
    %40 = vector.load %arg2[%c6, %c0_36, %c0_37] : memref<9x8x16xbf16, #tpu.memory_space<vmem>>, vector<1x8x16xbf16>
    %41 = vector.shape_cast %40 : vector<1x8x16xbf16> to vector<8x16xbf16>
    %cst_38 = arith.constant dense<0.000000e+00> : vector<8x288xf32>
    %42 = tpu.matmul %41, %39, %cst_38 {dimension_numbers = #tpu.dot_dimension_numbers<[1], [0], [0], [1], [0, 0, 1, 1], [], []>} : vector<8x16xbf16>, vector<16x288xbf16>, vector<8x288xf32> -> vector<8x288xf32>
    %43 = arith.addf %37, %42 : vector<8x288xf32>
    %c0_39 = arith.constant 0 : index
    %c0_40 = arith.constant 0 : index
    %c37 = arith.constant 37 : index
    %44 = vector.load %arg1[%c0_39, %c0_40, %c37] : memref<1x16x384xbf16, #tpu.memory_space<vmem>>, vector<1x16x288xbf16>
    %45 = vector.shape_cast %44 : vector<1x16x288xbf16> to vector<16x288xbf16>
    %c7 = arith.constant 7 : index
    %c0_41 = arith.constant 0 : index
    %c0_42 = arith.constant 0 : index
    %46 = vector.load %arg2[%c7, %c0_41, %c0_42] : memref<9x8x16xbf16, #tpu.memory_space<vmem>>, vector<1x8x16xbf16>
    %47 = vector.shape_cast %46 : vector<1x8x16xbf16> to vector<8x16xbf16>
    %cst_43 = arith.constant dense<0.000000e+00> : vector<8x288xf32>
    %48 = tpu.matmul %47, %45, %cst_43 {dimension_numbers = #tpu.dot_dimension_numbers<[1], [0], [0], [1], [0, 0, 1, 1], [], []>} : vector<8x16xbf16>, vector<16x288xbf16>, vector<8x288xf32> -> vector<8x288xf32>
    %49 = arith.addf %43, %48 : vector<8x288xf32>
    %c0_44 = arith.constant 0 : index
    %c0_45 = arith.constant 0 : index
    %c38 = arith.constant 38 : index
    %50 = vector.load %arg1[%c0_44, %c0_45, %c38] : memref<1x16x384xbf16, #tpu.memory_space<vmem>>, vector<1x16x288xbf16>
    %51 = vector.shape_cast %50 : vector<1x16x288xbf16> to vector<16x288xbf16>
    %c8 = arith.constant 8 : index
    %c0_46 = arith.constant 0 : index
    %c0_47 = arith.constant 0 : index
    %52 = vector.load %arg2[%c8, %c0_46, %c0_47] : memref<9x8x16xbf16, #tpu.memory_space<vmem>>, vector<1x8x16xbf16>
    %53 = vector.shape_cast %52 : vector<1x8x16xbf16> to vector<8x16xbf16>
    %cst_48 = arith.constant dense<0.000000e+00> : vector<8x288xf32>
    %54 = tpu.matmul %53, %51, %cst_48 {dimension_numbers = #tpu.dot_dimension_numbers<[1], [0], [0], [1], [0, 0, 1, 1], [], []>} : vector<8x16xbf16>, vector<16x288xbf16>, vector<8x288xf32> -> vector<8x288xf32>
    %55 = arith.addf %49, %54 : vector<8x288xf32>
    %c0_49 = arith.constant 0 : index
    %c0_50 = arith.constant 0 : index
    %56 = vector.load %arg7[%c0_49, %c0_50] : memref<8x288xf32, #tpu.memory_space<vmem>>, vector<8x288xf32>
    tpu.vector_store %arg7[%c0_49, %c0_50], %55 {strides = array<i32>} : memref<8x288xf32, #tpu.memory_space<vmem>>, vector<8x288xf32>,
    %c0_51 = arith.constant 0 : index
    %c0_52 = arith.constant 0 : index
    %57 = vector.load %arg3[%c0_51, %c0_52] : memref<1x288xf32, #tpu.memory_space<vmem>>, vector<1x288xf32>
    %58 = vector.broadcast %57 : vector<1x288xf32> to vector<8x288xf32>
    %59 = arith.mulf %55, %58 : vector<8x288xf32>
    %cst_53 = arith.constant dense<0.000000e+00> : vector<8xf32>
    %60 = vector.multi_reduction <add>, %59, %cst_53 [1] : vector<8x288xf32> to vector<8xf32>
    %61 = vector.shape_cast %60 : vector<8xf32> to vector<8x1xf32>
    %62 = arith.addf %0, %61 : vector<8x1xf32>
    %cst_54 = arith.constant 3.906250e-03 : f32
    %63 = vector.broadcast %cst_54 : f32 to vector<8x1xf32>
    %64 = arith.mulf %62, %63 : vector<8x1xf32>
    %cst_55 = arith.constant 0.000000e+00 : f32
    %65 = vector.broadcast %cst_55 : f32 to vector<8x1xf32>
    %c0_56 = arith.constant 0 : index
    %c0_57 = arith.constant 0 : index
    %66 = vector.load %arg7[%c0_56, %c0_57] : memref<8x288xf32, #tpu.memory_space<vmem>>, vector<8x288xf32>
    %67 = vector.broadcast %64 : vector<8x1xf32> to vector<8x288xf32>
    %68 = arith.subf %66, %67 : vector<8x288xf32>
    %c0_58 = arith.constant 0 : index
    %c0_59 = arith.constant 0 : index
    %69 = vector.load %arg3[%c0_58, %c0_59] : memref<1x288xf32, #tpu.memory_space<vmem>>, vector<1x288xf32>
    %70 = vector.broadcast %69 : vector<1x288xf32> to vector<8x288xf32>
    %71 = arith.mulf %68, %70 : vector<8x288xf32>
    %72 = arith.mulf %71, %71 : vector<8x288xf32>
    %cst_60 = arith.constant dense<0.000000e+00> : vector<8xf32>
    %73 = vector.multi_reduction <add>, %72, %cst_60 [1] : vector<8x288xf32> to vector<8xf32>
    %74 = vector.shape_cast %73 : vector<8xf32> to vector<8x1xf32>
    %75 = arith.addf %65, %74 : vector<8x1xf32>
    %cst_61 = arith.constant 3.906250e-03 : f32
    %76 = vector.broadcast %cst_61 : f32 to vector<8x1xf32>
    %77 = arith.mulf %75, %76 : vector<8x1xf32>
    %cst_62 = arith.constant 9.99999974E-6 : f32
    %78 = vector.broadcast %cst_62 : f32 to vector<8x1xf32>
    %79 = arith.addf %77, %78 : vector<8x1xf32>
    %80 = math.rsqrt %79 : vector<8x1xf32>
    %c0_63 = arith.constant 0 : index
    %c0_64 = arith.constant 0 : index
    %81 = vector.load %arg4[%c0_63, %c0_64] : memref<8x1xf32, #tpu.memory_space<vmem>>, vector<8x1xf32>
    %82 = arith.mulf %81, %80 : vector<8x1xf32>
    %c0_65 = arith.constant 0 : index
    %c0_66 = arith.constant 0 : index
    %83 = vector.load %arg5[%c0_65, %c0_66] : memref<8x1xf32, #tpu.memory_space<vmem>>, vector<8x1xf32>
    %84 = arith.mulf %64, %82 : vector<8x1xf32>
    %85 = arith.subf %83, %84 : vector<8x1xf32>
    %c0_67 = arith.constant 0 : index
    %c0_68 = arith.constant 0 : index
    %86 = vector.load %arg7[%c0_67, %c0_68] : memref<8x288xf32, #tpu.memory_space<vmem>>, vector<8x288xf32>
    %87 = vector.broadcast %82 : vector<8x1xf32> to vector<8x288xf32>
    %88 = arith.mulf %86, %87 : vector<8x288xf32>
    %89 = vector.broadcast %85 : vector<8x1xf32> to vector<8x288xf32>
    %90 = arith.addf %88, %89 : vector<8x288xf32>
    %cst_69 = arith.constant 0.000000e+00 : f32
    %91 = vector.broadcast %cst_69 : f32 to vector<8x288xf32>
    %92 = arith.maximumf %90, %91 : vector<8x288xf32>
    %93 = arith.truncf %92 : vector<8x288xf32> to vector<8x288xbf16>
    %c0_70 = arith.constant 0 : index
    %c0_71 = arith.constant 0 : index
    %c0_72 = arith.constant 0 : index
    %94 = vector.load %arg6[%c0_70, %c0_71, %c0_72] : memref<1x8x288xbf16, #tpu.memory_space<vmem>>, vector<1x8x288xbf16>
    %95 = vector.shape_cast %94 : vector<1x8x288xbf16> to vector<8x288xbf16>
    %96 = vector.shape_cast %93 : vector<8x288xbf16> to vector<1x8x288xbf16>
    tpu.vector_store %arg6[%c0_70, %c0_71, %c0_72], %96 {strides = array<i32>} : memref<1x8x288xbf16, #tpu.memory_space<vmem>>, vector<1x8x288xbf16>,
    return
  }
  func.func @transform_0(%arg0: i32) -> (i32, i32, i32) {
    %c0_i32 = arith.constant 0 : i32
    %c0_i32_0 = arith.constant 0 : i32
    %c0_i32_1 = arith.constant 0 : i32
    return %arg0, %c0_i32, %c0_i32_0 : i32, i32, i32
  }
  func.func @transform_1(%arg0: i32) -> (i32, i32, i32) {
    %c0_i32 = arith.constant 0 : i32
    %c0_i32_0 = arith.constant 0 : i32
    %c0_i32_1 = arith.constant 0 : i32
    %c0_i32_2 = arith.constant 0 : i32
    return %c0_i32, %c0_i32_0, %c0_i32_1 : i32, i32, i32
  }
  func.func @transform_2(%arg0: i32) -> (i32, i32) {
    %c0_i32 = arith.constant 0 : i32
    %c0_i32_0 = arith.constant 0 : i32
    %c0_i32_1 = arith.constant 0 : i32
    return %c0_i32, %c0_i32_0 : i32, i32
  }
  func.func @transform_3(%arg0: i32) -> (i32, i32) {
    %c0_i32 = arith.constant 0 : i32
    %c0_i32_0 = arith.constant 0 : i32
    %c0_i32_1 = arith.constant 0 : i32
    return %c0_i32, %c0_i32_0 : i32, i32
  }
  func.func @transform_4(%arg0: i32) -> (i32, i32) {
    %c0_i32 = arith.constant 0 : i32
    %c0_i32_0 = arith.constant 0 : i32
    %c0_i32_1 = arith.constant 0 : i32
    return %c0_i32, %c0_i32_0 : i32, i32
  }
  func.func @transform_5(%arg0: i32) -> (i32, i32, i32) {
    %c0_i32 = arith.constant 0 : i32
    %c0_i32_0 = arith.constant 0 : i32
    %c0_i32_1 = arith.constant 0 : i32
    return %arg0, %c0_i32, %c0_i32_0 : i32, i32, i32
  }
}

module attributes {stable_mosaic.version = 11 : i64} {
  func.func @conv_in_act_kernel(%arg0: i32, %arg1: memref<1x8x512xbf16, #tpu.memory_space<vmem>>, %arg2: memref<49x8x8xbf16, #tpu.memory_space<vmem>>, %arg3: memref<1x352xf32, #tpu.memory_space<vmem>>, %arg4: memref<8x1xf32, #tpu.memory_space<vmem>>, %arg5: memref<8x1xf32, #tpu.memory_space<vmem>>, %arg6: memref<1x8x352xf32, #tpu.memory_space<vmem>>, %arg7: memref<8x352xf32, #tpu.memory_space<vmem>>) attributes {dimension_semantics = [#tpu.dimension_semantics<parallel>], iteration_bounds = array<i64: 2>, scalar_prefetch = 0 : i64, scratch_operands = 1 : i64, tpu.core_type = #tpu.core_type<tc>, window_params = [{transform_indices = @transform_0, window_bounds = array<i64: 1, 8, 512>}, {pipeline_mode = #tpu.pipeline_mode<synchronous>, transform_indices = @transform_1, window_bounds = array<i64: 49, 8, 8>}, {pipeline_mode = #tpu.pipeline_mode<synchronous>, transform_indices = @transform_2, window_bounds = array<i64: 1, 352>}, {pipeline_mode = #tpu.pipeline_mode<synchronous>, transform_indices = @transform_3, window_bounds = array<i64: 8, 1>}, {pipeline_mode = #tpu.pipeline_mode<synchronous>, transform_indices = @transform_4, window_bounds = array<i64: 8, 1>}, {transform_indices = @transform_5, window_bounds = array<i64: 1, 8, 352>}]} {
    %c0 = arith.constant 0 : index
    %c0_0 = arith.constant 0 : index
    %0 = vector.load %arg5[%c0, %c0_0] : memref<8x1xf32, #tpu.memory_space<vmem>>, vector<8x1xf32>
    %cst = arith.constant 0.000000e+00 : f32
    %1 = vector.broadcast %cst : f32 to vector<8x352xf32>
    %c0_1 = arith.constant 0 : index
    %c0_2 = arith.constant 0 : index
    %c0_3 = arith.constant 0 : index
    %2 = vector.load %arg1[%c0_1, %c0_2, %c0_3] : memref<1x8x512xbf16, #tpu.memory_space<vmem>>, vector<1x8x352xbf16>
    %3 = vector.shape_cast %2 : vector<1x8x352xbf16> to vector<8x352xbf16>
    %c0_4 = arith.constant 0 : index
    %c0_5 = arith.constant 0 : index
    %c0_6 = arith.constant 0 : index
    %4 = vector.load %arg2[%c0_4, %c0_5, %c0_6] : memref<49x8x8xbf16, #tpu.memory_space<vmem>>, vector<1x8x8xbf16>
    %5 = vector.shape_cast %4 : vector<1x8x8xbf16> to vector<8x8xbf16>
    %cst_7 = arith.constant dense<0.000000e+00> : vector<8x352xf32>
    %6 = tpu.matmul %5, %3, %cst_7 {dimension_numbers = #tpu.dot_dimension_numbers<[1], [0], [0], [1], [0, 0, 1, 1], [], []>} : vector<8x8xbf16>, vector<8x352xbf16>, vector<8x352xf32> -> vector<8x352xf32>
    %7 = arith.addf %1, %6 : vector<8x352xf32>
    %c0_8 = arith.constant 0 : index
    %c0_9 = arith.constant 0 : index
    %c1 = arith.constant 1 : index
    %8 = vector.load %arg1[%c0_8, %c0_9, %c1] : memref<1x8x512xbf16, #tpu.memory_space<vmem>>, vector<1x8x352xbf16>
    %9 = vector.shape_cast %8 : vector<1x8x352xbf16> to vector<8x352xbf16>
    %c1_10 = arith.constant 1 : index
    %c0_11 = arith.constant 0 : index
    %c0_12 = arith.constant 0 : index
    %10 = vector.load %arg2[%c1_10, %c0_11, %c0_12] : memref<49x8x8xbf16, #tpu.memory_space<vmem>>, vector<1x8x8xbf16>
    %11 = vector.shape_cast %10 : vector<1x8x8xbf16> to vector<8x8xbf16>
    %cst_13 = arith.constant dense<0.000000e+00> : vector<8x352xf32>
    %12 = tpu.matmul %11, %9, %cst_13 {dimension_numbers = #tpu.dot_dimension_numbers<[1], [0], [0], [1], [0, 0, 1, 1], [], []>} : vector<8x8xbf16>, vector<8x352xbf16>, vector<8x352xf32> -> vector<8x352xf32>
    %13 = arith.addf %7, %12 : vector<8x352xf32>
    %c0_14 = arith.constant 0 : index
    %c0_15 = arith.constant 0 : index
    %c2 = arith.constant 2 : index
    %14 = vector.load %arg1[%c0_14, %c0_15, %c2] : memref<1x8x512xbf16, #tpu.memory_space<vmem>>, vector<1x8x352xbf16>
    %15 = vector.shape_cast %14 : vector<1x8x352xbf16> to vector<8x352xbf16>
    %c2_16 = arith.constant 2 : index
    %c0_17 = arith.constant 0 : index
    %c0_18 = arith.constant 0 : index
    %16 = vector.load %arg2[%c2_16, %c0_17, %c0_18] : memref<49x8x8xbf16, #tpu.memory_space<vmem>>, vector<1x8x8xbf16>
    %17 = vector.shape_cast %16 : vector<1x8x8xbf16> to vector<8x8xbf16>
    %cst_19 = arith.constant dense<0.000000e+00> : vector<8x352xf32>
    %18 = tpu.matmul %17, %15, %cst_19 {dimension_numbers = #tpu.dot_dimension_numbers<[1], [0], [0], [1], [0, 0, 1, 1], [], []>} : vector<8x8xbf16>, vector<8x352xbf16>, vector<8x352xf32> -> vector<8x352xf32>
    %19 = arith.addf %13, %18 : vector<8x352xf32>
    %c0_20 = arith.constant 0 : index
    %c0_21 = arith.constant 0 : index
    %c3 = arith.constant 3 : index
    %20 = vector.load %arg1[%c0_20, %c0_21, %c3] : memref<1x8x512xbf16, #tpu.memory_space<vmem>>, vector<1x8x352xbf16>
    %21 = vector.shape_cast %20 : vector<1x8x352xbf16> to vector<8x352xbf16>
    %c3_22 = arith.constant 3 : index
    %c0_23 = arith.constant 0 : index
    %c0_24 = arith.constant 0 : index
    %22 = vector.load %arg2[%c3_22, %c0_23, %c0_24] : memref<49x8x8xbf16, #tpu.memory_space<vmem>>, vector<1x8x8xbf16>
    %23 = vector.shape_cast %22 : vector<1x8x8xbf16> to vector<8x8xbf16>
    %cst_25 = arith.constant dense<0.000000e+00> : vector<8x352xf32>
    %24 = tpu.matmul %23, %21, %cst_25 {dimension_numbers = #tpu.dot_dimension_numbers<[1], [0], [0], [1], [0, 0, 1, 1], [], []>} : vector<8x8xbf16>, vector<8x352xbf16>, vector<8x352xf32> -> vector<8x352xf32>
    %25 = arith.addf %19, %24 : vector<8x352xf32>
    %c0_26 = arith.constant 0 : index
    %c0_27 = arith.constant 0 : index
    %c4 = arith.constant 4 : index
    %26 = vector.load %arg1[%c0_26, %c0_27, %c4] : memref<1x8x512xbf16, #tpu.memory_space<vmem>>, vector<1x8x352xbf16>
    %27 = vector.shape_cast %26 : vector<1x8x352xbf16> to vector<8x352xbf16>
    %c4_28 = arith.constant 4 : index
    %c0_29 = arith.constant 0 : index
    %c0_30 = arith.constant 0 : index
    %28 = vector.load %arg2[%c4_28, %c0_29, %c0_30] : memref<49x8x8xbf16, #tpu.memory_space<vmem>>, vector<1x8x8xbf16>
    %29 = vector.shape_cast %28 : vector<1x8x8xbf16> to vector<8x8xbf16>
    %cst_31 = arith.constant dense<0.000000e+00> : vector<8x352xf32>
    %30 = tpu.matmul %29, %27, %cst_31 {dimension_numbers = #tpu.dot_dimension_numbers<[1], [0], [0], [1], [0, 0, 1, 1], [], []>} : vector<8x8xbf16>, vector<8x352xbf16>, vector<8x352xf32> -> vector<8x352xf32>
    %31 = arith.addf %25, %30 : vector<8x352xf32>
    %c0_32 = arith.constant 0 : index
    %c0_33 = arith.constant 0 : index
    %c5 = arith.constant 5 : index
    %32 = vector.load %arg1[%c0_32, %c0_33, %c5] : memref<1x8x512xbf16, #tpu.memory_space<vmem>>, vector<1x8x352xbf16>
    %33 = vector.shape_cast %32 : vector<1x8x352xbf16> to vector<8x352xbf16>
    %c5_34 = arith.constant 5 : index
    %c0_35 = arith.constant 0 : index
    %c0_36 = arith.constant 0 : index
    %34 = vector.load %arg2[%c5_34, %c0_35, %c0_36] : memref<49x8x8xbf16, #tpu.memory_space<vmem>>, vector<1x8x8xbf16>
    %35 = vector.shape_cast %34 : vector<1x8x8xbf16> to vector<8x8xbf16>
    %cst_37 = arith.constant dense<0.000000e+00> : vector<8x352xf32>
    %36 = tpu.matmul %35, %33, %cst_37 {dimension_numbers = #tpu.dot_dimension_numbers<[1], [0], [0], [1], [0, 0, 1, 1], [], []>} : vector<8x8xbf16>, vector<8x352xbf16>, vector<8x352xf32> -> vector<8x352xf32>
    %37 = arith.addf %31, %36 : vector<8x352xf32>
    %c0_38 = arith.constant 0 : index
    %c0_39 = arith.constant 0 : index
    %c6 = arith.constant 6 : index
    %38 = vector.load %arg1[%c0_38, %c0_39, %c6] : memref<1x8x512xbf16, #tpu.memory_space<vmem>>, vector<1x8x352xbf16>
    %39 = vector.shape_cast %38 : vector<1x8x352xbf16> to vector<8x352xbf16>
    %c6_40 = arith.constant 6 : index
    %c0_41 = arith.constant 0 : index
    %c0_42 = arith.constant 0 : index
    %40 = vector.load %arg2[%c6_40, %c0_41, %c0_42] : memref<49x8x8xbf16, #tpu.memory_space<vmem>>, vector<1x8x8xbf16>
    %41 = vector.shape_cast %40 : vector<1x8x8xbf16> to vector<8x8xbf16>
    %cst_43 = arith.constant dense<0.000000e+00> : vector<8x352xf32>
    %42 = tpu.matmul %41, %39, %cst_43 {dimension_numbers = #tpu.dot_dimension_numbers<[1], [0], [0], [1], [0, 0, 1, 1], [], []>} : vector<8x8xbf16>, vector<8x352xbf16>, vector<8x352xf32> -> vector<8x352xf32>
    %43 = arith.addf %37, %42 : vector<8x352xf32>
    %c0_44 = arith.constant 0 : index
    %c0_45 = arith.constant 0 : index
    %c22 = arith.constant 22 : index
    %44 = vector.load %arg1[%c0_44, %c0_45, %c22] : memref<1x8x512xbf16, #tpu.memory_space<vmem>>, vector<1x8x352xbf16>
    %45 = vector.shape_cast %44 : vector<1x8x352xbf16> to vector<8x352xbf16>
    %c7 = arith.constant 7 : index
    %c0_46 = arith.constant 0 : index
    %c0_47 = arith.constant 0 : index
    %46 = vector.load %arg2[%c7, %c0_46, %c0_47] : memref<49x8x8xbf16, #tpu.memory_space<vmem>>, vector<1x8x8xbf16>
    %47 = vector.shape_cast %46 : vector<1x8x8xbf16> to vector<8x8xbf16>
    %cst_48 = arith.constant dense<0.000000e+00> : vector<8x352xf32>
    %48 = tpu.matmul %47, %45, %cst_48 {dimension_numbers = #tpu.dot_dimension_numbers<[1], [0], [0], [1], [0, 0, 1, 1], [], []>} : vector<8x8xbf16>, vector<8x352xbf16>, vector<8x352xf32> -> vector<8x352xf32>
    %49 = arith.addf %43, %48 : vector<8x352xf32>
    %c0_49 = arith.constant 0 : index
    %c0_50 = arith.constant 0 : index
    %c23 = arith.constant 23 : index
    %50 = vector.load %arg1[%c0_49, %c0_50, %c23] : memref<1x8x512xbf16, #tpu.memory_space<vmem>>, vector<1x8x352xbf16>
    %51 = vector.shape_cast %50 : vector<1x8x352xbf16> to vector<8x352xbf16>
    %c8 = arith.constant 8 : index
    %c0_51 = arith.constant 0 : index
    %c0_52 = arith.constant 0 : index
    %52 = vector.load %arg2[%c8, %c0_51, %c0_52] : memref<49x8x8xbf16, #tpu.memory_space<vmem>>, vector<1x8x8xbf16>
    %53 = vector.shape_cast %52 : vector<1x8x8xbf16> to vector<8x8xbf16>
    %cst_53 = arith.constant dense<0.000000e+00> : vector<8x352xf32>
    %54 = tpu.matmul %53, %51, %cst_53 {dimension_numbers = #tpu.dot_dimension_numbers<[1], [0], [0], [1], [0, 0, 1, 1], [], []>} : vector<8x8xbf16>, vector<8x352xbf16>, vector<8x352xf32> -> vector<8x352xf32>
    %55 = arith.addf %49, %54 : vector<8x352xf32>
    %c0_54 = arith.constant 0 : index
    %c0_55 = arith.constant 0 : index
    %c24 = arith.constant 24 : index
    %56 = vector.load %arg1[%c0_54, %c0_55, %c24] : memref<1x8x512xbf16, #tpu.memory_space<vmem>>, vector<1x8x352xbf16>
    %57 = vector.shape_cast %56 : vector<1x8x352xbf16> to vector<8x352xbf16>
    %c9 = arith.constant 9 : index
    %c0_56 = arith.constant 0 : index
    %c0_57 = arith.constant 0 : index
    %58 = vector.load %arg2[%c9, %c0_56, %c0_57] : memref<49x8x8xbf16, #tpu.memory_space<vmem>>, vector<1x8x8xbf16>
    %59 = vector.shape_cast %58 : vector<1x8x8xbf16> to vector<8x8xbf16>
    %cst_58 = arith.constant dense<0.000000e+00> : vector<8x352xf32>
    %60 = tpu.matmul %59, %57, %cst_58 {dimension_numbers = #tpu.dot_dimension_numbers<[1], [0], [0], [1], [0, 0, 1, 1], [], []>} : vector<8x8xbf16>, vector<8x352xbf16>, vector<8x352xf32> -> vector<8x352xf32>
    %61 = arith.addf %55, %60 : vector<8x352xf32>
    %c0_59 = arith.constant 0 : index
    %c0_60 = arith.constant 0 : index
    %c25 = arith.constant 25 : index
    %62 = vector.load %arg1[%c0_59, %c0_60, %c25] : memref<1x8x512xbf16, #tpu.memory_space<vmem>>, vector<1x8x352xbf16>
    %63 = vector.shape_cast %62 : vector<1x8x352xbf16> to vector<8x352xbf16>
    %c10 = arith.constant 10 : index
    %c0_61 = arith.constant 0 : index
    %c0_62 = arith.constant 0 : index
    %64 = vector.load %arg2[%c10, %c0_61, %c0_62] : memref<49x8x8xbf16, #tpu.memory_space<vmem>>, vector<1x8x8xbf16>
    %65 = vector.shape_cast %64 : vector<1x8x8xbf16> to vector<8x8xbf16>
    %cst_63 = arith.constant dense<0.000000e+00> : vector<8x352xf32>
    %66 = tpu.matmul %65, %63, %cst_63 {dimension_numbers = #tpu.dot_dimension_numbers<[1], [0], [0], [1], [0, 0, 1, 1], [], []>} : vector<8x8xbf16>, vector<8x352xbf16>, vector<8x352xf32> -> vector<8x352xf32>
    %67 = arith.addf %61, %66 : vector<8x352xf32>
    %c0_64 = arith.constant 0 : index
    %c0_65 = arith.constant 0 : index
    %c26 = arith.constant 26 : index
    %68 = vector.load %arg1[%c0_64, %c0_65, %c26] : memref<1x8x512xbf16, #tpu.memory_space<vmem>>, vector<1x8x352xbf16>
    %69 = vector.shape_cast %68 : vector<1x8x352xbf16> to vector<8x352xbf16>
    %c11 = arith.constant 11 : index
    %c0_66 = arith.constant 0 : index
    %c0_67 = arith.constant 0 : index
    %70 = vector.load %arg2[%c11, %c0_66, %c0_67] : memref<49x8x8xbf16, #tpu.memory_space<vmem>>, vector<1x8x8xbf16>
    %71 = vector.shape_cast %70 : vector<1x8x8xbf16> to vector<8x8xbf16>
    %cst_68 = arith.constant dense<0.000000e+00> : vector<8x352xf32>
    %72 = tpu.matmul %71, %69, %cst_68 {dimension_numbers = #tpu.dot_dimension_numbers<[1], [0], [0], [1], [0, 0, 1, 1], [], []>} : vector<8x8xbf16>, vector<8x352xbf16>, vector<8x352xf32> -> vector<8x352xf32>
    %73 = arith.addf %67, %72 : vector<8x352xf32>
    %c0_69 = arith.constant 0 : index
    %c0_70 = arith.constant 0 : index
    %c27 = arith.constant 27 : index
    %74 = vector.load %arg1[%c0_69, %c0_70, %c27] : memref<1x8x512xbf16, #tpu.memory_space<vmem>>, vector<1x8x352xbf16>
    %75 = vector.shape_cast %74 : vector<1x8x352xbf16> to vector<8x352xbf16>
    %c12 = arith.constant 12 : index
    %c0_71 = arith.constant 0 : index
    %c0_72 = arith.constant 0 : index
    %76 = vector.load %arg2[%c12, %c0_71, %c0_72] : memref<49x8x8xbf16, #tpu.memory_space<vmem>>, vector<1x8x8xbf16>
    %77 = vector.shape_cast %76 : vector<1x8x8xbf16> to vector<8x8xbf16>
    %cst_73 = arith.constant dense<0.000000e+00> : vector<8x352xf32>
    %78 = tpu.matmul %77, %75, %cst_73 {dimension_numbers = #tpu.dot_dimension_numbers<[1], [0], [0], [1], [0, 0, 1, 1], [], []>} : vector<8x8xbf16>, vector<8x352xbf16>, vector<8x352xf32> -> vector<8x352xf32>
    %79 = arith.addf %73, %78 : vector<8x352xf32>
    %c0_74 = arith.constant 0 : index
    %c0_75 = arith.constant 0 : index
    %c28 = arith.constant 28 : index
    %80 = vector.load %arg1[%c0_74, %c0_75, %c28] : memref<1x8x512xbf16, #tpu.memory_space<vmem>>, vector<1x8x352xbf16>
    %81 = vector.shape_cast %80 : vector<1x8x352xbf16> to vector<8x352xbf16>
    %c13 = arith.constant 13 : index
    %c0_76 = arith.constant 0 : index
    %c0_77 = arith.constant 0 : index
    %82 = vector.load %arg2[%c13, %c0_76, %c0_77] : memref<49x8x8xbf16, #tpu.memory_space<vmem>>, vector<1x8x8xbf16>
    %83 = vector.shape_cast %82 : vector<1x8x8xbf16> to vector<8x8xbf16>
    %cst_78 = arith.constant dense<0.000000e+00> : vector<8x352xf32>
    %84 = tpu.matmul %83, %81, %cst_78 {dimension_numbers = #tpu.dot_dimension_numbers<[1], [0], [0], [1], [0, 0, 1, 1], [], []>} : vector<8x8xbf16>, vector<8x352xbf16>, vector<8x352xf32> -> vector<8x352xf32>
    %85 = arith.addf %79, %84 : vector<8x352xf32>
    %c0_79 = arith.constant 0 : index
    %c0_80 = arith.constant 0 : index
    %c44 = arith.constant 44 : index
    %86 = vector.load %arg1[%c0_79, %c0_80, %c44] : memref<1x8x512xbf16, #tpu.memory_space<vmem>>, vector<1x8x352xbf16>
    %87 = vector.shape_cast %86 : vector<1x8x352xbf16> to vector<8x352xbf16>
    %c14 = arith.constant 14 : index
    %c0_81 = arith.constant 0 : index
    %c0_82 = arith.constant 0 : index
    %88 = vector.load %arg2[%c14, %c0_81, %c0_82] : memref<49x8x8xbf16, #tpu.memory_space<vmem>>, vector<1x8x8xbf16>
    %89 = vector.shape_cast %88 : vector<1x8x8xbf16> to vector<8x8xbf16>
    %cst_83 = arith.constant dense<0.000000e+00> : vector<8x352xf32>
    %90 = tpu.matmul %89, %87, %cst_83 {dimension_numbers = #tpu.dot_dimension_numbers<[1], [0], [0], [1], [0, 0, 1, 1], [], []>} : vector<8x8xbf16>, vector<8x352xbf16>, vector<8x352xf32> -> vector<8x352xf32>
    %91 = arith.addf %85, %90 : vector<8x352xf32>
    %c0_84 = arith.constant 0 : index
    %c0_85 = arith.constant 0 : index
    %c45 = arith.constant 45 : index
    %92 = vector.load %arg1[%c0_84, %c0_85, %c45] : memref<1x8x512xbf16, #tpu.memory_space<vmem>>, vector<1x8x352xbf16>
    %93 = vector.shape_cast %92 : vector<1x8x352xbf16> to vector<8x352xbf16>
    %c15 = arith.constant 15 : index
    %c0_86 = arith.constant 0 : index
    %c0_87 = arith.constant 0 : index
    %94 = vector.load %arg2[%c15, %c0_86, %c0_87] : memref<49x8x8xbf16, #tpu.memory_space<vmem>>, vector<1x8x8xbf16>
    %95 = vector.shape_cast %94 : vector<1x8x8xbf16> to vector<8x8xbf16>
    %cst_88 = arith.constant dense<0.000000e+00> : vector<8x352xf32>
    %96 = tpu.matmul %95, %93, %cst_88 {dimension_numbers = #tpu.dot_dimension_numbers<[1], [0], [0], [1], [0, 0, 1, 1], [], []>} : vector<8x8xbf16>, vector<8x352xbf16>, vector<8x352xf32> -> vector<8x352xf32>
    %97 = arith.addf %91, %96 : vector<8x352xf32>
    %c0_89 = arith.constant 0 : index
    %c0_90 = arith.constant 0 : index
    %c46 = arith.constant 46 : index
    %98 = vector.load %arg1[%c0_89, %c0_90, %c46] : memref<1x8x512xbf16, #tpu.memory_space<vmem>>, vector<1x8x352xbf16>
    %99 = vector.shape_cast %98 : vector<1x8x352xbf16> to vector<8x352xbf16>
    %c16 = arith.constant 16 : index
    %c0_91 = arith.constant 0 : index
    %c0_92 = arith.constant 0 : index
    %100 = vector.load %arg2[%c16, %c0_91, %c0_92] : memref<49x8x8xbf16, #tpu.memory_space<vmem>>, vector<1x8x8xbf16>
    %101 = vector.shape_cast %100 : vector<1x8x8xbf16> to vector<8x8xbf16>
    %cst_93 = arith.constant dense<0.000000e+00> : vector<8x352xf32>
    %102 = tpu.matmul %101, %99, %cst_93 {dimension_numbers = #tpu.dot_dimension_numbers<[1], [0], [0], [1], [0, 0, 1, 1], [], []>} : vector<8x8xbf16>, vector<8x352xbf16>, vector<8x352xf32> -> vector<8x352xf32>
    %103 = arith.addf %97, %102 : vector<8x352xf32>
    %c0_94 = arith.constant 0 : index
    %c0_95 = arith.constant 0 : index
    %c47 = arith.constant 47 : index
    %104 = vector.load %arg1[%c0_94, %c0_95, %c47] : memref<1x8x512xbf16, #tpu.memory_space<vmem>>, vector<1x8x352xbf16>
    %105 = vector.shape_cast %104 : vector<1x8x352xbf16> to vector<8x352xbf16>
    %c17 = arith.constant 17 : index
    %c0_96 = arith.constant 0 : index
    %c0_97 = arith.constant 0 : index
    %106 = vector.load %arg2[%c17, %c0_96, %c0_97] : memref<49x8x8xbf16, #tpu.memory_space<vmem>>, vector<1x8x8xbf16>
    %107 = vector.shape_cast %106 : vector<1x8x8xbf16> to vector<8x8xbf16>
    %cst_98 = arith.constant dense<0.000000e+00> : vector<8x352xf32>
    %108 = tpu.matmul %107, %105, %cst_98 {dimension_numbers = #tpu.dot_dimension_numbers<[1], [0], [0], [1], [0, 0, 1, 1], [], []>} : vector<8x8xbf16>, vector<8x352xbf16>, vector<8x352xf32> -> vector<8x352xf32>
    %109 = arith.addf %103, %108 : vector<8x352xf32>
    %c0_99 = arith.constant 0 : index
    %c0_100 = arith.constant 0 : index
    %c48 = arith.constant 48 : index
    %110 = vector.load %arg1[%c0_99, %c0_100, %c48] : memref<1x8x512xbf16, #tpu.memory_space<vmem>>, vector<1x8x352xbf16>
    %111 = vector.shape_cast %110 : vector<1x8x352xbf16> to vector<8x352xbf16>
    %c18 = arith.constant 18 : index
    %c0_101 = arith.constant 0 : index
    %c0_102 = arith.constant 0 : index
    %112 = vector.load %arg2[%c18, %c0_101, %c0_102] : memref<49x8x8xbf16, #tpu.memory_space<vmem>>, vector<1x8x8xbf16>
    %113 = vector.shape_cast %112 : vector<1x8x8xbf16> to vector<8x8xbf16>
    %cst_103 = arith.constant dense<0.000000e+00> : vector<8x352xf32>
    %114 = tpu.matmul %113, %111, %cst_103 {dimension_numbers = #tpu.dot_dimension_numbers<[1], [0], [0], [1], [0, 0, 1, 1], [], []>} : vector<8x8xbf16>, vector<8x352xbf16>, vector<8x352xf32> -> vector<8x352xf32>
    %115 = arith.addf %109, %114 : vector<8x352xf32>
    %c0_104 = arith.constant 0 : index
    %c0_105 = arith.constant 0 : index
    %c49 = arith.constant 49 : index
    %116 = vector.load %arg1[%c0_104, %c0_105, %c49] : memref<1x8x512xbf16, #tpu.memory_space<vmem>>, vector<1x8x352xbf16>
    %117 = vector.shape_cast %116 : vector<1x8x352xbf16> to vector<8x352xbf16>
    %c19 = arith.constant 19 : index
    %c0_106 = arith.constant 0 : index
    %c0_107 = arith.constant 0 : index
    %118 = vector.load %arg2[%c19, %c0_106, %c0_107] : memref<49x8x8xbf16, #tpu.memory_space<vmem>>, vector<1x8x8xbf16>
    %119 = vector.shape_cast %118 : vector<1x8x8xbf16> to vector<8x8xbf16>
    %cst_108 = arith.constant dense<0.000000e+00> : vector<8x352xf32>
    %120 = tpu.matmul %119, %117, %cst_108 {dimension_numbers = #tpu.dot_dimension_numbers<[1], [0], [0], [1], [0, 0, 1, 1], [], []>} : vector<8x8xbf16>, vector<8x352xbf16>, vector<8x352xf32> -> vector<8x352xf32>
    %121 = arith.addf %115, %120 : vector<8x352xf32>
    %c0_109 = arith.constant 0 : index
    %c0_110 = arith.constant 0 : index
    %c50 = arith.constant 50 : index
    %122 = vector.load %arg1[%c0_109, %c0_110, %c50] : memref<1x8x512xbf16, #tpu.memory_space<vmem>>, vector<1x8x352xbf16>
    %123 = vector.shape_cast %122 : vector<1x8x352xbf16> to vector<8x352xbf16>
    %c20 = arith.constant 20 : index
    %c0_111 = arith.constant 0 : index
    %c0_112 = arith.constant 0 : index
    %124 = vector.load %arg2[%c20, %c0_111, %c0_112] : memref<49x8x8xbf16, #tpu.memory_space<vmem>>, vector<1x8x8xbf16>
    %125 = vector.shape_cast %124 : vector<1x8x8xbf16> to vector<8x8xbf16>
    %cst_113 = arith.constant dense<0.000000e+00> : vector<8x352xf32>
    %126 = tpu.matmul %125, %123, %cst_113 {dimension_numbers = #tpu.dot_dimension_numbers<[1], [0], [0], [1], [0, 0, 1, 1], [], []>} : vector<8x8xbf16>, vector<8x352xbf16>, vector<8x352xf32> -> vector<8x352xf32>
    %127 = arith.addf %121, %126 : vector<8x352xf32>
    %c0_114 = arith.constant 0 : index
    %c0_115 = arith.constant 0 : index
    %c66 = arith.constant 66 : index
    %128 = vector.load %arg1[%c0_114, %c0_115, %c66] : memref<1x8x512xbf16, #tpu.memory_space<vmem>>, vector<1x8x352xbf16>
    %129 = vector.shape_cast %128 : vector<1x8x352xbf16> to vector<8x352xbf16>
    %c21 = arith.constant 21 : index
    %c0_116 = arith.constant 0 : index
    %c0_117 = arith.constant 0 : index
    %130 = vector.load %arg2[%c21, %c0_116, %c0_117] : memref<49x8x8xbf16, #tpu.memory_space<vmem>>, vector<1x8x8xbf16>
    %131 = vector.shape_cast %130 : vector<1x8x8xbf16> to vector<8x8xbf16>
    %cst_118 = arith.constant dense<0.000000e+00> : vector<8x352xf32>
    %132 = tpu.matmul %131, %129, %cst_118 {dimension_numbers = #tpu.dot_dimension_numbers<[1], [0], [0], [1], [0, 0, 1, 1], [], []>} : vector<8x8xbf16>, vector<8x352xbf16>, vector<8x352xf32> -> vector<8x352xf32>
    %133 = arith.addf %127, %132 : vector<8x352xf32>
    %c0_119 = arith.constant 0 : index
    %c0_120 = arith.constant 0 : index
    %c67 = arith.constant 67 : index
    %134 = vector.load %arg1[%c0_119, %c0_120, %c67] : memref<1x8x512xbf16, #tpu.memory_space<vmem>>, vector<1x8x352xbf16>
    %135 = vector.shape_cast %134 : vector<1x8x352xbf16> to vector<8x352xbf16>
    %c22_121 = arith.constant 22 : index
    %c0_122 = arith.constant 0 : index
    %c0_123 = arith.constant 0 : index
    %136 = vector.load %arg2[%c22_121, %c0_122, %c0_123] : memref<49x8x8xbf16, #tpu.memory_space<vmem>>, vector<1x8x8xbf16>
    %137 = vector.shape_cast %136 : vector<1x8x8xbf16> to vector<8x8xbf16>
    %cst_124 = arith.constant dense<0.000000e+00> : vector<8x352xf32>
    %138 = tpu.matmul %137, %135, %cst_124 {dimension_numbers = #tpu.dot_dimension_numbers<[1], [0], [0], [1], [0, 0, 1, 1], [], []>} : vector<8x8xbf16>, vector<8x352xbf16>, vector<8x352xf32> -> vector<8x352xf32>
    %139 = arith.addf %133, %138 : vector<8x352xf32>
    %c0_125 = arith.constant 0 : index
    %c0_126 = arith.constant 0 : index
    %c68 = arith.constant 68 : index
    %140 = vector.load %arg1[%c0_125, %c0_126, %c68] : memref<1x8x512xbf16, #tpu.memory_space<vmem>>, vector<1x8x352xbf16>
    %141 = vector.shape_cast %140 : vector<1x8x352xbf16> to vector<8x352xbf16>
    %c23_127 = arith.constant 23 : index
    %c0_128 = arith.constant 0 : index
    %c0_129 = arith.constant 0 : index
    %142 = vector.load %arg2[%c23_127, %c0_128, %c0_129] : memref<49x8x8xbf16, #tpu.memory_space<vmem>>, vector<1x8x8xbf16>
    %143 = vector.shape_cast %142 : vector<1x8x8xbf16> to vector<8x8xbf16>
    %cst_130 = arith.constant dense<0.000000e+00> : vector<8x352xf32>
    %144 = tpu.matmul %143, %141, %cst_130 {dimension_numbers = #tpu.dot_dimension_numbers<[1], [0], [0], [1], [0, 0, 1, 1], [], []>} : vector<8x8xbf16>, vector<8x352xbf16>, vector<8x352xf32> -> vector<8x352xf32>
    %145 = arith.addf %139, %144 : vector<8x352xf32>
    %c0_131 = arith.constant 0 : index
    %c0_132 = arith.constant 0 : index
    %c69 = arith.constant 69 : index
    %146 = vector.load %arg1[%c0_131, %c0_132, %c69] : memref<1x8x512xbf16, #tpu.memory_space<vmem>>, vector<1x8x352xbf16>
    %147 = vector.shape_cast %146 : vector<1x8x352xbf16> to vector<8x352xbf16>
    %c24_133 = arith.constant 24 : index
    %c0_134 = arith.constant 0 : index
    %c0_135 = arith.constant 0 : index
    %148 = vector.load %arg2[%c24_133, %c0_134, %c0_135] : memref<49x8x8xbf16, #tpu.memory_space<vmem>>, vector<1x8x8xbf16>
    %149 = vector.shape_cast %148 : vector<1x8x8xbf16> to vector<8x8xbf16>
    %cst_136 = arith.constant dense<0.000000e+00> : vector<8x352xf32>
    %150 = tpu.matmul %149, %147, %cst_136 {dimension_numbers = #tpu.dot_dimension_numbers<[1], [0], [0], [1], [0, 0, 1, 1], [], []>} : vector<8x8xbf16>, vector<8x352xbf16>, vector<8x352xf32> -> vector<8x352xf32>
    %151 = arith.addf %145, %150 : vector<8x352xf32>
    %c0_137 = arith.constant 0 : index
    %c0_138 = arith.constant 0 : index
    %c70 = arith.constant 70 : index
    %152 = vector.load %arg1[%c0_137, %c0_138, %c70] : memref<1x8x512xbf16, #tpu.memory_space<vmem>>, vector<1x8x352xbf16>
    %153 = vector.shape_cast %152 : vector<1x8x352xbf16> to vector<8x352xbf16>
    %c25_139 = arith.constant 25 : index
    %c0_140 = arith.constant 0 : index
    %c0_141 = arith.constant 0 : index
    %154 = vector.load %arg2[%c25_139, %c0_140, %c0_141] : memref<49x8x8xbf16, #tpu.memory_space<vmem>>, vector<1x8x8xbf16>
    %155 = vector.shape_cast %154 : vector<1x8x8xbf16> to vector<8x8xbf16>
    %cst_142 = arith.constant dense<0.000000e+00> : vector<8x352xf32>
    %156 = tpu.matmul %155, %153, %cst_142 {dimension_numbers = #tpu.dot_dimension_numbers<[1], [0], [0], [1], [0, 0, 1, 1], [], []>} : vector<8x8xbf16>, vector<8x352xbf16>, vector<8x352xf32> -> vector<8x352xf32>
    %157 = arith.addf %151, %156 : vector<8x352xf32>
    %c0_143 = arith.constant 0 : index
    %c0_144 = arith.constant 0 : index
    %c71 = arith.constant 71 : index
    %158 = vector.load %arg1[%c0_143, %c0_144, %c71] : memref<1x8x512xbf16, #tpu.memory_space<vmem>>, vector<1x8x352xbf16>
    %159 = vector.shape_cast %158 : vector<1x8x352xbf16> to vector<8x352xbf16>
    %c26_145 = arith.constant 26 : index
    %c0_146 = arith.constant 0 : index
    %c0_147 = arith.constant 0 : index
    %160 = vector.load %arg2[%c26_145, %c0_146, %c0_147] : memref<49x8x8xbf16, #tpu.memory_space<vmem>>, vector<1x8x8xbf16>
    %161 = vector.shape_cast %160 : vector<1x8x8xbf16> to vector<8x8xbf16>
    %cst_148 = arith.constant dense<0.000000e+00> : vector<8x352xf32>
    %162 = tpu.matmul %161, %159, %cst_148 {dimension_numbers = #tpu.dot_dimension_numbers<[1], [0], [0], [1], [0, 0, 1, 1], [], []>} : vector<8x8xbf16>, vector<8x352xbf16>, vector<8x352xf32> -> vector<8x352xf32>
    %163 = arith.addf %157, %162 : vector<8x352xf32>
    %c0_149 = arith.constant 0 : index
    %c0_150 = arith.constant 0 : index
    %c72 = arith.constant 72 : index
    %164 = vector.load %arg1[%c0_149, %c0_150, %c72] : memref<1x8x512xbf16, #tpu.memory_space<vmem>>, vector<1x8x352xbf16>
    %165 = vector.shape_cast %164 : vector<1x8x352xbf16> to vector<8x352xbf16>
    %c27_151 = arith.constant 27 : index
    %c0_152 = arith.constant 0 : index
    %c0_153 = arith.constant 0 : index
    %166 = vector.load %arg2[%c27_151, %c0_152, %c0_153] : memref<49x8x8xbf16, #tpu.memory_space<vmem>>, vector<1x8x8xbf16>
    %167 = vector.shape_cast %166 : vector<1x8x8xbf16> to vector<8x8xbf16>
    %cst_154 = arith.constant dense<0.000000e+00> : vector<8x352xf32>
    %168 = tpu.matmul %167, %165, %cst_154 {dimension_numbers = #tpu.dot_dimension_numbers<[1], [0], [0], [1], [0, 0, 1, 1], [], []>} : vector<8x8xbf16>, vector<8x352xbf16>, vector<8x352xf32> -> vector<8x352xf32>
    %169 = arith.addf %163, %168 : vector<8x352xf32>
    %c0_155 = arith.constant 0 : index
    %c0_156 = arith.constant 0 : index
    %c88 = arith.constant 88 : index
    %170 = vector.load %arg1[%c0_155, %c0_156, %c88] : memref<1x8x512xbf16, #tpu.memory_space<vmem>>, vector<1x8x352xbf16>
    %171 = vector.shape_cast %170 : vector<1x8x352xbf16> to vector<8x352xbf16>
    %c28_157 = arith.constant 28 : index
    %c0_158 = arith.constant 0 : index
    %c0_159 = arith.constant 0 : index
    %172 = vector.load %arg2[%c28_157, %c0_158, %c0_159] : memref<49x8x8xbf16, #tpu.memory_space<vmem>>, vector<1x8x8xbf16>
    %173 = vector.shape_cast %172 : vector<1x8x8xbf16> to vector<8x8xbf16>
    %cst_160 = arith.constant dense<0.000000e+00> : vector<8x352xf32>
    %174 = tpu.matmul %173, %171, %cst_160 {dimension_numbers = #tpu.dot_dimension_numbers<[1], [0], [0], [1], [0, 0, 1, 1], [], []>} : vector<8x8xbf16>, vector<8x352xbf16>, vector<8x352xf32> -> vector<8x352xf32>
    %175 = arith.addf %169, %174 : vector<8x352xf32>
    %c0_161 = arith.constant 0 : index
    %c0_162 = arith.constant 0 : index
    %c89 = arith.constant 89 : index
    %176 = vector.load %arg1[%c0_161, %c0_162, %c89] : memref<1x8x512xbf16, #tpu.memory_space<vmem>>, vector<1x8x352xbf16>
    %177 = vector.shape_cast %176 : vector<1x8x352xbf16> to vector<8x352xbf16>
    %c29 = arith.constant 29 : index
    %c0_163 = arith.constant 0 : index
    %c0_164 = arith.constant 0 : index
    %178 = vector.load %arg2[%c29, %c0_163, %c0_164] : memref<49x8x8xbf16, #tpu.memory_space<vmem>>, vector<1x8x8xbf16>
    %179 = vector.shape_cast %178 : vector<1x8x8xbf16> to vector<8x8xbf16>
    %cst_165 = arith.constant dense<0.000000e+00> : vector<8x352xf32>
    %180 = tpu.matmul %179, %177, %cst_165 {dimension_numbers = #tpu.dot_dimension_numbers<[1], [0], [0], [1], [0, 0, 1, 1], [], []>} : vector<8x8xbf16>, vector<8x352xbf16>, vector<8x352xf32> -> vector<8x352xf32>
    %181 = arith.addf %175, %180 : vector<8x352xf32>
    %c0_166 = arith.constant 0 : index
    %c0_167 = arith.constant 0 : index
    %c90 = arith.constant 90 : index
    %182 = vector.load %arg1[%c0_166, %c0_167, %c90] : memref<1x8x512xbf16, #tpu.memory_space<vmem>>, vector<1x8x352xbf16>
    %183 = vector.shape_cast %182 : vector<1x8x352xbf16> to vector<8x352xbf16>
    %c30 = arith.constant 30 : index
    %c0_168 = arith.constant 0 : index
    %c0_169 = arith.constant 0 : index
    %184 = vector.load %arg2[%c30, %c0_168, %c0_169] : memref<49x8x8xbf16, #tpu.memory_space<vmem>>, vector<1x8x8xbf16>
    %185 = vector.shape_cast %184 : vector<1x8x8xbf16> to vector<8x8xbf16>
    %cst_170 = arith.constant dense<0.000000e+00> : vector<8x352xf32>
    %186 = tpu.matmul %185, %183, %cst_170 {dimension_numbers = #tpu.dot_dimension_numbers<[1], [0], [0], [1], [0, 0, 1, 1], [], []>} : vector<8x8xbf16>, vector<8x352xbf16>, vector<8x352xf32> -> vector<8x352xf32>
    %187 = arith.addf %181, %186 : vector<8x352xf32>
    %c0_171 = arith.constant 0 : index
    %c0_172 = arith.constant 0 : index
    %c91 = arith.constant 91 : index
    %188 = vector.load %arg1[%c0_171, %c0_172, %c91] : memref<1x8x512xbf16, #tpu.memory_space<vmem>>, vector<1x8x352xbf16>
    %189 = vector.shape_cast %188 : vector<1x8x352xbf16> to vector<8x352xbf16>
    %c31 = arith.constant 31 : index
    %c0_173 = arith.constant 0 : index
    %c0_174 = arith.constant 0 : index
    %190 = vector.load %arg2[%c31, %c0_173, %c0_174] : memref<49x8x8xbf16, #tpu.memory_space<vmem>>, vector<1x8x8xbf16>
    %191 = vector.shape_cast %190 : vector<1x8x8xbf16> to vector<8x8xbf16>
    %cst_175 = arith.constant dense<0.000000e+00> : vector<8x352xf32>
    %192 = tpu.matmul %191, %189, %cst_175 {dimension_numbers = #tpu.dot_dimension_numbers<[1], [0], [0], [1], [0, 0, 1, 1], [], []>} : vector<8x8xbf16>, vector<8x352xbf16>, vector<8x352xf32> -> vector<8x352xf32>
    %193 = arith.addf %187, %192 : vector<8x352xf32>
    %c0_176 = arith.constant 0 : index
    %c0_177 = arith.constant 0 : index
    %c92 = arith.constant 92 : index
    %194 = vector.load %arg1[%c0_176, %c0_177, %c92] : memref<1x8x512xbf16, #tpu.memory_space<vmem>>, vector<1x8x352xbf16>
    %195 = vector.shape_cast %194 : vector<1x8x352xbf16> to vector<8x352xbf16>
    %c32 = arith.constant 32 : index
    %c0_178 = arith.constant 0 : index
    %c0_179 = arith.constant 0 : index
    %196 = vector.load %arg2[%c32, %c0_178, %c0_179] : memref<49x8x8xbf16, #tpu.memory_space<vmem>>, vector<1x8x8xbf16>
    %197 = vector.shape_cast %196 : vector<1x8x8xbf16> to vector<8x8xbf16>
    %cst_180 = arith.constant dense<0.000000e+00> : vector<8x352xf32>
    %198 = tpu.matmul %197, %195, %cst_180 {dimension_numbers = #tpu.dot_dimension_numbers<[1], [0], [0], [1], [0, 0, 1, 1], [], []>} : vector<8x8xbf16>, vector<8x352xbf16>, vector<8x352xf32> -> vector<8x352xf32>
    %199 = arith.addf %193, %198 : vector<8x352xf32>
    %c0_181 = arith.constant 0 : index
    %c0_182 = arith.constant 0 : index
    %c93 = arith.constant 93 : index
    %200 = vector.load %arg1[%c0_181, %c0_182, %c93] : memref<1x8x512xbf16, #tpu.memory_space<vmem>>, vector<1x8x352xbf16>
    %201 = vector.shape_cast %200 : vector<1x8x352xbf16> to vector<8x352xbf16>
    %c33 = arith.constant 33 : index
    %c0_183 = arith.constant 0 : index
    %c0_184 = arith.constant 0 : index
    %202 = vector.load %arg2[%c33, %c0_183, %c0_184] : memref<49x8x8xbf16, #tpu.memory_space<vmem>>, vector<1x8x8xbf16>
    %203 = vector.shape_cast %202 : vector<1x8x8xbf16> to vector<8x8xbf16>
    %cst_185 = arith.constant dense<0.000000e+00> : vector<8x352xf32>
    %204 = tpu.matmul %203, %201, %cst_185 {dimension_numbers = #tpu.dot_dimension_numbers<[1], [0], [0], [1], [0, 0, 1, 1], [], []>} : vector<8x8xbf16>, vector<8x352xbf16>, vector<8x352xf32> -> vector<8x352xf32>
    %205 = arith.addf %199, %204 : vector<8x352xf32>
    %c0_186 = arith.constant 0 : index
    %c0_187 = arith.constant 0 : index
    %c94 = arith.constant 94 : index
    %206 = vector.load %arg1[%c0_186, %c0_187, %c94] : memref<1x8x512xbf16, #tpu.memory_space<vmem>>, vector<1x8x352xbf16>
    %207 = vector.shape_cast %206 : vector<1x8x352xbf16> to vector<8x352xbf16>
    %c34 = arith.constant 34 : index
    %c0_188 = arith.constant 0 : index
    %c0_189 = arith.constant 0 : index
    %208 = vector.load %arg2[%c34, %c0_188, %c0_189] : memref<49x8x8xbf16, #tpu.memory_space<vmem>>, vector<1x8x8xbf16>
    %209 = vector.shape_cast %208 : vector<1x8x8xbf16> to vector<8x8xbf16>
    %cst_190 = arith.constant dense<0.000000e+00> : vector<8x352xf32>
    %210 = tpu.matmul %209, %207, %cst_190 {dimension_numbers = #tpu.dot_dimension_numbers<[1], [0], [0], [1], [0, 0, 1, 1], [], []>} : vector<8x8xbf16>, vector<8x352xbf16>, vector<8x352xf32> -> vector<8x352xf32>
    %211 = arith.addf %205, %210 : vector<8x352xf32>
    %c0_191 = arith.constant 0 : index
    %c0_192 = arith.constant 0 : index
    %c110 = arith.constant 110 : index
    %212 = vector.load %arg1[%c0_191, %c0_192, %c110] : memref<1x8x512xbf16, #tpu.memory_space<vmem>>, vector<1x8x352xbf16>
    %213 = vector.shape_cast %212 : vector<1x8x352xbf16> to vector<8x352xbf16>
    %c35 = arith.constant 35 : index
    %c0_193 = arith.constant 0 : index
    %c0_194 = arith.constant 0 : index
    %214 = vector.load %arg2[%c35, %c0_193, %c0_194] : memref<49x8x8xbf16, #tpu.memory_space<vmem>>, vector<1x8x8xbf16>
    %215 = vector.shape_cast %214 : vector<1x8x8xbf16> to vector<8x8xbf16>
    %cst_195 = arith.constant dense<0.000000e+00> : vector<8x352xf32>
    %216 = tpu.matmul %215, %213, %cst_195 {dimension_numbers = #tpu.dot_dimension_numbers<[1], [0], [0], [1], [0, 0, 1, 1], [], []>} : vector<8x8xbf16>, vector<8x352xbf16>, vector<8x352xf32> -> vector<8x352xf32>
    %217 = arith.addf %211, %216 : vector<8x352xf32>
    %c0_196 = arith.constant 0 : index
    %c0_197 = arith.constant 0 : index
    %c111 = arith.constant 111 : index
    %218 = vector.load %arg1[%c0_196, %c0_197, %c111] : memref<1x8x512xbf16, #tpu.memory_space<vmem>>, vector<1x8x352xbf16>
    %219 = vector.shape_cast %218 : vector<1x8x352xbf16> to vector<8x352xbf16>
    %c36 = arith.constant 36 : index
    %c0_198 = arith.constant 0 : index
    %c0_199 = arith.constant 0 : index
    %220 = vector.load %arg2[%c36, %c0_198, %c0_199] : memref<49x8x8xbf16, #tpu.memory_space<vmem>>, vector<1x8x8xbf16>
    %221 = vector.shape_cast %220 : vector<1x8x8xbf16> to vector<8x8xbf16>
    %cst_200 = arith.constant dense<0.000000e+00> : vector<8x352xf32>
    %222 = tpu.matmul %221, %219, %cst_200 {dimension_numbers = #tpu.dot_dimension_numbers<[1], [0], [0], [1], [0, 0, 1, 1], [], []>} : vector<8x8xbf16>, vector<8x352xbf16>, vector<8x352xf32> -> vector<8x352xf32>
    %223 = arith.addf %217, %222 : vector<8x352xf32>
    %c0_201 = arith.constant 0 : index
    %c0_202 = arith.constant 0 : index
    %c112 = arith.constant 112 : index
    %224 = vector.load %arg1[%c0_201, %c0_202, %c112] : memref<1x8x512xbf16, #tpu.memory_space<vmem>>, vector<1x8x352xbf16>
    %225 = vector.shape_cast %224 : vector<1x8x352xbf16> to vector<8x352xbf16>
    %c37 = arith.constant 37 : index
    %c0_203 = arith.constant 0 : index
    %c0_204 = arith.constant 0 : index
    %226 = vector.load %arg2[%c37, %c0_203, %c0_204] : memref<49x8x8xbf16, #tpu.memory_space<vmem>>, vector<1x8x8xbf16>
    %227 = vector.shape_cast %226 : vector<1x8x8xbf16> to vector<8x8xbf16>
    %cst_205 = arith.constant dense<0.000000e+00> : vector<8x352xf32>
    %228 = tpu.matmul %227, %225, %cst_205 {dimension_numbers = #tpu.dot_dimension_numbers<[1], [0], [0], [1], [0, 0, 1, 1], [], []>} : vector<8x8xbf16>, vector<8x352xbf16>, vector<8x352xf32> -> vector<8x352xf32>
    %229 = arith.addf %223, %228 : vector<8x352xf32>
    %c0_206 = arith.constant 0 : index
    %c0_207 = arith.constant 0 : index
    %c113 = arith.constant 113 : index
    %230 = vector.load %arg1[%c0_206, %c0_207, %c113] : memref<1x8x512xbf16, #tpu.memory_space<vmem>>, vector<1x8x352xbf16>
    %231 = vector.shape_cast %230 : vector<1x8x352xbf16> to vector<8x352xbf16>
    %c38 = arith.constant 38 : index
    %c0_208 = arith.constant 0 : index
    %c0_209 = arith.constant 0 : index
    %232 = vector.load %arg2[%c38, %c0_208, %c0_209] : memref<49x8x8xbf16, #tpu.memory_space<vmem>>, vector<1x8x8xbf16>
    %233 = vector.shape_cast %232 : vector<1x8x8xbf16> to vector<8x8xbf16>
    %cst_210 = arith.constant dense<0.000000e+00> : vector<8x352xf32>
    %234 = tpu.matmul %233, %231, %cst_210 {dimension_numbers = #tpu.dot_dimension_numbers<[1], [0], [0], [1], [0, 0, 1, 1], [], []>} : vector<8x8xbf16>, vector<8x352xbf16>, vector<8x352xf32> -> vector<8x352xf32>
    %235 = arith.addf %229, %234 : vector<8x352xf32>
    %c0_211 = arith.constant 0 : index
    %c0_212 = arith.constant 0 : index
    %c114 = arith.constant 114 : index
    %236 = vector.load %arg1[%c0_211, %c0_212, %c114] : memref<1x8x512xbf16, #tpu.memory_space<vmem>>, vector<1x8x352xbf16>
    %237 = vector.shape_cast %236 : vector<1x8x352xbf16> to vector<8x352xbf16>
    %c39 = arith.constant 39 : index
    %c0_213 = arith.constant 0 : index
    %c0_214 = arith.constant 0 : index
    %238 = vector.load %arg2[%c39, %c0_213, %c0_214] : memref<49x8x8xbf16, #tpu.memory_space<vmem>>, vector<1x8x8xbf16>
    %239 = vector.shape_cast %238 : vector<1x8x8xbf16> to vector<8x8xbf16>
    %cst_215 = arith.constant dense<0.000000e+00> : vector<8x352xf32>
    %240 = tpu.matmul %239, %237, %cst_215 {dimension_numbers = #tpu.dot_dimension_numbers<[1], [0], [0], [1], [0, 0, 1, 1], [], []>} : vector<8x8xbf16>, vector<8x352xbf16>, vector<8x352xf32> -> vector<8x352xf32>
    %241 = arith.addf %235, %240 : vector<8x352xf32>
    %c0_216 = arith.constant 0 : index
    %c0_217 = arith.constant 0 : index
    %c115 = arith.constant 115 : index
    %242 = vector.load %arg1[%c0_216, %c0_217, %c115] : memref<1x8x512xbf16, #tpu.memory_space<vmem>>, vector<1x8x352xbf16>
    %243 = vector.shape_cast %242 : vector<1x8x352xbf16> to vector<8x352xbf16>
    %c40 = arith.constant 40 : index
    %c0_218 = arith.constant 0 : index
    %c0_219 = arith.constant 0 : index
    %244 = vector.load %arg2[%c40, %c0_218, %c0_219] : memref<49x8x8xbf16, #tpu.memory_space<vmem>>, vector<1x8x8xbf16>
    %245 = vector.shape_cast %244 : vector<1x8x8xbf16> to vector<8x8xbf16>
    %cst_220 = arith.constant dense<0.000000e+00> : vector<8x352xf32>
    %246 = tpu.matmul %245, %243, %cst_220 {dimension_numbers = #tpu.dot_dimension_numbers<[1], [0], [0], [1], [0, 0, 1, 1], [], []>} : vector<8x8xbf16>, vector<8x352xbf16>, vector<8x352xf32> -> vector<8x352xf32>
    %247 = arith.addf %241, %246 : vector<8x352xf32>
    %c0_221 = arith.constant 0 : index
    %c0_222 = arith.constant 0 : index
    %c116 = arith.constant 116 : index
    %248 = vector.load %arg1[%c0_221, %c0_222, %c116] : memref<1x8x512xbf16, #tpu.memory_space<vmem>>, vector<1x8x352xbf16>
    %249 = vector.shape_cast %248 : vector<1x8x352xbf16> to vector<8x352xbf16>
    %c41 = arith.constant 41 : index
    %c0_223 = arith.constant 0 : index
    %c0_224 = arith.constant 0 : index
    %250 = vector.load %arg2[%c41, %c0_223, %c0_224] : memref<49x8x8xbf16, #tpu.memory_space<vmem>>, vector<1x8x8xbf16>
    %251 = vector.shape_cast %250 : vector<1x8x8xbf16> to vector<8x8xbf16>
    %cst_225 = arith.constant dense<0.000000e+00> : vector<8x352xf32>
    %252 = tpu.matmul %251, %249, %cst_225 {dimension_numbers = #tpu.dot_dimension_numbers<[1], [0], [0], [1], [0, 0, 1, 1], [], []>} : vector<8x8xbf16>, vector<8x352xbf16>, vector<8x352xf32> -> vector<8x352xf32>
    %253 = arith.addf %247, %252 : vector<8x352xf32>
    %c0_226 = arith.constant 0 : index
    %c0_227 = arith.constant 0 : index
    %c132 = arith.constant 132 : index
    %254 = vector.load %arg1[%c0_226, %c0_227, %c132] : memref<1x8x512xbf16, #tpu.memory_space<vmem>>, vector<1x8x352xbf16>
    %255 = vector.shape_cast %254 : vector<1x8x352xbf16> to vector<8x352xbf16>
    %c42 = arith.constant 42 : index
    %c0_228 = arith.constant 0 : index
    %c0_229 = arith.constant 0 : index
    %256 = vector.load %arg2[%c42, %c0_228, %c0_229] : memref<49x8x8xbf16, #tpu.memory_space<vmem>>, vector<1x8x8xbf16>
    %257 = vector.shape_cast %256 : vector<1x8x8xbf16> to vector<8x8xbf16>
    %cst_230 = arith.constant dense<0.000000e+00> : vector<8x352xf32>
    %258 = tpu.matmul %257, %255, %cst_230 {dimension_numbers = #tpu.dot_dimension_numbers<[1], [0], [0], [1], [0, 0, 1, 1], [], []>} : vector<8x8xbf16>, vector<8x352xbf16>, vector<8x352xf32> -> vector<8x352xf32>
    %259 = arith.addf %253, %258 : vector<8x352xf32>
    %c0_231 = arith.constant 0 : index
    %c0_232 = arith.constant 0 : index
    %c133 = arith.constant 133 : index
    %260 = vector.load %arg1[%c0_231, %c0_232, %c133] : memref<1x8x512xbf16, #tpu.memory_space<vmem>>, vector<1x8x352xbf16>
    %261 = vector.shape_cast %260 : vector<1x8x352xbf16> to vector<8x352xbf16>
    %c43 = arith.constant 43 : index
    %c0_233 = arith.constant 0 : index
    %c0_234 = arith.constant 0 : index
    %262 = vector.load %arg2[%c43, %c0_233, %c0_234] : memref<49x8x8xbf16, #tpu.memory_space<vmem>>, vector<1x8x8xbf16>
    %263 = vector.shape_cast %262 : vector<1x8x8xbf16> to vector<8x8xbf16>
    %cst_235 = arith.constant dense<0.000000e+00> : vector<8x352xf32>
    %264 = tpu.matmul %263, %261, %cst_235 {dimension_numbers = #tpu.dot_dimension_numbers<[1], [0], [0], [1], [0, 0, 1, 1], [], []>} : vector<8x8xbf16>, vector<8x352xbf16>, vector<8x352xf32> -> vector<8x352xf32>
    %265 = arith.addf %259, %264 : vector<8x352xf32>
    %c0_236 = arith.constant 0 : index
    %c0_237 = arith.constant 0 : index
    %c134 = arith.constant 134 : index
    %266 = vector.load %arg1[%c0_236, %c0_237, %c134] : memref<1x8x512xbf16, #tpu.memory_space<vmem>>, vector<1x8x352xbf16>
    %267 = vector.shape_cast %266 : vector<1x8x352xbf16> to vector<8x352xbf16>
    %c44_238 = arith.constant 44 : index
    %c0_239 = arith.constant 0 : index
    %c0_240 = arith.constant 0 : index
    %268 = vector.load %arg2[%c44_238, %c0_239, %c0_240] : memref<49x8x8xbf16, #tpu.memory_space<vmem>>, vector<1x8x8xbf16>
    %269 = vector.shape_cast %268 : vector<1x8x8xbf16> to vector<8x8xbf16>
    %cst_241 = arith.constant dense<0.000000e+00> : vector<8x352xf32>
    %270 = tpu.matmul %269, %267, %cst_241 {dimension_numbers = #tpu.dot_dimension_numbers<[1], [0], [0], [1], [0, 0, 1, 1], [], []>} : vector<8x8xbf16>, vector<8x352xbf16>, vector<8x352xf32> -> vector<8x352xf32>
    %271 = arith.addf %265, %270 : vector<8x352xf32>
    %c0_242 = arith.constant 0 : index
    %c0_243 = arith.constant 0 : index
    %c135 = arith.constant 135 : index
    %272 = vector.load %arg1[%c0_242, %c0_243, %c135] : memref<1x8x512xbf16, #tpu.memory_space<vmem>>, vector<1x8x352xbf16>
    %273 = vector.shape_cast %272 : vector<1x8x352xbf16> to vector<8x352xbf16>
    %c45_244 = arith.constant 45 : index
    %c0_245 = arith.constant 0 : index
    %c0_246 = arith.constant 0 : index
    %274 = vector.load %arg2[%c45_244, %c0_245, %c0_246] : memref<49x8x8xbf16, #tpu.memory_space<vmem>>, vector<1x8x8xbf16>
    %275 = vector.shape_cast %274 : vector<1x8x8xbf16> to vector<8x8xbf16>
    %cst_247 = arith.constant dense<0.000000e+00> : vector<8x352xf32>
    %276 = tpu.matmul %275, %273, %cst_247 {dimension_numbers = #tpu.dot_dimension_numbers<[1], [0], [0], [1], [0, 0, 1, 1], [], []>} : vector<8x8xbf16>, vector<8x352xbf16>, vector<8x352xf32> -> vector<8x352xf32>
    %277 = arith.addf %271, %276 : vector<8x352xf32>
    %c0_248 = arith.constant 0 : index
    %c0_249 = arith.constant 0 : index
    %c136 = arith.constant 136 : index
    %278 = vector.load %arg1[%c0_248, %c0_249, %c136] : memref<1x8x512xbf16, #tpu.memory_space<vmem>>, vector<1x8x352xbf16>
    %279 = vector.shape_cast %278 : vector<1x8x352xbf16> to vector<8x352xbf16>
    %c46_250 = arith.constant 46 : index
    %c0_251 = arith.constant 0 : index
    %c0_252 = arith.constant 0 : index
    %280 = vector.load %arg2[%c46_250, %c0_251, %c0_252] : memref<49x8x8xbf16, #tpu.memory_space<vmem>>, vector<1x8x8xbf16>
    %281 = vector.shape_cast %280 : vector<1x8x8xbf16> to vector<8x8xbf16>
    %cst_253 = arith.constant dense<0.000000e+00> : vector<8x352xf32>
    %282 = tpu.matmul %281, %279, %cst_253 {dimension_numbers = #tpu.dot_dimension_numbers<[1], [0], [0], [1], [0, 0, 1, 1], [], []>} : vector<8x8xbf16>, vector<8x352xbf16>, vector<8x352xf32> -> vector<8x352xf32>
    %283 = arith.addf %277, %282 : vector<8x352xf32>
    %c0_254 = arith.constant 0 : index
    %c0_255 = arith.constant 0 : index
    %c137 = arith.constant 137 : index
    %284 = vector.load %arg1[%c0_254, %c0_255, %c137] : memref<1x8x512xbf16, #tpu.memory_space<vmem>>, vector<1x8x352xbf16>
    %285 = vector.shape_cast %284 : vector<1x8x352xbf16> to vector<8x352xbf16>
    %c47_256 = arith.constant 47 : index
    %c0_257 = arith.constant 0 : index
    %c0_258 = arith.constant 0 : index
    %286 = vector.load %arg2[%c47_256, %c0_257, %c0_258] : memref<49x8x8xbf16, #tpu.memory_space<vmem>>, vector<1x8x8xbf16>
    %287 = vector.shape_cast %286 : vector<1x8x8xbf16> to vector<8x8xbf16>
    %cst_259 = arith.constant dense<0.000000e+00> : vector<8x352xf32>
    %288 = tpu.matmul %287, %285, %cst_259 {dimension_numbers = #tpu.dot_dimension_numbers<[1], [0], [0], [1], [0, 0, 1, 1], [], []>} : vector<8x8xbf16>, vector<8x352xbf16>, vector<8x352xf32> -> vector<8x352xf32>
    %289 = arith.addf %283, %288 : vector<8x352xf32>
    %c0_260 = arith.constant 0 : index
    %c0_261 = arith.constant 0 : index
    %c138 = arith.constant 138 : index
    %290 = vector.load %arg1[%c0_260, %c0_261, %c138] : memref<1x8x512xbf16, #tpu.memory_space<vmem>>, vector<1x8x352xbf16>
    %291 = vector.shape_cast %290 : vector<1x8x352xbf16> to vector<8x352xbf16>
    %c48_262 = arith.constant 48 : index
    %c0_263 = arith.constant 0 : index
    %c0_264 = arith.constant 0 : index
    %292 = vector.load %arg2[%c48_262, %c0_263, %c0_264] : memref<49x8x8xbf16, #tpu.memory_space<vmem>>, vector<1x8x8xbf16>
    %293 = vector.shape_cast %292 : vector<1x8x8xbf16> to vector<8x8xbf16>
    %cst_265 = arith.constant dense<0.000000e+00> : vector<8x352xf32>
    %294 = tpu.matmul %293, %291, %cst_265 {dimension_numbers = #tpu.dot_dimension_numbers<[1], [0], [0], [1], [0, 0, 1, 1], [], []>} : vector<8x8xbf16>, vector<8x352xbf16>, vector<8x352xf32> -> vector<8x352xf32>
    %295 = arith.addf %289, %294 : vector<8x352xf32>
    %296 = vector.broadcast %0 : vector<8x1xf32> to vector<8x352xf32>
    %297 = arith.addf %295, %296 : vector<8x352xf32>
    %298 = math.tanh %297 : vector<8x352xf32>
    %c0_266 = arith.constant 0 : index
    %c0_267 = arith.constant 0 : index
    %c0_268 = arith.constant 0 : index
    %299 = vector.load %arg6[%c0_266, %c0_267, %c0_268] : memref<1x8x352xf32, #tpu.memory_space<vmem>>, vector<1x8x352xf32>
    %300 = vector.shape_cast %299 : vector<1x8x352xf32> to vector<8x352xf32>
    %301 = vector.shape_cast %298 : vector<8x352xf32> to vector<1x8x352xf32>
    tpu.vector_store %arg6[%c0_266, %c0_267, %c0_268], %301 {strides = array<i32>} : memref<1x8x352xf32, #tpu.memory_space<vmem>>, vector<1x8x352xf32>,
    return
  }
  func.func @transform_0(%arg0: i32) -> (i32, i32, i32) {
    %c0_i32 = arith.constant 0 : i32
    %c0_i32_0 = arith.constant 0 : i32
    %c0_i32_1 = arith.constant 0 : i32
    return %arg0, %c0_i32, %c0_i32_0 : i32, i32, i32
  }
  func.func @transform_1(%arg0: i32) -> (i32, i32, i32) {
    %c0_i32 = arith.constant 0 : i32
    %c0_i32_0 = arith.constant 0 : i32
    %c0_i32_1 = arith.constant 0 : i32
    %c0_i32_2 = arith.constant 0 : i32
    return %c0_i32, %c0_i32_0, %c0_i32_1 : i32, i32, i32
  }
  func.func @transform_2(%arg0: i32) -> (i32, i32) {
    %c0_i32 = arith.constant 0 : i32
    %c0_i32_0 = arith.constant 0 : i32
    %c0_i32_1 = arith.constant 0 : i32
    return %c0_i32, %c0_i32_0 : i32, i32
  }
  func.func @transform_3(%arg0: i32) -> (i32, i32) {
    %c0_i32 = arith.constant 0 : i32
    %c0_i32_0 = arith.constant 0 : i32
    %c0_i32_1 = arith.constant 0 : i32
    return %c0_i32, %c0_i32_0 : i32, i32
  }
  func.func @transform_4(%arg0: i32) -> (i32, i32) {
    %c0_i32 = arith.constant 0 : i32
    %c0_i32_0 = arith.constant 0 : i32
    %c0_i32_1 = arith.constant 0 : i32
    return %c0_i32, %c0_i32_0 : i32, i32
  }
  func.func @transform_5(%arg0: i32) -> (i32, i32, i32) {
    %c0_i32 = arith.constant 0 : i32
    %c0_i32_0 = arith.constant 0 : i32
    %c0_i32_1 = arith.constant 0 : i32
    return %arg0, %c0_i32, %c0_i32_0 : i32, i32, i32
  }
}

module attributes {stable_mosaic.version = 11 : i64} {
  func.func @region_stats_kernel(%arg0: i32, %arg1: i32, %arg2: memref<8x1xi32, #tpu.memory_space<vmem>>, %arg3: memref<1x8x352xf32, #tpu.memory_space<vmem>>, %arg4: memref<1x1x352xi32, #tpu.memory_space<vmem>>, %arg5: memref<1x8x8xf32, #tpu.memory_space<vmem>>, %arg6: memref<8x8xf32, #tpu.memory_space<vmem>>) attributes {dimension_semantics = [#tpu.dimension_semantics<parallel>, #tpu.dimension_semantics<arbitrary>], iteration_bounds = array<i64: 2, 1>, scalar_prefetch = 0 : i64, scratch_operands = 1 : i64, tpu.core_type = #tpu.core_type<tc>, window_params = [{pipeline_mode = #tpu.pipeline_mode<synchronous>, transform_indices = @transform_0, window_bounds = array<i64: 8, 1>}, {transform_indices = @transform_1, window_bounds = array<i64: 1, 8, 352>}, {transform_indices = @transform_2, window_bounds = array<i64: 1, 1, 352>}, {transform_indices = @transform_3, window_bounds = array<i64: 1, 8, 8>}]} {
    %c0_i32 = arith.constant 0 : i32
    %0 = arith.cmpi eq, %arg1, %c0_i32 : i32
    %1 = arith.extui %0 : i1 to i32
    %c0_i32_0 = arith.constant 0 : i32
    %2 = arith.cmpi ne, %1, %c0_i32_0 : i32
    scf.if %2 {
      %cst_14 = arith.constant 0.000000e+00 : f32
      %20 = vector.broadcast %cst_14 : f32 to vector<8x8xf32>
      %c0_15 = arith.constant 0 : index
      %c0_16 = arith.constant 0 : index
      %21 = vector.load %arg6[%c0_15, %c0_16] : memref<8x8xf32, #tpu.memory_space<vmem>>, vector<8x8xf32>
      tpu.vector_store %arg6[%c0_15, %c0_16], %20 {strides = array<i32>} : memref<8x8xf32, #tpu.memory_space<vmem>>, vector<8x8xf32>,
    } else {
    }
    %c0 = arith.constant 0 : index
    %c0_1 = arith.constant 0 : index
    %c0_2 = arith.constant 0 : index
    %3 = vector.load %arg4[%c0, %c0_1, %c0_2] : memref<1x1x352xi32, #tpu.memory_space<vmem>>, vector<1x1x352xi32>
    %4 = vector.shape_cast %3 : vector<1x1x352xi32> to vector<1x352xi32>
    %c0_3 = arith.constant 0 : index
    %c0_4 = arith.constant 0 : index
    %5 = vector.load %arg2[%c0_3, %c0_4] : memref<8x1xi32, #tpu.memory_space<vmem>>, vector<8x1xi32>
    %6 = vector.broadcast %4 : vector<1x352xi32> to vector<8x352xi32>
    %7 = vector.broadcast %5 : vector<8x1xi32> to vector<8x352xi32>
    %8 = arith.cmpi eq, %6, %7 : vector<8x352xi32>
    %9 = arith.extui %8 : vector<8x352xi1> to vector<8x352xi32>
    %10 = arith.sitofp %9 : vector<8x352xi32> to vector<8x352xf32>
    %c0_5 = arith.constant 0 : index
    %c0_6 = arith.constant 0 : index
    %11 = vector.load %arg6[%c0_5, %c0_6] : memref<8x8xf32, #tpu.memory_space<vmem>>, vector<8x8xf32>
    %c0_7 = arith.constant 0 : index
    %c0_8 = arith.constant 0 : index
    %c0_9 = arith.constant 0 : index
    %12 = vector.load %arg3[%c0_7, %c0_8, %c0_9] : memref<1x8x352xf32, #tpu.memory_space<vmem>>, vector<1x8x352xf32>
    %13 = vector.shape_cast %12 : vector<1x8x352xf32> to vector<8x352xf32>
    %cst = arith.constant dense<0.000000e+00> : vector<8x8xf32>
    %14 = tpu.matmul %13, %10, %cst {dimension_numbers = #tpu.dot_dimension_numbers<[1], [1], [0], [0], [0, 0, 1, 0], [], []>} : vector<8x352xf32>, vector<8x352xf32>, vector<8x8xf32> -> vector<8x8xf32>
    %15 = arith.addf %11, %14 : vector<8x8xf32>
    %c0_10 = arith.constant 0 : index
    %c0_11 = arith.constant 0 : index
    %16 = vector.load %arg6[%c0_10, %c0_11] : memref<8x8xf32, #tpu.memory_space<vmem>>, vector<8x8xf32>
    tpu.vector_store %arg6[%c0_10, %c0_11], %15 {strides = array<i32>} : memref<8x8xf32, #tpu.memory_space<vmem>>, vector<8x8xf32>,
    %c0_i32_12 = arith.constant 0 : i32
    %17 = arith.cmpi eq, %arg1, %c0_i32_12 : i32
    %18 = arith.extui %17 : i1 to i32
    %c0_i32_13 = arith.constant 0 : i32
    %19 = arith.cmpi ne, %18, %c0_i32_13 : i32
    scf.if %19 {
      %c0_14 = arith.constant 0 : index
      %c0_15 = arith.constant 0 : index
      %20 = vector.load %arg6[%c0_14, %c0_15] : memref<8x8xf32, #tpu.memory_space<vmem>>, vector<8x8xf32>
      %21 = vector.extract_strided_slice %20 {offsets = [7, 0], sizes = [1, 8], strides = [1, 1]} : vector<8x8xf32> to vector<1x8xf32>
      %cst_16 = arith.constant 1.000000e+00 : f32
      %22 = vector.broadcast %cst_16 : f32 to vector<1x8xf32>
      %23 = arith.maximumf %21, %22 : vector<1x8xf32>
      %24 = vector.broadcast %23 : vector<1x8xf32> to vector<8x8xf32>
      %25 = arith.divf %20, %24 : vector<8x8xf32>
      %c0_17 = arith.constant 0 : index
      %c0_18 = arith.constant 0 : index
      %c0_19 = arith.constant 0 : index
      %26 = vector.load %arg5[%c0_17, %c0_18, %c0_19] : memref<1x8x8xf32, #tpu.memory_space<vmem>>, vector<1x8x8xf32>
      %27 = vector.shape_cast %26 : vector<1x8x8xf32> to vector<8x8xf32>
      %28 = vector.shape_cast %25 : vector<8x8xf32> to vector<1x8x8xf32>
      tpu.vector_store %arg5[%c0_17, %c0_18, %c0_19], %28 {strides = array<i32>} : memref<1x8x8xf32, #tpu.memory_space<vmem>>, vector<1x8x8xf32>,
    } else {
    }
    return
  }
  func.func @transform_0(%arg0: i32, %arg1: i32) -> (i32, i32) {
    %c0_i32 = arith.constant 0 : i32
    %c0_i32_0 = arith.constant 0 : i32
    %c0_i32_1 = arith.constant 0 : i32
    return %c0_i32, %c0_i32_0 : i32, i32
  }
  func.func @transform_1(%arg0: i32, %arg1: i32) -> (i32, i32, i32) {
    %c0_i32 = arith.constant 0 : i32
    %c0_i32_0 = arith.constant 0 : i32
    return %arg0, %c0_i32, %arg1 : i32, i32, i32
  }
  func.func @transform_2(%arg0: i32, %arg1: i32) -> (i32, i32, i32) {
    %c0_i32 = arith.constant 0 : i32
    %c0_i32_0 = arith.constant 0 : i32
    return %arg0, %c0_i32, %arg1 : i32, i32, i32
  }
  func.func @transform_3(%arg0: i32, %arg1: i32) -> (i32, i32, i32) {
    %c0_i32 = arith.constant 0 : i32
    %c0_i32_0 = arith.constant 0 : i32
    %c0_i32_1 = arith.constant 0 : i32
    return %arg0, %c0_i32, %c0_i32_0 : i32, i32, i32
  }
}

module attributes {stable_mosaic.version = 11 : i64} {
  func.func @region_bcast_kernel(%arg0: i32, %arg1: i32, %arg2: memref<8x1xi32, #tpu.memory_space<vmem>>, %arg3: memref<1x8x8xf32, #tpu.memory_space<vmem>>, %arg4: memref<1x1x352xi32, #tpu.memory_space<vmem>>, %arg5: memref<1x8x352xf32, #tpu.memory_space<vmem>>) attributes {dimension_semantics = [#tpu.dimension_semantics<parallel>, #tpu.dimension_semantics<arbitrary>], iteration_bounds = array<i64: 2, 1>, scalar_prefetch = 0 : i64, scratch_operands = 0 : i64, tpu.core_type = #tpu.core_type<tc>, window_params = [{pipeline_mode = #tpu.pipeline_mode<synchronous>, transform_indices = @transform_0, window_bounds = array<i64: 8, 1>}, {transform_indices = @transform_1, window_bounds = array<i64: 1, 8, 8>}, {transform_indices = @transform_2, window_bounds = array<i64: 1, 1, 352>}, {transform_indices = @transform_3, window_bounds = array<i64: 1, 8, 352>}]} {
    %c0 = arith.constant 0 : index
    %c0_0 = arith.constant 0 : index
    %c0_1 = arith.constant 0 : index
    %0 = vector.load %arg4[%c0, %c0_0, %c0_1] : memref<1x1x352xi32, #tpu.memory_space<vmem>>, vector<1x1x352xi32>
    %1 = vector.shape_cast %0 : vector<1x1x352xi32> to vector<1x352xi32>
    %c0_2 = arith.constant 0 : index
    %c0_3 = arith.constant 0 : index
    %2 = vector.load %arg2[%c0_2, %c0_3] : memref<8x1xi32, #tpu.memory_space<vmem>>, vector<8x1xi32>
    %3 = vector.broadcast %1 : vector<1x352xi32> to vector<8x352xi32>
    %4 = vector.broadcast %2 : vector<8x1xi32> to vector<8x352xi32>
    %5 = arith.cmpi eq, %3, %4 : vector<8x352xi32>
    %6 = arith.extui %5 : vector<8x352xi1> to vector<8x352xi32>
    %7 = arith.sitofp %6 : vector<8x352xi32> to vector<8x352xf32>
    %c0_4 = arith.constant 0 : index
    %c0_5 = arith.constant 0 : index
    %c0_6 = arith.constant 0 : index
    %8 = vector.load %arg3[%c0_4, %c0_5, %c0_6] : memref<1x8x8xf32, #tpu.memory_space<vmem>>, vector<1x8x8xf32>
    %9 = vector.shape_cast %8 : vector<1x8x8xf32> to vector<8x8xf32>
    %cst = arith.constant dense<0.000000e+00> : vector<8x352xf32>
    %10 = tpu.matmul %9, %7, %cst {dimension_numbers = #tpu.dot_dimension_numbers<[1], [0], [0], [1], [0, 0, 1, 1], [], []>} : vector<8x8xf32>, vector<8x352xf32>, vector<8x352xf32> -> vector<8x352xf32>
    %c0_7 = arith.constant 0 : index
    %c0_8 = arith.constant 0 : index
    %c0_9 = arith.constant 0 : index
    %11 = vector.load %arg5[%c0_7, %c0_8, %c0_9] : memref<1x8x352xf32, #tpu.memory_space<vmem>>, vector<1x8x352xf32>
    %12 = vector.shape_cast %11 : vector<1x8x352xf32> to vector<8x352xf32>
    %13 = vector.shape_cast %10 : vector<8x352xf32> to vector<1x8x352xf32>
    tpu.vector_store %arg5[%c0_7, %c0_8, %c0_9], %13 {strides = array<i32>} : memref<1x8x352xf32, #tpu.memory_space<vmem>>, vector<1x8x352xf32>,
    return
  }
  func.func @transform_0(%arg0: i32, %arg1: i32) -> (i32, i32) {
    %c0_i32 = arith.constant 0 : i32
    %c0_i32_0 = arith.constant 0 : i32
    %c0_i32_1 = arith.constant 0 : i32
    return %c0_i32, %c0_i32_0 : i32, i32
  }
  func.func @transform_1(%arg0: i32, %arg1: i32) -> (i32, i32, i32) {
    %c0_i32 = arith.constant 0 : i32
    %c0_i32_0 = arith.constant 0 : i32
    %c0_i32_1 = arith.constant 0 : i32
    return %arg0, %c0_i32, %c0_i32_0 : i32, i32, i32
  }
  func.func @transform_2(%arg0: i32, %arg1: i32) -> (i32, i32, i32) {
    %c0_i32 = arith.constant 0 : i32
    %c0_i32_0 = arith.constant 0 : i32
    return %arg0, %c0_i32, %arg1 : i32, i32, i32
  }
  func.func @transform_3(%arg0: i32, %arg1: i32) -> (i32, i32, i32) {
    %c0_i32 = arith.constant 0 : i32
    %c0_i32_0 = arith.constant 0 : i32
    return %arg0, %c0_i32, %arg1 : i32, i32, i32
  }
}

</mosaic_0001>

<bundles_post_ra>
// kernel: encoder_forward.9
= control target key start
LH: loop header
LB: loop body
LE: loop exit
PB: predicated region body
PF: predicated region fallthrough
CT: control target
= control target key end

     0   :  { %s1178_s18 = smov 0   ;;  %s1292_s0 = inlined_call_operand.vmem [shape: bf16[2,8,384], index: 0, kind: input, shape index: {}]   ;;  %s1293_s1 = inlined_call_operand.vmem [shape: bf16[9,16,8], index: 1, kind: input, shape index: {}]   ;;  %s1294_s2 = inlined_call_operand.vmem [shape: f32[1,72], index: 2, kind: input, shape index: {}]   ;;  %s1295_s3 = inlined_call_operand.vmem [shape: f32[16,1], index: 3, kind: input, shape index: {}]   ;;  %s1296_s4 = inlined_call_operand.vmem [shape: f32[16,1], index: 4, kind: input, shape index: {}]   ;;  %s1297_s5 = inlined_call_operand.vmem [shape: bf16[2,16,72], index: 5, kind: output, shape index: {}]  }
   0x1 LB: > { %s930_s19 = sadd.s32 4294967295, %s1135_s18   ;;  %p934_p0 = scmp.ge.s32.totalorder %s1135_s18, 1  ;;  %s1135_s18 = sphi %s1178_s18, %s15_s18  }
   0x2   : > { %p187_p1 = scmp.lt.s32.totalorder %s1135_s18, 3 }
   0x4   : > { %p188_p2 = pnand %p934_p0, %p187_p1 }
   0x5   : > { %p215_p3 = scmp.lt.s32.totalorder (!%p188_p2), %s930_s19, 1  ;;  %v1137_v0 = vmov (!%p188_p2), 0.0   ;;  %vm1138_vm0 = vmmov (!%p188_p2), 0   ;;  %s1139_s24 = smov (!%p188_p2), 13   ;;  %vm247_vm1 = vcmask (!%p188_p2), 384000   ;;  %vm493_vm2 = vcmask (!%p188_p2), 105472  }
   0x6   : > { %191 = sbr.rel (%p188_p2) target bundleno = 864 (0x360), region = 40  ;;  %1004 = vmatprep.subr.bf16.mxu1 (!%p188_p2), %v1137_v0  ;;  %1028 = vmatprep.subr.bf16.mxu0 (!%p188_p2), %v1137_v0  ;;  %s1140_s25 = smov (!%p188_p2), 47   ;;  %vm253_vm3 = vcmask (!%p188_p2), 1043456   ;;  %v1116_v18 = vld [vmem:[%s1293_s1 + $0x8] sm:$0xff] (!%p188_p2)   ;;  %v1117_v19 = vld [vmem:[%s1293_s1 + $0x20] sm:$0xff] (!%p188_p2)   ;;  %vm249_vm4 = vcmask (!%p188_p2), 64512  }
   0x7   : > { %1006 = vmatprep.mubr.msk.bf16.mxu1 (!%p188_p2), %vm1138_vm0, %v1137_v0  ;;  %1030 = vmatprep.mubr.msk.bf16.mxu0 (!%p188_p2), %vm1138_vm0, %v1137_v0  ;;  %s1141_s26 = smov (!%p188_p2), 93   ;;  %s1142_s27 = smov (!%p188_p2), 119   ;;  %v1118_v26 = vld [vmem:[%s1293_s1] sm:$0xff] (!%p188_p2)   ;;  %v1119_v27 = vld [vmem:[%s1293_s1 + $0x28] sm:$0xff] (!%p188_p2)   ;;  %vm674_vm5 = vcmask (!%p188_p2), 310272   ;;  %v1120_v33 = vld [vmem:[%s1293_s1 + $0x10] sm:$0xff] (!%p188_p2)  }
   0x8   : > { %s1143_s28 = smov (!%p188_p2), 38   ;;  %s1144_s29 = smov (!%p188_p2), 127   ;;  %v1121_v34 = vld [vmem:[%s1293_s1 + $0x30] sm:$0xff] (!%p188_p2)   ;;  %v1122_v38 = vld [vmem:[%s1293_s1 + $0x18] sm:$0xff] (!%p188_p2)   ;;  %v1124_v41 = vld [vmem:[%s1293_s1 + $0x40] sm:$0xff] (!%p188_p2)   ;;  %vm784_vm6 = vcmask (!%p188_p2), 588800  }
   0x9   : > { %s1145_s30 = smov (!%p188_p2), 94   ;;  %s1146_s6 = smov (!%p188_p2), 118   ;;  %v1123_v39 = vld [vmem:[%s1293_s1 + $0x38] sm:$0xff] (!%p188_p2)   ;;  %v978_v47 = vld [vmem:[%s1294_s2] ss:$0 sm:$0xff] (!%p188_p2)  ;;  %vm872_vm7 = vcmask (!%p188_p2), 584704  }
   0xd   : > { %s1299_s19 = smov (!%p215_p3, %s930_s19), 1 }
   0xe   : > { %s1088_s20 = smul.u32 12, %s1299_s19  ;;  %s983_s12 = sshll.u32 %s1299_s19, 3 }
   0xf   : > { %s224_s15 = scalar_lea.vmem %s1297_s5, %s983_s12 }
  0x10   : > { %s219_s23 = scalar_lea.vmem %s1292_s0, %s1088_s20 }
  0x11   : > { %v475_v1 = vld [vmem:[%s219_s23 + $0x4] sm:$0xff]  ;;  %v226_v5 = vld [vmem:[%s219_s23] sm:$0xf] }
  0x12   : > { %v229_v2 = vld [vmem:[%s219_s23] sm:$0xff]  ;;  %v959_v3 = vcombine.low %v475_v1, %v475_v1  ;;  %v960_v6 = vcombine.high %v475_v1, %v475_v1  ;;  %v949_v9 = vcombine.low %v226_v5, %v226_v5  ;;  %v307_v21 = vsel %vm253_vm3, %v226_v5, 0 }
  0x13   : > { %v941_v4 = vcombine.low %v229_v2, %v229_v2  ;;  %v942_v7 = vcombine.high %v229_v2, %v229_v2  ;;  %v1114_v8 = vld [vmem:[%s219_s23 + $0x4] ss:$0 sps:$4 sm:$0xff]  }
  0x14   : > { %489 = vrot.lane.b32.xlu0 %v959_v3, %s1139_s24 }
  0x15   : > { %243 = vrot.lane.b32.xlu1 %v941_v4, %s1140_s25 }
  0x18   : > { %491 = vrot.lane.b32.xlu0 %v960_v6, %s1139_s24 }
  0x19   : > { %245 = vrot.lane.b32.xlu1 %v942_v7, %s1140_s25 }
  0x1c   : > { %552 = vrot.lane.b32.xlu0 %v1114_v8, %s1141_s26 }
  0x1d   : > { %611 = vrot.lane.b32.xlu1 %v949_v9, %s1142_s27 }
  0x20   : > { %670 = vrot.lane.b32.xlu0 %v941_v4, %s1143_s28 }
  0x21   : > { %672 = vrot.lane.b32.xlu1 %v942_v7, %s1143_s28  ;;  %v1147_v7 = vmov 0  }
  0x22   : > { %1108 = vset.pattern.permute.xlu0 %v1147_v7  ;;  %1109 = vset.pattern.permute.xlu1 %v1147_v7 }
  0x24   : > { %361 = vrot.lane.b32.xlu0 %v949_v9, %s1144_s29 }
  0x25   : > { %424 = vrot.lane.b32.xlu1 %v1114_v8, %s1145_s30 }
  0x28   : > { %733 = vrot.lane.b32.xlu0 %v949_v9, %s1146_s6 }
  0x86   : > { %v490_v10 = vpop.permute.xlu0 %489 }
  0x87   : > { %v244_v11 = vpop.permute.xlu1 %243 }
  0x8a   : > { %v492_v12 = vpop.permute.xlu0 %491 }
  0x8b   : > { %v246_v13 = vpop.permute.xlu1 %245  ;;  %v494_v15 = vsel %vm493_vm2, %v490_v10, %v492_v12 }
  0x8c   : > { %v248_v14 = vsel %vm247_vm1, %v244_v11, %v246_v13  ;;  %v499_v17 = vsel %vm253_vm3, %v494_v15, 0 }
  0x8d   : > { %v255_v16 = vsel %vm253_vm3, %v248_v14, 0  ;;  %1029 = vmatpush3.bf16.msra.mxu0 %v499_v17  ;;  %v828_v14 = vld [vmem:[%s1295_s3] sm:$0xff] }
  0x8e   : > { %1005 = vmatpush3.bf16.msra.mxu1 %v255_v16  ;;  %v553_v20 = vpop.permute.xlu0 %552  ;;  %1034 = vmatprep.subr.bf16.mxu0 %v1137_v0  ;;  %v829_v16 = vld [vmem:[%s1295_s3 + $0x8] sm:$0xff] }
  0x8f   : > { %1010 = vmatprep.subr.bf16.mxu1 %v1137_v0  ;;  %v558_v22 = vsel %vm253_vm3, %v553_v20, 0  ;;  %v612_v24 = vpop.permute.xlu1 %611 }
  0x90   : > { %1031 = vmatmul.mubr.msk.bf16.vlgmr.msra.gmra.mrb[0].mxu0 %vm249_vm4, %v1117_v19  ;;  %v617_v28 = vsel %vm253_vm3, %v612_v24, 0  ;;  %v833_v24 = vld [vmem:[%s1296_s4 + $0x8] sm:$0xff] }
  0x91   : > { %1007 = vmatmul.mubr.msk.bf16.vlgmr.msra.gmra.mrb[0].mxu1 %vm249_vm4, %v1116_v18  ;;  %1035 = vmatpush3.bf16.msra.mxu0 %v558_v22 }
  0x92   : > { %1011 = vmatpush3.bf16.msra.mxu1 %v307_v21  ;;  %1012 = vmatprep.mubr.msk.bf16.mxu1 %vm1138_vm0, %v1137_v0  ;;  %v671_v23 = vpop.permute.xlu0 %670  ;;  %v832_v21 = vld [vmem:[%s1296_s4] sm:$0xff] }
  0x93   : > { %1036 = vmatprep.mubr.msk.bf16.mxu0 %vm1138_vm0, %v1137_v0  ;;  %1040 = vmatprep.subr.bf16.mxu0 %v1137_v0  ;;  %v673_v30 = vpop.permute.xlu1 %672 }
  0x94   : > { %1016 = vmatprep.subr.bf16.mxu1 %v1137_v0  ;;  %v675_v31 = vsel %vm674_vm5, %v671_v23, %v673_v30 }
  0x95   : > { %v680_v35 = vsel %vm253_vm3, %v675_v31, 0 }
  0x96   : > { %v362_v25 = vpop.permute.xlu0 %361 }
  0x97   : > { %v367_v29 = vsel %vm253_vm3, %v362_v25, 0  ;;  %v425_v32 = vpop.permute.xlu1 %424 }
  0x98   : > { %v430_v36 = vsel %vm253_vm3, %v425_v32, 0 }
  0x9a   : > { %v734_v37 = vpop.permute.xlu0 %733 }
  0x9b   : > { %v739_v40 = vsel %vm253_vm3, %v734_v37, 0 }
  0x9c   : > { %1037 = vmatmul.mubr.msk.bf16.vlgmr.msra.gmra.mrb[0].mxu0 %vm249_vm4, %v1119_v27 }
  0x9d   : > { %1013 = vmatmul.mubr.msk.bf16.vlgmr.msra.gmra.mrb[0].mxu1 %vm249_vm4, %v1118_v26  ;;  %1041 = vmatpush3.bf16.msra.mxu0 %v617_v28 }
  0x9e   : > { %1017 = vmatpush3.bf16.msra.mxu1 %v367_v29  ;;  %1018 = vmatprep.mubr.msk.bf16.mxu1 %vm1138_vm0, %v1137_v0 }
  0x9f   : > { %1042 = vmatprep.mubr.msk.bf16.mxu0 %vm1138_vm0, %v1137_v0  ;;  %1046 = vmatprep.subr.bf16.mxu0 %v1137_v0 }
  0xa0   : > { %1022 = vmatprep.subr.bf16.mxu1 %v1137_v0 }
  0xa8   : > { %1043 = vmatmul.mubr.msk.bf16.vlgmr.msra.gmra.mrb[0].mxu0 %vm249_vm4, %v1121_v34 }
  0xa9   : > { %1019 = vmatmul.mubr.msk.bf16.vlgmr.msra.gmra.mrb[0].mxu1 %vm249_vm4, %v1120_v33  ;;  %1047 = vmatpush3.bf16.msra.mxu0 %v680_v35 }
  0xaa   : > { %1023 = vmatpush3.bf16.msra.mxu1 %v430_v36  ;;  %1024 = vmatprep.mubr.msk.bf16.mxu1 %vm1138_vm0, %v1137_v0 }
  0xab   : > { %1048 = vmatprep.mubr.msk.bf16.mxu0 %vm1138_vm0, %v1137_v0  ;;  %1052 = vmatprep.subr.bf16.mxu0 %v1137_v0 }
  0xb4   : > { %1049 = vmatmul.mubr.msk.bf16.vlgmr.msra.gmra.mrb[0].mxu0 %vm249_vm4, %v1123_v39 }
  0xb5   : > { %1025 = vmatmul.mubr.msk.bf16.vlgmr.msra.gmra.mrb[0].mxu1 %vm249_vm4, %v1122_v38  ;;  %1053 = vmatpush3.bf16.msra.mxu0 %v739_v40 }
  0xb6   : > { %1054 = vmatprep.mubr.msk.bf16.mxu0 %vm1138_vm0, %v1137_v0 }
  0xc0   : > { %1055 = vmatmul.mubr.msk.bf16.vlgmr.msra.gmra.mrb[0].mxu0 %vm249_vm4, %v1124_v41 }
 0x188   : > { %v466_v42 = vpop.f32.mrb[0].mxu1 }
 0x189   : > { %v1026_v43 = vpop.f32.mrb[1].mxu1 }
 0x18a   : > { %v469_v44 = vpop.f32.mrb[2].mxu1 }
 0x18b   : > { %v1027_v45 = vpop.f32.mrb[3].mxu1 }
 0x193   : > { %v775_v46 = vpop.f32.mrb[0].mxu0 }
 0x194   : > { %v1058_v48 = vadd.f32 %v775_v46, %v466_v42  ;;  %v1056_v49 = vpop.f32.mrb[1].mxu0 }
 0x195   : > { %v778_v50 = vpop.f32.mrb[2].mxu0 }
 0x196   : > { %785 = vst.msk [vmem:[#allocation2] sm:$0xff] %vm784_vm6, %v1058_v48  ;;  %v1059_v51 = vadd.f32 %v778_v50, %v469_v44  ;;  %v1057_v52 = vpop.f32.mrb[3].mxu0  ;;  %v794_v53 = vmul.f32 %v1058_v48, %v978_v47 }
 0x198   : > { %786 = vst.msk [vmem:[#allocation2 + $0x8] sm:$0xff] %vm784_vm6, %v1059_v51  ;;  %v796_v54 = vsel %vm784_vm6, %v794_v53, 0.0  ;;  %v795_v55 = vmul.f32 %v1059_v51, %v978_v47 }
 0x199   : > { %797 = vadd.xlane.f32.xlu1 %v796_v54 }
 0x19a   : > { %v799_v56 = vsel %vm784_vm6, %v795_v55, 0.0 }
 0x19b   : > { %800 = vadd.xlane.f32.xlu0 %v799_v56 }
 0x19d   : > { %v806_v59 = vld [vmem:[#allocation2] sm:$0xff] }
 0x19f   : > { %v807_v63 = vld [vmem:[#allocation2 + $0x8] sm:$0xff] }
 0x226   : > { %v798_v57 = vpop.xlane.xlu1 %797 }
 0x227   : > { %v804_v58 = vmul.f32 0.015625, %v798_v57 }
 0x228   : > { %v801_v60 = vpop.xlane.xlu0 %800 }
 0x229   : > { %v808_v61 = vsub.f32 %v806_v59, %v804_v58  ;;  %v805_v62 = vmul.f32 0.015625, %v801_v60 }
 0x22b   : > { %v809_v0 = vsub.f32 %v807_v63, %v805_v62  ;;  %v810_v1 = vmul.f32 %v978_v47, %v808_v61 }
 0x22d   : > { %v812_v2 = vmul.f32 %v810_v1, %v810_v1  ;;  %v811_v3 = vmul.f32 %v978_v47, %v809_v0 }
 0x22f   : > { %v814_v4 = vsel %vm784_vm6, %v812_v2, 0.0  ;;  %v813_v5 = vmul.f32 %v811_v3, %v811_v3 }
 0x230   : > { %815 = vadd.xlane.f32.xlu0 %v814_v4 }
 0x231   : > { %v817_v6 = vsel %vm784_vm6, %v813_v5, 0.0 }
 0x232   : > { %818 = vadd.xlane.f32.xlu1 %v817_v6 }
 0x2bd   : > { %v816_v8 = vpop.xlane.xlu0 %815 }
 0x2be   : > { %v822_v9 = vmul.f32 0.015625, %v816_v8 }
 0x2bf   : > { %v819_v10 = vpop.xlane.xlu1 %818 }
 0x2c0   : > { %v824_v11 = vadd.f32 1e-05, %v822_v9  ;;  %v823_v12 = vmul.f32 0.015625, %v819_v10 }
 0x2c2   : > { %1125 = vrsqrt.f32 %v824_v11  ;;  %v825_v13 = vadd.f32 1e-05, %v823_v12 }
 0x2c4   : > { %1127 = vrsqrt.f32 %v825_v13 }
 0x2cc   : > { %v1126_v15 = vpop.eup %1125 }
 0x2cd   : > { %v830_v17 = vmul.f32 %v1126_v15, %v828_v14 }
 0x2ce   : > { %v1128_v18 = vpop.eup %1127 }
 0x2cf   : > { %840 = vperm.xlu0 %1108, %v830_v17   ;;  %v831_v19 = vmul.f32 %v1128_v18, %v829_v16  ;;  %v834_v20 = vmul.f32 %v830_v17, %v804_v58 }
 0x2d1   : > { %845 = vperm.xlu1 %1109, %v831_v19   ;;  %v836_v22 = vsub.f32 %v832_v21, %v834_v20  ;;  %v835_v23 = vmul.f32 %v831_v19, %v805_v62 }
 0x2d3   : > { %v837_v25 = vsub.f32 %v833_v24, %v835_v23 }
 0x2d5   : > { %852 = vperm.xlu1 %1109, %v836_v22  }
 0x2d9   : > { %857 = vperm.xlu1 %1109, %v837_v25  }
 0x34e   : > { %v841_v26 = vpop.permute.xlu0 %840 }
 0x34f   : > { %v848_v28 = vmul.f32 %v841_v26, %v806_v59 }
 0x350   : > { %v846_v27 = vpop.permute.xlu1 %845 }
 0x351   : > { %v849_v31 = vmul.f32 %v846_v27, %v807_v63 }
 0x354   : > { %v853_v29 = vpop.permute.xlu1 %852 }
 0x355   : > { %v860_v30 = vadd.f32 %v853_v29, %v848_v28 }
 0x357   : > { %v862_v32 = vmax.f32 %v860_v30, 0.0 }
 0x358   : > { %v858_v33 = vpop.permute.xlu1 %857 }
 0x359   : > { %v984_v34 = vpack.c.bf16 %v862_v32, %v862_v32  ;;  %v861_v35 = vadd.f32 %v858_v33, %v849_v31 }
 0x35b   : > { %873 = vst.msk [vmem:[%s224_s15] sm:$0xf] %vm872_vm7, %v984_v34  ;;  %v863_v36 = vmax.f32 %v861_v35, 0.0 }
 0x35d   : > { %v985_v37 = vpack.c.bf16 %v863_v36, %v863_v36 }
 0x35f   : > { %874 = vst.msk [vmem:[%s224_s15 + $0x4] sm:$0xf] %vm872_vm7, %v985_v37 }
 0x360 PF: > { %s15_s18 = sadd.s32 1, %s1135_s18  }
 0x361   : > { %p12_p4 = scmp.ge.s32.totalorder %s15_s18, 4  }
 0x363   :  { %14 = sbr.rel (!%p12_p4) target bundleno = 1 (0x1), region = 78 }

// kernel: encoder_forward.8
= control target key start
LH: loop header
LB: loop body
LE: loop exit
PB: predicated region body
PF: predicated region fallthrough
CT: control target
= control target key end

     0   :  { %s6866_s18 = smov 0   ;;  %s7777_s0 = inlined_call_operand.vmem [shape: bf16[2,8,512], index: 0, kind: input, shape index: {}]   ;;  %s7778_s1 = inlined_call_operand.vmem [shape: bf16[49,8,8], index: 1, kind: input, shape index: {}]   ;;  %s7779_s2 = inlined_call_operand.vmem [shape: f32[1,352], index: 2, kind: input, shape index: {}]   ;;  %s7780_s3 = inlined_call_operand.vmem [shape: f32[8,1], index: 3, kind: input, shape index: {}]   ;;  %s7781_s4 = inlined_call_operand.vmem [shape: f32[8,1], index: 4, kind: input, shape index: {}]   ;;  %s7782_s5 = inlined_call_operand.vmem [shape: bf16[2,8,352], index: 5, kind: output, shape index: {}]  }
   0x1 LB: > { %s5715_s19 = sadd.s32 4294967295, %s6786_s18   ;;  %p5719_p0 = scmp.ge.s32.totalorder %s6786_s18, 1  ;;  %s6786_s18 = sphi %s6866_s18, %s15_s18  }
   0x2   : > { %p187_p1 = scmp.lt.s32.totalorder %s6786_s18, 3 }
   0x4   : > { %p188_p2 = pnand %p5719_p0, %p187_p1 }
   0x5   : > { %p215_p3 = scmp.lt.s32.totalorder (!%p188_p2), %s5715_s19, 1  ;;  %v6788_v0 = vmov (!%p188_p2), 0.0   ;;  %vm6789_vm0 = vmmov (!%p188_p2), 0   ;;  %v6790_v1 = vmov (!%p188_p2), 0   ;;  %s6791_s24 = smov (!%p188_p2), 127   ;;  %vm252_vm1 = vcmask (!%p188_p2), 1043456  }
   0x6   : > { %191 = sbr.rel (%p188_p2) target bundleno = 1390 (0x56e), region = 40  ;;  %6033 = vmatprep.subr.bf16.mxu1 (!%p188_p2), %v6788_v0  ;;  %6035 = vmatprep.mubr.msk.bf16.mxu1 (!%p188_p2), %vm6789_vm0, %v6788_v0  ;;  %s6792_s25 = smov (!%p188_p2), 126   ;;  %v5723_v12 = vld [vmem:[%s7778_s1 + $0x4] sm:$0xf] (!%p188_p2)  ;;  %vm248_vm2 = vcmask (!%p188_p2), 64512   ;;  %vm245_vm3 = vcmask (!%p188_p2), 1039360  }
   0x7   : > { %294 = vmatprep.mubr.bf16.mxu0 (!%p188_p2), %v6790_v1  ;;  %6768 = vset.pattern.permute.xlu0 (!%p188_p2), %v6790_v1  ;;  %s6793_s26 = smov (!%p188_p2), 125   ;;  %s6794_s27 = smov (!%p188_p2), 124   ;;  %vm444_vm4 = vcmask (!%p188_p2), 1031168   ;;  %v228_v24 = vld [vmem:[%s7778_s1] sm:$0xf] (!%p188_p2)  ;;  %vm551_vm5 = vcmask (!%p188_p2), 1022976  }
   0x8   : > { %6769 = vset.pattern.permute.xlu1 (!%p188_p2), %v6790_v1  ;;  %s6795_s28 = smov (!%p188_p2), 123   ;;  %s6796_s29 = smov (!%p188_p2), 122   ;;  %v5733_v32 = vld [vmem:[%s7778_s1 + $0x8] sm:$0xf] (!%p188_p2)  ;;  %vm658_vm6 = vcmask (!%p188_p2), 1014784   ;;  %vm765_vm7 = vcmask (!%p188_p2), 1006592  }
   0x9   : > { %s6797_s30 = smov (!%p188_p2), 106   ;;  %s6798_s6 = smov (!%p188_p2), 105   ;;  %v5737_v40 = vld [vmem:[%s7778_s1 + $0xc] sm:$0xf] (!%p188_p2)  ;;  %v5741_v48 = vld [vmem:[%s7778_s1 + $0x10] sm:$0xf] (!%p188_p2) }
   0xa   : > { %s6799_s7 = smov (!%p188_p2), 104   ;;  %s6800_s8 = smov (!%p188_p2), 103   ;;  %vm872_vm8 = vcmask (!%p188_p2), 998400   ;;  %v5745_v56 = vld [vmem:[%s7778_s1 + $0x14] sm:$0xf] (!%p188_p2)  ;;  %vm979_vm9 = vcmask (!%p188_p2), 867328  }
   0xb   : > { %s6801_s9 = smov (!%p188_p2), 102   ;;  %s6802_s10 = smov (!%p188_p2), 101   ;;  %vm1086_vm10 = vcmask (!%p188_p2), 859136   ;;  %vm1193_vm11 = vcmask (!%p188_p2), 850944   ;;  %vm1300_vm12 = vcmask (!%p188_p2), 842752   ;;  %vm1407_vm13 = vcmask (!%p188_p2), 834560  }
   0xc   : > { %s6803_s11 = smov (!%p188_p2), 100   ;;  %s6804_s12 = smov (!%p188_p2), 84   ;;  %vm1514_vm14 = vcmask (!%p188_p2), 826368   ;;  %vm1621_vm15 = vcmask (!%p188_p2), 818176  }
   0xd   : > { %s7784_s19 = smov (!%p215_p3, %s5715_s19), 1  ;;  %s6805_s13 = smov 83  }
   0xe   : > { %s5932_s20 = sshll.u32 %s7784_s19, 4  ;;  %s6806_s14 = smov 82  }
   0xf   : > { %s6886_s23 = scalar_lea.vmem %s7777_s0, %s5932_s20  ;;  %s6807_s15 = smov 81  }
  0x10   : > { %v6889_v2 = vld [vmem:[%s6886_s23 + $0x8] ss:$0 sps:$4 sm:$0xff]   ;;  %v1720_v3 = vld [vmem:[%s6886_s23] sm:$0xff]  ;;  %s6808_s16 = smov 80   ;;  %s6809_s21 = smov 79  }
  0x11   : > { %v6892_v4 = vcombine.low %v1720_v3, %v1720_v3  ;;  %243 = vrot.lane.b32.xlu1 %v6889_v2, %s6791_s24  ;;  %v6895_v5 = vcombine.high %v1720_v3, %v1720_v3  ;;  %v1721_v6 = vld [vmem:[%s6886_s23 + $0x8] sm:$0xff]  ;;  %v353_v13 = vsel %vm252_vm1, %v6889_v2, 0  ;;  %s6816_s17 = smov 57   ;;  %s6817_s20 = smov 56  }
  0x12   : > { %v6944_v7 = vcombine.low %v1721_v6, %v1721_v6  ;;  %v6949_v8 = vcombine.high %v1721_v6, %v1721_v6  ;;  %s6824_s22 = smov 34  }
  0x13   : > { %239 = vrot.lane.b32.xlu0 %v6892_v4, %s6791_s24  ;;  %v347_v20 = vsel %vm252_vm1, %v6892_v4, 0 }
  0x15   : > { %438 = vrot.lane.b32.xlu1 %v6892_v4, %s6792_s25 }
  0x17   : > { %241 = vrot.lane.b32.xlu0 %v6895_v5, %s6791_s24  ;;  %s6818_s24 = smov 40  }
  0x19   : > { %442 = vrot.lane.b32.xlu1 %v6889_v2, %s6792_s25 }
  0x1b   : > { %440 = vrot.lane.b32.xlu0 %v6895_v5, %s6792_s25  ;;  %s6810_s25 = smov 78  }
  0x1d   : > { %547 = vrot.lane.b32.xlu1 %v6895_v5, %s6793_s26 }
  0x1f   : > { %545 = vrot.lane.b32.xlu0 %v6892_v4, %s6793_s26 }
  0x21   : > { %652 = vrot.lane.b32.xlu1 %v6892_v4, %s6794_s27 }
  0x23   : > { %549 = vrot.lane.b32.xlu0 %v6889_v2, %s6793_s26  ;;  %s6811_s26 = smov 62  }
  0x25   : > { %656 = vrot.lane.b32.xlu1 %v6889_v2, %s6794_s27 }
  0x27   : > { %654 = vrot.lane.b32.xlu0 %v6895_v5, %s6794_s27 }
  0x29   : > { %761 = vrot.lane.b32.xlu1 %v6895_v5, %s6795_s28 }
  0x2b   : > { %759 = vrot.lane.b32.xlu0 %v6892_v4, %s6795_s28 }
  0x2d   : > { %866 = vrot.lane.b32.xlu1 %v6892_v4, %s6796_s29 }
  0x2f   : > { %763 = vrot.lane.b32.xlu0 %v6889_v2, %s6795_s28 }
  0x31   : > { %870 = vrot.lane.b32.xlu1 %v6889_v2, %s6796_s29 }
  0x33   : > { %868 = vrot.lane.b32.xlu0 %v6895_v5, %s6796_s29 }
  0x35   : > { %975 = vrot.lane.b32.xlu1 %v6895_v5, %s6797_s30 }
  0x37   : > { %973 = vrot.lane.b32.xlu0 %v6892_v4, %s6797_s30 }
  0x39   : > { %1080 = vrot.lane.b32.xlu1 %v6892_v4, %s6798_s6 }
  0x3b   : > { %977 = vrot.lane.b32.xlu0 %v6889_v2, %s6797_s30  ;;  %s6819_s30 = smov 39  }
  0x3d   : > { %1084 = vrot.lane.b32.xlu1 %v6889_v2, %s6798_s6 }
  0x3f   : > { %1082 = vrot.lane.b32.xlu0 %v6895_v5, %s6798_s6 }
  0x41   : > { %1189 = vrot.lane.b32.xlu1 %v6895_v5, %s6799_s7 }
  0x43   : > { %1187 = vrot.lane.b32.xlu0 %v6892_v4, %s6799_s7 }
  0x45   : > { %1294 = vrot.lane.b32.xlu1 %v6892_v4, %s6800_s8 }
  0x47   : > { %1191 = vrot.lane.b32.xlu0 %v6889_v2, %s6799_s7  ;;  %s6812_s7 = smov 61  }
  0x49   : > { %1298 = vrot.lane.b32.xlu1 %v6889_v2, %s6800_s8 }
  0x4b   : > { %1296 = vrot.lane.b32.xlu0 %v6895_v5, %s6800_s8  ;;  %s6820_s8 = smov 38  }
  0x4d   : > { %1403 = vrot.lane.b32.xlu1 %v6895_v5, %s6801_s9 }
  0x4f   : > { %1401 = vrot.lane.b32.xlu0 %v6892_v4, %s6801_s9 }
  0x51   : > { %1508 = vrot.lane.b32.xlu1 %v6892_v4, %s6802_s10 }
  0x53   : > { %1405 = vrot.lane.b32.xlu0 %v6889_v2, %s6801_s9 }
  0x55   : > { %1512 = vrot.lane.b32.xlu1 %v6889_v2, %s6802_s10 }
  0x57   : > { %1510 = vrot.lane.b32.xlu0 %v6895_v5, %s6802_s10  ;;  %s6813_s10 = smov 60  }
  0x59   : > { %1617 = vrot.lane.b32.xlu1 %v6895_v5, %s6803_s11 }
  0x5b   : > { %1615 = vrot.lane.b32.xlu0 %v6892_v4, %s6803_s11 }
  0x5d   : > { %1734 = vrot.lane.b32.xlu1 %v6892_v4, %s6804_s12 }
  0x5f   : > { %1619 = vrot.lane.b32.xlu0 %v6889_v2, %s6803_s11  ;;  %s6814_s11 = smov 59   ;;  %v5749_v2 = vld [vmem:[%s7778_s1 + $0x18] sm:$0xf] }
  0x61   : > { %1738 = vrot.lane.b32.xlu1 %v6944_v7, %s6804_s12 }
  0x63   : > { %1736 = vrot.lane.b32.xlu0 %v6895_v5, %s6804_s12 }
  0x65   : > { %1844 = vrot.lane.b32.xlu1 %v6892_v4, %s6805_s13 }
  0x67   : > { %1740 = vrot.lane.b32.xlu0 %v6949_v8, %s6804_s12 }
  0x69   : > { %1848 = vrot.lane.b32.xlu1 %v6944_v7, %s6805_s13 }
  0x6b   : > { %1846 = vrot.lane.b32.xlu0 %v6895_v5, %s6805_s13 }
  0x6d   : > { %1954 = vrot.lane.b32.xlu1 %v6892_v4, %s6806_s14 }
  0x6f   : > { %1850 = vrot.lane.b32.xlu0 %v6949_v8, %s6805_s13  ;;  %s6828_s13 = smov 15  }
  0x71   : > { %1958 = vrot.lane.b32.xlu1 %v6944_v7, %s6806_s14 }
  0x73   : > { %1956 = vrot.lane.b32.xlu0 %v6895_v5, %s6806_s14 }
  0x75   : > { %2064 = vrot.lane.b32.xlu1 %v6892_v4, %s6807_s15 }
  0x77   : > { %1960 = vrot.lane.b32.xlu0 %v6949_v8, %s6806_s14  ;;  %s6815_s14 = smov 58  }
  0x79   : > { %2068 = vrot.lane.b32.xlu1 %v6944_v7, %s6807_s15 }
  0x7b   : > { %2066 = vrot.lane.b32.xlu0 %v6895_v5, %s6807_s15 }
  0x7d   : > { %2174 = vrot.lane.b32.xlu1 %v6892_v4, %s6808_s16 }
  0x7f   : > { %2070 = vrot.lane.b32.xlu0 %v6949_v8, %s6807_s15 }
  0x81   : > { %2178 = vrot.lane.b32.xlu1 %v6944_v7, %s6808_s16 }
  0x83   : > { %2176 = vrot.lane.b32.xlu0 %v6895_v5, %s6808_s16  ;;  %v244_v9 = vpop.permute.xlu1 %243 }
  0x84   : > { %v260_v11 = vsel %vm252_vm1, %v244_v9, 0 }
  0x85   : > { %v240_v10 = vpop.permute.xlu0 %239  ;;  %6034 = vmatpush3.bf16.msra.mxu1 %v260_v11  ;;  %2284 = vrot.lane.b32.xlu1 %v6892_v4, %s6809_s21 }
  0x86   : > { %6039 = vmatprep.subr.bf16.mxu1 %v6788_v0 }
  0x87   : > { %2180 = vrot.lane.b32.xlu0 %v6949_v8, %s6808_s16  ;;  %v439_v14 = vpop.permute.xlu1 %438  ;;  %s6829_s16 = smov 14  }
  0x88   : > { %6036 = vmatmul.mubr.msk.bf16.vlgmr.msra.gmra.mrb[0].mxu1 %vm248_vm2, %v5723_v12 }
  0x89   : > { %v242_v15 = vpop.permute.xlu0 %241  ;;  %6040 = vmatpush3.bf16.msra.mxu1 %v353_v13  ;;  %6041 = vmatprep.mubr.msk.bf16.mxu1 %vm6789_vm0, %v6788_v0 }
  0x8a   : > { %v247_v16 = vsel %vm245_vm3, %v242_v15, %v244_v9  ;;  %v246_v17 = vsel %vm245_vm3, %v240_v10, %v242_v15  ;;  %6045 = vmatprep.subr.bf16.mxu1 %v6788_v0  ;;  %2288 = vrot.lane.b32.xlu1 %v6944_v7, %s6809_s21  ;;  %vm1742_vm3 = vcmask 687104  }
  0x8b   : > { %5727 = vmatprep.subr.msk.bf16.mxu0 %vm252_vm1, %v247_v16  ;;  %v254_v18 = vsel %vm252_vm1, %v246_v17, 0  ;;  %v443_v19 = vpop.permute.xlu1 %442  ;;  %2286 = vrot.lane.b32.xlu0 %v6895_v5, %s6809_s21 }
  0x8c   : > { %263 = vmatpush1.bf16.msra.mxu0 %v254_v18  ;;  %v457_v25 = vsel %vm252_vm1, %v443_v19, 0 }
  0x8d   : > { %5730 = vmatprep.subr.msk.bf16.mxu0 %vm252_vm1, %v6895_v5  ;;  %v441_v21 = vpop.permute.xlu0 %440 }
  0x8e   : > { %v446_v22 = vsel %vm444_vm4, %v441_v21, %v443_v19  ;;  %2394 = vrot.lane.b32.xlu1 %v6892_v4, %s6810_s25  ;;  %v445_v26 = vsel %vm444_vm4, %v439_v14, %v441_v21  ;;  %v5753_v14 = vld [vmem:[%s7778_s1 + $0x1c] sm:$0xf]  ;;  %vm1852_vm4 = vcmask 678912  }
  0x8f   : > { %5728 = vmatmul.mubr.msk.bf16.vlgmr.msra.gmra.mrb[0].mxu0 %vm248_vm2, %v5723_v12  ;;  %2290 = vrot.lane.b32.xlu0 %v6949_v8, %s6809_s21  ;;  %v548_v27 = vpop.permute.xlu1 %547  ;;  %v451_v29 = vsel %vm252_vm1, %v445_v26, 0  ;;  %s6830_s21 = smov 13  }
  0x90   : > { %356 = vmatpush1.bf16.msra.mxu0 %v347_v20  ;;  %387 = vmatprep.mubr.bf16.mxu0 %v6790_v1 }
  0x91   : > { %5734 = vmatprep.subr.msk.bf16.mxu0 %vm252_vm1, %v446_v22  ;;  %v546_v23 = vpop.permute.xlu0 %545  ;;  %v5757_v22 = vld [vmem:[%s7778_s1 + $0x20] sm:$0xf] }
  0x92   : > { %2398 = vrot.lane.b32.xlu1 %v6944_v7, %s6810_s25  ;;  %v552_v34 = vsel %vm551_vm5, %v546_v23, %v548_v27 }
  0x93   : > { %2396 = vrot.lane.b32.xlu0 %v6895_v5, %s6810_s25  ;;  %v653_v31 = vpop.permute.xlu1 %652  ;;  %v558_v37 = vsel %vm252_vm1, %v552_v34, 0 }
  0x94   : > { %6042 = vmatmul.mubr.msk.bf16.vlgmr.msra.gmra.mrb[0].mxu1 %vm248_vm2, %v228_v24 }
  0x95   : > { %6046 = vmatpush3.bf16.msra.mxu1 %v457_v25  ;;  %6047 = vmatprep.mubr.msk.bf16.mxu1 %vm6789_vm0, %v6788_v0  ;;  %v550_v28 = vpop.permute.xlu0 %549 }
  0x96   : > { %6051 = vmatprep.subr.bf16.mxu1 %v6788_v0  ;;  %v553_v30 = vsel %vm551_vm5, %v548_v27, %v550_v28  ;;  %2504 = vrot.lane.b32.xlu1 %v6892_v4, %s6811_s26  ;;  %v564_v33 = vsel %vm252_vm1, %v550_v28, 0  ;;  %vm1962_vm5 = vcmask 670720  }
  0x97   : > { %2400 = vrot.lane.b32.xlu0 %v6949_v8, %s6810_s25  ;;  %v657_v36 = vpop.permute.xlu1 %656  ;;  %s6831_s25 = smov 12  }
  0x98   : > { %v671_v41 = vsel %vm252_vm1, %v657_v36, 0 }
  0x99   : > { %v655_v35 = vpop.permute.xlu0 %654 }
  0x9a   : > { %2508 = vrot.lane.b32.xlu1 %v6944_v7, %s6811_s26  ;;  %v660_v38 = vsel %vm658_vm6, %v655_v35, %v657_v36  ;;  %v659_v42 = vsel %vm658_vm6, %v653_v31, %v655_v35 }
  0x9b   : > { %5731 = vmatmul.mubr.msk.bf16.vlgmr.msra.gmra.mrb[0].mxu0 %vm248_vm2, %v228_v24  ;;  %2506 = vrot.lane.b32.xlu0 %v6895_v5, %s6811_s26  ;;  %v762_v43 = vpop.permute.xlu1 %761  ;;  %v665_v45 = vsel %vm252_vm1, %v659_v42, 0 }
  0x9c   : > { %460 = vmatpush1.bf16.msra.mxu0 %v451_v29  ;;  %491 = vmatprep.mubr.bf16.mxu0 %v6790_v1 }
  0x9d   : > { %5738 = vmatprep.subr.msk.bf16.mxu0 %vm252_vm1, %v553_v30  ;;  %v760_v39 = vpop.permute.xlu0 %759  ;;  %v5761_v30 = vld [vmem:[%s7778_s1 + $0x24] sm:$0xf] }
  0x9e   : > { %2614 = vrot.lane.b32.xlu1 %v6892_v4, %s6812_s7  ;;  %v766_v50 = vsel %vm765_vm7, %v760_v39, %v762_v43 }
  0x9f   : > { %2510 = vrot.lane.b32.xlu0 %v6949_v8, %s6811_s26  ;;  %v867_v47 = vpop.permute.xlu1 %866  ;;  %v772_v53 = vsel %vm252_vm1, %v766_v50, 0  ;;  %s6825_s26 = smov 18  }
  0xa0   : > { %6048 = vmatmul.mubr.msk.bf16.vlgmr.msra.gmra.mrb[0].mxu1 %vm248_vm2, %v5733_v32 }
  0xa1   : > { %6052 = vmatpush3.bf16.msra.mxu1 %v564_v33  ;;  %6053 = vmatprep.mubr.msk.bf16.mxu1 %vm6789_vm0, %v6788_v0  ;;  %v764_v44 = vpop.permute.xlu0 %763 }
  0xa2   : > { %6057 = vmatprep.subr.bf16.mxu1 %v6788_v0  ;;  %2618 = vrot.lane.b32.xlu1 %v6944_v7, %s6812_s7  ;;  %v767_v46 = vsel %vm765_vm7, %v762_v43, %v764_v44  ;;  %v778_v49 = vsel %vm252_vm1, %v764_v44, 0 }
  0xa3   : > { %2616 = vrot.lane.b32.xlu0 %v6895_v5, %s6812_s7  ;;  %v871_v52 = vpop.permute.xlu1 %870 }
  0xa4   : > { %v885_v57 = vsel %vm252_vm1, %v871_v52, 0 }
  0xa5   : > { %v869_v51 = vpop.permute.xlu0 %868 }
  0xa6   : > { %2724 = vrot.lane.b32.xlu1 %v6892_v4, %s6813_s10  ;;  %v874_v54 = vsel %vm872_vm8, %v869_v51, %v871_v52  ;;  %v873_v58 = vsel %vm872_vm8, %v867_v47, %v869_v51 }
  0xa7   : > { %5735 = vmatmul.mubr.msk.bf16.vlgmr.msra.gmra.mrb[0].mxu0 %vm248_vm2, %v5733_v32  ;;  %2620 = vrot.lane.b32.xlu0 %v6949_v8, %s6812_s7  ;;  %v976_v59 = vpop.permute.xlu1 %975  ;;  %v879_v61 = vsel %vm252_vm1, %v873_v58, 0  ;;  %s6826_s7 = smov 17  }
  0xa8   : > { %567 = vmatpush1.bf16.msra.mxu0 %v558_v37  ;;  %598 = vmatprep.mubr.bf16.mxu0 %v6790_v1 }
  0xa9   : > { %5742 = vmatprep.subr.msk.bf16.mxu0 %vm252_vm1, %v660_v38  ;;  %v974_v55 = vpop.permute.xlu0 %973  ;;  %v5765_v38 = vld [vmem:[%s7778_s1 + $0x28] sm:$0xf] }
  0xaa   : > { %2728 = vrot.lane.b32.xlu1 %v6944_v7, %s6813_s10  ;;  %v980_v6 = vsel %vm979_vm9, %v974_v55, %v976_v59 }
  0xab   : > { %2726 = vrot.lane.b32.xlu0 %v6895_v5, %s6813_s10  ;;  %v1081_v63 = vpop.permute.xlu1 %1080  ;;  %v986_v11 = vsel %vm252_vm1, %v980_v6, 0 }
  0xac   : > { %6054 = vmatmul.mubr.msk.bf16.vlgmr.msra.gmra.mrb[0].mxu1 %vm248_vm2, %v5737_v40 }
  0xad   : > { %6058 = vmatpush3.bf16.msra.mxu1 %v671_v41  ;;  %6059 = vmatprep.mubr.msk.bf16.mxu1 %vm6789_vm0, %v6788_v0  ;;  %v978_v60 = vpop.permute.xlu0 %977 }
  0xae   : > { %6063 = vmatprep.subr.bf16.mxu1 %v6788_v0  ;;  %2834 = vrot.lane.b32.xlu1 %v6892_v4, %s6814_s11  ;;  %v981_v62 = vsel %vm979_vm9, %v976_v59, %v978_v60  ;;  %v992_v3 = vsel %vm252_vm1, %v978_v60, 0  ;;  %vm2072_vm9 = vcmask 662528  }
  0xaf   : > { %2730 = vrot.lane.b32.xlu0 %v6949_v8, %s6813_s10  ;;  %v1085_v10 = vpop.permute.xlu1 %1084  ;;  %s6827_s10 = smov 16  }
  0xb0   : > { %v1099_v15 = vsel %vm252_vm1, %v1085_v10, 0 }
  0xb1   : > { %v1083_v9 = vpop.permute.xlu0 %1082 }
  0xb2   : > { %2838 = vrot.lane.b32.xlu1 %v6944_v7, %s6814_s11  ;;  %v1088_v12 = vsel %vm1086_vm10, %v1083_v9, %v1085_v10  ;;  %v1087_v16 = vsel %vm1086_vm10, %v1081_v63, %v1083_v9  ;;  %v5777_v63 = vld [vmem:[%s7778_s1 + $0x34] sm:$0xf]  ;;  %vm2182_vm10 = vcmask 654336  }
  0xb3   : > { %5739 = vmatmul.mubr.msk.bf16.vlgmr.msra.gmra.mrb[0].mxu0 %vm248_vm2, %v5737_v40  ;;  %2836 = vrot.lane.b32.xlu0 %v6895_v5, %s6814_s11  ;;  %v1190_v17 = vpop.permute.xlu1 %1189  ;;  %v1093_v19 = vsel %vm252_vm1, %v1087_v16, 0 }
  0xb4   : > { %674 = vmatpush1.bf16.msra.mxu0 %v665_v45  ;;  %705 = vmatprep.mubr.bf16.mxu0 %v6790_v1 }
  0xb5   : > { %5746 = vmatprep.subr.msk.bf16.mxu0 %vm252_vm1, %v767_v46  ;;  %v1188_v13 = vpop.permute.xlu0 %1187  ;;  %v5769_v46 = vld [vmem:[%s7778_s1 + $0x2c] sm:$0xf] }
  0xb6   : > { %2944 = vrot.lane.b32.xlu1 %v6892_v4, %s6815_s14  ;;  %v1194_v24 = vsel %vm1193_vm11, %v1188_v13, %v1190_v17 }
  0xb7   : > { %2840 = vrot.lane.b32.xlu0 %v6949_v8, %s6814_s11  ;;  %v1295_v21 = vpop.permute.xlu1 %1294  ;;  %v1200_v27 = vsel %vm252_vm1, %v1194_v24, 0  ;;  %s6821_s11 = smov 37  }
  0xb8   : > { %6060 = vmatmul.mubr.msk.bf16.vlgmr.msra.gmra.mrb[0].mxu1 %vm248_vm2, %v5741_v48 }
  0xb9   : > { %6064 = vmatpush3.bf16.msra.mxu1 %v778_v49  ;;  %6065 = vmatprep.mubr.msk.bf16.mxu1 %vm6789_vm0, %v6788_v0  ;;  %v1192_v18 = vpop.permute.xlu0 %1191 }
  0xba   : > { %6069 = vmatprep.subr.bf16.mxu1 %v6788_v0  ;;  %2948 = vrot.lane.b32.xlu1 %v6944_v7, %s6815_s14  ;;  %v1195_v20 = vsel %vm1193_vm11, %v1190_v17, %v1192_v18  ;;  %v1206_v23 = vsel %vm252_vm1, %v1192_v18, 0  ;;  %vm2292_vm11 = vcmask 646144  }
  0xbb   : > { %2946 = vrot.lane.b32.xlu0 %v6895_v5, %s6815_s14  ;;  %v1299_v26 = vpop.permute.xlu1 %1298 }
  0xbc   : > { %v1313_v31 = vsel %vm252_vm1, %v1299_v26, 0 }
  0xbd   : > { %v1297_v25 = vpop.permute.xlu0 %1296 }
  0xbe   : > { %3054 = vrot.lane.b32.xlu1 %v6892_v4, %s6816_s17  ;;  %v1302_v28 = vsel %vm1300_vm12, %v1297_v25, %v1299_v26  ;;  %v1301_v32 = vsel %vm1300_vm12, %v1295_v21, %v1297_v25  ;;  %v5789_v25 = vld [vmem:[%s7778_s1 + $0x3c] sm:$0xf]  ;;  %vm2402_vm12 = vcmask 637952  }
  0xbf   : > { %5743 = vmatmul.mubr.msk.bf16.vlgmr.msra.gmra.mrb[0].mxu0 %vm248_vm2, %v5741_v48  ;;  %2950 = vrot.lane.b32.xlu0 %v6949_v8, %s6815_s14  ;;  %v1404_v33 = vpop.permute.xlu1 %1403  ;;  %v1307_v35 = vsel %vm252_vm1, %v1301_v32, 0  ;;  %s6822_s14 = smov 36  }
  0xc0   : > { %781 = vmatpush1.bf16.msra.mxu0 %v772_v53  ;;  %812 = vmatprep.mubr.bf16.mxu0 %v6790_v1  ;;  %v5773_v53 = vld [vmem:[%s7778_s1 + $0x30] sm:$0xf] }
  0xc1   : > { %5750 = vmatprep.subr.msk.bf16.mxu0 %vm252_vm1, %v874_v54  ;;  %v1402_v29 = vpop.permute.xlu0 %1401 }
  0xc2   : > { %3058 = vrot.lane.b32.xlu1 %v6944_v7, %s6816_s17  ;;  %v1408_v40 = vsel %vm1407_vm13, %v1402_v29, %v1404_v33 }
  0xc3   : > { %3056 = vrot.lane.b32.xlu0 %v6895_v5, %s6816_s17  ;;  %v1509_v37 = vpop.permute.xlu1 %1508  ;;  %v1414_v43 = vsel %vm252_vm1, %v1408_v40, 0 }
  0xc4   : > { %6066 = vmatmul.mubr.msk.bf16.vlgmr.msra.gmra.mrb[0].mxu1 %vm248_vm2, %v5745_v56 }
  0xc5   : > { %6070 = vmatpush3.bf16.msra.mxu1 %v885_v57  ;;  %6071 = vmatprep.mubr.msk.bf16.mxu1 %vm6789_vm0, %v6788_v0  ;;  %v1406_v34 = vpop.permute.xlu0 %1405 }
  0xc6   : > { %6075 = vmatprep.subr.bf16.mxu1 %v6788_v0  ;;  %3164 = vrot.lane.b32.xlu1 %v6892_v4, %s6817_s20  ;;  %v1409_v36 = vsel %vm1407_vm13, %v1404_v33, %v1406_v34  ;;  %v1420_v39 = vsel %vm252_vm1, %v1406_v34, 0  ;;  %vm2512_vm13 = vcmask 506880  }
  0xc7   : > { %3060 = vrot.lane.b32.xlu0 %v6949_v8, %s6816_s17  ;;  %v1513_v42 = vpop.permute.xlu1 %1512  ;;  %s6823_s17 = smov 35  }
  0xc8   : > { %v1527_v47 = vsel %vm252_vm1, %v1513_v42, 0 }
  0xc9   : > { %v1511_v41 = vpop.permute.xlu0 %1510 }
  0xca   : > { %3168 = vrot.lane.b32.xlu1 %v6944_v7, %s6817_s20  ;;  %v1516_v44 = vsel %vm1514_vm14, %v1511_v41, %v1513_v42  ;;  %v1515_v48 = vsel %vm1514_vm14, %v1509_v37, %v1511_v41  ;;  %vm2622_vm14 = vcmask 498688  }
  0xcb   : > { %5747 = vmatmul.mubr.msk.bf16.vlgmr.msra.gmra.mrb[0].mxu0 %vm248_vm2, %v5745_v56  ;;  %3166 = vrot.lane.b32.xlu0 %v6895_v5, %s6817_s20  ;;  %v1618_v49 = vpop.permute.xlu1 %1617  ;;  %v1521_v51 = vsel %vm252_vm1, %v1515_v48, 0 }
  0xcc   : > { %888 = vmatpush1.bf16.msra.mxu0 %v879_v61  ;;  %919 = vmatprep.mubr.bf16.mxu0 %v6790_v1 }
  0xcd   : > { %5754 = vmatprep.subr.msk.bf16.mxu0 %vm252_vm1, %v981_v62  ;;  %v1616_v45 = vpop.permute.xlu0 %1615 }
  0xce   : > { %3274 = vrot.lane.b32.xlu1 %v6892_v4, %s6818_s24  ;;  %v1622_v57 = vsel %vm1621_vm15, %v1616_v45, %v1618_v49  ;;  %v5797_v45 = vld [vmem:[%s7778_s1 + $0x44] sm:$0xf] }
  0xcf   : > { %3170 = vrot.lane.b32.xlu0 %v6949_v8, %s6817_s20  ;;  %v1735_v55 = vpop.permute.xlu1 %1734  ;;  %v1628_v58 = vsel %vm252_vm1, %v1622_v57, 0 }
  0xd0   : > { %6072 = vmatmul.mubr.msk.bf16.vlgmr.msra.gmra.mrb[0].mxu1 %vm248_vm2, %v5749_v2 }
  0xd1   : > { %6076 = vmatpush3.bf16.msra.mxu1 %v992_v3  ;;  %6077 = vmatprep.mubr.msk.bf16.mxu1 %vm6789_vm0, %v6788_v0  ;;  %v1620_v50 = vpop.permute.xlu0 %1619 }
  0xd2   : > { %6081 = vmatprep.subr.bf16.mxu1 %v6788_v0  ;;  %3278 = vrot.lane.b32.xlu1 %v6944_v7, %s6818_s24  ;;  %v1623_v52 = vsel %vm1621_vm15, %v1618_v49, %v1620_v50  ;;  %v1634_v54 = vsel %vm252_vm1, %v1620_v50, 0  ;;  %vm2732_vm15 = vcmask 490496  }
  0xd3   : > { %3276 = vrot.lane.b32.xlu0 %v6895_v5, %s6818_s24  ;;  %v1739_v59 = vpop.permute.xlu1 %1738 }
  0xd5   : > { %v1737_v56 = vpop.permute.xlu0 %1736 }
  0xd6   : > { %3384 = vrot.lane.b32.xlu1 %v6892_v4, %s6819_s30  ;;  %v1744_v61 = vsel %vm1742_vm3, %v1737_v56, %v1739_v59  ;;  %v1743_v9 = vsel %vm1742_vm3, %v1735_v55, %v1737_v56  ;;  %v5801_v55 = vld [vmem:[%s7778_s1 + $0x48] sm:$0xf] }
  0xd7   : > { %5751 = vmatmul.mubr.msk.bf16.vlgmr.msra.gmra.mrb[0].mxu0 %vm248_vm2, %v5749_v2  ;;  %3280 = vrot.lane.b32.xlu0 %v6949_v8, %s6818_s24  ;;  %v1845_v3 = vpop.permute.xlu1 %1844  ;;  %v1750_v10 = vsel %vm252_vm1, %v1743_v9, 0 }
  0xd8   : > { %995 = vmatpush1.bf16.msra.mxu0 %v986_v11  ;;  %1026 = vmatprep.mubr.bf16.mxu0 %v6790_v1 }
  0xd9   : > { %5758 = vmatprep.subr.msk.bf16.mxu0 %vm252_vm1, %v1088_v12  ;;  %v1741_v60 = vpop.permute.xlu0 %1740 }
  0xda   : > { %3388 = vrot.lane.b32.xlu1 %v6944_v7, %s6819_s30  ;;  %v1745_v62 = vsel %vm1742_vm3, %v1739_v59, %v1741_v60  ;;  %vm2842_vm3 = vcmask 482304  }
  0xdb   : > { %3386 = vrot.lane.b32.xlu0 %v6895_v5, %s6819_s30  ;;  %v1756_v2 = vsel %vm252_vm1, %v1745_v62, 0  ;;  %v1849_v11 = vpop.permute.xlu1 %1848 }
  0xdc   : > { %6078 = vmatmul.mubr.msk.bf16.vlgmr.msra.gmra.mrb[0].mxu1 %vm248_vm2, %v5753_v14 }
  0xdd   : > { %6082 = vmatpush3.bf16.msra.mxu1 %v1099_v15  ;;  %6083 = vmatprep.mubr.msk.bf16.mxu1 %vm6789_vm0, %v6788_v0  ;;  %v1847_v6 = vpop.permute.xlu0 %1846  ;;  %v5781_v15 = vld [vmem:[%s7778_s1 + $0x38] sm:$0xf] }
  0xde   : > { %6087 = vmatprep.subr.bf16.mxu1 %v6788_v0  ;;  %3494 = vrot.lane.b32.xlu1 %v6892_v4, %s6820_s8  ;;  %v1854_v13 = vsel %vm1852_vm4, %v1847_v6, %v1849_v11 }
  0xdf   : > { %3390 = vrot.lane.b32.xlu0 %v6949_v8, %s6819_s30  ;;  %v1955_v17 = vpop.permute.xlu1 %1954 }
  0xe1   : > { %v1851_v12 = vpop.permute.xlu0 %1850 }
  0xe2   : > { %3498 = vrot.lane.b32.xlu1 %v6944_v7, %s6820_s8 }
  0xe3   : > { %5755 = vmatmul.mubr.msk.bf16.vlgmr.msra.gmra.mrb[0].mxu0 %vm248_vm2, %v5753_v14  ;;  %3496 = vrot.lane.b32.xlu0 %v6895_v5, %s6820_s8  ;;  %v1855_v14 = vsel %vm1852_vm4, %v1849_v11, %v1851_v12  ;;  %v1959_v21 = vpop.permute.xlu1 %1958 }
  0xe4   : > { %1102 = vmatpush1.bf16.msra.mxu0 %v1093_v19  ;;  %1133 = vmatprep.mubr.bf16.mxu0 %v6790_v1  ;;  %v1866_v16 = vsel %vm252_vm1, %v1855_v14, 0  ;;  %v1853_v19 = vsel %vm1852_vm4, %v1845_v3, %v1847_v6  ;;  %v5805_v3 = vld [vmem:[%s7778_s1 + $0x4c] sm:$0xf]  ;;  %vm2952_vm4 = vcmask 474112  }
  0xe5   : > { %5762 = vmatprep.subr.msk.bf16.mxu0 %vm252_vm1, %v1195_v20  ;;  %v1957_v18 = vpop.permute.xlu0 %1956  ;;  %v1860_v20 = vsel %vm252_vm1, %v1853_v19, 0 }
  0xe6   : > { %3604 = vrot.lane.b32.xlu1 %v6892_v4, %s6821_s11  ;;  %v1963_v29 = vsel %vm1962_vm5, %v1955_v17, %v1957_v18  ;;  %v5809_v17 = vld [vmem:[%s7778_s1 + $0x50] sm:$0xf] }
  0xe7   : > { %3500 = vrot.lane.b32.xlu0 %v6949_v8, %s6820_s8 }
  0xe8   : > { %6084 = vmatmul.mubr.msk.bf16.vlgmr.msra.gmra.mrb[0].mxu1 %vm248_vm2, %v5757_v22 }
  0xe9   : > { %6088 = vmatpush3.bf16.msra.mxu1 %v1206_v23  ;;  %6089 = vmatprep.mubr.msk.bf16.mxu1 %vm6789_vm0, %v6788_v0  ;;  %v1964_v23 = vsel %vm1962_vm5, %v1957_v18, %v1959_v21 }
  0xea   : > { %6093 = vmatprep.subr.bf16.mxu1 %v6788_v0  ;;  %3608 = vrot.lane.b32.xlu1 %v6944_v7, %s6821_s11 }
  0xeb   : > { %3606 = vrot.lane.b32.xlu0 %v6895_v5, %s6821_s11 }
  0xee   : > { %3714 = vrot.lane.b32.xlu1 %v6892_v4, %s6822_s14 }
  0xef   : > { %5759 = vmatmul.mubr.msk.bf16.vlgmr.msra.gmra.mrb[0].mxu0 %vm248_vm2, %v5757_v22  ;;  %3610 = vrot.lane.b32.xlu0 %v6949_v8, %s6821_s11  ;;  %v1961_v22 = vpop.permute.xlu0 %1960  ;;  %s6833_s11 = smov 120  }
  0xf0   : > { %1209 = vmatpush1.bf16.msra.mxu0 %v1200_v27  ;;  %1240 = vmatprep.mubr.bf16.mxu0 %v6790_v1  ;;  %v1965_v24 = vsel %vm1962_vm5, %v1959_v21, %v1961_v22  ;;  %v2065_v27 = vpop.permute.xlu1 %2064  ;;  %vm3062_vm5 = vcmask 465920  }
  0xf1   : > { %5766 = vmatprep.subr.msk.bf16.mxu0 %vm252_vm1, %v1302_v28  ;;  %v1976_v26 = vsel %vm252_vm1, %v1965_v24, 0 }
  0xf2   : > { %3718 = vrot.lane.b32.xlu1 %v6944_v7, %s6822_s14 }
  0xf3   : > { %3716 = vrot.lane.b32.xlu0 %v6895_v5, %s6822_s14  ;;  %v2067_v28 = vpop.permute.xlu0 %2066 }
  0xf4   : > { %6090 = vmatmul.mubr.msk.bf16.vlgmr.msra.gmra.mrb[0].mxu1 %vm248_vm2, %v5761_v30 }
  0xf5   : > { %6094 = vmatpush3.bf16.msra.mxu1 %v1313_v31  ;;  %6095 = vmatprep.mubr.msk.bf16.mxu1 %vm6789_vm0, %v6788_v0  ;;  %v2069_v31 = vpop.permute.xlu1 %2068 }
  0xf6   : > { %6099 = vmatprep.subr.bf16.mxu1 %v6788_v0  ;;  %3824 = vrot.lane.b32.xlu1 %v6892_v4, %s6823_s17  ;;  %v2074_v33 = vsel %vm2072_vm9, %v2067_v28, %v2069_v31 }
  0xf7   : > { %3720 = vrot.lane.b32.xlu0 %v6949_v8, %s6822_s14  ;;  %v2071_v32 = vpop.permute.xlu0 %2070  ;;  %s6834_s14 = smov 119  }
  0xf8   : > { %v2075_v34 = vsel %vm2072_vm9, %v2069_v31, %v2071_v32 }
  0xf9   : > { %v2175_v37 = vpop.permute.xlu1 %2174 }
  0xfa   : > { %3828 = vrot.lane.b32.xlu1 %v6944_v7, %s6823_s17 }
  0xfb   : > { %5763 = vmatmul.mubr.msk.bf16.vlgmr.msra.gmra.mrb[0].mxu0 %vm248_vm2, %v5761_v30  ;;  %3826 = vrot.lane.b32.xlu0 %v6895_v5, %s6823_s17  ;;  %v1970_v30 = vsel %vm252_vm1, %v1963_v29, 0 }
  0xfc   : > { %1316 = vmatpush1.bf16.msra.mxu0 %v1307_v35  ;;  %1347 = vmatprep.mubr.bf16.mxu0 %v6790_v1  ;;  %v5793_v35 = vld [vmem:[%s7778_s1 + $0x40] sm:$0xf] }
  0xfd   : > { %5770 = vmatprep.subr.msk.bf16.mxu0 %vm252_vm1, %v1409_v36  ;;  %v2086_v36 = vsel %vm252_vm1, %v2075_v34, 0  ;;  %v2179_v41 = vpop.permute.xlu1 %2178 }
  0xfe   : > { %3934 = vrot.lane.b32.xlu1 %v6892_v4, %s6824_s22 }
  0xff   : > { %3830 = vrot.lane.b32.xlu0 %v6949_v8, %s6823_s17  ;;  %s6835_s17 = smov 118  }
 0x100   : > { %6096 = vmatmul.mubr.msk.bf16.vlgmr.msra.gmra.mrb[0].mxu1 %vm248_vm2, %v5765_v38 }
 0x101   : > { %6100 = vmatpush3.bf16.msra.mxu1 %v1420_v39  ;;  %6101 = vmatprep.mubr.msk.bf16.mxu1 %vm6789_vm0, %v6788_v0  ;;  %v2073_v39 = vsel %vm2072_vm9, %v2065_v27, %v2067_v28  ;;  %vm3172_vm9 = vcmask 457728  }
 0x102   : > { %6105 = vmatprep.subr.bf16.mxu1 %v6788_v0  ;;  %3938 = vrot.lane.b32.xlu1 %v6944_v7, %s6824_s22  ;;  %v2080_v40 = vsel %vm252_vm1, %v2073_v39, 0 }
 0x103   : > { %3936 = vrot.lane.b32.xlu0 %v6895_v5, %s6824_s22 }
 0x106   : > { %4044 = vrot.lane.b32.xlu1 %v6892_v4, %s6825_s26 }
 0x107   : > { %5767 = vmatmul.mubr.msk.bf16.vlgmr.msra.gmra.mrb[0].mxu0 %vm248_vm2, %v5765_v38  ;;  %3940 = vrot.lane.b32.xlu0 %v6949_v8, %s6824_s22  ;;  %v2177_v38 = vpop.permute.xlu0 %2176 }
 0x108   : > { %1423 = vmatpush1.bf16.msra.mxu0 %v1414_v43  ;;  %1454 = vmatprep.mubr.bf16.mxu0 %v6790_v1  ;;  %v2184_v43 = vsel %vm2182_vm10, %v2177_v38, %v2179_v41  ;;  %v2183_v49 = vsel %vm2182_vm10, %v2175_v37, %v2177_v38  ;;  %v5817_v37 = vld [vmem:[%s7778_s1 + $0x58] sm:$0xf] }
 0x109   : > { %5774 = vmatprep.subr.msk.bf16.mxu0 %vm252_vm1, %v1516_v44  ;;  %v2190_v50 = vsel %vm252_vm1, %v2183_v49, 0 }
 0x10a   : > { %4048 = vrot.lane.b32.xlu1 %v6944_v7, %s6825_s26 }
 0x10b   : > { %4046 = vrot.lane.b32.xlu0 %v6895_v5, %s6825_s26  ;;  %v2181_v42 = vpop.permute.xlu0 %2180 }
 0x10c   : > { %6102 = vmatmul.mubr.msk.bf16.vlgmr.msra.gmra.mrb[0].mxu1 %vm248_vm2, %v5769_v46  ;;  %v2185_v44 = vsel %vm2182_vm10, %v2179_v41, %v2181_v42  ;;  %vm3282_vm10 = vcmask 326656  }
 0x10d   : > { %6106 = vmatpush3.bf16.msra.mxu1 %v1527_v47  ;;  %6107 = vmatprep.mubr.msk.bf16.mxu1 %vm6789_vm0, %v6788_v0  ;;  %v2285_v47 = vpop.permute.xlu1 %2284 }
 0x10e   : > { %6111 = vmatprep.subr.bf16.mxu1 %v6788_v0  ;;  %4154 = vrot.lane.b32.xlu1 %v6892_v4, %s6826_s7 }
 0x10f   : > { %4050 = vrot.lane.b32.xlu0 %v6949_v8, %s6825_s26  ;;  %v2287_v48 = vpop.permute.xlu0 %2286 }
 0x110   : > { %v2293_v59 = vsel %vm2292_vm11, %v2285_v47, %v2287_v48  ;;  %v5821_v47 = vld [vmem:[%s7778_s1 + $0x5c] sm:$0xf] }
 0x111   : > { %v2300_v60 = vsel %vm252_vm1, %v2293_v59, 0 }
 0x112   : > { %4158 = vrot.lane.b32.xlu1 %v6944_v7, %s6826_s7 }
 0x113   : > { %5771 = vmatmul.mubr.msk.bf16.vlgmr.msra.gmra.mrb[0].mxu0 %vm248_vm2, %v5769_v46  ;;  %4156 = vrot.lane.b32.xlu0 %v6895_v5, %s6826_s7  ;;  %v2196_v46 = vsel %vm252_vm1, %v2185_v44, 0 }
 0x114   : > { %1530 = vmatpush1.bf16.msra.mxu0 %v1521_v51  ;;  %1561 = vmatprep.mubr.bf16.mxu0 %v6790_v1  ;;  %v2289_v51 = vpop.permute.xlu1 %2288 }
 0x115   : > { %5778 = vmatprep.subr.msk.bf16.mxu0 %vm252_vm1, %v1623_v52  ;;  %v2291_v52 = vpop.permute.xlu0 %2290 }
 0x116   : > { %4264 = vrot.lane.b32.xlu1 %v6892_v4, %s6827_s10 }
 0x117   : > { %4160 = vrot.lane.b32.xlu0 %v6949_v8, %s6826_s7 }
 0x118   : > { %6108 = vmatmul.mubr.msk.bf16.vlgmr.msra.gmra.mrb[0].mxu1 %vm248_vm2, %v5773_v53  ;;  %v2395_v57 = vpop.permute.xlu1 %2394 }
 0x119   : > { %6112 = vmatpush3.bf16.msra.mxu1 %v1634_v54  ;;  %6113 = vmatprep.mubr.msk.bf16.mxu1 %vm6789_vm0, %v6788_v0  ;;  %v2295_v54 = vsel %vm2292_vm11, %v2289_v51, %v2291_v52 }
 0x11a   : > { %6117 = vmatprep.subr.bf16.mxu1 %v6788_v0  ;;  %4268 = vrot.lane.b32.xlu1 %v6944_v7, %s6827_s10  ;;  %v2306_v56 = vsel %vm252_vm1, %v2295_v54, 0 }
 0x11b   : > { %4266 = vrot.lane.b32.xlu0 %v6895_v5, %s6827_s10 }
 0x11e   : > { %4374 = vrot.lane.b32.xlu1 %v6892_v4, %s6828_s13 }
 0x11f   : > { %5775 = vmatmul.mubr.msk.bf16.vlgmr.msra.gmra.mrb[0].mxu0 %vm248_vm2, %v5773_v53  ;;  %4270 = vrot.lane.b32.xlu0 %v6949_v8, %s6827_s10  ;;  %v2294_v53 = vsel %vm2292_vm11, %v2287_v48, %v2289_v51  ;;  %vm3392_vm11 = vcmask 318464  }
 0x120   : > { %1637 = vmatpush1.bf16.msra.mxu0 %v1628_v58  ;;  %1668 = vmatprep.mubr.bf16.mxu0 %v6790_v1  ;;  %v2397_v58 = vpop.permute.xlu0 %2396 }
 0x121   : > { %5786 = vmatprep.subr.msk.bf16.mxu0 %vm252_vm1, %v1744_v61  ;;  %v2399_v61 = vpop.permute.xlu1 %2398  ;;  %v2403_v11 = vsel %vm2402_vm12, %v2395_v57, %v2397_v58  ;;  %v5825_v57 = vld [vmem:[%s7778_s1 + $0x60] sm:$0xf] }
 0x122   : > { %4378 = vrot.lane.b32.xlu1 %v6944_v7, %s6828_s13  ;;  %v2410_v12 = vsel %vm252_vm1, %v2403_v11, 0 }
 0x123   : > { %4376 = vrot.lane.b32.xlu0 %v6895_v5, %s6828_s13 }
 0x124   : > { %6114 = vmatmul.mubr.msk.bf16.vlgmr.msra.gmra.mrb[0].mxu1 %vm248_vm2, %v5777_v63  ;;  %v2401_v62 = vpop.permute.xlu0 %2400 }
 0x125   : > { %6118 = vmatpush3.bf16.msra.mxu1 %v1756_v2  ;;  %6119 = vmatprep.mubr.msk.bf16.mxu1 %vm6789_vm0, %v6788_v0  ;;  %v2405_v2 = vsel %vm2402_vm12, %v2399_v61, %v2401_v62  ;;  %v2505_v9 = vpop.permute.xlu1 %2504 }
 0x126   : > { %6123 = vmatprep.subr.bf16.mxu1 %v6788_v0  ;;  %4484 = vrot.lane.b32.xlu1 %v6892_v4, %s6829_s16  ;;  %v2416_v6 = vsel %vm252_vm1, %v2405_v2, 0 }
 0x127   : > { %4380 = vrot.lane.b32.xlu0 %v6949_v8, %s6828_s13 }
 0x12a   : > { %4488 = vrot.lane.b32.xlu1 %v6944_v7, %s6829_s16 }
 0x12b   : > { %5779 = vmatmul.mubr.msk.bf16.vlgmr.msra.gmra.mrb[0].mxu0 %vm248_vm2, %v5777_v63  ;;  %4486 = vrot.lane.b32.xlu0 %v6895_v5, %s6829_s16  ;;  %v2404_v63 = vsel %vm2402_vm12, %v2397_v58, %v2399_v61  ;;  %vm3502_vm12 = vcmask 310272  }
 0x12c   : > { %1759 = vmatpush1.bf16.msra.mxu0 %v1750_v10  ;;  %1790 = vmatprep.mubr.bf16.mxu0 %v6790_v1  ;;  %v2507_v10 = vpop.permute.xlu0 %2506 }
 0x12d   : > { %5790 = vmatprep.subr.msk.bf16.mxu0 %vm252_vm1, %v1854_v13  ;;  %v2509_v13 = vpop.permute.xlu1 %2508  ;;  %v2513_v19 = vsel %vm2512_vm13, %v2505_v9, %v2507_v10  ;;  %v5829_v9 = vld [vmem:[%s7778_s1 + $0x64] sm:$0xf] }
 0x12e   : > { %4594 = vrot.lane.b32.xlu1 %v6892_v4, %s6830_s21 }
 0x12f   : > { %4490 = vrot.lane.b32.xlu0 %v6949_v8, %s6829_s16 }
 0x130   : > { %6120 = vmatmul.mubr.msk.bf16.vlgmr.msra.gmra.mrb[0].mxu1 %vm248_vm2, %v5781_v15  ;;  %v2511_v14 = vpop.permute.xlu0 %2510 }
 0x131   : > { %6124 = vmatpush3.bf16.msra.mxu1 %v1866_v16  ;;  %6125 = vmatprep.mubr.msk.bf16.mxu1 %vm6789_vm0, %v6788_v0  ;;  %v2515_v16 = vsel %vm2512_vm13, %v2509_v13, %v2511_v14 }
 0x132   : > { %6129 = vmatprep.subr.bf16.mxu1 %v6788_v0  ;;  %4598 = vrot.lane.b32.xlu1 %v6944_v7, %s6830_s21 }
 0x133   : > { %4596 = vrot.lane.b32.xlu0 %v6895_v5, %s6830_s21 }
 0x134   : > { %v2617_v18 = vpop.permute.xlu0 %2616 }
 0x136   : > { %4704 = vrot.lane.b32.xlu1 %v6892_v4, %s6831_s25  ;;  %v2526_v4 = vsel %vm252_vm1, %v2515_v16, 0 }
 0x137   : > { %5787 = vmatmul.mubr.msk.bf16.vlgmr.msra.gmra.mrb[0].mxu0 %vm248_vm2, %v5781_v15  ;;  %4600 = vrot.lane.b32.xlu0 %v6949_v8, %s6830_s21  ;;  %v2514_v15 = vsel %vm2512_vm13, %v2507_v10, %v2509_v13  ;;  %vm3612_vm13 = vcmask 302080  }
 0x138   : > { %1869 = vmatpush1.bf16.msra.mxu0 %v1860_v20  ;;  %1900 = vmatprep.mubr.bf16.mxu0 %v6790_v1  ;;  %v2520_v20 = vsel %vm252_vm1, %v2513_v19, 0  ;;  %v2621_v21 = vpop.permute.xlu0 %2620 }
 0x139   : > { %5794 = vmatprep.subr.msk.bf16.mxu0 %vm252_vm1, %v1964_v23 }
 0x13a   : > { %4708 = vrot.lane.b32.xlu1 %v6944_v7, %s6831_s25 }
 0x13b   : > { %4706 = vrot.lane.b32.xlu0 %v6895_v5, %s6831_s25  ;;  %v2615_v5 = vpop.permute.xlu1 %2614 }
 0x13c   : > { %6126 = vmatmul.mubr.msk.bf16.vlgmr.msra.gmra.mrb[0].mxu1 %vm248_vm2, %v5789_v25  ;;  %v2727_v29 = vpop.permute.xlu0 %2726  ;;  %v2623_v31 = vsel %vm2622_vm14, %v2615_v5, %v2617_v18  ;;  %v5833_v5 = vld [vmem:[%s7778_s1 + $0x68] sm:$0xf] }
 0x13d   : > { %6130 = vmatpush3.bf16.msra.mxu1 %v1976_v26  ;;  %6131 = vmatprep.mubr.msk.bf16.mxu1 %vm6789_vm0, %v6788_v0  ;;  %v5813_v26 = vld [vmem:[%s7778_s1 + $0x54] sm:$0xf]  ;;  %v2630_v32 = vsel %vm252_vm1, %v2623_v31, 0 }
 0x13e   : > { %6135 = vmatprep.subr.bf16.mxu1 %v6788_v0 }
 0x13f   : > { %4710 = vrot.lane.b32.xlu0 %v6949_v8, %s6831_s25  ;;  %v2619_v7 = vpop.permute.xlu1 %2618  ;;  %v4812_v8 = vld [vmem:[%s6886_s23 + $0x4] sm:$0xff]  ;;  %s6711_s25 = smul.u32 12, %s7784_s19 }
 0x140   : > { %v2624_v22 = vsel %vm2622_vm14, %v2617_v18, %v2619_v7  ;;  %v7368_v23 = vcombine.low %v4812_v8, %v4812_v8  ;;  %v7370_v24 = vcombine.high %v4812_v8, %v4812_v8  ;;  %v2731_v34 = vpop.permute.xlu0 %2730 }
 0x141   : > { %s224_s6 = scalar_lea.vmem %s7782_s5, %s6711_s25 }
 0x142   : > { %4824 = vrot.lane.b32.xlu1 %v7368_v23, %s6794_s27 }
 0x143   : > { %5791 = vmatmul.mubr.msk.bf16.vlgmr.msra.gmra.mrb[0].mxu0 %vm248_vm2, %v5789_v25  ;;  %v2625_v25 = vsel %vm2622_vm14, %v2619_v7, %v2621_v21  ;;  %4826 = vrot.lane.b32.xlu0 %v7370_v24, %s6794_s27  ;;  %v2725_v28 = vpop.permute.xlu1 %2724  ;;  %vm3722_vm14 = vcmask 293888  }
 0x144   : > { %1979 = vmatpush1.bf16.msra.mxu0 %v1970_v30  ;;  %2010 = vmatprep.mubr.bf16.mxu0 %v6790_v1  ;;  %v2636_v27 = vsel %vm252_vm1, %v2625_v25, 0  ;;  %v7385_v30 = vld [vmem:[%s6886_s23 + $0xc] ss:$0 sps:$4 sm:$0xff]   ;;  %v2733_v41 = vsel %vm2732_vm15, %v2725_v28, %v2727_v29 }
 0x145   : > { %5798 = vmatprep.subr.msk.bf16.mxu0 %vm252_vm1, %v2074_v33  ;;  %v2740_v42 = vsel %vm252_vm1, %v2733_v41, 0 }
 0x146   : > { %4828 = vrot.lane.b32.xlu1 %v7385_v30, %s6794_s27 }
 0x147   : > { %4930 = vrot.lane.b32.xlu0 %v7368_v23, %s6795_s28  ;;  %v2729_v33 = vpop.permute.xlu1 %2728 }
 0x148   : > { %6132 = vmatmul.mubr.msk.bf16.vlgmr.msra.gmra.mrb[0].mxu1 %vm248_vm2, %v5793_v35 }
 0x149   : > { %6136 = vmatpush3.bf16.msra.mxu1 %v2086_v36  ;;  %6137 = vmatprep.mubr.msk.bf16.mxu1 %vm6789_vm0, %v6788_v0  ;;  %v2735_v36 = vsel %vm2732_vm15, %v2729_v33, %v2731_v34 }
 0x14a   : > { %6141 = vmatprep.subr.bf16.mxu1 %v6788_v0  ;;  %4932 = vrot.lane.b32.xlu1 %v7370_v24, %s6795_s28  ;;  %v2746_v38 = vsel %vm252_vm1, %v2735_v36, 0 }
 0x14b   : > { %4934 = vrot.lane.b32.xlu0 %v7385_v30, %s6795_s28  ;;  %v2835_v39 = vpop.permute.xlu1 %2834 }
 0x14e   : > { %5036 = vrot.lane.b32.xlu1 %v7368_v23, %s6796_s29 }
 0x14f   : > { %5795 = vmatmul.mubr.msk.bf16.vlgmr.msra.gmra.mrb[0].mxu0 %vm248_vm2, %v5793_v35  ;;  %v2734_v35 = vsel %vm2732_vm15, %v2727_v29, %v2729_v33  ;;  %5038 = vrot.lane.b32.xlu0 %v7370_v24, %s6796_s29  ;;  %vm3832_vm15 = vcmask 285696  }
 0x150   : > { %2089 = vmatpush1.bf16.msra.mxu0 %v2080_v40  ;;  %2120 = vmatprep.mubr.bf16.mxu0 %v6790_v1  ;;  %v2837_v40 = vpop.permute.xlu0 %2836 }
 0x151   : > { %5802 = vmatprep.subr.msk.bf16.mxu0 %vm252_vm1, %v2184_v43  ;;  %v2839_v43 = vpop.permute.xlu1 %2838  ;;  %v2843_v51 = vsel %vm2842_vm3, %v2835_v39, %v2837_v40 }
 0x152   : > { %5040 = vrot.lane.b32.xlu1 %v7385_v30, %s6796_s29  ;;  %v2850_v52 = vsel %vm252_vm1, %v2843_v51, 0  ;;  %s6832_s29 = smov 121  }
 0x153   : > { %5142 = vrot.lane.b32.xlu0 %v7368_v23, %s6832_s29 }
 0x154   : > { %6138 = vmatmul.mubr.msk.bf16.vlgmr.msra.gmra.mrb[0].mxu1 %vm248_vm2, %v5797_v45  ;;  %v2841_v44 = vpop.permute.xlu0 %2840 }
 0x155   : > { %6142 = vmatpush3.bf16.msra.mxu1 %v2196_v46  ;;  %6143 = vmatprep.mubr.msk.bf16.mxu1 %vm6789_vm0, %v6788_v0  ;;  %v2845_v46 = vsel %vm2842_vm3, %v2839_v43, %v2841_v44  ;;  %v2945_v49 = vpop.permute.xlu1 %2944 }
 0x156   : > { %6147 = vmatprep.subr.bf16.mxu1 %v6788_v0  ;;  %v2856_v48 = vsel %vm252_vm1, %v2845_v46, 0  ;;  %5144 = vrot.lane.b32.xlu1 %v7370_v24, %s6832_s29 }
 0x157   : > { %5146 = vrot.lane.b32.xlu0 %v7385_v30, %s6832_s29 }
 0x15a   : > { %5249 = vrot.lane.b32.xlu1 %v7368_v23, %s6833_s11 }
 0x15b   : > { %5799 = vmatmul.mubr.msk.bf16.vlgmr.msra.gmra.mrb[0].mxu0 %vm248_vm2, %v5797_v45  ;;  %v2844_v45 = vsel %vm2842_vm3, %v2837_v40, %v2839_v43  ;;  %5251 = vrot.lane.b32.xlu0 %v7370_v24, %s6833_s11  ;;  %vm3942_vm3 = vcmask 277504  }
 0x15c   : > { %2199 = vmatpush1.bf16.msra.mxu0 %v2190_v50  ;;  %2230 = vmatprep.mubr.bf16.mxu0 %v6790_v1  ;;  %v2947_v50 = vpop.permute.xlu0 %2946 }
 0x15d   : > { %5806 = vmatprep.subr.msk.bf16.mxu0 %vm252_vm1, %v2294_v53  ;;  %v2949_v53 = vpop.permute.xlu1 %2948  ;;  %v2953_v61 = vsel %vm2952_vm4, %v2945_v49, %v2947_v50 }
 0x15e   : > { %v2960_v62 = vsel %vm252_vm1, %v2953_v61, 0  ;;  %5253 = vrot.lane.b32.xlu1 %v7385_v30, %s6833_s11 }
 0x15f   : > { %5356 = vrot.lane.b32.xlu0 %v7368_v23, %s6834_s14 }
 0x160   : > { %6144 = vmatmul.mubr.msk.bf16.vlgmr.msra.gmra.mrb[0].mxu1 %vm248_vm2, %v5801_v55  ;;  %v2951_v54 = vpop.permute.xlu0 %2950 }
 0x161   : > { %6148 = vmatpush3.bf16.msra.mxu1 %v2306_v56  ;;  %6149 = vmatprep.mubr.msk.bf16.mxu1 %vm6789_vm0, %v6788_v0  ;;  %v2955_v56 = vsel %vm2952_vm4, %v2949_v53, %v2951_v54  ;;  %v3055_v59 = vpop.permute.xlu1 %3054 }
 0x162   : > { %6153 = vmatprep.subr.bf16.mxu1 %v6788_v0  ;;  %v2966_v58 = vsel %vm252_vm1, %v2955_v56, 0  ;;  %5358 = vrot.lane.b32.xlu1 %v7370_v24, %s6834_s14 }
 0x163   : > { %5360 = vrot.lane.b32.xlu0 %v7385_v30, %s6834_s14 }
 0x166   : > { %5463 = vrot.lane.b32.xlu1 %v7368_v23, %s6835_s17 }
 0x167   : > { %5803 = vmatmul.mubr.msk.bf16.vlgmr.msra.gmra.mrb[0].mxu0 %vm248_vm2, %v5801_v55  ;;  %v2954_v55 = vsel %vm2952_vm4, %v2947_v50, %v2949_v53  ;;  %5465 = vrot.lane.b32.xlu0 %v7370_v24, %s6835_s17  ;;  %vm4052_vm4 = vcmask 146432  }
 0x168   : > { %2309 = vmatpush1.bf16.msra.mxu0 %v2300_v60  ;;  %2340 = vmatprep.mubr.bf16.mxu0 %v6790_v1  ;;  %v3057_v60 = vpop.permute.xlu0 %3056 }
 0x169   : > { %5810 = vmatprep.subr.msk.bf16.mxu0 %vm252_vm1, %v2404_v63  ;;  %v3059_v63 = vpop.permute.xlu1 %3058  ;;  %v3063_v13 = vsel %vm3062_vm5, %v3055_v59, %v3057_v60 }
 0x16a   : > { %v3070_v14 = vsel %vm252_vm1, %v3063_v13, 0  ;;  %5467 = vrot.lane.b32.xlu1 %v7385_v30, %s6835_s17 }
 0x16c   : > { %6150 = vmatmul.mubr.msk.bf16.vlgmr.msra.gmra.mrb[0].mxu1 %vm248_vm2, %v5805_v3  ;;  %v3061_v2 = vpop.permute.xlu0 %3060 }
 0x16d   : > { %6154 = vmatpush3.bf16.msra.mxu1 %v2416_v6  ;;  %6155 = vmatprep.mubr.msk.bf16.mxu1 %vm6789_vm0, %v6788_v0  ;;  %v3065_v6 = vsel %vm3062_vm5, %v3059_v63, %v3061_v2  ;;  %v3165_v11 = vpop.permute.xlu1 %3164 }
 0x16e   : > { %6159 = vmatprep.subr.bf16.mxu1 %v6788_v0  ;;  %v3076_v10 = vsel %vm252_vm1, %v3065_v6, 0 }
 0x173   : > { %5807 = vmatmul.mubr.msk.bf16.vlgmr.msra.gmra.mrb[0].mxu0 %vm248_vm2, %v5805_v3  ;;  %v3064_v3 = vsel %vm3062_vm5, %v3057_v60, %v3059_v63  ;;  %vm4162_vm5 = vcmask 138240  }
 0x174   : > { %2419 = vmatpush1.bf16.msra.mxu0 %v2410_v12  ;;  %2450 = vmatprep.mubr.bf16.mxu0 %v6790_v1  ;;  %v3167_v12 = vpop.permute.xlu0 %3166 }
 0x175   : > { %5814 = vmatprep.subr.msk.bf16.mxu0 %vm252_vm1, %v2514_v15  ;;  %v3169_v15 = vpop.permute.xlu1 %3168  ;;  %v3173_v7 = vsel %vm3172_vm9, %v3165_v11, %v3167_v12 }
 0x176   : > { %v3180_v21 = vsel %vm252_vm1, %v3173_v7, 0 }
 0x178   : > { %6156 = vmatmul.mubr.msk.bf16.vlgmr.msra.gmra.mrb[0].mxu1 %vm248_vm2, %v5809_v17  ;;  %v3171_v16 = vpop.permute.xlu0 %3170 }
 0x179   : > { %6160 = vmatpush3.bf16.msra.mxu1 %v2526_v4  ;;  %6161 = vmatprep.mubr.msk.bf16.mxu1 %vm6789_vm0, %v6788_v0  ;;  %v3175_v4 = vsel %vm3172_vm9, %v3169_v15, %v3171_v16  ;;  %v3275_v19 = vpop.permute.xlu1 %3274 }
 0x17a   : > { %6165 = vmatprep.subr.bf16.mxu1 %v6788_v0  ;;  %v3186_v18 = vsel %vm252_vm1, %v3175_v4, 0 }
 0x17d   : > { %v3279_v8 = vpop.permute.xlu1 %3278 }
 0x17f   : > { %5811 = vmatmul.mubr.msk.bf16.vlgmr.msra.gmra.mrb[0].mxu0 %vm248_vm2, %v5809_v17  ;;  %v3174_v17 = vsel %vm3172_vm9, %v3167_v12, %v3169_v15  ;;  %vm4272_vm9 = vcmask 130048  }
 0x180   : > { %2529 = vmatpush1.bf16.msra.mxu0 %v2520_v20  ;;  %2560 = vmatprep.mubr.bf16.mxu0 %v6790_v1  ;;  %v3277_v20 = vpop.permute.xlu0 %3276 }
 0x181   : > { %5818 = vmatprep.subr.msk.bf16.mxu0 %vm252_vm1, %v2624_v22  ;;  %v3284_v25 = vsel %vm3282_vm10, %v3277_v20, %v3279_v8  ;;  %v3385_v23 = vpop.permute.xlu1 %3384  ;;  %v3283_v24 = vsel %vm3282_vm10, %v3275_v19, %v3277_v20 }
 0x182   : > { %v3290_v31 = vsel %vm252_vm1, %v3283_v24, 0 }
 0x184   : > { %6162 = vmatmul.mubr.msk.bf16.vlgmr.msra.gmra.mrb[0].mxu1 %vm248_vm2, %v5813_v26  ;;  %v3281_v22 = vpop.permute.xlu0 %3280 }
 0x185   : > { %6166 = vmatpush3.bf16.msra.mxu1 %v2636_v27  ;;  %6167 = vmatprep.mubr.msk.bf16.mxu1 %vm6789_vm0, %v6788_v0  ;;  %v5837_v27 = vld [vmem:[%s7778_s1 + $0x6c] sm:$0xf] }
 0x186   : > { %6171 = vmatprep.subr.bf16.mxu1 %v6788_v0 }
 0x188   : > { %v3387_v29 = vpop.permute.xlu0 %3386 }
 0x189   : > { %v3393_v39 = vsel %vm3392_vm11, %v3385_v23, %v3387_v29 }
 0x18a   : > { %v3400_v40 = vsel %vm252_vm1, %v3393_v39, 0 }
 0x18b   : > { %5815 = vmatmul.mubr.msk.bf16.vlgmr.msra.gmra.mrb[0].mxu0 %vm248_vm2, %v5813_v26  ;;  %v3285_v26 = vsel %vm3282_vm10, %v3279_v8, %v3281_v22  ;;  %vm4382_vm10 = vcmask 121856  }
 0x18c   : > { %2639 = vmatpush1.bf16.msra.mxu0 %v2630_v32  ;;  %2670 = vmatprep.mubr.bf16.mxu0 %v6790_v1  ;;  %v3296_v28 = vsel %vm252_vm1, %v3285_v26, 0  ;;  %v3389_v32 = vpop.permute.xlu1 %3388  ;;  %v3391_v33 = vpop.permute.xlu0 %3390 }
 0x18d   : > { %5822 = vmatprep.subr.msk.bf16.mxu0 %vm252_vm1, %v2734_v35  ;;  %v3394_v30 = vsel %vm3392_vm11, %v3387_v29, %v3389_v32  ;;  %v3395_v34 = vsel %vm3392_vm11, %v3389_v32, %v3391_v33  ;;  %v5841_v35 = vld [vmem:[%s7778_s1 + $0x70] sm:$0xf]  ;;  %vm4492_vm11 = vcmask 113664  }
 0x18e   : > { %v3406_v36 = vsel %vm252_vm1, %v3395_v34, 0 }
 0x190   : > { %6168 = vmatmul.mubr.msk.bf16.vlgmr.msra.gmra.mrb[0].mxu1 %vm248_vm2, %v5817_v37 }
 0x191   : > { %6172 = vmatpush3.bf16.msra.mxu1 %v2746_v38  ;;  %6173 = vmatprep.mubr.msk.bf16.mxu1 %vm6789_vm0, %v6788_v0  ;;  %v3497_v38 = vpop.permute.xlu0 %3496 }
 0x192   : > { %6177 = vmatprep.subr.bf16.mxu1 %v6788_v0 }
 0x197   : > { %5819 = vmatmul.mubr.msk.bf16.vlgmr.msra.gmra.mrb[0].mxu0 %vm248_vm2, %v5817_v37  ;;  %v3495_v37 = vpop.permute.xlu1 %3494 }
 0x198   : > { %2749 = vmatpush1.bf16.msra.mxu0 %v2740_v42  ;;  %2780 = vmatprep.mubr.bf16.mxu0 %v6790_v1  ;;  %v3501_v42 = vpop.permute.xlu0 %3500  ;;  %v3503_v49 = vsel %vm3502_vm12, %v3495_v37, %v3497_v38 }
 0x199   : > { %5826 = vmatprep.subr.msk.bf16.mxu0 %vm252_vm1, %v2844_v45  ;;  %v5845_v45 = vld [vmem:[%s7778_s1 + $0x74] sm:$0xf]  ;;  %v3510_v50 = vsel %vm252_vm1, %v3503_v49, 0 }
 0x19b   : > { %v3499_v41 = vpop.permute.xlu1 %3498 }
 0x19c   : > { %6174 = vmatmul.mubr.msk.bf16.vlgmr.msra.gmra.mrb[0].mxu1 %vm248_vm2, %v5821_v47  ;;  %v3504_v43 = vsel %vm3502_vm12, %v3497_v38, %v3499_v41  ;;  %v3505_v44 = vsel %vm3502_vm12, %v3499_v41, %v3501_v42  ;;  %vm4602_vm12 = vcmask 105472  }
 0x19d   : > { %6178 = vmatpush3.bf16.msra.mxu1 %v2856_v48  ;;  %6179 = vmatprep.mubr.msk.bf16.mxu1 %vm6789_vm0, %v6788_v0  ;;  %v3516_v46 = vsel %vm252_vm1, %v3505_v44, 0  ;;  %v3607_v48 = vpop.permute.xlu0 %3606 }
 0x19e   : > { %6183 = vmatprep.subr.bf16.mxu1 %v6788_v0 }
 0x1a3   : > { %5823 = vmatmul.mubr.msk.bf16.vlgmr.msra.gmra.mrb[0].mxu0 %vm248_vm2, %v5821_v47  ;;  %v3605_v47 = vpop.permute.xlu1 %3604 }
 0x1a4   : > { %2859 = vmatpush1.bf16.msra.mxu0 %v2850_v52  ;;  %2890 = vmatprep.mubr.bf16.mxu0 %v6790_v1  ;;  %v3611_v52 = vpop.permute.xlu0 %3610  ;;  %v3613_v59 = vsel %vm3612_vm13, %v3605_v47, %v3607_v48 }
 0x1a5   : > { %5830 = vmatprep.subr.msk.bf16.mxu0 %vm252_vm1, %v2954_v55  ;;  %v5849_v55 = vld [vmem:[%s7778_s1 + $0x78] sm:$0xf]  ;;  %v3620_v60 = vsel %vm252_vm1, %v3613_v59, 0 }
 0x1a7   : > { %v3609_v51 = vpop.permute.xlu1 %3608 }
 0x1a8   : > { %6180 = vmatmul.mubr.msk.bf16.vlgmr.msra.gmra.mrb[0].mxu1 %vm248_vm2, %v5825_v57  ;;  %v3614_v53 = vsel %vm3612_vm13, %v3607_v48, %v3609_v51  ;;  %v3615_v54 = vsel %vm3612_vm13, %v3609_v51, %v3611_v52  ;;  %vm4712_vm13 = vcmask 97280  }
 0x1a9   : > { %6184 = vmatpush3.bf16.msra.mxu1 %v2966_v58  ;;  %6185 = vmatprep.mubr.msk.bf16.mxu1 %vm6789_vm0, %v6788_v0  ;;  %v3626_v56 = vsel %vm252_vm1, %v3615_v54, 0  ;;  %v3717_v58 = vpop.permute.xlu0 %3716 }
 0x1aa   : > { %6189 = vmatprep.subr.bf16.mxu1 %v6788_v0 }
 0x1af   : > { %5827 = vmatmul.mubr.msk.bf16.vlgmr.msra.gmra.mrb[0].mxu0 %vm248_vm2, %v5825_v57  ;;  %v3715_v57 = vpop.permute.xlu1 %3714 }
 0x1b0   : > { %2969 = vmatpush1.bf16.msra.mxu0 %v2960_v62  ;;  %3000 = vmatprep.mubr.bf16.mxu0 %v6790_v1  ;;  %v3721_v62 = vpop.permute.xlu0 %3720  ;;  %v3723_v11 = vsel %vm3722_vm14, %v3715_v57, %v3717_v58 }
 0x1b1   : > { %5834 = vmatprep.subr.msk.bf16.mxu0 %vm252_vm1, %v3064_v3  ;;  %v5853_v3 = vld [vmem:[%s7778_s1 + $0x7c] sm:$0xf]  ;;  %v3730_v12 = vsel %vm252_vm1, %v3723_v11, 0 }
 0x1b3   : > { %v3719_v61 = vpop.permute.xlu1 %3718 }
 0x1b4   : > { %6186 = vmatmul.mubr.msk.bf16.vlgmr.msra.gmra.mrb[0].mxu1 %vm248_vm2, %v5829_v9  ;;  %v3724_v63 = vsel %vm3722_vm14, %v3717_v58, %v3719_v61  ;;  %v3725_v2 = vsel %vm3722_vm14, %v3719_v61, %v3721_v62  ;;  %vm5469_vm14 = vcmask 965632  }
 0x1b5   : > { %6190 = vmatpush3.bf16.msra.mxu1 %v3076_v10  ;;  %6191 = vmatprep.mubr.msk.bf16.mxu1 %vm6789_vm0, %v6788_v0  ;;  %v3736_v6 = vsel %vm252_vm1, %v3725_v2, 0  ;;  %v3827_v10 = vpop.permute.xlu0 %3826 }
 0x1b6   : > { %6195 = vmatprep.subr.bf16.mxu1 %v6788_v0 }
 0x1bb   : > { %5831 = vmatmul.mubr.msk.bf16.vlgmr.msra.gmra.mrb[0].mxu0 %vm248_vm2, %v5829_v9  ;;  %v3825_v9 = vpop.permute.xlu1 %3824 }
 0x1bc   : > { %3079 = vmatpush1.bf16.msra.mxu0 %v3070_v14  ;;  %3110 = vmatprep.mubr.bf16.mxu0 %v6790_v1  ;;  %v3831_v14 = vpop.permute.xlu0 %3830  ;;  %v3833_v19 = vsel %vm3832_vm15, %v3825_v9, %v3827_v10 }
 0x1bd   : > { %5838 = vmatprep.subr.msk.bf16.mxu0 %vm252_vm1, %v3174_v17  ;;  %v5857_v17 = vld [vmem:[%s7778_s1 + $0x80] sm:$0xf]  ;;  %v3840_v20 = vsel %vm252_vm1, %v3833_v19, 0 }
 0x1bf   : > { %v3829_v13 = vpop.permute.xlu1 %3828 }
 0x1c0   : > { %6192 = vmatmul.mubr.msk.bf16.vlgmr.msra.gmra.mrb[0].mxu1 %vm248_vm2, %v5833_v5  ;;  %v3834_v15 = vsel %vm3832_vm15, %v3827_v10, %v3829_v13  ;;  %v3835_v16 = vsel %vm3832_vm15, %v3829_v13, %v3831_v14  ;;  %vm5570_vm15 = vcmask 785408  }
 0x1c1   : > { %6196 = vmatpush3.bf16.msra.mxu1 %v3186_v18  ;;  %6197 = vmatprep.mubr.msk.bf16.mxu1 %vm6789_vm0, %v6788_v0  ;;  %v3846_v4 = vsel %vm252_vm1, %v3835_v16, 0  ;;  %v3937_v18 = vpop.permute.xlu0 %3936 }
 0x1c2   : > { %6201 = vmatprep.subr.bf16.mxu1 %v6788_v0 }
 0x1c7   : > { %5835 = vmatmul.mubr.msk.bf16.vlgmr.msra.gmra.mrb[0].mxu0 %vm248_vm2, %v5833_v5  ;;  %v3935_v5 = vpop.permute.xlu1 %3934 }
 0x1c8   : > { %3189 = vmatpush1.bf16.msra.mxu0 %v3180_v21  ;;  %3220 = vmatprep.mubr.bf16.mxu0 %v6790_v1  ;;  %v3941_v21 = vpop.permute.xlu0 %3940  ;;  %v3943_v23 = vsel %vm3942_vm3, %v3935_v5, %v3937_v18 }
 0x1c9   : > { %5842 = vmatprep.subr.msk.bf16.mxu0 %vm252_vm1, %v3284_v25  ;;  %v5861_v25 = vld [vmem:[%s7778_s1 + $0x84] sm:$0xf]  ;;  %v3950_v29 = vsel %vm252_vm1, %v3943_v23, 0 }
 0x1cb   : > { %v3939_v7 = vpop.permute.xlu1 %3938 }
 0x1cc   : > { %6198 = vmatmul.mubr.msk.bf16.vlgmr.msra.gmra.mrb[0].mxu1 %vm248_vm2, %v5837_v27  ;;  %v3944_v8 = vsel %vm3942_vm3, %v3937_v18, %v3939_v7  ;;  %v3945_v22 = vsel %vm3942_vm3, %v3939_v7, %v3941_v21 }
 0x1cd   : > { %6202 = vmatpush3.bf16.msra.mxu1 %v3296_v28  ;;  %6203 = vmatprep.mubr.msk.bf16.mxu1 %vm6789_vm0, %v6788_v0  ;;  %v3956_v26 = vsel %vm252_vm1, %v3945_v22, 0  ;;  %v4047_v28 = vpop.permute.xlu0 %4046 }
 0x1ce   : > { %6207 = vmatprep.subr.bf16.mxu1 %v6788_v0 }
 0x1d3   : > { %5839 = vmatmul.mubr.msk.bf16.vlgmr.msra.gmra.mrb[0].mxu0 %vm248_vm2, %v5837_v27  ;;  %v4045_v27 = vpop.permute.xlu1 %4044 }
 0x1d4   : > { %3299 = vmatpush1.bf16.msra.mxu0 %v3290_v31  ;;  %3330 = vmatprep.mubr.bf16.mxu0 %v6790_v1  ;;  %v4051_v31 = vpop.permute.xlu0 %4050  ;;  %v4053_v37 = vsel %vm4052_vm4, %v4045_v27, %v4047_v28 }
 0x1d5   : > { %5846 = vmatprep.subr.msk.bf16.mxu0 %vm252_vm1, %v3394_v30  ;;  %v5865_v30 = vld [vmem:[%s7778_s1 + $0x88] sm:$0xf]  ;;  %v4060_v38 = vsel %vm252_vm1, %v4053_v37, 0 }
 0x1d7   : > { %v4049_v24 = vpop.permute.xlu1 %4048 }
 0x1d8   : > { %6204 = vmatmul.mubr.msk.bf16.vlgmr.msra.gmra.mrb[0].mxu1 %vm248_vm2, %v5841_v35  ;;  %v4054_v32 = vsel %vm4052_vm4, %v4047_v28, %v4049_v24  ;;  %v4055_v33 = vsel %vm4052_vm4, %v4049_v24, %v4051_v31 }
 0x1d9   : > { %6208 = vmatpush3.bf16.msra.mxu1 %v3406_v36  ;;  %6209 = vmatprep.mubr.msk.bf16.mxu1 %vm6789_vm0, %v6788_v0  ;;  %v4066_v34 = vsel %vm252_vm1, %v4055_v33, 0  ;;  %v4157_v36 = vpop.permute.xlu0 %4156  ;;  %v5889_v33 = vld [vmem:[%s7778_s1 + $0xa0] sm:$0xf] }
 0x1da   : > { %6213 = vmatprep.subr.bf16.mxu1 %v6788_v0 }
 0x1df   : > { %5843 = vmatmul.mubr.msk.bf16.vlgmr.msra.gmra.mrb[0].mxu0 %vm248_vm2, %v5841_v35  ;;  %v4155_v35 = vpop.permute.xlu1 %4154 }
 0x1e0   : > { %3409 = vmatpush1.bf16.msra.mxu0 %v3400_v40  ;;  %3440 = vmatprep.mubr.bf16.mxu0 %v6790_v1  ;;  %v4161_v40 = vpop.permute.xlu0 %4160  ;;  %v4163_v47 = vsel %vm4162_vm5, %v4155_v35, %v4157_v36 }
 0x1e1   : > { %5850 = vmatprep.subr.msk.bf16.mxu0 %vm252_vm1, %v3504_v43  ;;  %v5869_v43 = vld [vmem:[%s7778_s1 + $0x8c] sm:$0xf]  ;;  %v4170_v48 = vsel %vm252_vm1, %v4163_v47, 0 }
 0x1e3   : > { %v4159_v39 = vpop.permute.xlu1 %4158 }
 0x1e4   : > { %6210 = vmatmul.mubr.msk.bf16.vlgmr.msra.gmra.mrb[0].mxu1 %vm248_vm2, %v5845_v45  ;;  %v4164_v41 = vsel %vm4162_vm5, %v4157_v36, %v4159_v39  ;;  %v4165_v42 = vsel %vm4162_vm5, %v4159_v39, %v4161_v40  ;;  %v5893_v40 = vld [vmem:[%s7778_s1 + $0xa4] sm:$0xf] }
 0x1e5   : > { %6214 = vmatpush3.bf16.msra.mxu1 %v3516_v46  ;;  %6215 = vmatprep.mubr.msk.bf16.mxu1 %vm6789_vm0, %v6788_v0  ;;  %v4176_v44 = vsel %vm252_vm1, %v4165_v42, 0  ;;  %v4267_v46 = vpop.permute.xlu0 %4266 }
 0x1e6   : > { %6219 = vmatprep.subr.bf16.mxu1 %v6788_v0 }
 0x1eb   : > { %5847 = vmatmul.mubr.msk.bf16.vlgmr.msra.gmra.mrb[0].mxu0 %vm248_vm2, %v5845_v45  ;;  %v4265_v45 = vpop.permute.xlu1 %4264 }
 0x1ec   : > { %3519 = vmatpush1.bf16.msra.mxu0 %v3510_v50  ;;  %3550 = vmatprep.mubr.bf16.mxu0 %v6790_v1  ;;  %v4271_v50 = vpop.permute.xlu0 %4270  ;;  %v4273_v57 = vsel %vm4272_vm9, %v4265_v45, %v4267_v46 }
 0x1ed   : > { %5854 = vmatprep.subr.msk.bf16.mxu0 %vm252_vm1, %v3614_v53  ;;  %v5873_v53 = vld [vmem:[%s7778_s1 + $0x90] sm:$0xf]  ;;  %v4280_v58 = vsel %vm252_vm1, %v4273_v57, 0 }
 0x1ef   : > { %v4269_v49 = vpop.permute.xlu1 %4268 }
 0x1f0   : > { %6216 = vmatmul.mubr.msk.bf16.vlgmr.msra.gmra.mrb[0].mxu1 %vm248_vm2, %v5849_v55  ;;  %v4274_v51 = vsel %vm4272_vm9, %v4267_v46, %v4269_v49  ;;  %v4275_v52 = vsel %vm4272_vm9, %v4269_v49, %v4271_v50 }
 0x1f1   : > { %6220 = vmatpush3.bf16.msra.mxu1 %v3626_v56  ;;  %6221 = vmatprep.mubr.msk.bf16.mxu1 %vm6789_vm0, %v6788_v0  ;;  %v4286_v54 = vsel %vm252_vm1, %v4275_v52, 0  ;;  %v4377_v56 = vpop.permute.xlu0 %4376 }
 0x1f2   : > { %6225 = vmatprep.subr.bf16.mxu1 %v6788_v0 }
 0x1f7   : > { %5851 = vmatmul.mubr.msk.bf16.vlgmr.msra.gmra.mrb[0].mxu0 %vm248_vm2, %v5849_v55  ;;  %v4375_v55 = vpop.permute.xlu1 %4374 }
 0x1f8   : > { %3629 = vmatpush1.bf16.msra.mxu0 %v3620_v60  ;;  %3660 = vmatprep.mubr.bf16.mxu0 %v6790_v1  ;;  %v4381_v60 = vpop.permute.xlu0 %4380  ;;  %v4383_v9 = vsel %vm4382_vm10, %v4375_v55, %v4377_v56 }
 0x1f9   : > { %5858 = vmatprep.subr.msk.bf16.mxu0 %vm252_vm1, %v3724_v63  ;;  %v5877_v63 = vld [vmem:[%s7778_s1 + $0x94] sm:$0xf]  ;;  %v4390_v10 = vsel %vm252_vm1, %v4383_v9, 0 }
 0x1fb   : > { %v4379_v59 = vpop.permute.xlu1 %4378 }
 0x1fc   : > { %6222 = vmatmul.mubr.msk.bf16.vlgmr.msra.gmra.mrb[0].mxu1 %vm248_vm2, %v5853_v3  ;;  %v4384_v61 = vsel %vm4382_vm10, %v4377_v56, %v4379_v59  ;;  %v4385_v62 = vsel %vm4382_vm10, %v4379_v59, %v4381_v60  ;;  %v5904_v56 = vld [vmem:[%s7778_s1 + $0xac] sm:$0xf] }
 0x1fd   : > { %6226 = vmatpush3.bf16.msra.mxu1 %v3736_v6  ;;  %6227 = vmatprep.mubr.msk.bf16.mxu1 %vm6789_vm0, %v6788_v0  ;;  %v4396_v2 = vsel %vm252_vm1, %v4385_v62, 0  ;;  %v4487_v6 = vpop.permute.xlu0 %4486 }
 0x1fe   : > { %6231 = vmatprep.subr.bf16.mxu1 %v6788_v0 }
 0x203   : > { %5855 = vmatmul.mubr.msk.bf16.vlgmr.msra.gmra.mrb[0].mxu0 %vm248_vm2, %v5853_v3  ;;  %v4485_v3 = vpop.permute.xlu1 %4484 }
 0x204   : > { %3739 = vmatpush1.bf16.msra.mxu0 %v3730_v12  ;;  %3770 = vmatprep.mubr.bf16.mxu0 %v6790_v1  ;;  %v4491_v12 = vpop.permute.xlu0 %4490  ;;  %v4493_v5 = vsel %vm4492_vm11, %v4485_v3, %v4487_v6 }
 0x205   : > { %5862 = vmatprep.subr.msk.bf16.mxu0 %vm252_vm1, %v3834_v15  ;;  %v5881_v15 = vld [vmem:[%s7778_s1 + $0x98] sm:$0xf]  ;;  %v4500_v18 = vsel %vm252_vm1, %v4493_v5, 0 }
 0x207   : > { %v4489_v11 = vpop.permute.xlu1 %4488 }
 0x208   : > { %6228 = vmatmul.mubr.msk.bf16.vlgmr.msra.gmra.mrb[0].mxu1 %vm248_vm2, %v5857_v17  ;;  %v4494_v13 = vsel %vm4492_vm11, %v4487_v6, %v4489_v11  ;;  %v4495_v14 = vsel %vm4492_vm11, %v4489_v11, %v4491_v12 }
 0x209   : > { %6232 = vmatpush3.bf16.msra.mxu1 %v3846_v4  ;;  %6233 = vmatprep.mubr.msk.bf16.mxu1 %vm6789_vm0, %v6788_v0  ;;  %v4506_v16 = vsel %vm252_vm1, %v4495_v14, 0  ;;  %v4597_v4 = vpop.permute.xlu0 %4596  ;;  %v5912_v14 = vld [vmem:[%s7778_s1 + $0xb4] sm:$0xf] }
 0x20a   : > { %6237 = vmatprep.subr.bf16.mxu1 %v6788_v0 }
 0x20f   : > { %5859 = vmatmul.mubr.msk.bf16.vlgmr.msra.gmra.mrb[0].mxu0 %vm248_vm2, %v5857_v17  ;;  %v4595_v17 = vpop.permute.xlu1 %4594 }
 0x210   : > { %3849 = vmatpush1.bf16.msra.mxu0 %v3840_v20  ;;  %3880 = vmatprep.mubr.bf16.mxu0 %v6790_v1  ;;  %v4601_v20 = vpop.permute.xlu0 %4600  ;;  %v4603_v27 = vsel %vm4602_vm12, %v4595_v17, %v4597_v4 }
 0x211   : > { %5866 = vmatprep.subr.msk.bf16.mxu0 %vm252_vm1, %v3944_v8  ;;  %v5885_v8 = vld [vmem:[%s7778_s1 + $0x9c] sm:$0xf]  ;;  %v4610_v28 = vsel %vm252_vm1, %v4603_v27, 0 }
 0x212   : > { %v5920_v27 = vld [vmem:[%s7778_s1 + $0xbc] sm:$0xf] }
 0x213   : > { %v4599_v19 = vpop.permute.xlu1 %4598 }
 0x214   : > { %6234 = vmatmul.mubr.msk.bf16.vlgmr.msra.gmra.mrb[0].mxu1 %vm248_vm2, %v5861_v25  ;;  %v4604_v7 = vsel %vm4602_vm12, %v4597_v4, %v4599_v19  ;;  %v4605_v21 = vsel %vm4602_vm12, %v4599_v19, %v4601_v20  ;;  %v5916_v20 = vld [vmem:[%s7778_s1 + $0xb8] sm:$0xf] }
 0x215   : > { %6238 = vmatpush3.bf16.msra.mxu1 %v3956_v26  ;;  %6239 = vmatprep.mubr.msk.bf16.mxu1 %vm6789_vm0, %v6788_v0  ;;  %v4616_v22 = vsel %vm252_vm1, %v4605_v21, 0  ;;  %v4707_v26 = vpop.permute.xlu0 %4706 }
 0x216   : > { %6243 = vmatprep.subr.bf16.mxu1 %v6788_v0 }
 0x21b   : > { %5863 = vmatmul.mubr.msk.bf16.vlgmr.msra.gmra.mrb[0].mxu0 %vm248_vm2, %v5861_v25  ;;  %v4705_v25 = vpop.permute.xlu1 %4704 }
 0x21c   : > { %3959 = vmatpush1.bf16.msra.mxu0 %v3950_v29  ;;  %3990 = vmatprep.mubr.bf16.mxu0 %v6790_v1  ;;  %v4711_v29 = vpop.permute.xlu0 %4710 }
 0x21d   : > { %5870 = vmatprep.subr.msk.bf16.mxu0 %vm252_vm1, %v4054_v32 }
 0x21f   : > { %v4709_v23 = vpop.permute.xlu1 %4708 }
 0x220   : > { %6240 = vmatmul.mubr.msk.bf16.vlgmr.msra.gmra.mrb[0].mxu1 %vm248_vm2, %v5865_v30  ;;  %v4714_v24 = vsel %vm4712_vm13, %v4707_v26, %v4709_v23  ;;  %v4715_v31 = vsel %vm4712_vm13, %v4709_v23, %v4711_v29  ;;  %v4827_v35 = vpop.permute.xlu0 %4826 }
 0x221   : > { %6244 = vmatpush3.bf16.msra.mxu1 %v4066_v34  ;;  %6245 = vmatprep.mubr.msk.bf16.mxu1 %vm6789_vm0, %v6788_v0  ;;  %v4713_v34 = vsel %vm4712_vm13, %v4705_v25, %v4707_v26 }
 0x222   : > { %6249 = vmatprep.subr.bf16.mxu1 %v6788_v0  ;;  %v4720_v37 = vsel %vm252_vm1, %v4713_v34, 0  ;;  %v5572_v34 = vld [vmem:[%s7779_s2] sm:$0x7] }
 0x223   : > { %v4825_v32 = vpop.permute.xlu1 %4824 }
 0x224   : > { %v4931_v39 = vpop.permute.xlu0 %4930  ;;  %v4830_v42 = vsel %vm658_vm6, %v4825_v32, %v4827_v35 }
 0x225   : > { %v4836_v45 = vsel %vm252_vm1, %v4830_v42, 0 }
 0x227   : > { %5867 = vmatmul.mubr.msk.bf16.vlgmr.msra.gmra.mrb[0].mxu0 %vm248_vm2, %v5865_v30  ;;  %v4726_v30 = vsel %vm252_vm1, %v4715_v31, 0  ;;  %v4829_v36 = vpop.permute.xlu1 %4828  ;;  %v5574_v31 = vlaneseq }
 0x228   : > { %4069 = vmatpush1.bf16.msra.mxu0 %v4060_v38  ;;  %4100 = vmatprep.mubr.bf16.mxu0 %v6790_v1  ;;  %v4831_v38 = vsel %vm658_vm6, %v4827_v35, %v4829_v36  ;;  %vm5148_vm6 = vcmask 990208  }
 0x229   : > { %5874 = vmatprep.subr.msk.bf16.mxu0 %vm252_vm1, %v4164_v41  ;;  %v4842_v41 = vsel %vm252_vm1, %v4829_v36, 0  ;;  %v5575_v32 = vshrl.u32 %v5574_v31, 7 }
 0x22b   : > { %v5580_v35 = vsub.s32 1, %v5575_v32 }
 0x22c   : > { %6246 = vmatmul.mubr.msk.bf16.vlgmr.msra.gmra.mrb[0].mxu1 %vm248_vm2, %v5869_v43 }
 0x22d   : > { %6250 = vmatpush3.bf16.msra.mxu1 %v4176_v44  ;;  %6251 = vmatprep.mubr.msk.bf16.mxu1 %vm6789_vm0, %v6788_v0  ;;  %v4935_v44 = vpop.permute.xlu0 %4934 }
 0x22e   : > { %6255 = vmatprep.subr.bf16.mxu1 %v6788_v0  ;;  %v4948_v49 = vsel %vm252_vm1, %v4935_v44, 0 }
 0x233   : > { %5871 = vmatmul.mubr.msk.bf16.vlgmr.msra.gmra.mrb[0].mxu0 %vm248_vm2, %v5869_v43  ;;  %v4933_v43 = vpop.permute.xlu1 %4932 }
 0x234   : > { %4179 = vmatpush1.bf16.msra.mxu0 %v4170_v48  ;;  %4210 = vmatprep.mubr.bf16.mxu0 %v6790_v1  ;;  %v4937_v46 = vsel %vm765_vm7, %v4933_v43, %v4935_v44  ;;  %v5897_v48 = vld [vmem:[%s7778_s1 + $0xa8] sm:$0xf]  ;;  %v4936_v50 = vsel %vm765_vm7, %v4931_v39, %v4933_v43  ;;  %vm5255_vm7 = vcmask 982016  }
 0x235   : > { %5878 = vmatprep.subr.msk.bf16.mxu0 %vm252_vm1, %v4274_v51  ;;  %v5039_v51 = vpop.permute.xlu0 %5038 }
 0x237   : > { %v5037_v47 = vpop.permute.xlu1 %5036 }
 0x238   : > { %6252 = vmatmul.mubr.msk.bf16.vlgmr.msra.gmra.mrb[0].mxu1 %vm248_vm2, %v5873_v53 }
 0x239   : > { %6256 = vmatpush3.bf16.msra.mxu1 %v4286_v54  ;;  %6257 = vmatprep.mubr.msk.bf16.mxu1 %vm6789_vm0, %v6788_v0  ;;  %v5143_v55 = vpop.permute.xlu0 %5142 }
 0x23a   : > { %6261 = vmatprep.subr.bf16.mxu1 %v6788_v0 }
 0x23b   : > { %v5041_v52 = vpop.permute.xlu1 %5040 }
 0x23c   : > { %v5043_v54 = vsel %vm872_vm8, %v5039_v51, %v5041_v52  ;;  %v5054_v57 = vsel %vm252_vm1, %v5041_v52, 0 }
 0x23d   : > { %v5147_v60 = vpop.permute.xlu0 %5146 }
 0x23e   : > { %v5161_v3 = vsel %vm252_vm1, %v5147_v60, 0 }
 0x23f   : > { %5875 = vmatmul.mubr.msk.bf16.vlgmr.msra.gmra.mrb[0].mxu0 %vm248_vm2, %v5873_v53  ;;  %v4942_v53 = vsel %vm252_vm1, %v4936_v50, 0  ;;  %v5145_v59 = vpop.permute.xlu1 %5144 }
 0x240   : > { %4289 = vmatpush1.bf16.msra.mxu0 %v4280_v58  ;;  %4320 = vmatprep.mubr.bf16.mxu0 %v6790_v1  ;;  %v5042_v58 = vsel %vm872_vm8, %v5037_v47, %v5039_v51  ;;  %v5150_v62 = vsel %vm5148_vm6, %v5145_v59, %v5147_v60  ;;  %v5149_v6 = vsel %vm5148_vm6, %v5143_v55, %v5145_v59  ;;  %vm5362_vm8 = vcmask 973824  }
 0x241   : > { %5882 = vmatprep.subr.msk.bf16.mxu0 %vm252_vm1, %v4384_v61  ;;  %v5048_v61 = vsel %vm252_vm1, %v5042_v58, 0  ;;  %v5252_v9 = vpop.permute.xlu0 %5251  ;;  %v5155_v11 = vsel %vm252_vm1, %v5149_v6, 0 }
 0x244   : > { %6258 = vmatmul.mubr.msk.bf16.vlgmr.msra.gmra.mrb[0].mxu1 %vm248_vm2, %v5877_v63 }
 0x245   : > { %6262 = vmatpush3.bf16.msra.mxu1 %v4396_v2  ;;  %6263 = vmatprep.mubr.msk.bf16.mxu1 %vm6789_vm0, %v6788_v0  ;;  %v5908_v2 = vld [vmem:[%s7778_s1 + $0xb0] sm:$0xf] }
 0x246   : > { %6267 = vmatprep.subr.bf16.mxu1 %v6788_v0 }
 0x24b   : > { %5879 = vmatmul.mubr.msk.bf16.vlgmr.msra.gmra.mrb[0].mxu0 %vm248_vm2, %v5877_v63  ;;  %v5250_v63 = vpop.permute.xlu1 %5249 }
 0x24c   : > { %4399 = vmatpush1.bf16.msra.mxu0 %v4390_v10  ;;  %4430 = vmatprep.mubr.bf16.mxu0 %v6790_v1 }
 0x24d   : > { %5886 = vmatprep.subr.msk.bf16.mxu0 %vm252_vm1, %v4494_v13  ;;  %v5357_v13 = vpop.permute.xlu0 %5356 }
 0x24f   : > { %v5254_v10 = vpop.permute.xlu1 %5253 }
 0x250   : > { %6264 = vmatmul.mubr.msk.bf16.vlgmr.msra.gmra.mrb[0].mxu1 %vm248_vm2, %v5881_v15  ;;  %v5257_v12 = vsel %vm5255_vm7, %v5252_v9, %v5254_v10 }
 0x251   : > { %6268 = vmatpush3.bf16.msra.mxu1 %v4506_v16  ;;  %6269 = vmatprep.mubr.msk.bf16.mxu1 %vm6789_vm0, %v6788_v0  ;;  %v5256_v16 = vsel %vm5255_vm7, %v5250_v63, %v5252_v9  ;;  %v5361_v4 = vpop.permute.xlu0 %5360 }
 0x252   : > { %6273 = vmatprep.subr.bf16.mxu1 %v6788_v0  ;;  %v5262_v5 = vsel %vm252_vm1, %v5256_v16, 0 }
 0x253   : > { %v5359_v17 = vpop.permute.xlu1 %5358 }
 0x254   : > { %v5363_v21 = vsel %vm5362_vm8, %v5357_v13, %v5359_v17 }
 0x255   : > { %v5369_v25 = vsel %vm252_vm1, %v5363_v21, 0 }
 0x257   : > { %5883 = vmatmul.mubr.msk.bf16.vlgmr.msra.gmra.mrb[0].mxu0 %vm248_vm2, %v5881_v15  ;;  %v5268_v15 = vsel %vm252_vm1, %v5254_v10, 0  ;;  %v5464_v19 = vpop.permute.xlu1 %5463 }
 0x258   : > { %4509 = vmatpush1.bf16.msra.mxu0 %v4500_v18  ;;  %4540 = vmatprep.mubr.bf16.mxu0 %v6790_v1  ;;  %v5364_v18 = vsel %vm5362_vm8, %v5359_v17, %v5361_v4 }
 0x259   : > { %5890 = vmatprep.subr.msk.bf16.mxu0 %vm252_vm1, %v4604_v7  ;;  %v5375_v7 = vsel %vm252_vm1, %v5361_v4, 0 }
 0x25c   : > { %6270 = vmatmul.mubr.msk.bf16.vlgmr.msra.gmra.mrb[0].mxu1 %vm248_vm2, %v5885_v8 }
 0x25d   : > { %6274 = vmatpush3.bf16.msra.mxu1 %v4616_v22  ;;  %6275 = vmatprep.mubr.msk.bf16.mxu1 %vm6789_vm0, %v6788_v0  ;;  %v5468_v22 = vpop.permute.xlu1 %5467 }
 0x25e   : > { %6279 = vmatprep.subr.bf16.mxu1 %v6788_v0 }
 0x263   : > { %5887 = vmatmul.mubr.msk.bf16.vlgmr.msra.gmra.mrb[0].mxu0 %vm248_vm2, %v5885_v8  ;;  %v5466_v8 = vpop.permute.xlu0 %5465 }
 0x264   : > { %4619 = vmatpush1.bf16.msra.mxu0 %v4610_v28  ;;  %4650 = vmatprep.mubr.bf16.mxu0 %v6790_v1  ;;  %v5471_v26 = vsel %vm5469_vm14, %v5466_v8, %v5468_v22  ;;  %v5482_v28 = vsel %vm252_vm1, %v5468_v22, 0  ;;  %v5470_v23 = vsel %vm5469_vm14, %v5464_v19, %v5466_v8 }
 0x265   : > { %5894 = vmatprep.subr.msk.bf16.mxu0 %vm252_vm1, %v4714_v24  ;;  %v5476_v29 = vsel %vm252_vm1, %v5470_v23, 0  ;;  %v5924_v24 = vld [vmem:[%s7778_s1 + $0xc0] sm:$0xf] }
 0x268   : > { %6276 = vmatmul.mubr.msk.bf16.vlgmr.msra.gmra.mrb[0].mxu1 %vm248_vm2, %v5889_v33 }
 0x269   : > { %6280 = vmatpush3.bf16.msra.mxu1 %v4726_v30  ;;  %6281 = vmatprep.mubr.msk.bf16.mxu1 %vm6789_vm0, %v6788_v0 }
 0x26a   : > { %6285 = vmatprep.subr.bf16.mxu1 %v6788_v0 }
 0x26f   : > { %5891 = vmatmul.mubr.msk.bf16.vlgmr.msra.gmra.mrb[0].mxu0 %vm248_vm2, %v5889_v33  ;;  %v5584_v33 = vsub.s32 2, %v5575_v32 }
 0x270   : > { %4729 = vmatpush1.bf16.msra.mxu0 %v4720_v37  ;;  %4760 = vmatprep.mubr.bf16.mxu0 %v6790_v1 }
 0x271   : > { %5901 = vmatprep.subr.msk.bf16.mxu0 %vm252_vm1, %v4831_v38  ;;  %v5585_v37 = vrot.slane %v5572_v34, %v5584_v33 }
 0x274   : > { %6282 = vmatmul.mubr.msk.bf16.vlgmr.msra.gmra.mrb[0].mxu1 %vm248_vm2, %v5893_v40 }
 0x275   : > { %6286 = vmatpush3.bf16.msra.mxu1 %v4842_v41  ;;  %6287 = vmatprep.mubr.msk.bf16.mxu1 %vm6789_vm0, %v6788_v0 }
 0x276   : > { %6291 = vmatprep.subr.bf16.mxu1 %v6788_v0 }
 0x27b   : > { %5895 = vmatmul.mubr.msk.bf16.vlgmr.msra.gmra.mrb[0].mxu0 %vm248_vm2, %v5893_v40  ;;  %v5581_v40 = vrot.slane %v5572_v34, %v5580_v35 }
 0x27c   : > { %4845 = vmatpush1.bf16.msra.mxu0 %v4836_v45  ;;  %4876 = vmatprep.mubr.bf16.mxu0 %v6790_v1 }
 0x27d   : > { %5905 = vmatprep.subr.msk.bf16.mxu0 %vm252_vm1, %v4937_v46 }
 0x280   : > { %6288 = vmatmul.mubr.msk.bf16.vlgmr.msra.gmra.mrb[0].mxu1 %vm248_vm2, %v5897_v48 }
 0x281   : > { %6292 = vmatpush3.bf16.msra.mxu1 %v4948_v49  ;;  %6293 = vmatprep.mubr.msk.bf16.mxu1 %vm6789_vm0, %v6788_v0 }
 0x282   : > { %6297 = vmatprep.subr.bf16.mxu1 %v6788_v0 }
 0x287   : > { %5902 = vmatmul.mubr.msk.bf16.vlgmr.msra.gmra.mrb[0].mxu0 %vm248_vm2, %v5897_v48 }
 0x288   : > { %4951 = vmatpush1.bf16.msra.mxu0 %v4942_v53  ;;  %4982 = vmatprep.mubr.bf16.mxu0 %v6790_v1 }
 0x289   : > { %5909 = vmatprep.subr.msk.bf16.mxu0 %vm252_vm1, %v5043_v54 }
 0x28c   : > { %6294 = vmatmul.mubr.msk.bf16.vlgmr.msra.gmra.mrb[0].mxu1 %vm248_vm2, %v5904_v56 }
 0x28d   : > { %6298 = vmatpush3.bf16.msra.mxu1 %v5054_v57  ;;  %6299 = vmatprep.mubr.msk.bf16.mxu1 %vm6789_vm0, %v6788_v0 }
 0x28e   : > { %6303 = vmatprep.subr.bf16.mxu1 %v6788_v0 }
 0x293   : > { %5906 = vmatmul.mubr.msk.bf16.vlgmr.msra.gmra.mrb[0].mxu0 %vm248_vm2, %v5904_v56 }
 0x294   : > { %5057 = vmatpush1.bf16.msra.mxu0 %v5048_v61  ;;  %5088 = vmatprep.mubr.bf16.mxu0 %v6790_v1 }
 0x295   : > { %5913 = vmatprep.subr.msk.bf16.mxu0 %vm252_vm1, %v5150_v62 }
 0x298   : > { %6300 = vmatmul.mubr.msk.bf16.vlgmr.msra.gmra.mrb[0].mxu1 %vm248_vm2, %v5908_v2 }
 0x299   : > { %6304 = vmatpush3.bf16.msra.mxu1 %v5161_v3  ;;  %6305 = vmatprep.mubr.msk.bf16.mxu1 %vm6789_vm0, %v6788_v0 }
 0x29a   : > { %6309 = vmatprep.subr.bf16.mxu1 %v6788_v0 }
 0x29f   : > { %5910 = vmatmul.mubr.msk.bf16.vlgmr.msra.gmra.mrb[0].mxu0 %vm248_vm2, %v5908_v2 }
 0x2a0   : > { %5164 = vmatpush1.bf16.msra.mxu0 %v5155_v11  ;;  %5195 = vmatprep.mubr.bf16.mxu0 %v6790_v1  ;;  %v5620_v11 = vld [vmem:[%s7780_s3] sm:$0xff] }
 0x2a1   : > { %5917 = vmatprep.subr.msk.bf16.mxu0 %vm252_vm1, %v5257_v12 }
 0x2a4   : > { %6306 = vmatmul.mubr.msk.bf16.vlgmr.msra.gmra.mrb[0].mxu1 %vm248_vm2, %v5912_v14 }
 0x2a5   : > { %6310 = vmatpush3.bf16.msra.mxu1 %v5268_v15  ;;  %6311 = vmatprep.mubr.msk.bf16.mxu1 %vm6789_vm0, %v6788_v0 }
 0x2a6   : > { %6315 = vmatprep.subr.bf16.mxu1 %v6788_v0 }
 0x2ab   : > { %5914 = vmatmul.mubr.msk.bf16.vlgmr.msra.gmra.mrb[0].mxu0 %vm248_vm2, %v5912_v14  ;;  %v5622_v14 = vld [vmem:[%s7781_s4] sm:$0xff] }
 0x2ac   : > { %5271 = vmatpush1.bf16.msra.mxu0 %v5262_v5  ;;  %5302 = vmatprep.mubr.bf16.mxu0 %v6790_v1 }
 0x2ad   : > { %5921 = vmatprep.subr.msk.bf16.mxu0 %vm252_vm1, %v5364_v18 }
 0x2b0   : > { %6312 = vmatmul.mubr.msk.bf16.vlgmr.msra.gmra.mrb[0].mxu1 %vm248_vm2, %v5916_v20 }
 0x2b1   : > { %6316 = vmatpush3.bf16.msra.mxu1 %v5375_v7  ;;  %6317 = vmatprep.mubr.msk.bf16.mxu1 %vm6789_vm0, %v6788_v0 }
 0x2b2   : > { %6321 = vmatprep.subr.bf16.mxu1 %v6788_v0 }
 0x2b7   : > { %5918 = vmatmul.mubr.msk.bf16.vlgmr.msra.gmra.mrb[0].mxu0 %vm248_vm2, %v5916_v20 }
 0x2b8   : > { %5378 = vmatpush1.bf16.msra.mxu0 %v5369_v25  ;;  %5409 = vmatprep.mubr.bf16.mxu0 %v6790_v1 }
 0x2b9   : > { %5925 = vmatprep.subr.msk.bf16.mxu0 %vm252_vm1, %v5471_v26 }
 0x2bc   : > { %6318 = vmatmul.mubr.msk.bf16.vlgmr.msra.gmra.mrb[0].mxu1 %vm248_vm2, %v5920_v27 }
 0x2bd   : > { %6322 = vmatpush3.bf16.msra.mxu1 %v5482_v28  ;;  %6323 = vmatprep.mubr.msk.bf16.mxu1 %vm6789_vm0, %v6788_v0  ;;  %v5576_v0 = vsub.s32 0, %v5575_v32  ;;  %vm5658_vm0 = vcmask 781312  }
 0x2bf   : > { %v5577_v39 = vrot.slane %v5572_v34, %v5576_v0 }
 0x2c3   : > { %5922 = vmatmul.mubr.msk.bf16.vlgmr.msra.gmra.mrb[0].mxu0 %vm248_vm2, %v5920_v27 }
 0x2c4   : > { %5485 = vmatpush1.bf16.msra.mxu0 %v5476_v29  ;;  %5516 = vmatprep.mubr.bf16.mxu0 %v6790_v1 }
 0x2c8   : > { %6324 = vmatmul.mubr.msk.bf16.vlgmr.msra.gmra.mrb[0].mxu1 %vm248_vm2, %v5924_v24 }
 0x2cf   : > { %5926 = vmatmul.mubr.msk.bf16.vlgmr.msra.gmra.mrb[0].mxu0 %vm248_vm2, %v5924_v24 }
 0x39b   : > { %v5559_v30 = vpop.f32.mrb[0].mxu1 }
 0x39c   : > { %5571 = vst.msk [vmem:[#allocation2 + $0x10] sm:$0xff] %vm5570_vm15, %v5559_v30  ;;  %v6325_v1 = vpop.f32.mrb[1].mxu1  ;;  %v5591_v42 = vmul.f32 %v5585_v37, %v5559_v30 }
 0x39d   : > { %v5562_v36 = vpop.f32.mrb[2].mxu1 }
 0x39e   : > { %v6326_v38 = vpop.f32.mrb[3].mxu1  ;;  %v5593_v49 = vsel %vm5570_vm15, %v5591_v42, 0.0 }
 0x3a2   : > { %v5518_v41 = vpop.f32.mrb[0].mxu0 }
 0x3a3   : > { %v5589_v43 = vmul.f32 %v5577_v39, %v5518_v41  ;;  %v5520_v44 = vpop.f32.mrb[1].mxu0  ;;  %v5601_v53 = vld [vmem:[#allocation2 + $0x10] sm:$0xff] }
 0x3a4   : > { %v5590_v45 = vmul.f32 %v5581_v40, %v5520_v44  ;;  %v5522_v46 = vpop.f32.mrb[2].mxu0 }
 0x3a5   : > { %v5523_v47 = vpop.f32.mrb[3].mxu0 }
 0x3a6   : > { %v5592_v48 = vadd.f32 %v5590_v45, %v5589_v43 }
 0x3a8   : > { %v5594_v50 = vadd.f32 %v5593_v49, %v5592_v48 }
 0x3aa   : > { %5595 = vadd.xlane.f32.xlu0 %v5594_v50 }
 0x437   : > { %v5596_v51 = vpop.xlane.xlu0 %5595 }
 0x438   : > { %v5598_v52 = vmul.f32 0.00390625, %v5596_v51 }
 0x43a   : > { %v5602_v54 = vsub.f32 %v5518_v41, %v5598_v52  ;;  %v5603_v55 = vsub.f32 %v5520_v44, %v5598_v52  ;;  %v5604_v56 = vsub.f32 %v5601_v53, %v5598_v52 }
 0x43c   : > { %v5605_v57 = vmul.f32 %v5602_v54, %v5577_v39  ;;  %v5606_v58 = vmul.f32 %v5603_v55, %v5581_v40  ;;  %v5607_v59 = vmul.f32 %v5604_v56, %v5585_v37 }
 0x43e   : > { %v5608_v60 = vmul.f32 %v5605_v57, %v5605_v57  ;;  %v5609_v61 = vmul.f32 %v5606_v58, %v5606_v58  ;;  %v5610_v62 = vmul.f32 %v5607_v59, %v5607_v59 }
 0x440   : > { %v5611_v63 = vadd.f32 %v5609_v61, %v5608_v60  ;;  %v5612_v2 = vsel %vm5570_vm15, %v5610_v62, 0.0 }
 0x442   : > { %v5613_v3 = vadd.f32 %v5612_v2, %v5611_v63 }
 0x444   : > { %5614 = vadd.xlane.f32.xlu1 %v5613_v3 }
 0x4d1   : > { %v5615_v6 = vpop.xlane.xlu1 %5614 }
 0x4d2   : > { %v5617_v9 = vmul.f32 0.00390625, %v5615_v6 }
 0x4d4   : > { %v5618_v10 = vadd.f32 1e-05, %v5617_v9 }
 0x4d6   : > { %6778 = vrsqrt.f32 %v5618_v10 }
 0x4e0   : > { %v6779_v12 = vpop.eup %6778 }
 0x4e1   : > { %v5621_v13 = vmul.f32 %v6779_v12, %v5620_v11 }
 0x4e3   : > { %5627 = vperm.xlu0 %6768, %v5621_v13   ;;  %v5623_v15 = vmul.f32 %v5621_v13, %v5598_v52 }
 0x4e5   : > { %v5624_v16 = vsub.f32 %v5622_v14, %v5623_v15 }
 0x4e7   : > { %5635 = vperm.xlu1 %6769, %v5624_v16  }
 0x562   : > { %v5628_v17 = vpop.permute.xlu0 %5627 }
 0x563   : > { %v5630_v4 = vmul.f32 %v5628_v17, %v5518_v41  ;;  %v5631_v5 = vmul.f32 %v5628_v17, %v5520_v44  ;;  %v5632_v18 = vmul.f32 %v5628_v17, %v5601_v53 }
 0x566   : > { %v5636_v19 = vpop.permute.xlu1 %5635 }
 0x567   : > { %v5638_v20 = vadd.f32 %v5636_v19, %v5630_v4  ;;  %v5639_v7 = vadd.f32 %v5636_v19, %v5631_v5  ;;  %v5640_v21 = vadd.f32 %v5636_v19, %v5632_v18 }
 0x569   : > { %v5641_v8 = vmax.f32 %v5638_v20, 0.0  ;;  %v5642_v22 = vmax.f32 %v5639_v7, 0.0  ;;  %v5643_v25 = vmax.f32 %v5640_v21, 0.0 }
 0x56b   : > { %v5933_v26 = vpack.c.bf16 %v5642_v22, %v5641_v8  ;;  %v5934_v27 = vpack.c.bf16 %v5643_v25, %v5643_v25 }
 0x56d   : > { %5657 = vst [vmem:[%s224_s6] sm:$0xff] %v5933_v26  ;;  %5659 = vst.msk [vmem:[%s224_s6 + $0x8] sm:$0xf] %vm5658_vm0, %v5934_v27 }
 0x56e PF: > { %s15_s18 = sadd.s32 1, %s6786_s18  }
 0x56f   : > { %p12_p4 = scmp.ge.s32.totalorder %s15_s18, 4  }
 0x571   :  { %14 = sbr.rel (!%p12_p4) target bundleno = 1 (0x1), region = 118 }

// kernel: encoder_forward.10
= control target key start
LH: loop header
LB: loop body
LE: loop exit
PB: predicated region body
PF: predicated region fallthrough
CT: control target
= control target key end

     0   :  { %s1441_s18 = smov 0   ;;  %s1601_s0 = inlined_call_operand.vmem [shape: bf16[2,16,128], index: 0, kind: input, shape index: {}]   ;;  %s1602_s1 = inlined_call_operand.vmem [shape: bf16[9,32,16], index: 1, kind: input, shape index: {}]   ;;  %s1603_s2 = inlined_call_operand.vmem [shape: f32[1,20], index: 2, kind: input, shape index: {}]   ;;  %s1604_s3 = inlined_call_operand.vmem [shape: f32[32,1], index: 3, kind: input, shape index: {}]   ;;  %s1605_s4 = inlined_call_operand.vmem [shape: f32[32,1], index: 4, kind: input, shape index: {}]   ;;  %s1606_s5 = inlined_call_operand.vmem [shape: bf16[2,32,20], index: 5, kind: output, shape index: {}]  }
   0x1 LB: > { %s1144_s19 = sadd.s32 4294967295, %s1400_s18   ;;  %p1148_p0 = scmp.ge.s32.totalorder %s1400_s18, 1  ;;  %s1400_s18 = sphi %s1441_s18, %s15_s18  }
   0x2   : > { %p187_p1 = scmp.lt.s32.totalorder %s1400_s18, 3 }
   0x4   : > { %p188_p2 = pnand %p1148_p0, %p187_p1 }
   0x5   : > { %p215_p3 = scmp.lt.s32.totalorder (!%p188_p2), %s1144_s19, 1  ;;  %vm255_vm0 = vcmask (!%p188_p2), 130048   ;;  %v1368_v0 = vld [vmem:[%s1602_s1 + $0x40] sm:$0xff] (!%p188_p2)   ;;  %v1370_v1 = vld [vmem:[%s1602_s1 + $0x10] sm:$0xff] (!%p188_p2)   ;;  %s1402_s28 = smov (!%p188_p2), 53   ;;  %v1369_v5 = vld [vmem:[%s1602_s1 + $0x48] sm:$0xff] (!%p188_p2)  }
   0x6   : > { %191 = sbr.rel (%p188_p2) target bundleno = 871 (0x367), region = 40  ;;  %1288 = vmatprep.mubr.msk.bf16.mxu0 (!%p188_p2), %vm255_vm0, %v1368_v0  ;;  %1264 = vmatprep.mubr.msk.bf16.mxu1 (!%p188_p2), %vm255_vm0, %v1370_v1  ;;  %s1403_s29 = smov (!%p188_p2), 77   ;;  %v1372_v6 = vld [vmem:[%s1602_s1 + $0x50] sm:$0xff] (!%p188_p2)   ;;  %v1371_v9 = vld [vmem:[%s1602_s1 + $0x18] sm:$0xff] (!%p188_p2)   ;;  %v1374_v10 = vld [vmem:[%s1602_s1] sm:$0xff] (!%p188_p2)   ;;  %vm916_vm1 = vcmask (!%p188_p2), 162816  }
   0x7   : > { %s1404_s30 = smov (!%p188_p2), 103   ;;  %s1405_s6 = smov (!%p188_p2), 123   ;;  %v1373_v12 = vld [vmem:[%s1602_s1 + $0x58] sm:$0xff] (!%p188_p2)   ;;  %v1376_v13 = vld [vmem:[%s1602_s1 + $0x60] sm:$0xff] (!%p188_p2)   ;;  %v1375_v15 = vld [vmem:[%s1602_s1 + $0x8] sm:$0xff] (!%p188_p2)   ;;  %vm1084_vm2 = vcmask (!%p188_p2), 158720  }
   0x8   : > { %s1406_s7 = smov (!%p188_p2), 98   ;;  %s1407_s8 = smov (!%p188_p2), 127   ;;  %v1378_v16 = vld [vmem:[%s1602_s1 + $0x20] sm:$0xff] (!%p188_p2)   ;;  %v1377_v18 = vld [vmem:[%s1602_s1 + $0x68] sm:$0xff] (!%p188_p2)   ;;  %v1380_v19 = vld [vmem:[%s1602_s1 + $0x70] sm:$0xff] (!%p188_p2)  }
   0x9   : > { %s1408_s9 = smov (!%p188_p2), 122   ;;  %s1409_s10 = smov (!%p188_p2), 78   ;;  %v1379_v21 = vld [vmem:[%s1602_s1 + $0x28] sm:$0xff] (!%p188_p2)   ;;  %v1382_v22 = vld [vmem:[%s1602_s1 + $0x30] sm:$0xff] (!%p188_p2)   ;;  %v1381_v23 = vld [vmem:[%s1602_s1 + $0x78] sm:$0xff] (!%p188_p2)  }
   0xa   : > { %v1384_v24 = vld [vmem:[%s1602_s1 + $0x80] sm:$0xff] (!%p188_p2)   ;;  %v1383_v25 = vld [vmem:[%s1602_s1 + $0x38] sm:$0xff] (!%p188_p2)   ;;  %v1385_v26 = vld [vmem:[%s1602_s1 + $0x88] sm:$0xff] (!%p188_p2)  }
   0xb   : > { %v1222_v34 = vld [vmem:[%s1603_s2] ss:$0 sm:$0xff] (!%p188_p2) }
   0xd   : > { %s1608_s19 = smov (!%p215_p3, %s1144_s19), 1 }
   0xe   : > { %s1229_s24 = sshll.u32 %s1608_s19, 3  ;;  %s1230_s15 = sshll.u32 %s1608_s19, 4 }
   0xf   : > { %s219_s27 = scalar_lea.vmem %s1601_s0, %s1229_s24  ;;  %s224_s20 = scalar_lea.vmem %s1606_s5, %s1230_s15 }
  0x10   : > { %v1367_v2 = vld [vmem:[%s219_s27] sm:$0xff]  }
  0x11   : > { %546 = vrot.lane.b32.xlu0 %v1367_v2, %s1402_s28  ;;  %623 = vrot.lane.b32.xlu1 %v1367_v2, %s1403_s29 }
  0x15   : > { %252 = vrot.lane.b32.xlu0 %v1367_v2, %s1404_s30  ;;  %700 = vrot.lane.b32.xlu1 %v1367_v2, %s1405_s6 }
  0x19   : > { %777 = vrot.lane.b32.xlu1 %v1367_v2, %s1406_s7  ;;  %392 = vrot.lane.b32.xlu0 %v1367_v2, %s1407_s8 }
  0x1d   : > { %854 = vrot.lane.b32.xlu1 %v1367_v2, %s1408_s9  ;;  %469 = vrot.lane.b32.xlu0 %v1367_v2, %s1409_s10 }
  0x83   : > { %v547_v3 = vpop.permute.xlu0 %546  ;;  %v624_v4 = vpop.permute.xlu1 %623 }
  0x84   : > { %1286 = vmatprep.subr.bf16.mxu0 %v547_v3 }
  0x85   : > { %1287 = vmatpush3.bf16.msra.mxu0 %v547_v3 }
  0x86   : > { %1292 = vmatprep.subr.bf16.mxu0 %v624_v4 }
  0x87   : > { %v253_v7 = vpop.permute.xlu0 %252  ;;  %v701_v8 = vpop.permute.xlu1 %700 }
  0x88   : > { %1262 = vmatprep.subr.bf16.mxu1 %v253_v7  ;;  %1289 = vmatmul.mubr.msk.bf16.vlgmr.msra.gmra.mrb[0].mxu0 %vm255_vm0, %v1369_v5 }
  0x89   : > { %1263 = vmatpush3.bf16.msra.mxu1 %v253_v7  ;;  %1293 = vmatpush3.bf16.msra.mxu0 %v624_v4 }
  0x8a   : > { %1294 = vmatprep.mubr.msk.bf16.mxu0 %vm255_vm0, %v1372_v6  ;;  %1298 = vmatprep.subr.bf16.mxu0 %v701_v8 }
  0x8b   : > { %1268 = vmatprep.subr.bf16.mxu1 %v1367_v2  ;;  %v393_v11 = vpop.permute.xlu0 %392  ;;  %v778_v14 = vpop.permute.xlu1 %777 }
  0x8c   : > { %1265 = vmatmul.mubr.msk.bf16.vlgmr.msra.gmra.mrb[0].mxu1 %vm255_vm0, %v1371_v9 }
  0x8d   : > { %1269 = vmatpush3.bf16.msra.mxu1 %v1367_v2  ;;  %1270 = vmatprep.mubr.msk.bf16.mxu1 %vm255_vm0, %v1374_v10 }
  0x8e   : > { %1274 = vmatprep.subr.bf16.mxu1 %v393_v11 }
  0x8f   : > { %v470_v17 = vpop.permute.xlu0 %469  ;;  %v855_v20 = vpop.permute.xlu1 %854 }
  0x94   : > { %1295 = vmatmul.mubr.msk.bf16.vlgmr.msra.gmra.mrb[0].mxu0 %vm255_vm0, %v1373_v12  ;;  %v1410_v12 = vmov 0  }
  0x95   : > { %1299 = vmatpush3.bf16.msra.mxu0 %v701_v8  ;;  %1300 = vmatprep.mubr.msk.bf16.mxu0 %vm255_vm0, %v1376_v13 }
  0x96   : > { %1304 = vmatprep.subr.bf16.mxu0 %v778_v14  ;;  %1365 = vset.pattern.permute.xlu1 %v1410_v12 }
  0x97   : > { %1366 = vset.pattern.permute.xlu0 %v1410_v12 }
  0x98   : > { %1271 = vmatmul.mubr.msk.bf16.vlgmr.msra.gmra.mrb[0].mxu1 %vm255_vm0, %v1375_v15 }
  0x99   : > { %1275 = vmatpush3.bf16.msra.mxu1 %v393_v11  ;;  %1276 = vmatprep.mubr.msk.bf16.mxu1 %vm255_vm0, %v1378_v16 }
  0x9a   : > { %1280 = vmatprep.subr.bf16.mxu1 %v470_v17 }
  0xa0   : > { %1301 = vmatmul.mubr.msk.bf16.vlgmr.msra.gmra.mrb[0].mxu0 %vm255_vm0, %v1377_v18 }
  0xa1   : > { %1305 = vmatpush3.bf16.msra.mxu0 %v778_v14  ;;  %1306 = vmatprep.mubr.msk.bf16.mxu0 %vm255_vm0, %v1380_v19 }
  0xa2   : > { %1310 = vmatprep.subr.bf16.mxu0 %v855_v20 }
  0xa4   : > { %1277 = vmatmul.mubr.msk.bf16.vlgmr.msra.gmra.mrb[0].mxu1 %vm255_vm0, %v1379_v21 }
  0xa5   : > { %1281 = vmatpush3.bf16.msra.mxu1 %v470_v17  ;;  %1282 = vmatprep.mubr.msk.bf16.mxu1 %vm255_vm0, %v1382_v22 }
  0xac   : > { %1307 = vmatmul.mubr.msk.bf16.vlgmr.msra.gmra.mrb[0].mxu0 %vm255_vm0, %v1381_v23 }
  0xad   : > { %1311 = vmatpush3.bf16.msra.mxu0 %v855_v20  ;;  %1312 = vmatprep.mubr.msk.bf16.mxu0 %vm255_vm0, %v1384_v24 }
  0xb0   : > { %1283 = vmatmul.mubr.msk.bf16.vlgmr.msra.gmra.mrb[0].mxu1 %vm255_vm0, %v1383_v25  ;;  %v996_v25 = vld [vmem:[%s1604_s3] sm:$0xff] }
  0xb8   : > { %1313 = vmatmul.mubr.msk.bf16.vlgmr.msra.gmra.mrb[0].mxu0 %vm255_vm0, %v1385_v26 }
 0x183   : > { %v1284_v27 = vpop.f32.mrb[0].mxu1 }
 0x184   : > { %v512_v28 = vpop.f32.mrb[1].mxu1 }
 0x185   : > { %v1285_v29 = vpop.f32.mrb[2].mxu1 }
 0x186   : > { %v515_v30 = vpop.f32.mrb[3].mxu1 }
 0x18b   : > { %v1314_v31 = vpop.f32.mrb[0].mxu0 }
 0x18c   : > { %v1316_v32 = vadd.f32 %v1314_v31, %v1284_v27  ;;  %v897_v33 = vpop.f32.mrb[1].mxu0  ;;  %v997_v27 = vld [vmem:[%s1604_s3 + $0x8] sm:$0xff] }
 0x18d   : > { %v1317_v35 = vadd.f32 %v897_v33, %v512_v28  ;;  %v1315_v36 = vpop.f32.mrb[2].mxu0 }
 0x18e   : > { %919 = vst.msk [vmem:[#allocation2 + $0x10] sm:$0xff] %vm916_vm1, %v1316_v32  ;;  %v1318_v37 = vadd.f32 %v1315_v36, %v1285_v29  ;;  %v900_v38 = vpop.f32.mrb[3].mxu0  ;;  %v930_v43 = vmul.f32 %v1316_v32, %v1222_v34 }
 0x18f   : > { %917 = vst.msk [vmem:[#allocation2] sm:$0xff] %vm916_vm1, %v1317_v35  ;;  %v1319_v39 = vadd.f32 %v900_v38, %v515_v30  ;;  %v928_v40 = vmul.f32 %v1317_v35, %v1222_v34  ;;  %v998_v30 = vld [vmem:[%s1604_s3 + $0x10] sm:$0xff] }
 0x190   : > { %920 = vst.msk [vmem:[#allocation2 + $0x18] sm:$0xff] %vm916_vm1, %v1318_v37  ;;  %v938_v45 = vsel %vm916_vm1, %v930_v43, 0.0  ;;  %v931_v46 = vmul.f32 %v1318_v37, %v1222_v34  ;;  %v1006_v38 = vld [vmem:[%s1605_s4 + $0x10] sm:$0xff] }
 0x191   : > { %918 = vst.msk [vmem:[#allocation2 + $0x8] sm:$0xff] %vm916_vm1, %v1319_v39  ;;  %v932_v41 = vsel %vm916_vm1, %v928_v40, 0.0  ;;  %v929_v42 = vmul.f32 %v1319_v39, %v1222_v34 }
 0x192   : > { %933 = vadd.xlane.f32.xlu0 %v932_v41  ;;  %v941_v47 = vsel %vm916_vm1, %v931_v46, 0.0  ;;  %v1004_v41 = vld [vmem:[%s1605_s4] sm:$0xff] }
 0x193   : > { %v935_v44 = vsel %vm916_vm1, %v929_v42, 0.0 }
 0x194   : > { %936 = vadd.xlane.f32.xlu1 %v935_v44  ;;  %v1005_v44 = vld [vmem:[%s1605_s4 + $0x8] sm:$0xff] }
 0x195   : > { %v1550_v59 = vld [vmem:[#allocation2 + $0x10] sm:$0xff] }
 0x196   : > { %939 = vadd.xlane.f32.xlu0 %v938_v45  ;;  %v1540_v50 = vld [vmem:[#allocation2] sm:$0xff] }
 0x197   : > { %v1554_v4 = vld [vmem:[#allocation2 + $0x18] sm:$0xff] }
 0x198   : > { %v1546_v54 = vld [vmem:[#allocation2 + $0x8] sm:$0xff] }
 0x19a   : > { %942 = vadd.xlane.f32.xlu0 %v941_v47  ;;  %v1007_v47 = vld [vmem:[%s1605_s4 + $0x18] sm:$0xff] }
 0x21f   : > { %v934_v48 = vpop.xlane.xlu0 %933 }
 0x220   : > { %v1538_v49 = vmul.f32 0.0625, %v934_v48 }
 0x221   : > { %v937_v51 = vpop.xlane.xlu1 %936 }
 0x222   : > { %v956_v52 = vsub.f32 %v1540_v50, %v1538_v49  ;;  %v1544_v53 = vmul.f32 0.0625, %v937_v51 }
 0x223   : > { %v940_v55 = vpop.xlane.xlu0 %939 }
 0x224   : > { %v957_v56 = vsub.f32 %v1546_v54, %v1544_v53  ;;  %v950_v57 = vmul.f32 0.0625, %v940_v55  ;;  %v960_v58 = vmul.f32 %v1222_v34, %v956_v52 }
 0x226   : > { %v958_v60 = vsub.f32 %v1550_v59, %v950_v57  ;;  %v964_v61 = vmul.f32 %v960_v58, %v960_v58  ;;  %v961_v62 = vmul.f32 %v1222_v34, %v957_v56 }
 0x227   : > { %v943_v63 = vpop.xlane.xlu0 %942 }
 0x228   : > { %v951_v0 = vmul.f32 0.0625, %v943_v63  ;;  %v968_v1 = vsel %vm916_vm1, %v964_v61, 0.0  ;;  %v965_v2 = vmul.f32 %v961_v62, %v961_v62  ;;  %v962_v3 = vmul.f32 %v1222_v34, %v958_v60 }
 0x229   : > { %969 = vadd.xlane.f32.xlu1 %v968_v1 }
 0x22a   : > { %v959_v5 = vsub.f32 %v1554_v4, %v951_v0  ;;  %v971_v6 = vsel %vm916_vm1, %v965_v2, 0.0  ;;  %v966_v7 = vmul.f32 %v962_v3, %v962_v3 }
 0x22b   : > { %972 = vadd.xlane.f32.xlu0 %v971_v6 }
 0x22c   : > { %v974_v8 = vsel %vm916_vm1, %v966_v7, 0.0  ;;  %v963_v9 = vmul.f32 %v1222_v34, %v959_v5  ;;  %v999_v34 = vld [vmem:[%s1604_s3 + $0x18] sm:$0xff] }
 0x22d   : > { %975 = vadd.xlane.f32.xlu1 %v974_v8 }
 0x22e   : > { %v967_v10 = vmul.f32 %v963_v9, %v963_v9 }
 0x230   : > { %v977_v11 = vsel %vm916_vm1, %v967_v10, 0.0 }
 0x231   : > { %978 = vadd.xlane.f32.xlu0 %v977_v11 }
 0x2b6   : > { %v970_v13 = vpop.xlane.xlu1 %969 }
 0x2b7   : > { %v984_v14 = vmul.f32 0.0625, %v970_v13 }
 0x2b8   : > { %v973_v15 = vpop.xlane.xlu0 %972 }
 0x2b9   : > { %v988_v16 = vadd.f32 1e-05, %v984_v14  ;;  %v985_v17 = vmul.f32 0.0625, %v973_v15 }
 0x2ba   : > { %v976_v18 = vpop.xlane.xlu1 %975 }
 0x2bb   : > { %1386 = vrsqrt.f32 %v988_v16  ;;  %v989_v19 = vadd.f32 1e-05, %v985_v17  ;;  %v986_v20 = vmul.f32 0.0625, %v976_v18 }
 0x2bd   : > { %1388 = vrsqrt.f32 %v989_v19  ;;  %v990_v21 = vadd.f32 1e-05, %v986_v20 }
 0x2be   : > { %v979_v22 = vpop.xlane.xlu0 %978 }
 0x2bf   : > { %1390 = vrsqrt.f32 %v990_v21  ;;  %v987_v23 = vmul.f32 0.0625, %v979_v22 }
 0x2c1   : > { %v991_v24 = vadd.f32 1e-05, %v987_v23 }
 0x2c3   : > { %1392 = vrsqrt.f32 %v991_v24 }
 0x2c5   : > { %v1387_v26 = vpop.eup %1386 }
 0x2c6   : > { %v1000_v28 = vmul.f32 %v1387_v26, %v996_v25 }
 0x2c7   : > { %v1389_v29 = vpop.eup %1388 }
 0x2c8   : > { %1018 = vperm.xlu1 %1365, %v1000_v28   ;;  %v1001_v31 = vmul.f32 %v1389_v29, %v997_v27  ;;  %v1008_v40 = vmul.f32 %v1000_v28, %v1538_v49 }
 0x2c9   : > { %v1391_v32 = vpop.eup %1390 }
 0x2ca   : > { %1023 = vperm.xlu0 %1366, %v1001_v31   ;;  %v1002_v33 = vmul.f32 %v1391_v32, %v998_v30  ;;  %v1012_v42 = vsub.f32 %v1004_v41, %v1008_v40  ;;  %v1009_v43 = vmul.f32 %v1001_v31, %v1544_v53 }
 0x2cc   : > { %1028 = vperm.xlu1 %1365, %v1002_v33   ;;  %v1010_v37 = vmul.f32 %v1002_v33, %v950_v57  ;;  %v1013_v45 = vsub.f32 %v1005_v44, %v1009_v43 }
 0x2cd   : > { %v1393_v35 = vpop.eup %1392 }
 0x2ce   : > { %v1003_v36 = vmul.f32 %v1393_v35, %v999_v34  ;;  %v1014_v39 = vsub.f32 %v1006_v38, %v1010_v37 }
 0x2d0   : > { %1033 = vperm.xlu1 %1365, %v1003_v36   ;;  %v1011_v46 = vmul.f32 %v1003_v36, %v951_v0 }
 0x2d2   : > { %v1015_v48 = vsub.f32 %v1007_v47, %v1011_v46 }
 0x2d4   : > { %1052 = vperm.xlu1 %1365, %v1014_v39  }
 0x2d8   : > { %1042 = vperm.xlu1 %1365, %v1012_v42  }
 0x2dc   : > { %1047 = vperm.xlu1 %1365, %v1013_v45  }
 0x2e0   : > { %1057 = vperm.xlu1 %1365, %v1015_v48  }
 0x347   : > { %v1019_v49 = vpop.permute.xlu1 %1018 }
 0x348   : > { %v1036_v57 = vmul.f32 %v1019_v49, %v1540_v50 }
 0x349   : > { %v1024_v60 = vpop.permute.xlu0 %1023 }
 0x34a   : > { %v1037_v0 = vmul.f32 %v1024_v60, %v1546_v54 }
 0x34b   : > { %v1029_v51 = vpop.permute.xlu1 %1028 }
 0x34c   : > { %v1038_v55 = vmul.f32 %v1029_v51, %v1550_v59 }
 0x34f   : > { %v1034_v52 = vpop.permute.xlu1 %1033 }
 0x350   : > { %v1039_v50 = vmul.f32 %v1034_v52, %v1554_v4 }
 0x353   : > { %v1053_v53 = vpop.permute.xlu1 %1052 }
 0x354   : > { %v1062_v56 = vadd.f32 %v1053_v53, %v1038_v55 }
 0x356   : > { %v1066_v58 = vmax.f32 %v1062_v56, 0.0 }
 0x357   : > { %v1043_v61 = vpop.permute.xlu1 %1042 }
 0x358   : > { %v1233_v62 = vpack.c.bf16 %v1066_v58, %v1066_v58  ;;  %v1060_v63 = vadd.f32 %v1043_v61, %v1036_v57 }
 0x35a   : > { %1087 = vst.msk [vmem:[%s224_s20 + $0x8] sm:$0xf] %vm1084_vm2, %v1233_v62  ;;  %v1064_v59 = vmax.f32 %v1060_v63, 0.0 }
 0x35b   : > { %v1048_v1 = vpop.permute.xlu1 %1047 }
 0x35c   : > { %v1231_v2 = vpack.c.bf16 %v1064_v59, %v1064_v59  ;;  %v1061_v3 = vadd.f32 %v1048_v1, %v1037_v0 }
 0x35e   : > { %1085 = vst.msk [vmem:[%s224_s20] sm:$0xf] %vm1084_vm2, %v1231_v2  ;;  %v1065_v5 = vmax.f32 %v1061_v3, 0.0 }
 0x35f   : > { %v1058_v6 = vpop.permute.xlu1 %1057 }
 0x360   : > { %v1232_v7 = vpack.c.bf16 %v1065_v5, %v1065_v5  ;;  %v1063_v8 = vadd.f32 %v1058_v6, %v1039_v50 }
 0x362   : > { %1086 = vst.msk [vmem:[%s224_s20 + $0x4] sm:$0xf] %vm1084_vm2, %v1232_v7  ;;  %v1067_v9 = vmax.f32 %v1063_v8, 0.0 }
 0x364   : > { %v1234_v10 = vpack.c.bf16 %v1067_v9, %v1067_v9 }
 0x366   : > { %1088 = vst.msk [vmem:[%s224_s20 + $0xc] sm:$0xf] %vm1084_vm2, %v1234_v10 }
 0x367 PF: > { %s15_s18 = sadd.s32 1, %s1400_s18  }
 0x368   : > { %p12_p4 = scmp.ge.s32.totalorder %s15_s18, 4  }
 0x36a   :  { %14 = sbr.rel (!%p12_p4) target bundleno = 1 (0x1), region = 78 }

// kernel: encoder_forward.11
= control target key start
LH: loop header
LB: loop body
LE: loop exit
PB: predicated region body
PF: predicated region fallthrough
CT: control target
= control target key end

     0   :  { %s1186_s18 = smov 0   ;;  %s1300_s0 = inlined_call_operand.vmem [shape: bf16[2,32,128], index: 0, kind: input, shape index: {}]   ;;  %s1301_s1 = inlined_call_operand.vmem [shape: bf16[9,16,32], index: 1, kind: input, shape index: {}]   ;;  %s1302_s2 = inlined_call_operand.vmem [shape: f32[1,80], index: 2, kind: input, shape index: {}]   ;;  %s1303_s3 = inlined_call_operand.vmem [shape: f32[16,1], index: 3, kind: input, shape index: {}]   ;;  %s1304_s4 = inlined_call_operand.vmem [shape: f32[16,1], index: 4, kind: input, shape index: {}]   ;;  %s1305_s5 = inlined_call_operand.vmem [shape: bf16[2,16,80], index: 5, kind: output, shape index: {}]  }
   0x1 LB: > { %s918_s19 = sadd.s32 4294967295, %s1143_s18   ;;  %p922_p0 = scmp.ge.s32.totalorder %s1143_s18, 1  ;;  %s1143_s18 = sphi %s1186_s18, %s15_s18  }
   0x2   : > { %p187_p1 = scmp.lt.s32.totalorder %s1143_s18, 3 }
   0x4   : > { %p188_p2 = pnand %p922_p0, %p187_p1 }
   0x5   : > { %p215_p3 = scmp.lt.s32.totalorder (!%p188_p2), %s918_s19, 1  ;;  %v1145_v0 = vmov (!%p188_p2), 0.0   ;;  %vm1146_vm0 = vmmov (!%p188_p2), 0   ;;  %s1147_s24 = smov (!%p188_p2), 117   ;;  %v1124_v7 = vld [vmem:[%s1301_s1 + $0x20] sm:$0xff] (!%p188_p2)   ;;  %vm256_vm1 = vcmask (!%p188_p2), 261120  }
   0x6   : > { %191 = sbr.rel (%p188_p2) target bundleno = 857 (0x359), region = 40  ;;  %1031 = vmatprep.subr.bf16.mxu0 (!%p188_p2), %v1145_v0  ;;  %999 = vmatprep.subr.bf16.mxu1 (!%p188_p2), %v1145_v0  ;;  %s1148_s25 = smov (!%p188_p2), 127   ;;  %v1125_v9 = vld [vmem:[%s1301_s1 + $0x8] sm:$0xff] (!%p188_p2)   ;;  %v1127_v13 = vld [vmem:[%s1301_s1] sm:$0xff] (!%p188_p2)   ;;  %v1128_v18 = vld [vmem:[%s1301_s1 + $0x30] sm:$0xff] (!%p188_p2)   ;;  %vm772_vm2 = vcmask (!%p188_p2), 654336  }
   0x7   : > { %1035 = vmatprep.mubr.msk.bf16.mxu0 (!%p188_p2), %vm1146_vm0, %v1145_v0  ;;  %1003 = vmatprep.mubr.msk.bf16.mxu1 (!%p188_p2), %vm1146_vm0, %v1145_v0  ;;  %s1149_s26 = smov (!%p188_p2), 116   ;;  %s1150_s27 = smov (!%p188_p2), 108   ;;  %v1126_v12 = vld [vmem:[%s1301_s1 + $0x28] sm:$0xff] (!%p188_p2)   ;;  %v1129_v19 = vld [vmem:[%s1301_s1 + $0x10] sm:$0xff] (!%p188_p2)   ;;  %v1130_v24 = vld [vmem:[%s1301_s1 + $0x38] sm:$0xff] (!%p188_p2)   ;;  %v1155_v57 = vmov (!%p188_p2), 0  }
   0x8   : > { %s1151_s28 = smov (!%p188_p2), 126   ;;  %s1152_s29 = smov (!%p188_p2), 107   ;;  %v1131_v25 = vld [vmem:[%s1301_s1 + $0x18] sm:$0xff] (!%p188_p2)   ;;  %v1132_v27 = vld [vmem:[%s1301_s1 + $0x40] sm:$0xff] (!%p188_p2)   ;;  %1120 = vset.pattern.permute.xlu1 (!%p188_p2), %v1155_v57  ;;  %1121 = vset.pattern.permute.xlu0 (!%p188_p2), %v1155_v57  ;;  %vm860_vm3 = vcmask (!%p188_p2), 650240  }
   0x9   : > { %s1153_s30 = smov (!%p188_p2), 118   ;;  %s1154_s6 = smov (!%p188_p2), 106   ;;  %v963_v33 = vld [vmem:[%s1302_s2] ss:$0 sm:$0xff] (!%p188_p2) }
   0xd   : > { %s1307_s19 = smov (!%p215_p3, %s918_s19), 1 }
   0xe   : > { %s968_s20 = sshll.u32 %s1307_s19, 4  ;;  %s969_s12 = sshll.u32 %s1307_s19, 3 }
   0xf   : > { %s219_s23 = scalar_lea.vmem %s1300_s0, %s968_s20  ;;  %s224_s15 = scalar_lea.vmem %s1305_s5, %s969_s12 }
  0x10   : > { %v1122_v1 = vld [vmem:[%s219_s23] sm:$0xff]   ;;  %v1123_v2 = vld [vmem:[%s219_s23 + $0x8] sm:$0xff]  }
  0x11   : > { %480 = vrot.lane.b32.xlu0 %v1122_v1, %s1147_s24  ;;  %250 = vrot.lane.b32.xlu1 %v1122_v1, %s1148_s25 }
  0x15   : > { %482 = vrot.lane.b32.xlu0 %v1123_v2, %s1147_s24  ;;  %540 = vrot.lane.b32.xlu1 %v1122_v1, %s1149_s26 }
  0x19   : > { %252 = vrot.lane.b32.xlu0 %v1123_v2, %s1148_s25  ;;  %542 = vrot.lane.b32.xlu1 %v1123_v2, %s1149_s26 }
  0x1d   : > { %600 = vrot.lane.b32.xlu0 %v1122_v1, %s1150_s27  ;;  %602 = vrot.lane.b32.xlu1 %v1123_v2, %s1150_s27 }
  0x21   : > { %360 = vrot.lane.b32.xlu0 %v1122_v1, %s1151_s28  ;;  %660 = vrot.lane.b32.xlu1 %v1122_v1, %s1152_s29 }
  0x25   : > { %362 = vrot.lane.b32.xlu0 %v1123_v2, %s1151_s28  ;;  %662 = vrot.lane.b32.xlu1 %v1123_v2, %s1152_s29 }
  0x29   : > { %420 = vrot.lane.b32.xlu0 %v1122_v1, %s1153_s30  ;;  %720 = vrot.lane.b32.xlu1 %v1122_v1, %s1154_s6 }
  0x2d   : > { %422 = vrot.lane.b32.xlu0 %v1123_v2, %s1153_s30  ;;  %722 = vrot.lane.b32.xlu1 %v1123_v2, %s1154_s6 }
  0x83   : > { %v481_v3 = vpop.permute.xlu0 %480  ;;  %v251_v4 = vpop.permute.xlu1 %250 }
  0x84   : > { %1032 = vmatpush3.bf16.msra.mxu0 %v481_v3  ;;  %1000 = vmatpush3.bf16.msra.mxu1 %v251_v4  ;;  %v820_v3 = vld [vmem:[%s1304_s4] sm:$0xff]  ;;  %v817_v4 = vld [vmem:[%s1303_s3 + $0x8] sm:$0xff] }
  0x85   : > { %1033 = vmatprep.subr.bf16.mxu0 %v1145_v0  ;;  %1001 = vmatprep.subr.bf16.mxu1 %v1145_v0 }
  0x87   : > { %v483_v5 = vpop.permute.xlu0 %482  ;;  %v541_v6 = vpop.permute.xlu1 %540 }
  0x88   : > { %1034 = vmatpush3.bf16.msra.mxu0 %v483_v5 }
  0x89   : > { %1039 = vmatprep.subr.bf16.mxu0 %v1145_v0 }
  0x8b   : > { %1036 = vmatmul.mubr.msk.bf16.vlgmr.msra.gmra.mrb[0].mxu0 %vm256_vm1, %v1124_v7  ;;  %v253_v8 = vpop.permute.xlu0 %252  ;;  %v543_v10 = vpop.permute.xlu1 %542 }
  0x8c   : > { %1002 = vmatpush3.bf16.msra.mxu1 %v253_v8  ;;  %1040 = vmatpush3.bf16.msra.mxu0 %v541_v6 }
  0x8d   : > { %1041 = vmatprep.subr.bf16.mxu0 %v1145_v0  ;;  %1007 = vmatprep.subr.bf16.mxu1 %v1145_v0 }
  0x8e   : > { %1043 = vmatprep.mubr.msk.bf16.mxu0 %vm1146_vm0, %v1145_v0 }
  0x8f   : > { %1004 = vmatmul.mubr.msk.bf16.vlgmr.msra.gmra.mrb[0].mxu1 %vm256_vm1, %v1125_v9  ;;  %v601_v11 = vpop.permute.xlu0 %600  ;;  %v603_v15 = vpop.permute.xlu1 %602  ;;  %v821_v9 = vld [vmem:[%s1304_s4 + $0x8] sm:$0xff] }
  0x90   : > { %1042 = vmatpush3.bf16.msra.mxu0 %v543_v10  ;;  %1008 = vmatpush3.bf16.msra.mxu1 %v1122_v1 }
  0x91   : > { %1009 = vmatprep.subr.bf16.mxu1 %v1145_v0  ;;  %1047 = vmatprep.subr.bf16.mxu0 %v1145_v0 }
  0x92   : > { %1011 = vmatprep.mubr.msk.bf16.mxu1 %vm1146_vm0, %v1145_v0 }
  0x93   : > { %v361_v14 = vpop.permute.xlu0 %360  ;;  %v661_v17 = vpop.permute.xlu1 %660 }
  0x94   : > { %1010 = vmatpush3.bf16.msra.mxu1 %v1123_v2 }
  0x95   : > { %1015 = vmatprep.subr.bf16.mxu1 %v1145_v0 }
  0x97   : > { %1044 = vmatmul.mubr.msk.bf16.vlgmr.msra.gmra.mrb[0].mxu0 %vm256_vm1, %v1126_v12  ;;  %v363_v16 = vpop.permute.xlu0 %362  ;;  %v663_v21 = vpop.permute.xlu1 %662 }
  0x98   : > { %1048 = vmatpush3.bf16.msra.mxu0 %v601_v11  ;;  %1051 = vmatprep.mubr.msk.bf16.mxu0 %vm1146_vm0, %v1145_v0 }
  0x99   : > { %1049 = vmatprep.subr.bf16.mxu0 %v1145_v0 }
  0x9b   : > { %1012 = vmatmul.mubr.msk.bf16.vlgmr.msra.gmra.mrb[0].mxu1 %vm256_vm1, %v1127_v13  ;;  %v421_v20 = vpop.permute.xlu0 %420  ;;  %v721_v23 = vpop.permute.xlu1 %720 }
  0x9c   : > { %1050 = vmatpush3.bf16.msra.mxu0 %v603_v15  ;;  %1016 = vmatpush3.bf16.msra.mxu1 %v361_v14 }
  0x9d   : > { %1017 = vmatprep.subr.bf16.mxu1 %v1145_v0  ;;  %1055 = vmatprep.subr.bf16.mxu0 %v1145_v0 }
  0x9e   : > { %1019 = vmatprep.mubr.msk.bf16.mxu1 %vm1146_vm0, %v1145_v0 }
  0x9f   : > { %v423_v22 = vpop.permute.xlu0 %422  ;;  %v723_v26 = vpop.permute.xlu1 %722 }
  0xa0   : > { %1018 = vmatpush3.bf16.msra.mxu1 %v363_v16 }
  0xa1   : > { %1023 = vmatprep.subr.bf16.mxu1 %v1145_v0 }
  0xa3   : > { %1052 = vmatmul.mubr.msk.bf16.vlgmr.msra.gmra.mrb[0].mxu0 %vm256_vm1, %v1128_v18 }
  0xa4   : > { %1056 = vmatpush3.bf16.msra.mxu0 %v661_v17  ;;  %1059 = vmatprep.mubr.msk.bf16.mxu0 %vm1146_vm0, %v1145_v0 }
  0xa5   : > { %1057 = vmatprep.subr.bf16.mxu0 %v1145_v0 }
  0xa7   : > { %1020 = vmatmul.mubr.msk.bf16.vlgmr.msra.gmra.mrb[0].mxu1 %vm256_vm1, %v1129_v19 }
  0xa8   : > { %1058 = vmatpush3.bf16.msra.mxu0 %v663_v21  ;;  %1024 = vmatpush3.bf16.msra.mxu1 %v421_v20 }
  0xa9   : > { %1025 = vmatprep.subr.bf16.mxu1 %v1145_v0  ;;  %1063 = vmatprep.subr.bf16.mxu0 %v1145_v0 }
  0xaa   : > { %1027 = vmatprep.mubr.msk.bf16.mxu1 %vm1146_vm0, %v1145_v0 }
  0xac   : > { %1026 = vmatpush3.bf16.msra.mxu1 %v423_v22 }
  0xaf   : > { %1060 = vmatmul.mubr.msk.bf16.vlgmr.msra.gmra.mrb[0].mxu0 %vm256_vm1, %v1130_v24 }
  0xb0   : > { %1064 = vmatpush3.bf16.msra.mxu0 %v721_v23  ;;  %1067 = vmatprep.mubr.msk.bf16.mxu0 %vm1146_vm0, %v1145_v0 }
  0xb1   : > { %1065 = vmatprep.subr.bf16.mxu0 %v1145_v0  ;;  %v816_v0 = vld [vmem:[%s1303_s3] sm:$0xff] }
  0xb3   : > { %1028 = vmatmul.mubr.msk.bf16.vlgmr.msra.gmra.mrb[0].mxu1 %vm256_vm1, %v1131_v25 }
  0xb4   : > { %1066 = vmatpush3.bf16.msra.mxu0 %v723_v26 }
  0xbb   : > { %1068 = vmatmul.mubr.msk.bf16.vlgmr.msra.gmra.mrb[0].mxu0 %vm256_vm1, %v1132_v27 }
 0x186   : > { %v463_v28 = vpop.f32.mrb[0].mxu1 }
 0x187   : > { %v1029_v29 = vpop.f32.mrb[1].mxu1 }
 0x188   : > { %v466_v30 = vpop.f32.mrb[2].mxu1 }
 0x189   : > { %v1030_v31 = vpop.f32.mrb[3].mxu1 }
 0x18e   : > { %v763_v32 = vpop.f32.mrb[0].mxu0 }
 0x18f   : > { %v1071_v34 = vadd.f32 %v763_v32, %v463_v28  ;;  %v1069_v35 = vpop.f32.mrb[1].mxu0 }
 0x190   : > { %v766_v36 = vpop.f32.mrb[2].mxu0 }
 0x191   : > { %773 = vst.msk [vmem:[#allocation2] sm:$0xff] %vm772_vm2, %v1071_v34  ;;  %v1072_v37 = vadd.f32 %v766_v36, %v466_v30  ;;  %v1070_v38 = vpop.f32.mrb[3].mxu0  ;;  %v782_v39 = vmul.f32 %v1071_v34, %v963_v33 }
 0x193   : > { %774 = vst.msk [vmem:[#allocation2 + $0x8] sm:$0xff] %vm772_vm2, %v1072_v37  ;;  %v784_v40 = vsel %vm772_vm2, %v782_v39, 0.0  ;;  %v783_v41 = vmul.f32 %v1072_v37, %v963_v33 }
 0x194   : > { %785 = vadd.xlane.f32.xlu0 %v784_v40 }
 0x195   : > { %v787_v42 = vsel %vm772_vm2, %v783_v41, 0.0 }
 0x196   : > { %788 = vadd.xlane.f32.xlu1 %v787_v42 }
 0x198   : > { %v794_v45 = vld [vmem:[#allocation2] sm:$0xff] }
 0x19a   : > { %v795_v49 = vld [vmem:[#allocation2 + $0x8] sm:$0xff] }
 0x221   : > { %v786_v43 = vpop.xlane.xlu0 %785 }
 0x222   : > { %v792_v44 = vmul.f32 0.015625, %v786_v43 }
 0x223   : > { %v789_v46 = vpop.xlane.xlu1 %788 }
 0x224   : > { %v796_v47 = vsub.f32 %v794_v45, %v792_v44  ;;  %v793_v48 = vmul.f32 0.015625, %v789_v46 }
 0x226   : > { %v797_v50 = vsub.f32 %v795_v49, %v793_v48  ;;  %v798_v51 = vmul.f32 %v963_v33, %v796_v47 }
 0x228   : > { %v800_v52 = vmul.f32 %v798_v51, %v798_v51  ;;  %v799_v53 = vmul.f32 %v963_v33, %v797_v50 }
 0x22a   : > { %v802_v54 = vsel %vm772_vm2, %v800_v52, 0.0  ;;  %v801_v55 = vmul.f32 %v799_v53, %v799_v53 }
 0x22b   : > { %803 = vadd.xlane.f32.xlu0 %v802_v54 }
 0x22c   : > { %v805_v56 = vsel %vm772_vm2, %v801_v55, 0.0 }
 0x22f   : > { %806 = vadd.xlane.f32.xlu0 %v805_v56 }
 0x2b8   : > { %v804_v58 = vpop.xlane.xlu0 %803 }
 0x2b9   : > { %v810_v59 = vmul.f32 0.015625, %v804_v58 }
 0x2bb   : > { %v812_v60 = vadd.f32 1e-05, %v810_v59 }
 0x2bc   : > { %v807_v61 = vpop.xlane.xlu0 %806 }
 0x2bd   : > { %1133 = vrsqrt.f32 %v812_v60  ;;  %v811_v62 = vmul.f32 0.015625, %v807_v61 }
 0x2bf   : > { %v813_v63 = vadd.f32 1e-05, %v811_v62 }
 0x2c1   : > { %1135 = vrsqrt.f32 %v813_v63 }
 0x2c7   : > { %v1134_v1 = vpop.eup %1133 }
 0x2c8   : > { %v818_v2 = vmul.f32 %v1134_v1, %v816_v0 }
 0x2ca   : > { %828 = vperm.xlu1 %1120, %v818_v2   ;;  %v822_v5 = vmul.f32 %v818_v2, %v792_v44 }
 0x2cb   : > { %v1136_v6 = vpop.eup %1135 }
 0x2cc   : > { %v824_v7 = vsub.f32 %v820_v3, %v822_v5  ;;  %v819_v8 = vmul.f32 %v1136_v6, %v817_v4 }
 0x2ce   : > { %840 = vperm.xlu1 %1120, %v824_v7   ;;  %833 = vperm.xlu0 %1121, %v819_v8   ;;  %v823_v10 = vmul.f32 %v819_v8, %v793_v48 }
 0x2d0   : > { %v825_v11 = vsub.f32 %v821_v9, %v823_v10 }
 0x2d2   : > { %845 = vperm.xlu1 %1120, %v825_v11  }
 0x349   : > { %v829_v12 = vpop.permute.xlu1 %828 }
 0x34a   : > { %v836_v13 = vmul.f32 %v829_v12, %v794_v45 }
 0x34d   : > { %v841_v14 = vpop.permute.xlu1 %840  ;;  %v834_v15 = vpop.permute.xlu0 %833 }
 0x34e   : > { %v848_v16 = vadd.f32 %v841_v14, %v836_v13  ;;  %v837_v18 = vmul.f32 %v834_v15, %v795_v49 }
 0x350   : > { %v850_v17 = vmax.f32 %v848_v16, 0.0 }
 0x351   : > { %v846_v19 = vpop.permute.xlu1 %845 }
 0x352   : > { %v970_v20 = vpack.c.bf16 %v850_v17, %v850_v17  ;;  %v849_v21 = vadd.f32 %v846_v19, %v837_v18 }
 0x354   : > { %861 = vst.msk [vmem:[%s224_s15] sm:$0xf] %vm860_vm3, %v970_v20  ;;  %v851_v22 = vmax.f32 %v849_v21, 0.0 }
 0x356   : > { %v971_v23 = vpack.c.bf16 %v851_v22, %v851_v22 }
 0x358   : > { %862 = vst.msk [vmem:[%s224_s15 + $0x4] sm:$0xf] %vm860_vm3, %v971_v23 }
 0x359 PF: > { %s15_s18 = sadd.s32 1, %s1143_s18  }
 0x35a   : > { %p12_p4 = scmp.ge.s32.totalorder %s15_s18, 4  }
 0x35c   :  { %14 = sbr.rel (!%p12_p4) target bundleno = 1 (0x1), region = 78 }

// kernel: encoder_forward.12
= control target key start
LH: loop header
LB: loop body
LE: loop exit
PB: predicated region body
PF: predicated region fallthrough
CT: control target
= control target key end

     0   :  { %s1540_s18 = smov 0   ;;  %s1668_s0 = inlined_call_operand.vmem [shape: bf16[2,16,384], index: 0, kind: input, shape index: {}]   ;;  %s1669_s1 = inlined_call_operand.vmem [shape: bf16[9,8,16], index: 1, kind: input, shape index: {}]   ;;  %s1670_s2 = inlined_call_operand.vmem [shape: f32[1,288], index: 2, kind: input, shape index: {}]   ;;  %s1671_s3 = inlined_call_operand.vmem [shape: f32[8,1], index: 3, kind: input, shape index: {}]   ;;  %s1672_s4 = inlined_call_operand.vmem [shape: f32[8,1], index: 4, kind: input, shape index: {}]   ;;  %s1673_s5 = inlined_call_operand.vmem [shape: bf16[2,8,288], index: 5, kind: output, shape index: {}]  }
   0x1 LB: > { %s1284_s19 = sadd.s32 4294967295, %s1497_s18   ;;  %p1288_p0 = scmp.ge.s32.totalorder %s1497_s18, 1  ;;  %s1497_s18 = sphi %s1540_s18, %s15_s18  }
   0x2   : > { %p187_p1 = scmp.lt.s32.totalorder %s1497_s18, 3 }
   0x4   : > { %p188_p2 = pnand %p1288_p0, %p187_p1 }
   0x5   : > { %p215_p3 = scmp.lt.s32.totalorder (!%p188_p2), %s1284_s19, 1  ;;  %v1499_v0 = vmov (!%p188_p2), 0.0   ;;  %vm1500_vm0 = vmmov (!%p188_p2), 0   ;;  %v1501_v1 = vmov (!%p188_p2), 0   ;;  %s1502_s24 = smov (!%p188_p2), 127   ;;  %vm252_vm1 = vcmask (!%p188_p2), 1039360  }
   0x6   : > { %191 = sbr.rel (%p188_p2) target bundleno = 909 (0x38d), region = 40  ;;  %1344 = vmatprep.subr.bf16.mxu1 (!%p188_p2), %v1499_v0  ;;  %1346 = vmatprep.mubr.msk.bf16.mxu1 (!%p188_p2), %vm1500_vm0, %v1499_v0  ;;  %s1503_s25 = smov (!%p188_p2), 126   ;;  %v1291_v9 = vld [vmem:[%s1669_s1 + $0x4] sm:$0xf] (!%p188_p2)  ;;  %vm258_vm2 = vcmask (!%p188_p2), 130048   ;;  %vm438_vm3 = vcmask (!%p188_p2), 1031168   ;;  %v1143_v54 = vlaneseq (!%p188_p2) }
   0x7   : > { %294 = vmatprep.mubr.bf16.mxu0 (!%p188_p2), %v1501_v1  ;;  %1483 = vset.pattern.permute.xlu0 (!%p188_p2), %v1501_v1  ;;  %s1504_s26 = smov (!%p188_p2), 110   ;;  %s1505_s27 = smov (!%p188_p2), 109   ;;  %v230_v15 = vld [vmem:[%s1669_s1] sm:$0xf] (!%p188_p2)  ;;  %vm539_vm4 = vcmask (!%p188_p2), 900096   ;;  %vm640_vm5 = vcmask (!%p188_p2), 891904  }
   0x8   : > { %1484 = vset.pattern.permute.xlu1 (!%p188_p2), %v1501_v1  ;;  %s1506_s28 = smov (!%p188_p2), 108   ;;  %s1507_s29 = smov (!%p188_p2), 92   ;;  %v1299_v21 = vld [vmem:[%s1669_s1 + $0x8] sm:$0xf] (!%p188_p2)  ;;  %v1302_v27 = vld [vmem:[%s1669_s1 + $0xc] sm:$0xf] (!%p188_p2) }
   0x9   : > { %s1508_s30 = smov (!%p188_p2), 91   ;;  %s1509_s6 = smov (!%p188_p2), 90   ;;  %vm741_vm6 = vcmask (!%p188_p2), 883712   ;;  %v1305_v33 = vld [vmem:[%s1669_s1 + $0x10] sm:$0xf] (!%p188_p2)  ;;  %vm842_vm7 = vcmask (!%p188_p2), 752640  }
   0xa   : > { %v1308_v39 = vld [vmem:[%s1669_s1 + $0x14] sm:$0xf] (!%p188_p2)  ;;  %vm943_vm8 = vcmask (!%p188_p2), 744448   ;;  %v1311_v45 = vld [vmem:[%s1669_s1 + $0x18] sm:$0xf] (!%p188_p2)  ;;  %vm1044_vm9 = vcmask (!%p188_p2), 736256  }
   0xb   : > { %v1314_v51 = vld [vmem:[%s1669_s1 + $0x1c] sm:$0xf] (!%p188_p2)  ;;  %v1317_v53 = vld [vmem:[%s1669_s1 + $0x20] sm:$0xf] (!%p188_p2)  ;;  %v1144_v55 = vshrl.u32 (!%p188_p2), %v1143_v54, 7  ;;  %vm1139_vm10 = vcmask (!%p188_p2), 261120  }
   0xc   : > { %v1141_v58 = vld [vmem:[%s1670_s2] sm:$0x7] (!%p188_p2)  ;;  %vm1227_vm11 = vcmask (!%p188_p2), 257024  }
   0xd   : > { %s1675_s19 = smov (!%p215_p3, %s1284_s19), 1  ;;  %v1153_v56 = vsub.s32 2, %v1144_v55  ;;  %v1145_v57 = vsub.s32 0, %v1144_v55  ;;  %v1149_v59 = vsub.s32 1, %v1144_v55 }
   0xe   : > { %s1462_s20 = smul.u32 24, %s1675_s19 }
   0xf   : > { %v1154_v60 = vrot.slane %v1141_v58, %v1153_v56  ;;  %v1146_v61 = vrot.slane %v1141_v58, %v1145_v57  ;;  %v1150_v63 = vrot.slane %v1141_v58, %v1149_v59  ;;  %s1463_s8 = smul.u32 12, %s1675_s19 }
  0x10   : > { %s219_s23 = scalar_lea.vmem %s1668_s0, %s1462_s20 }
  0x11   : > { %v1485_v2 = vld [vmem:[%s219_s23 + $0x4] ss:$12 sps:$4 sm:$0xff]   ;;  %v1487_v3 = vld [vmem:[%s219_s23] ss:$12 sps:$4 sm:$0xff]   ;;  %v1488_v4 = vld [vmem:[%s219_s23 + $0x8] ss:$12 sps:$4 sm:$0xff]   ;;  %s224_s11 = scalar_lea.vmem %s1673_s5, %s1463_s8 }
  0x12   : > { %248 = vrot.lane.b32.xlu0 %v1485_v2, %s1502_s24  ;;  %246 = vrot.lane.b32.xlu1 %v1487_v3, %s1502_s24 }
  0x16   : > { %250 = vrot.lane.b32.xlu0 %v1488_v4, %s1502_s24  ;;  %434 = vrot.lane.b32.xlu1 %v1485_v2, %s1503_s25 }
  0x1a   : > { %436 = vrot.lane.b32.xlu0 %v1488_v4, %s1503_s25  ;;  %432 = vrot.lane.b32.xlu1 %v1487_v3, %s1503_s25 }
  0x1e   : > { %535 = vrot.lane.b32.xlu0 %v1485_v2, %s1504_s26  ;;  %537 = vrot.lane.b32.xlu1 %v1488_v4, %s1504_s26 }
  0x22   : > { %533 = vrot.lane.b32.xlu0 %v1487_v3, %s1504_s26  ;;  %636 = vrot.lane.b32.xlu1 %v1485_v2, %s1505_s27 }
  0x26   : > { %638 = vrot.lane.b32.xlu0 %v1488_v4, %s1505_s27  ;;  %634 = vrot.lane.b32.xlu1 %v1487_v3, %s1505_s27 }
  0x2a   : > { %737 = vrot.lane.b32.xlu0 %v1485_v2, %s1506_s28  ;;  %739 = vrot.lane.b32.xlu1 %v1488_v4, %s1506_s28 }
  0x2e   : > { %735 = vrot.lane.b32.xlu0 %v1487_v3, %s1506_s28  ;;  %838 = vrot.lane.b32.xlu1 %v1485_v2, %s1507_s29 }
  0x32   : > { %840 = vrot.lane.b32.xlu0 %v1488_v4, %s1507_s29  ;;  %836 = vrot.lane.b32.xlu1 %v1487_v3, %s1507_s29 }
  0x36   : > { %939 = vrot.lane.b32.xlu0 %v1485_v2, %s1508_s30  ;;  %941 = vrot.lane.b32.xlu1 %v1488_v4, %s1508_s30 }
  0x3a   : > { %937 = vrot.lane.b32.xlu0 %v1487_v3, %s1508_s30  ;;  %1040 = vrot.lane.b32.xlu1 %v1485_v2, %s1509_s6 }
  0x3e   : > { %1042 = vrot.lane.b32.xlu0 %v1488_v4, %s1509_s6  ;;  %1038 = vrot.lane.b32.xlu1 %v1487_v3, %s1509_s6 }
  0x84   : > { %v249_v5 = vpop.permute.xlu0 %248  ;;  %v247_v6 = vpop.permute.xlu1 %246 }
  0x85   : > { %v253_v10 = vsel %vm252_vm1, %v247_v6, %v249_v5 }
  0x88   : > { %v251_v7 = vpop.permute.xlu0 %250  ;;  %v435_v11 = vpop.permute.xlu1 %434 }
  0x89   : > { %1345 = vmatpush3.bf16.msra.mxu1 %v251_v7  ;;  %v254_v8 = vsel %vm252_vm1, %v249_v5, %v251_v7 }
  0x8a   : > { %262 = vmatprep.subr.bf16.mxu0 %v254_v8  ;;  %1350 = vmatprep.subr.bf16.mxu1 %v1499_v0 }
  0x8b   : > { %263 = vmatpush1.bf16.msra.mxu0 %v253_v10 }
  0x8c   : > { %1347 = vmatmul.mubr.msk.bf16.vlgmr.msra.gmra.mrb[0].mxu1 %vm258_vm2, %v1291_v9  ;;  %349 = vmatprep.subr.bf16.mxu0 %v1485_v2  ;;  %v437_v12 = vpop.permute.xlu0 %436  ;;  %v433_v14 = vpop.permute.xlu1 %432 }
  0x8d   : > { %1351 = vmatpush3.bf16.msra.mxu1 %v1488_v4  ;;  %1352 = vmatprep.mubr.msk.bf16.mxu1 %vm1500_vm0, %v1499_v0  ;;  %v440_v13 = vsel %vm438_vm3, %v435_v11, %v437_v12  ;;  %v439_v17 = vsel %vm438_vm3, %v433_v14, %v435_v11 }
  0x8e   : > { %1295 = vmatmul.mubr.msk.bf16.vlgmr.msra.gmra.mrb[0].mxu0 %vm258_vm2, %v1291_v9  ;;  %1356 = vmatprep.subr.bf16.mxu1 %v1499_v0 }
  0x8f   : > { %350 = vmatpush1.bf16.msra.mxu0 %v1487_v3  ;;  %381 = vmatprep.mubr.bf16.mxu0 %v1501_v1 }
  0x90   : > { %447 = vmatprep.subr.bf16.mxu0 %v440_v13  ;;  %v538_v16 = vpop.permute.xlu1 %537  ;;  %v536_v18 = vpop.permute.xlu0 %535 }
  0x91   : > { %v541_v19 = vsel %vm539_vm4, %v536_v18, %v538_v16 }
  0x94   : > { %v534_v20 = vpop.permute.xlu0 %533  ;;  %v637_v24 = vpop.permute.xlu1 %636 }
  0x95   : > { %v540_v23 = vsel %vm539_vm4, %v534_v20, %v536_v18 }
  0x98   : > { %1353 = vmatmul.mubr.msk.bf16.vlgmr.msra.gmra.mrb[0].mxu1 %vm258_vm2, %v230_v15  ;;  %v639_v22 = vpop.permute.xlu0 %638  ;;  %v635_v26 = vpop.permute.xlu1 %634 }
  0x99   : > { %1357 = vmatpush3.bf16.msra.mxu1 %v437_v12  ;;  %1358 = vmatprep.mubr.msk.bf16.mxu1 %vm1500_vm0, %v1499_v0  ;;  %v642_v25 = vsel %vm640_vm5, %v637_v24, %v639_v22  ;;  %v641_v29 = vsel %vm640_vm5, %v635_v26, %v637_v24 }
  0x9a   : > { %1297 = vmatmul.mubr.msk.bf16.vlgmr.msra.gmra.mrb[0].mxu0 %vm258_vm2, %v230_v15  ;;  %1362 = vmatprep.subr.bf16.mxu1 %v1499_v0 }
  0x9b   : > { %448 = vmatpush1.bf16.msra.mxu0 %v439_v17  ;;  %479 = vmatprep.mubr.bf16.mxu0 %v1501_v1 }
  0x9c   : > { %548 = vmatprep.subr.bf16.mxu0 %v541_v19  ;;  %v740_v28 = vpop.permute.xlu1 %739  ;;  %v738_v30 = vpop.permute.xlu0 %737 }
  0x9d   : > { %v743_v31 = vsel %vm741_vm6, %v738_v30, %v740_v28 }
  0xa0   : > { %v736_v32 = vpop.permute.xlu0 %735  ;;  %v839_v36 = vpop.permute.xlu1 %838 }
  0xa1   : > { %v742_v35 = vsel %vm741_vm6, %v736_v32, %v738_v30 }
  0xa4   : > { %1359 = vmatmul.mubr.msk.bf16.vlgmr.msra.gmra.mrb[0].mxu1 %vm258_vm2, %v1299_v21  ;;  %v841_v34 = vpop.permute.xlu0 %840  ;;  %v837_v38 = vpop.permute.xlu1 %836 }
  0xa5   : > { %1363 = vmatpush3.bf16.msra.mxu1 %v538_v16  ;;  %1364 = vmatprep.mubr.msk.bf16.mxu1 %vm1500_vm0, %v1499_v0  ;;  %v844_v37 = vsel %vm842_vm7, %v839_v36, %v841_v34  ;;  %v843_v41 = vsel %vm842_vm7, %v837_v38, %v839_v36 }
  0xa6   : > { %1300 = vmatmul.mubr.msk.bf16.vlgmr.msra.gmra.mrb[0].mxu0 %vm258_vm2, %v1299_v21  ;;  %1368 = vmatprep.subr.bf16.mxu1 %v1499_v0 }
  0xa7   : > { %549 = vmatpush1.bf16.msra.mxu0 %v540_v23  ;;  %580 = vmatprep.mubr.bf16.mxu0 %v1501_v1 }
  0xa8   : > { %649 = vmatprep.subr.bf16.mxu0 %v642_v25  ;;  %v942_v40 = vpop.permute.xlu1 %941  ;;  %v940_v42 = vpop.permute.xlu0 %939 }
  0xa9   : > { %v945_v43 = vsel %vm943_vm8, %v940_v42, %v942_v40 }
  0xac   : > { %v938_v44 = vpop.permute.xlu0 %937  ;;  %v1041_v48 = vpop.permute.xlu1 %1040 }
  0xad   : > { %v944_v47 = vsel %vm943_vm8, %v938_v44, %v940_v42 }
  0xb0   : > { %1365 = vmatmul.mubr.msk.bf16.vlgmr.msra.gmra.mrb[0].mxu1 %vm258_vm2, %v1302_v27  ;;  %v1043_v46 = vpop.permute.xlu0 %1042  ;;  %v1039_v50 = vpop.permute.xlu1 %1038 }
  0xb1   : > { %1369 = vmatpush3.bf16.msra.mxu1 %v639_v22  ;;  %1370 = vmatprep.mubr.msk.bf16.mxu1 %vm1500_vm0, %v1499_v0  ;;  %v1046_v49 = vsel %vm1044_vm9, %v1041_v48, %v1043_v46  ;;  %v1045_v52 = vsel %vm1044_vm9, %v1039_v50, %v1041_v48 }
  0xb2   : > { %1303 = vmatmul.mubr.msk.bf16.vlgmr.msra.gmra.mrb[0].mxu0 %vm258_vm2, %v1302_v27  ;;  %1374 = vmatprep.subr.bf16.mxu1 %v1499_v0 }
  0xb3   : > { %650 = vmatpush1.bf16.msra.mxu0 %v641_v29  ;;  %681 = vmatprep.mubr.bf16.mxu0 %v1501_v1 }
  0xb4   : > { %750 = vmatprep.subr.bf16.mxu0 %v743_v31  ;;  %v1189_v31 = vld [vmem:[%s1671_s3] sm:$0xff] }
  0xbc   : > { %1371 = vmatmul.mubr.msk.bf16.vlgmr.msra.gmra.mrb[0].mxu1 %vm258_vm2, %v1305_v33 }
  0xbd   : > { %1375 = vmatpush3.bf16.msra.mxu1 %v740_v28  ;;  %1376 = vmatprep.mubr.msk.bf16.mxu1 %vm1500_vm0, %v1499_v0 }
  0xbe   : > { %1306 = vmatmul.mubr.msk.bf16.vlgmr.msra.gmra.mrb[0].mxu0 %vm258_vm2, %v1305_v33  ;;  %1380 = vmatprep.subr.bf16.mxu1 %v1499_v0 }
  0xbf   : > { %751 = vmatpush1.bf16.msra.mxu0 %v742_v35  ;;  %782 = vmatprep.mubr.bf16.mxu0 %v1501_v1 }
  0xc0   : > { %851 = vmatprep.subr.bf16.mxu0 %v844_v37 }
  0xc8   : > { %1377 = vmatmul.mubr.msk.bf16.vlgmr.msra.gmra.mrb[0].mxu1 %vm258_vm2, %v1308_v39 }
  0xc9   : > { %1381 = vmatpush3.bf16.msra.mxu1 %v841_v34  ;;  %1382 = vmatprep.mubr.msk.bf16.mxu1 %vm1500_vm0, %v1499_v0  ;;  %v1191_v34 = vld [vmem:[%s1672_s4] sm:$0xff] }
  0xca   : > { %1309 = vmatmul.mubr.msk.bf16.vlgmr.msra.gmra.mrb[0].mxu0 %vm258_vm2, %v1308_v39  ;;  %1386 = vmatprep.subr.bf16.mxu1 %v1499_v0 }
  0xcb   : > { %852 = vmatpush1.bf16.msra.mxu0 %v843_v41  ;;  %883 = vmatprep.mubr.bf16.mxu0 %v1501_v1 }
  0xcc   : > { %952 = vmatprep.subr.bf16.mxu0 %v945_v43 }
  0xd4   : > { %1383 = vmatmul.mubr.msk.bf16.vlgmr.msra.gmra.mrb[0].mxu1 %vm258_vm2, %v1311_v45 }
  0xd5   : > { %1387 = vmatpush3.bf16.msra.mxu1 %v942_v40  ;;  %1388 = vmatprep.mubr.msk.bf16.mxu1 %vm1500_vm0, %v1499_v0 }
  0xd6   : > { %1312 = vmatmul.mubr.msk.bf16.vlgmr.msra.gmra.mrb[0].mxu0 %vm258_vm2, %v1311_v45  ;;  %1392 = vmatprep.subr.bf16.mxu1 %v1499_v0 }
  0xd7   : > { %953 = vmatpush1.bf16.msra.mxu0 %v944_v47  ;;  %984 = vmatprep.mubr.bf16.mxu0 %v1501_v1 }
  0xd8   : > { %1053 = vmatprep.subr.bf16.mxu0 %v1046_v49 }
  0xe0   : > { %1389 = vmatmul.mubr.msk.bf16.vlgmr.msra.gmra.mrb[0].mxu1 %vm258_vm2, %v1314_v51 }
  0xe1   : > { %1393 = vmatpush3.bf16.msra.mxu1 %v1043_v46  ;;  %1394 = vmatprep.mubr.msk.bf16.mxu1 %vm1500_vm0, %v1499_v0 }
  0xe2   : > { %1315 = vmatmul.mubr.msk.bf16.vlgmr.msra.gmra.mrb[0].mxu0 %vm258_vm2, %v1314_v51 }
  0xe3   : > { %1054 = vmatpush1.bf16.msra.mxu0 %v1045_v52  ;;  %1085 = vmatprep.mubr.bf16.mxu0 %v1501_v1 }
  0xec   : > { %1395 = vmatmul.mubr.msk.bf16.vlgmr.msra.gmra.mrb[0].mxu1 %vm258_vm2, %v1317_v53 }
  0xee   : > { %1318 = vmatmul.mubr.msk.bf16.vlgmr.msra.gmra.mrb[0].mxu0 %vm258_vm2, %v1317_v53 }
 0x1bf   : > { %v1128_v62 = vpop.f32.mrb[0].mxu1 }
 0x1c0   : > { %1140 = vst.msk [vmem:[#allocation2 + $0x10] sm:$0xff] %vm1139_vm10, %v1128_v62  ;;  %v1396_v0 = vpop.f32.mrb[1].mxu1  ;;  %v1160_v3 = vmul.f32 %v1154_v60, %v1128_v62 }
 0x1c1   : > { %v1087_v1 = vpop.f32.mrb[0].mxu0  ;;  %v1131_v2 = vpop.f32.mrb[2].mxu1 }
 0x1c2   : > { %v1158_v4 = vmul.f32 %v1146_v61, %v1087_v1  ;;  %v1089_v5 = vpop.f32.mrb[1].mxu0  ;;  %v1397_v6 = vpop.f32.mrb[3].mxu1  ;;  %v1162_v11 = vsel %vm1139_vm10, %v1160_v3, 0.0 }
 0x1c3   : > { %v1159_v7 = vmul.f32 %v1150_v63, %v1089_v5  ;;  %v1091_v8 = vpop.f32.mrb[2].mxu0 }
 0x1c4   : > { %v1092_v9 = vpop.f32.mrb[3].mxu0 }
 0x1c5   : > { %v1161_v10 = vadd.f32 %v1159_v7, %v1158_v4 }
 0x1c7   : > { %v1163_v12 = vadd.f32 %v1162_v11, %v1161_v10  ;;  %v1170_v15 = vld [vmem:[#allocation2 + $0x10] sm:$0xff] }
 0x1c9   : > { %1164 = vadd.xlane.f32.xlu0 %v1163_v12 }
 0x256   : > { %v1165_v13 = vpop.xlane.xlu0 %1164 }
 0x257   : > { %v1167_v14 = vmul.f32 0.00390625, %v1165_v13 }
 0x259   : > { %v1171_v16 = vsub.f32 %v1087_v1, %v1167_v14  ;;  %v1172_v17 = vsub.f32 %v1089_v5, %v1167_v14  ;;  %v1173_v18 = vsub.f32 %v1170_v15, %v1167_v14 }
 0x25b   : > { %v1174_v19 = vmul.f32 %v1171_v16, %v1146_v61  ;;  %v1175_v20 = vmul.f32 %v1172_v17, %v1150_v63  ;;  %v1176_v21 = vmul.f32 %v1173_v18, %v1154_v60 }
 0x25d   : > { %v1177_v22 = vmul.f32 %v1174_v19, %v1174_v19  ;;  %v1178_v23 = vmul.f32 %v1175_v20, %v1175_v20  ;;  %v1179_v24 = vmul.f32 %v1176_v21, %v1176_v21 }
 0x25f   : > { %v1180_v25 = vadd.f32 %v1178_v23, %v1177_v22  ;;  %v1181_v26 = vsel %vm1139_vm10, %v1179_v24, 0.0 }
 0x261   : > { %v1182_v27 = vadd.f32 %v1181_v26, %v1180_v25 }
 0x263   : > { %1183 = vadd.xlane.f32.xlu1 %v1182_v27 }
 0x2f0   : > { %v1184_v28 = vpop.xlane.xlu1 %1183 }
 0x2f1   : > { %v1186_v29 = vmul.f32 0.00390625, %v1184_v28 }
 0x2f3   : > { %v1187_v30 = vadd.f32 1e-05, %v1186_v29 }
 0x2f5   : > { %1489 = vrsqrt.f32 %v1187_v30 }
 0x2ff   : > { %v1490_v32 = vpop.eup %1489 }
 0x300   : > { %v1190_v33 = vmul.f32 %v1490_v32, %v1189_v31 }
 0x302   : > { %1196 = vperm.xlu0 %1483, %v1190_v33   ;;  %v1192_v35 = vmul.f32 %v1190_v33, %v1167_v14 }
 0x304   : > { %v1193_v36 = vsub.f32 %v1191_v34, %v1192_v35 }
 0x306   : > { %1204 = vperm.xlu1 %1484, %v1193_v36  }
 0x381   : > { %v1197_v37 = vpop.permute.xlu0 %1196 }
 0x382   : > { %v1199_v38 = vmul.f32 %v1197_v37, %v1087_v1  ;;  %v1200_v39 = vmul.f32 %v1197_v37, %v1089_v5  ;;  %v1201_v40 = vmul.f32 %v1197_v37, %v1170_v15 }
 0x385   : > { %v1205_v41 = vpop.permute.xlu1 %1204 }
 0x386   : > { %v1207_v42 = vadd.f32 %v1205_v41, %v1199_v38  ;;  %v1208_v43 = vadd.f32 %v1205_v41, %v1200_v39  ;;  %v1209_v44 = vadd.f32 %v1205_v41, %v1201_v40 }
 0x388   : > { %v1210_v45 = vmax.f32 %v1207_v42, 0.0  ;;  %v1211_v46 = vmax.f32 %v1208_v43, 0.0  ;;  %v1212_v47 = vmax.f32 %v1209_v44, 0.0 }
 0x38a   : > { %v1324_v48 = vpack.c.bf16 %v1211_v46, %v1210_v45  ;;  %v1325_v49 = vpack.c.bf16 %v1212_v47, %v1212_v47 }
 0x38c   : > { %1226 = vst [vmem:[%s224_s11] sm:$0xff] %v1324_v48  ;;  %1228 = vst.msk [vmem:[%s224_s11 + $0x8] sm:$0xf] %vm1227_vm11, %v1325_v49 }
 0x38d PF: > { %s15_s18 = sadd.s32 1, %s1497_s18  }
 0x38e   : > { %p12_p4 = scmp.ge.s32.totalorder %s15_s18, 4  }
 0x390   :  { %14 = sbr.rel (!%p12_p4) target bundleno = 1 (0x1), region = 78 }

// kernel: encoder_forward.14
= control target key start
LH: loop header
LB: loop body
LE: loop exit
PB: predicated region body
PF: predicated region fallthrough
CT: control target
= control target key end

     0   :  { %s614_s12 = smov 0   ;;  %s616_s13 = smov 0   ;;  %s661_s0 = inlined_call_operand.vmem [shape: s32[8,1], index: 0, kind: input, shape index: {}]   ;;  %s662_s1 = inlined_call_operand.vmem [shape: f32[2,8,352], index: 1, kind: input, shape index: {}]   ;;  %s663_s2 = inlined_call_operand.vmem [shape: s32[2,1,352], index: 2, kind: input, shape index: {}]   ;;  %s664_s3 = inlined_call_operand.vmem [shape: f32[2,8,8], index: 3, kind: output, shape index: {}]  }
   0x1   :  { %s618_s14 = smov 0  }
   0x2 LB: > { %s25_s15 = sadd.s32 1, %s584_s13  ;;  %p514_p0 = scmp.ge.s32.totalorder %s588_s14, 1  ;;  %s588_s14 = sphi %s618_s14, %s13_s14   ;;  %s584_s13 = sphi %s616_s13, %s666_s13   ;;  %s580_s12 = sphi %s614_s12, %s665_s12  }
   0x3   : > { %p27_p1 = scmp.ge.s32.totalorder %s25_s15, 2  ;;  %p172_p2 = scmp.lt.s32.totalorder %s588_s14, 3 }
   0x5   : > { %s668_s15 = smov (%p27_p1, %s25_s15), 0  ;;  %p173_p3 = pnand %p514_p0, %p172_p2 }
   0x6   : > { %v237_v0 = vld [vmem:[%s661_s0] sm:$0xff] (!%p173_p3)  ;;  %p208_p4 = scmp.lt.s32.totalorder (!%p173_p3), %s580_s12, 1  ;;  %v590_v1 = vmov (!%p173_p3), 0   ;;  %vm234_vm0 = vcmask (!%p173_p3), 64512   ;;  %v591_v2 = vmov (!%p173_p3), 0.0   ;;  %vm592_vm1 = vmmov (!%p173_p3), 0  }
   0x7   : > { %176 = sbr.rel (%p173_p3) target bundleno = 383 (0x17f), region = 32  ;;  %563 = vset.pattern.permute.xlu0 (!%p173_p3), %v590_v1  ;;  %528 = vmatprep.subr.mxu1 (!%p173_p3), %v591_v2  ;;  %235 = vst.msk [vmem:[#allocation2] sm:$0xff] (!%p173_p3), %vm234_vm0, %v591_v2  ;;  %v238_v4 = vlaneseq (!%p173_p3)  ;;  %vm266_vm2 = vcmask (!%p173_p3), 785408   ;;  %v593_v14 = vmov (!%p173_p3), 1.0  }
   0x8   : > { %251 = vperm.xlu0 (!%p173_p3), %563, %v237_v0   ;;  %530 = vmatprep.mubr.msk.f32.mxu1 (!%p173_p3), %vm592_vm1, %v591_v2 }
   0x9   : > { %v239_v5 = vshrl.u32 (!%p173_p3), %v238_v4, 7 }
   0xb   : > { %v248_v6 = vsub.s32 (!%p173_p3), 2, %v239_v5  ;;  %v244_v7 = vsub.s32 (!%p173_p3), 1, %v239_v5  ;;  %v240_v8 = vsub.s32 (!%p173_p3), 0, %v239_v5  ;;  %v423_v25 = vsub.s32 (!%p173_p3), 7, %v239_v5 }
   0xe   : > { %s670_s12 = smov (!%p208_p4, %s580_s12), 1  ;;  %v262_v19 = vld [vmem:[#allocation2] sm:$0xff] }
   0xf   : > { %s533_s18 = smul.u32 24, %s670_s12  ;;  %s516_s26 = sshll.u32 %s670_s12, 3 }
  0x10   : > { %s534_s22 = smul.u32 3, %s670_s12  ;;  %s229_s29 = scalar_lea.vmem %s664_s3, %s516_s26 }
  0x11   : > { %s215_s21 = scalar_lea.vmem %s662_s1, %s533_s18 }
  0x12   : > { %v264_v3 = vld [vmem:[%s215_s21 + $0x8] sm:$0xff]  ;;  %s224_s25 = scalar_lea.vmem %s663_s2, %s534_s22  ;;  %v263_v16 = vld [vmem:[%s215_s21] sm:$0xff]  ;;  %v265_v17 = vld [vmem:[%s215_s21 + $0x10] sm:$0xff] }
  0x13   : > { %337 = vmatprep.mubr.f32.mxu0 %v264_v3  ;;  %v236_v9 = vld [vmem:[%s224_s25] sm:$0x7] }
  0x14   : > { %v249_v10 = vrot.slane %v236_v9, %v248_v6  ;;  %v245_v11 = vrot.slane %v236_v9, %v244_v7  ;;  %v241_v12 = vrot.slane %v236_v9, %v240_v8 }
  0x87   : > { %v252_v13 = vpop.permute.xlu0 %251 }
  0x88   : > { %vm255_vm3 = vcmp.eq.s32.totalorder %v249_v10, %v252_v13  ;;  %vm254_vm4 = vcmp.eq.s32.totalorder %v245_v11, %v252_v13  ;;  %vm253_vm5 = vcmp.eq.s32.totalorder %v241_v12, %v252_v13 }
  0x89   : > { %520 = vmatprep.subr.msk.mxu0 %vm254_vm4, %v593_v14  ;;  %v519_v15 = vsel %vm255_vm3, 1.0, %v591_v2 }
  0x8a   : > { %521 = vmatpush1.xpose.msk.msra.mxu0 %vm253_vm5, %v593_v14  ;;  %529 = vmatpush3.xpose.msk.msra.mxu1 %vm266_vm2, %v519_v15 }
  0x8d   : > { %338 = vmatmul.mubr.f32.vlgmr.msra.gmra.mrb[0].mxu0 %v263_v16  ;;  %531 = vmatmul.mubr.msk.f32.vlgmr.msra.gmra.mrb[0].mxu1 %vm266_vm2, %v265_v17 }
 0x160   : > { %v339_v18 = vpop.f32.mrb[0].mxu0  ;;  %v409_v20 = vpop.f32.mrb[0].mxu1 }
 0x161   : > { %v410_v21 = vadd.f32 %v409_v20, %v339_v18  ;;  %v341_v22 = vpop.f32.mrb[1].mxu0  ;;  %v532_v23 = vpop.f32.mrb[1].mxu1 }
 0x163   : > { %v413_v24 = vadd.f32 %v410_v21, %v262_v19 }
 0x165   : > { %415 = vst.msk [vmem:[#allocation2] sm:$0xff] %vm234_vm0, %v413_v24 }
 0x16c   : > { %v419_v26 = vld [vmem:[#allocation2] sm:$0xff] }
 0x16d   : > { %v420_v27 = vmax.f32 %v419_v26, 1.0 }
 0x16f   : > { %v424_v28 = vrot.slane %v420_v27, %v423_v25 }
 0x171   : > { %564 = vrcp.f32 %v424_v28 }
 0x17b   : > { %v565_v29 = vpop.eup %564 }
 0x17c   : > { %v426_v30 = vmul.f32 %v565_v29, %v419_v26 }
 0x17e   : > { %427 = vst.msk [vmem:[%s229_s29] sm:$0xff] %vm234_vm0, %v426_v30 }
 0x17f PF: > { %s13_s14 = sadd.s32 1, %s588_s14   ;;  %s665_s12 = smov %s584_s13 }
 0x180   : > { %p10_p5 = scmp.ge.s32.totalorder %s13_s14, 4   ;;  %s666_s13 = smov %s668_s15 }
 0x182   :  { %12 = sbr.rel (!%p10_p5) target bundleno = 2 (0x2), region = 73 }

// kernel: encoder_forward.15
= control target key start
LH: loop header
LB: loop body
LE: loop exit
PB: predicated region body
PF: predicated region fallthrough
CT: control target
= control target key end

     0   :  { %s599_s12 = smov 0   ;;  %s601_s13 = smov 0   ;;  %s638_s0 = inlined_call_operand.vmem [shape: s32[8,1], index: 0, kind: input, shape index: {}]   ;;  %s639_s1 = inlined_call_operand.vmem [shape: f32[2,8,8], index: 1, kind: input, shape index: {}]   ;;  %s640_s2 = inlined_call_operand.vmem [shape: s32[2,1,352], index: 2, kind: input, shape index: {}]   ;;  %s641_s3 = inlined_call_operand.vmem [shape: f32[2,8,352], index: 3, kind: output, shape index: {}]  }
   0x1   :  { %s603_s14 = smov 0  }
   0x2 LB: > { %s25_s15 = sadd.s32 1, %s569_s13  ;;  %p500_p0 = scmp.ge.s32.totalorder %s573_s14, 1  ;;  %s573_s14 = sphi %s603_s14, %s13_s14   ;;  %s569_s13 = sphi %s601_s13, %s643_s13   ;;  %s565_s12 = sphi %s599_s12, %s642_s12  }
   0x3   : > { %p27_p1 = scmp.ge.s32.totalorder %s25_s15, 2  ;;  %p166_p2 = scmp.lt.s32.totalorder %s573_s14, 3 }
   0x5   : > { %s645_s15 = smov (%p27_p1, %s25_s15), 0  ;;  %p167_p3 = pnand %p500_p0, %p166_p2 }
   0x6   : > { %v225_v0 = vld [vmem:[%s638_s0] sm:$0xff] (!%p167_p3)  ;;  %v575_v1 = vmov (!%p167_p3), 0   ;;  %v576_v2 = vmov (!%p167_p3), 0.0   ;;  %vm577_vm0 = vmmov (!%p167_p3), 0   ;;  %p201_p4 = scmp.lt.s32.totalorder (!%p167_p3), %s565_s12, 1  ;;  %v226_v3 = vlaneseq (!%p167_p3) }
   0x7   : > { %170 = sbr.rel (%p167_p3) target bundleno = 353 (0x161), region = 32  ;;  %550 = vset.pattern.permute.xlu0 (!%p167_p3), %v575_v1  ;;  %515 = vmatprep.subr.mxu1 (!%p167_p3), %v576_v2  ;;  %vm251_vm1 = vcmask (!%p167_p3), 64512   ;;  %v578_v14 = vmov (!%p167_p3), 1.0   ;;  %vm398_vm5 = vcmask (!%p167_p3), 785408  }
   0x8   : > { %239 = vperm.xlu0 (!%p167_p3), %550, %v225_v0   ;;  %319 = vmatprep.mubr.f32.mxu0 (!%p167_p3), %v576_v2  ;;  %v227_v4 = vshrl.u32 (!%p167_p3), %v226_v3, 7 }
   0x9   : > { %517 = vmatprep.mubr.msk.f32.mxu1 (!%p167_p3), %vm577_vm0, %v576_v2 }
   0xa   : > { %v232_v5 = vsub.s32 (!%p167_p3), 1, %v227_v4  ;;  %v236_v6 = vsub.s32 (!%p167_p3), 2, %v227_v4  ;;  %v228_v7 = vsub.s32 (!%p167_p3), 0, %v227_v4 }
   0xe   : > { %s647_s12 = smov (!%p201_p4, %s565_s12), 1 }
   0xf   : > { %s520_s18 = smul.u32 3, %s647_s12  ;;  %s501_s22 = sshll.u32 %s647_s12, 3 }
  0x10   : > { %s204_s25 = scalar_lea.vmem %s639_s1, %s501_s22  ;;  %s521_s26 = smul.u32 24, %s647_s12 }
  0x11   : > { %s212_s21 = scalar_lea.vmem %s640_s2, %s520_s18  ;;  %v250_v13 = vld [vmem:[%s204_s25] sm:$0xff] }
  0x12   : > { %v224_v8 = vld [vmem:[%s212_s21] sm:$0x7]  ;;  %s222_s29 = scalar_lea.vmem %s641_s3, %s521_s26 }
  0x13   : > { %v233_v9 = vrot.slane %v224_v8, %v232_v5  ;;  %v237_v10 = vrot.slane %v224_v8, %v236_v6  ;;  %v229_v11 = vrot.slane %v224_v8, %v228_v7 }
  0x87   : > { %v240_v12 = vpop.permute.xlu0 %239 }
  0x88   : > { %vm242_vm2 = vcmp.eq.s32.totalorder %v233_v9, %v240_v12  ;;  %vm243_vm3 = vcmp.eq.s32.totalorder %v237_v10, %v240_v12  ;;  %vm241_vm4 = vcmp.eq.s32.totalorder %v229_v11, %v240_v12 }
  0x89   : > { %506 = vmatprep.subr.msk.mxu0 %vm242_vm2, %v578_v14  ;;  %516 = vmatpush3.msk.msra.mxu1 %vm243_vm3, %v578_v14 }
  0x8a   : > { %507 = vmatpush1.msk.msra.mxu0 %vm241_vm4, %v578_v14  ;;  %518 = vmatmul.mubr.msk.f32.vlgmr.msra.gmra.mrb[0].mxu1 %vm251_vm1, %v250_v13 }
  0x8b   : > { %508 = vmatmul.mubr.msk.f32.vlgmr.msra.gmra.mrb[0].mxu0 %vm251_vm1, %v250_v13 }
 0x15d   : > { %v392_v15 = vpop.f32.mrb[0].mxu1 }
 0x15e   : > { %v321_v16 = vpop.f32.mrb[0].mxu0  ;;  %399 = vst.msk [vmem:[%s222_s29 + $0x10] sm:$0xff] %vm398_vm5, %v392_v15  ;;  %v519_v17 = vpop.f32.mrb[1].mxu1 }
 0x15f   : > { %396 = vst [vmem:[%s222_s29] sm:$0xff] %v321_v16  ;;  %v323_v18 = vpop.f32.mrb[1].mxu0 }
 0x160   : > { %397 = vst [vmem:[%s222_s29 + $0x8] sm:$0xff] %v323_v18 }
 0x161 PF: > { %s13_s14 = sadd.s32 1, %s573_s14   ;;  %s642_s12 = smov %s569_s13 }
 0x162   : > { %p10_p5 = scmp.ge.s32.totalorder %s13_s14, 4   ;;  %s643_s13 = smov %s645_s15 }
 0x164   :  { %12 = sbr.rel (!%p10_p5) target bundleno = 2 (0x2), region = 65 }

// kernel: encoder_forward.13
= control target key start
LH: loop header
LB: loop body
LE: loop exit
PB: predicated region body
PF: predicated region fallthrough
CT: control target
= control target key end

     0   :  { %s6405_s18 = smov 0   ;;  %s7448_s0 = inlined_call_operand.vmem [shape: bf16[2,8,512], index: 0, kind: input, shape index: {}]   ;;  %s7449_s1 = inlined_call_operand.vmem [shape: bf16[49,8,8], index: 1, kind: input, shape index: {}]   ;;  %s7450_s2 = inlined_call_operand.vmem [shape: f32[1,352], index: 2, kind: input, shape index: {}]   ;;  %s7451_s3 = inlined_call_operand.vmem [shape: f32[8,1], index: 3, kind: input, shape index: {}]   ;;  %s7452_s4 = inlined_call_operand.vmem [shape: f32[8,1], index: 4, kind: input, shape index: {}]   ;;  %s7453_s5 = inlined_call_operand.vmem [shape: f32[2,8,352], index: 5, kind: output, shape index: {}]  }
   0x1 LB: > { %s5639_s2 = sadd.s32 4294967295, %s6325_s18   ;;  %p5643_p0 = scmp.ge.s32.totalorder %s6325_s18, 1  ;;  %s6325_s18 = sphi %s6405_s18, %s15_s18  }
   0x2   : > { %p187_p1 = scmp.lt.s32.totalorder %s6325_s18, 3 }
   0x4   : > { %p188_p2 = pnand %p5643_p0, %p187_p1 }
   0x5   : > { %p215_p3 = scmp.lt.s32.totalorder (!%p188_p2), %s5639_s2, 1  ;;  %v6327_v0 = vmov (!%p188_p2), 0.0   ;;  %vm6328_vm0 = vmmov (!%p188_p2), 0   ;;  %v6329_v1 = vmov (!%p188_p2), 0   ;;  %s6330_s22 = smov (!%p188_p2), 127   ;;  %vm253_vm1 = vcmask (!%p188_p2), 1043456  }
   0x6   : > { %191 = sbr.rel (%p188_p2) target bundleno = 756 (0x2f4), region = 40  ;;  %5953 = vmatprep.subr.bf16.mxu1 (!%p188_p2), %v6327_v0  ;;  %5955 = vmatprep.mubr.msk.bf16.mxu1 (!%p188_p2), %vm6328_vm0, %v6327_v0  ;;  %s6331_s23 = smov (!%p188_p2), 126   ;;  %v5647_v12 = vld [vmem:[%s7449_s1 + $0x4] sm:$0xf] (!%p188_p2)  ;;  %vm249_vm2 = vcmask (!%p188_p2), 64512   ;;  %vm246_vm3 = vcmask (!%p188_p2), 1039360  }
   0x7   : > { %295 = vmatprep.mubr.bf16.mxu0 (!%p188_p2), %v6329_v1  ;;  %6304 = vset.pattern.permute.xlu0 (!%p188_p2), %v6329_v1  ;;  %s6332_s24 = smov (!%p188_p2), 125   ;;  %s6333_s25 = smov (!%p188_p2), 124   ;;  %vm445_vm4 = vcmask (!%p188_p2), 1031168   ;;  %v229_v22 = vld [vmem:[%s7449_s1] sm:$0xf] (!%p188_p2)  ;;  %vm552_vm5 = vcmask (!%p188_p2), 1022976  }
   0x8   : > { %s6334_s26 = smov (!%p188_p2), 123   ;;  %s6335_s27 = smov (!%p188_p2), 122   ;;  %v5657_v31 = vld [vmem:[%s7449_s1 + $0x8] sm:$0xf] (!%p188_p2)  ;;  %vm659_vm6 = vcmask (!%p188_p2), 1014784   ;;  %vm766_vm7 = vcmask (!%p188_p2), 1006592  }
   0x9   : > { %s6336_s28 = smov (!%p188_p2), 106   ;;  %s6337_s29 = smov (!%p188_p2), 105   ;;  %v5661_v40 = vld [vmem:[%s7449_s1 + $0xc] sm:$0xf] (!%p188_p2)  ;;  %v5665_v49 = vld [vmem:[%s7449_s1 + $0x10] sm:$0xf] (!%p188_p2) }
   0xa   : > { %s6338_s30 = smov (!%p188_p2), 104   ;;  %s6339_s6 = smov (!%p188_p2), 103   ;;  %vm873_vm8 = vcmask (!%p188_p2), 998400   ;;  %v5669_v58 = vld [vmem:[%s7449_s1 + $0x14] sm:$0xf] (!%p188_p2)  ;;  %vm980_vm9 = vcmask (!%p188_p2), 867328  }
   0xb   : > { %s6340_s7 = smov (!%p188_p2), 102   ;;  %s6341_s8 = smov (!%p188_p2), 101   ;;  %vm1087_vm10 = vcmask (!%p188_p2), 859136   ;;  %vm1194_vm11 = vcmask (!%p188_p2), 850944   ;;  %vm1301_vm12 = vcmask (!%p188_p2), 842752   ;;  %vm1408_vm13 = vcmask (!%p188_p2), 834560  }
   0xc   : > { %s6342_s9 = smov (!%p188_p2), 100   ;;  %s6343_s10 = smov (!%p188_p2), 84   ;;  %vm1515_vm14 = vcmask (!%p188_p2), 826368   ;;  %vm1622_vm15 = vcmask (!%p188_p2), 818176  }
   0xd   : > { %s7455_s2 = smov (!%p215_p3, %s5639_s2), 1  ;;  %s6344_s11 = smov 83  }
   0xe   : > { %s5854_s3 = sshll.u32 %s7455_s2, 4  ;;  %s6345_s12 = smov 82  }
   0xf   : > { %s6424_s21 = scalar_lea.vmem %s7448_s0, %s5854_s3  ;;  %s6346_s13 = smov 81  }
  0x10   : > { %v6427_v2 = vld [vmem:[%s6424_s21 + $0x8] ss:$0 sps:$4 sm:$0xff]   ;;  %v1721_v3 = vld [vmem:[%s6424_s21] sm:$0xff]  ;;  %s6347_s14 = smov 80   ;;  %s6348_s17 = smov 79  }
  0x11   : > { %v6430_v4 = vcombine.low %v1721_v3, %v1721_v3  ;;  %244 = vrot.lane.b32.xlu1 %v6427_v2, %s6330_s22  ;;  %v6433_v5 = vcombine.high %v1721_v3, %v1721_v3  ;;  %v1722_v6 = vld [vmem:[%s6424_s21 + $0x8] sm:$0xff]  ;;  %v354_v13 = vsel %vm253_vm1, %v6427_v2, 0  ;;  %s6349_s20 = smov 78   ;;  %s6353_s15 = smov 59  }
  0x12   : > { %v6482_v7 = vcombine.low %v1722_v6, %v1722_v6  ;;  %v6487_v8 = vcombine.high %v1722_v6, %v1722_v6  ;;  %s6354_s3 = smov 58  }
  0x13   : > { %240 = vrot.lane.b32.xlu0 %v6430_v4, %s6330_s22  ;;  %v348_v20 = vsel %vm253_vm1, %v6430_v4, 0 }
  0x15   : > { %439 = vrot.lane.b32.xlu1 %v6430_v4, %s6331_s23 }
  0x17   : > { %242 = vrot.lane.b32.xlu0 %v6433_v5, %s6330_s22  ;;  %s6355_s22 = smov 57  }
  0x19   : > { %443 = vrot.lane.b32.xlu1 %v6427_v2, %s6331_s23 }
  0x1b   : > { %441 = vrot.lane.b32.xlu0 %v6433_v5, %s6331_s23 }
  0x1d   : > { %548 = vrot.lane.b32.xlu1 %v6433_v5, %s6332_s24 }
  0x1f   : > { %546 = vrot.lane.b32.xlu0 %v6430_v4, %s6332_s24 }
  0x21   : > { %653 = vrot.lane.b32.xlu1 %v6430_v4, %s6333_s25 }
  0x23   : > { %550 = vrot.lane.b32.xlu0 %v6427_v2, %s6332_s24  ;;  %s6362_s24 = smov 35  }
  0x25   : > { %657 = vrot.lane.b32.xlu1 %v6427_v2, %s6333_s25 }
  0x27   : > { %655 = vrot.lane.b32.xlu0 %v6433_v5, %s6333_s25 }
  0x29   : > { %762 = vrot.lane.b32.xlu1 %v6433_v5, %s6334_s26 }
  0x2b   : > { %760 = vrot.lane.b32.xlu0 %v6430_v4, %s6334_s26 }
  0x2d   : > { %867 = vrot.lane.b32.xlu1 %v6430_v4, %s6335_s27 }
  0x2f   : > { %764 = vrot.lane.b32.xlu0 %v6427_v2, %s6334_s26 }
  0x31   : > { %871 = vrot.lane.b32.xlu1 %v6427_v2, %s6335_s27 }
  0x33   : > { %869 = vrot.lane.b32.xlu0 %v6433_v5, %s6335_s27 }
  0x35   : > { %976 = vrot.lane.b32.xlu1 %v6433_v5, %s6336_s28 }
  0x37   : > { %974 = vrot.lane.b32.xlu0 %v6430_v4, %s6336_s28 }
  0x39   : > { %1081 = vrot.lane.b32.xlu1 %v6430_v4, %s6337_s29 }
  0x3b   : > { %978 = vrot.lane.b32.xlu0 %v6427_v2, %s6336_s28 }
  0x3d   : > { %1085 = vrot.lane.b32.xlu1 %v6427_v2, %s6337_s29 }
  0x3f   : > { %1083 = vrot.lane.b32.xlu0 %v6433_v5, %s6337_s29  ;;  %s6350_s29 = smov 62  }
  0x41   : > { %1190 = vrot.lane.b32.xlu1 %v6433_v5, %s6338_s30 }
  0x43   : > { %1188 = vrot.lane.b32.xlu0 %v6430_v4, %s6338_s30 }
  0x45   : > { %1295 = vrot.lane.b32.xlu1 %v6430_v4, %s6339_s6 }
  0x47   : > { %1192 = vrot.lane.b32.xlu0 %v6427_v2, %s6338_s30  ;;  %s6356_s30 = smov 56  }
  0x49   : > { %1299 = vrot.lane.b32.xlu1 %v6427_v2, %s6339_s6 }
  0x4b   : > { %1297 = vrot.lane.b32.xlu0 %v6433_v5, %s6339_s6 }
  0x4d   : > { %1404 = vrot.lane.b32.xlu1 %v6433_v5, %s6340_s7 }
  0x4f   : > { %1402 = vrot.lane.b32.xlu0 %v6430_v4, %s6340_s7 }
  0x51   : > { %1509 = vrot.lane.b32.xlu1 %v6430_v4, %s6341_s8 }
  0x53   : > { %1406 = vrot.lane.b32.xlu0 %v6427_v2, %s6340_s7  ;;  %s6351_s7 = smov 61  }
  0x55   : > { %1513 = vrot.lane.b32.xlu1 %v6427_v2, %s6341_s8 }
  0x57   : > { %1511 = vrot.lane.b32.xlu0 %v6433_v5, %s6341_s8  ;;  %s6357_s8 = smov 40  }
  0x59   : > { %1618 = vrot.lane.b32.xlu1 %v6433_v5, %s6342_s9 }
  0x5b   : > { %1616 = vrot.lane.b32.xlu0 %v6430_v4, %s6342_s9 }
  0x5d   : > { %1735 = vrot.lane.b32.xlu1 %v6430_v4, %s6343_s10 }
  0x5f   : > { %1620 = vrot.lane.b32.xlu0 %v6427_v2, %s6342_s9 }
  0x61   : > { %1739 = vrot.lane.b32.xlu1 %v6482_v7, %s6343_s10 }
  0x63   : > { %1737 = vrot.lane.b32.xlu0 %v6433_v5, %s6343_s10 }
  0x65   : > { %1845 = vrot.lane.b32.xlu1 %v6430_v4, %s6344_s11 }
  0x67   : > { %1741 = vrot.lane.b32.xlu0 %v6487_v8, %s6343_s10  ;;  %s6352_s10 = smov 60  }
  0x69   : > { %1849 = vrot.lane.b32.xlu1 %v6482_v7, %s6344_s11 }
  0x6b   : > { %1847 = vrot.lane.b32.xlu0 %v6433_v5, %s6344_s11 }
  0x6d   : > { %1955 = vrot.lane.b32.xlu1 %v6430_v4, %s6345_s12 }
  0x6f   : > { %1851 = vrot.lane.b32.xlu0 %v6487_v8, %s6344_s11  ;;  %s6358_s11 = smov 39  }
  0x71   : > { %1959 = vrot.lane.b32.xlu1 %v6482_v7, %s6345_s12 }
  0x73   : > { %1957 = vrot.lane.b32.xlu0 %v6433_v5, %s6345_s12 }
  0x75   : > { %2065 = vrot.lane.b32.xlu1 %v6430_v4, %s6346_s13 }
  0x77   : > { %1961 = vrot.lane.b32.xlu0 %v6487_v8, %s6345_s12 }
  0x79   : > { %2069 = vrot.lane.b32.xlu1 %v6482_v7, %s6346_s13 }
  0x7b   : > { %2067 = vrot.lane.b32.xlu0 %v6433_v5, %s6346_s13 }
  0x7d   : > { %2175 = vrot.lane.b32.xlu1 %v6430_v4, %s6347_s14 }
  0x7f   : > { %2071 = vrot.lane.b32.xlu0 %v6487_v8, %s6346_s13 }
  0x81   : > { %2179 = vrot.lane.b32.xlu1 %v6482_v7, %s6347_s14 }
  0x83   : > { %2177 = vrot.lane.b32.xlu0 %v6433_v5, %s6347_s14  ;;  %v245_v9 = vpop.permute.xlu1 %244 }
  0x84   : > { %v261_v11 = vsel %vm253_vm1, %v245_v9, 0 }
  0x85   : > { %v241_v10 = vpop.permute.xlu0 %240  ;;  %5954 = vmatpush3.bf16.msra.mxu1 %v261_v11  ;;  %2285 = vrot.lane.b32.xlu1 %v6430_v4, %s6348_s17 }
  0x86   : > { %5959 = vmatprep.subr.bf16.mxu1 %v6327_v0 }
  0x87   : > { %2181 = vrot.lane.b32.xlu0 %v6487_v8, %s6347_s14  ;;  %v440_v14 = vpop.permute.xlu1 %439  ;;  %s6359_s14 = smov 38  }
  0x88   : > { %5956 = vmatmul.mubr.msk.bf16.vlgmr.msra.gmra.mrb[0].mxu1 %vm249_vm2, %v5647_v12 }
  0x89   : > { %v243_v15 = vpop.permute.xlu0 %242  ;;  %5960 = vmatpush3.bf16.msra.mxu1 %v354_v13  ;;  %5961 = vmatprep.mubr.msk.bf16.mxu1 %vm6328_vm0, %v6327_v0 }
  0x8a   : > { %v248_v16 = vsel %vm246_vm3, %v243_v15, %v245_v9  ;;  %v247_v17 = vsel %vm246_vm3, %v241_v10, %v243_v15  ;;  %5965 = vmatprep.subr.bf16.mxu1 %v6327_v0  ;;  %2289 = vrot.lane.b32.xlu1 %v6482_v7, %s6348_s17  ;;  %v5673_v9 = vld [vmem:[%s7449_s1 + $0x18] sm:$0xf]  ;;  %vm1743_vm3 = vcmask 687104  }
  0x8b   : > { %5651 = vmatprep.subr.msk.bf16.mxu0 %vm253_vm1, %v248_v16  ;;  %v255_v18 = vsel %vm253_vm1, %v247_v17, 0  ;;  %v444_v19 = vpop.permute.xlu1 %443  ;;  %2287 = vrot.lane.b32.xlu0 %v6433_v5, %s6348_s17 }
  0x8c   : > { %264 = vmatpush1.bf16.msra.mxu0 %v255_v18  ;;  %v458_v24 = vsel %vm253_vm1, %v444_v19, 0  ;;  %v5677_v18 = vld [vmem:[%s7449_s1 + $0x1c] sm:$0xf] }
  0x8d   : > { %5654 = vmatprep.subr.msk.bf16.mxu0 %vm253_vm1, %v6433_v5  ;;  %v442_v21 = vpop.permute.xlu0 %441 }
  0x8e   : > { %v447_v23 = vsel %vm445_vm4, %v442_v21, %v444_v19  ;;  %v446_v27 = vsel %vm445_vm4, %v440_v14, %v442_v21  ;;  %2395 = vrot.lane.b32.xlu1 %v6430_v4, %s6349_s20  ;;  %vm1853_vm4 = vcmask 678912  }
  0x8f   : > { %5652 = vmatmul.mubr.msk.bf16.vlgmr.msra.gmra.mrb[0].mxu0 %vm249_vm2, %v5647_v12  ;;  %v549_v25 = vpop.permute.xlu1 %548  ;;  %2291 = vrot.lane.b32.xlu0 %v6487_v8, %s6348_s17  ;;  %v452_v29 = vsel %vm253_vm1, %v446_v27, 0  ;;  %v5681_v27 = vld [vmem:[%s7449_s1 + $0x20] sm:$0xf]  ;;  %s6360_s17 = smov 37  }
  0x90   : > { %357 = vmatpush1.bf16.msra.mxu0 %v348_v20  ;;  %388 = vmatprep.mubr.bf16.mxu0 %v6329_v1 }
  0x91   : > { %5962 = vmatmul.mubr.msk.bf16.vlgmr.msra.gmra.mrb[4].mxu1 %vm249_vm2, %v229_v22  ;;  %5658 = vmatprep.subr.msk.bf16.mxu0 %vm253_vm1, %v447_v23  ;;  %v547_v26 = vpop.permute.xlu0 %546 }
  0x92   : > { %5966 = vmatpush3.bf16.msra.mxu1 %v458_v24  ;;  %5967 = vmatprep.mubr.msk.bf16.mxu1 %vm6328_vm0, %v6327_v0  ;;  %v553_v36 = vsel %vm552_vm5, %v547_v26, %v549_v25 }
  0x93   : > { %5971 = vmatprep.subr.bf16.mxu1 %v6327_v0  ;;  %v654_v28 = vpop.permute.xlu1 %653  ;;  %2397 = vrot.lane.b32.xlu0 %v6433_v5, %s6349_s20  ;;  %v559_v38 = vsel %vm253_vm1, %v553_v36, 0  ;;  %v5685_v36 = vld [vmem:[%s7449_s1 + $0x24] sm:$0xf] }
  0x94   : > { %2399 = vrot.lane.b32.xlu1 %v6482_v7, %s6349_s20 }
  0x95   : > { %v551_v30 = vpop.permute.xlu0 %550 }
  0x96   : > { %v554_v32 = vsel %vm552_vm5, %v549_v25, %v551_v30  ;;  %v565_v33 = vsel %vm253_vm1, %v551_v30, 0  ;;  %vm1963_vm5 = vcmask 670720  }
  0x97   : > { %5655 = vmatmul.mubr.msk.bf16.vlgmr.msra.gmra.mrb[4].mxu0 %vm249_vm2, %v229_v22  ;;  %v658_v34 = vpop.permute.xlu1 %657  ;;  %2401 = vrot.lane.b32.xlu0 %v6487_v8, %s6349_s20  ;;  %s6361_s20 = smov 36  }
  0x98   : > { %461 = vmatpush1.bf16.msra.mxu0 %v452_v29  ;;  %492 = vmatprep.mubr.bf16.mxu0 %v6329_v1  ;;  %v672_v42 = vsel %vm253_vm1, %v658_v34, 0 }
  0x99   : > { %5968 = vmatmul.mubr.msk.bf16.vlgmr.msra.gmra.mrb[8].mxu1 %vm249_vm2, %v5657_v31  ;;  %5662 = vmatprep.subr.msk.bf16.mxu0 %vm253_vm1, %v554_v32  ;;  %v656_v35 = vpop.permute.xlu0 %655 }
  0x9a   : > { %5972 = vmatpush3.bf16.msra.mxu1 %v565_v33  ;;  %5973 = vmatprep.mubr.msk.bf16.mxu1 %vm6328_vm0, %v6327_v0  ;;  %v661_v41 = vsel %vm659_vm6, %v656_v35, %v658_v34  ;;  %v660_v45 = vsel %vm659_vm6, %v654_v28, %v656_v35 }
  0x9b   : > { %5977 = vmatprep.subr.bf16.mxu1 %v6327_v0  ;;  %v763_v37 = vpop.permute.xlu1 %762  ;;  %2505 = vrot.lane.b32.xlu1 %v6430_v4, %s6350_s29  ;;  %v666_v47 = vsel %vm253_vm1, %v660_v45, 0  ;;  %v5689_v45 = vld [vmem:[%s7449_s1 + $0x28] sm:$0xf] }
  0x9c   : > { %2507 = vrot.lane.b32.xlu0 %v6433_v5, %s6350_s29 }
  0x9d   : > { %v761_v39 = vpop.permute.xlu0 %760 }
  0x9e   : > { %v767_v54 = vsel %vm766_vm7, %v761_v39, %v763_v37 }
  0x9f   : > { %5659 = vmatmul.mubr.msk.bf16.vlgmr.msra.gmra.mrb[8].mxu0 %vm249_vm2, %v5657_v31  ;;  %v868_v43 = vpop.permute.xlu1 %867  ;;  %2509 = vrot.lane.b32.xlu1 %v6482_v7, %s6350_s29  ;;  %v773_v56 = vsel %vm253_vm1, %v767_v54, 0  ;;  %v5693_v54 = vld [vmem:[%s7449_s1 + $0x2c] sm:$0xf] }
  0xa0   : > { %568 = vmatpush1.bf16.msra.mxu0 %v559_v38  ;;  %599 = vmatprep.mubr.bf16.mxu0 %v6329_v1 }
  0xa1   : > { %5974 = vmatmul.mubr.msk.bf16.vlgmr.msra.gmra.mrb[12].mxu1 %vm249_vm2, %v5661_v40  ;;  %5666 = vmatprep.subr.msk.bf16.mxu0 %vm253_vm1, %v661_v41  ;;  %v765_v44 = vpop.permute.xlu0 %764 }
  0xa2   : > { %5978 = vmatpush3.bf16.msra.mxu1 %v672_v42  ;;  %5979 = vmatprep.mubr.msk.bf16.mxu1 %vm6328_vm0, %v6327_v0  ;;  %v768_v50 = vsel %vm766_vm7, %v763_v37, %v765_v44  ;;  %v779_v51 = vsel %vm253_vm1, %v765_v44, 0 }
  0xa3   : > { %5983 = vmatprep.subr.bf16.mxu1 %v6327_v0  ;;  %v872_v46 = vpop.permute.xlu1 %871  ;;  %2511 = vrot.lane.b32.xlu0 %v6487_v8, %s6350_s29 }
  0xa4   : > { %2615 = vrot.lane.b32.xlu1 %v6430_v4, %s6351_s7  ;;  %v886_v60 = vsel %vm253_vm1, %v872_v46, 0 }
  0xa5   : > { %v870_v48 = vpop.permute.xlu0 %869 }
  0xa6   : > { %v875_v59 = vsel %vm873_vm8, %v870_v48, %v872_v46  ;;  %v874_v63 = vsel %vm873_vm8, %v868_v43, %v870_v48 }
  0xa7   : > { %5663 = vmatmul.mubr.msk.bf16.vlgmr.msra.gmra.mrb[12].mxu0 %vm249_vm2, %v5661_v40  ;;  %v977_v52 = vpop.permute.xlu1 %976  ;;  %2617 = vrot.lane.b32.xlu0 %v6433_v5, %s6351_s7  ;;  %v880_v3 = vsel %vm253_vm1, %v874_v63, 0  ;;  %v5697_v63 = vld [vmem:[%s7449_s1 + $0x30] sm:$0xf] }
  0xa8   : > { %675 = vmatpush1.bf16.msra.mxu0 %v666_v47  ;;  %706 = vmatprep.mubr.bf16.mxu0 %v6329_v1 }
  0xa9   : > { %5980 = vmatmul.mubr.msk.bf16.vlgmr.msra.gmra.mrb[16].mxu1 %vm249_vm2, %v5665_v49  ;;  %5670 = vmatprep.subr.msk.bf16.mxu0 %vm253_vm1, %v768_v50  ;;  %v975_v53 = vpop.permute.xlu0 %974 }
  0xaa   : > { %5984 = vmatpush3.bf16.msra.mxu1 %v779_v51  ;;  %5985 = vmatprep.mubr.msk.bf16.mxu1 %vm6328_vm0, %v6327_v0  ;;  %v981_v14 = vsel %vm980_vm9, %v975_v53, %v977_v52 }
  0xab   : > { %5989 = vmatprep.subr.bf16.mxu1 %v6327_v0  ;;  %v1082_v55 = vpop.permute.xlu1 %1081  ;;  %2619 = vrot.lane.b32.xlu1 %v6482_v7, %s6351_s7  ;;  %v987_v16 = vsel %vm253_vm1, %v981_v14, 0 }
  0xac   : > { %2621 = vrot.lane.b32.xlu0 %v6487_v8, %s6351_s7 }
  0xad   : > { %v979_v57 = vpop.permute.xlu0 %978 }
  0xae   : > { %v982_v10 = vsel %vm980_vm9, %v977_v52, %v979_v57  ;;  %v993_v11 = vsel %vm253_vm1, %v979_v57, 0  ;;  %vm2073_vm9 = vcmask 662528  }
  0xaf   : > { %5667 = vmatmul.mubr.msk.bf16.vlgmr.msra.gmra.mrb[16].mxu0 %vm249_vm2, %v5665_v49  ;;  %v1086_v61 = vpop.permute.xlu1 %1085  ;;  %2725 = vrot.lane.b32.xlu1 %v6430_v4, %s6352_s10 }
  0xb0   : > { %782 = vmatpush1.bf16.msra.mxu0 %v773_v56  ;;  %813 = vmatprep.mubr.bf16.mxu0 %v6329_v1  ;;  %v1100_v20 = vsel %vm253_vm1, %v1086_v61, 0 }
  0xb1   : > { %5986 = vmatmul.mubr.msk.bf16.vlgmr.msra.gmra.mrb[20].mxu1 %vm249_vm2, %v5669_v58  ;;  %5674 = vmatprep.subr.msk.bf16.mxu0 %vm253_vm1, %v875_v59  ;;  %v1084_v62 = vpop.permute.xlu0 %1083 }
  0xb2   : > { %5990 = vmatpush3.bf16.msra.mxu1 %v886_v60  ;;  %5991 = vmatprep.mubr.msk.bf16.mxu1 %vm6328_vm0, %v6327_v0  ;;  %v1089_v19 = vsel %vm1087_vm10, %v1084_v62, %v1086_v61  ;;  %v1088_v23 = vsel %vm1087_vm10, %v1082_v55, %v1084_v62  ;;  %vm2183_vm10 = vcmask 654336  }
  0xb3   : > { %5995 = vmatprep.subr.bf16.mxu1 %v6327_v0  ;;  %v1191_v2 = vpop.permute.xlu1 %1190  ;;  %2727 = vrot.lane.b32.xlu0 %v6433_v5, %s6352_s10  ;;  %v1094_v25 = vsel %vm253_vm1, %v1088_v23, 0 }
  0xb4   : > { %2729 = vrot.lane.b32.xlu1 %v6482_v7, %s6352_s10 }
  0xb5   : > { %v1189_v6 = vpop.permute.xlu0 %1188 }
  0xb6   : > { %v1195_v32 = vsel %vm1194_vm11, %v1189_v6, %v1191_v2 }
  0xb7   : > { %5671 = vmatmul.mubr.msk.bf16.vlgmr.msra.gmra.mrb[20].mxu0 %vm249_vm2, %v5669_v58  ;;  %v6623_v12 = vpop.permute.xlu1 %1295  ;;  %2731 = vrot.lane.b32.xlu0 %v6487_v8, %s6352_s10  ;;  %v1201_v34 = vsel %vm253_vm1, %v1195_v32, 0 }
  0xb8   : > { %889 = vmatpush1.bf16.msra.mxu0 %v880_v3  ;;  %920 = vmatprep.mubr.bf16.mxu0 %v6329_v1 }
  0xb9   : > { %5992 = vmatmul.mubr.msk.bf16.vlgmr.msra.gmra.mrb[24].mxu1 %vm249_vm2, %v5673_v9  ;;  %5678 = vmatprep.subr.msk.bf16.mxu0 %vm253_vm1, %v982_v10  ;;  %v1193_v13 = vpop.permute.xlu0 %1192 }
  0xba   : > { %5996 = vmatpush3.bf16.msra.mxu1 %v993_v11  ;;  %5997 = vmatprep.mubr.msk.bf16.mxu1 %vm6328_vm0, %v6327_v0  ;;  %v1196_v28 = vsel %vm1194_vm11, %v1191_v2, %v1193_v13  ;;  %v1207_v29 = vsel %vm253_vm1, %v1193_v13, 0  ;;  %vm2293_vm11 = vcmask 646144  }
  0xbb   : > { %6001 = vmatprep.subr.bf16.mxu1 %v6327_v0  ;;  %v1300_v15 = vpop.permute.xlu1 %1299  ;;  %2835 = vrot.lane.b32.xlu1 %v6430_v4, %s6353_s15 }
  0xbc   : > { %2837 = vrot.lane.b32.xlu0 %v6433_v5, %s6353_s15  ;;  %v1314_v38 = vsel %vm253_vm1, %v1300_v15, 0 }
  0xbd   : > { %v1298_v17 = vpop.permute.xlu0 %1297 }
  0xbe   : > { %v1303_v37 = vsel %vm1301_vm12, %v1298_v17, %v1300_v15  ;;  %v1302_v41 = vsel %vm1301_vm12, %v6623_v12, %v1298_v17  ;;  %v5701_v15 = vld [vmem:[%s7449_s1 + $0x34] sm:$0xf]  ;;  %vm2403_vm12 = vcmask 637952  }
  0xbf   : > { %5675 = vmatmul.mubr.msk.bf16.vlgmr.msra.gmra.mrb[24].mxu0 %vm249_vm2, %v5673_v9  ;;  %v6642_v21 = vpop.permute.xlu1 %1404  ;;  %2839 = vrot.lane.b32.xlu1 %v6482_v7, %s6353_s15  ;;  %v1308_v43 = vsel %vm253_vm1, %v1302_v41, 0 }
  0xc0   : > { %996 = vmatpush1.bf16.msra.mxu0 %v987_v16  ;;  %1027 = vmatprep.mubr.bf16.mxu0 %v6329_v1 }
  0xc1   : > { %5998 = vmatmul.mubr.msk.bf16.vlgmr.msra.gmra.mrb[28].mxu1 %vm249_vm2, %v5677_v18  ;;  %5682 = vmatprep.subr.msk.bf16.mxu0 %vm253_vm1, %v1089_v19  ;;  %v6646_v22 = vpop.permute.xlu0 %1402 }
  0xc2   : > { %6002 = vmatpush3.bf16.msra.mxu1 %v1100_v20  ;;  %6003 = vmatprep.mubr.msk.bf16.mxu1 %vm6328_vm0, %v6327_v0  ;;  %v1409_v50 = vsel %vm1408_vm13, %v6646_v22, %v6642_v21 }
  0xc3   : > { %6007 = vmatprep.subr.bf16.mxu1 %v6327_v0  ;;  %v6654_v24 = vpop.permute.xlu1 %1509  ;;  %2841 = vrot.lane.b32.xlu0 %v6487_v8, %s6353_s15  ;;  %v1415_v52 = vsel %vm253_vm1, %v1409_v50, 0 }
  0xc4   : > { %2945 = vrot.lane.b32.xlu1 %v6430_v4, %s6354_s3 }
  0xc5   : > { %v1407_v26 = vpop.permute.xlu0 %1406 }
  0xc6   : > { %v1410_v46 = vsel %vm1408_vm13, %v6642_v21, %v1407_v26  ;;  %v1421_v47 = vsel %vm253_vm1, %v1407_v26, 0  ;;  %vm2513_vm13 = vcmask 506880  }
  0xc7   : > { %5679 = vmatmul.mubr.msk.bf16.vlgmr.msra.gmra.mrb[28].mxu0 %vm249_vm2, %v5677_v18  ;;  %v6665_v30 = vpop.permute.xlu1 %1513  ;;  %2947 = vrot.lane.b32.xlu0 %v6433_v5, %s6354_s3 }
  0xc8   : > { %1103 = vmatpush1.bf16.msra.mxu0 %v1094_v25  ;;  %1134 = vmatprep.mubr.bf16.mxu0 %v6329_v1  ;;  %v1528_v56 = vsel %vm253_vm1, %v6665_v30, 0  ;;  %v5705_v25 = vld [vmem:[%s7449_s1 + $0x38] sm:$0xf] }
  0xc9   : > { %6004 = vmatmul.mubr.msk.bf16.vlgmr.msra.gmra.mrb[32].mxu1 %vm249_vm2, %v5681_v27  ;;  %5686 = vmatprep.subr.msk.bf16.mxu0 %vm253_vm1, %v1196_v28  ;;  %v6669_v31 = vpop.permute.xlu0 %1511 }
  0xca   : > { %6008 = vmatpush3.bf16.msra.mxu1 %v1207_v29  ;;  %6009 = vmatprep.mubr.msk.bf16.mxu1 %vm6328_vm0, %v6327_v0  ;;  %v1517_v55 = vsel %vm1515_vm14, %v6669_v31, %v6665_v30  ;;  %v1516_v59 = vsel %vm1515_vm14, %v6654_v24, %v6669_v31  ;;  %vm2623_vm14 = vcmask 498688  }
  0xcb   : > { %6013 = vmatprep.subr.bf16.mxu1 %v6327_v0  ;;  %v6677_v33 = vpop.permute.xlu1 %1618  ;;  %2949 = vrot.lane.b32.xlu1 %v6482_v7, %s6354_s3  ;;  %v1522_v61 = vsel %vm253_vm1, %v1516_v59, 0 }
  0xcc   : > { %2951 = vrot.lane.b32.xlu0 %v6487_v8, %s6354_s3 }
  0xcd   : > { %v6680_v35 = vpop.permute.xlu0 %1616 }
  0xce   : > { %v1623_v10 = vsel %vm1622_vm15, %v6680_v35, %v6677_v33 }
  0xcf   : > { %5683 = vmatmul.mubr.msk.bf16.vlgmr.msra.gmra.mrb[32].mxu0 %vm249_vm2, %v5681_v27  ;;  %v6690_v39 = vpop.permute.xlu1 %1735  ;;  %3055 = vrot.lane.b32.xlu1 %v6430_v4, %s6355_s22  ;;  %v1629_v13 = vsel %vm253_vm1, %v1623_v10, 0 }
  0xd0   : > { %1210 = vmatpush1.bf16.msra.mxu0 %v1201_v34  ;;  %1241 = vmatprep.mubr.bf16.mxu0 %v6329_v1 }
  0xd1   : > { %6010 = vmatmul.mubr.msk.bf16.vlgmr.msra.gmra.mrb[36].mxu1 %vm249_vm2, %v5685_v36  ;;  %5690 = vmatprep.subr.msk.bf16.mxu0 %vm253_vm1, %v1303_v37  ;;  %v1621_v40 = vpop.permute.xlu0 %1620 }
  0xd2   : > { %6014 = vmatpush3.bf16.msra.mxu1 %v1314_v38  ;;  %6015 = vmatprep.mubr.msk.bf16.mxu1 %vm6328_vm0, %v6327_v0  ;;  %v1624_v2 = vsel %vm1622_vm15, %v6677_v33, %v1621_v40  ;;  %v1635_v3 = vsel %vm253_vm1, %v1621_v40, 0  ;;  %v5713_v33 = vld [vmem:[%s7449_s1 + $0x3c] sm:$0xf]  ;;  %vm2733_vm15 = vcmask 490496  }
  0xd3   : > { %6019 = vmatprep.subr.bf16.mxu1 %v6327_v0  ;;  %v6701_v42 = vpop.permute.xlu1 %1739  ;;  %3057 = vrot.lane.b32.xlu0 %v6433_v5, %s6355_s22 }
  0xd4   : > { %3059 = vrot.lane.b32.xlu1 %v6482_v7, %s6355_s22 }
  0xd5   : > { %v6704_v44 = vpop.permute.xlu0 %1737 }
  0xd6   : > { %v1745_v16 = vsel %vm1743_vm3, %v6704_v44, %v6701_v42  ;;  %v1744_v20 = vsel %vm1743_vm3, %v6690_v39, %v6704_v44 }
  0xd7   : > { %5687 = vmatmul.mubr.msk.bf16.vlgmr.msra.gmra.mrb[36].mxu0 %vm249_vm2, %v5685_v36  ;;  %v6715_v48 = vpop.permute.xlu1 %1845  ;;  %3061 = vrot.lane.b32.xlu0 %v6487_v8, %s6355_s22  ;;  %v1751_v22 = vsel %vm253_vm1, %v1744_v20, 0  ;;  %v5733_v20 = vld [vmem:[%s7449_s1 + $0x50] sm:$0xf] }
  0xd8   : > { %1317 = vmatpush1.bf16.msra.mxu0 %v1308_v43  ;;  %1348 = vmatprep.mubr.bf16.mxu0 %v6329_v1 }
  0xd9   : > { %6016 = vmatmul.mubr.msk.bf16.vlgmr.msra.gmra.mrb[40].mxu1 %vm249_vm2, %v5689_v45  ;;  %5694 = vmatprep.subr.msk.bf16.mxu0 %vm253_vm1, %v1410_v46  ;;  %v1742_v49 = vpop.permute.xlu0 %1741 }
  0xda   : > { %6020 = vmatpush3.bf16.msra.mxu1 %v1421_v47  ;;  %6021 = vmatprep.mubr.msk.bf16.mxu1 %vm6328_vm0, %v6327_v0  ;;  %v1746_v11 = vsel %vm1743_vm3, %v6701_v42, %v1742_v49  ;;  %v5717_v42 = vld [vmem:[%s7449_s1 + $0x40] sm:$0xf]  ;;  %vm2843_vm3 = vcmask 482304  }
  0xdb   : > { %6025 = vmatprep.subr.bf16.mxu1 %v6327_v0  ;;  %v6727_v51 = vpop.permute.xlu1 %1849  ;;  %3165 = vrot.lane.b32.xlu1 %v6430_v4, %s6356_s30  ;;  %v1757_v17 = vsel %vm253_vm1, %v1746_v11, 0  ;;  %v5729_v11 = vld [vmem:[%s7449_s1 + $0x4c] sm:$0xf] }
  0xdc   : > { %3167 = vrot.lane.b32.xlu0 %v6433_v5, %s6356_s30 }
  0xdd   : > { %v6730_v53 = vpop.permute.xlu0 %1847 }
  0xde   : > { %v1855_v26 = vsel %vm1853_vm4, %v6730_v53, %v6727_v51  ;;  %v1854_v29 = vsel %vm1853_vm4, %v6715_v48, %v6730_v53 }
  0xdf   : > { %5691 = vmatmul.mubr.msk.bf16.vlgmr.msra.gmra.mrb[40].mxu0 %vm249_vm2, %v5689_v45  ;;  %v6744_v57 = vpop.permute.xlu1 %1955  ;;  %3169 = vrot.lane.b32.xlu1 %v6482_v7, %s6356_s30  ;;  %v1861_v32 = vsel %vm253_vm1, %v1854_v29, 0  ;;  %v5737_v29 = vld [vmem:[%s7449_s1 + $0x54] sm:$0xf] }
  0xe0   : > { %1424 = vmatpush1.bf16.msra.mxu0 %v1415_v52  ;;  %1455 = vmatprep.mubr.bf16.mxu0 %v6329_v1 }
  0xe1   : > { %6022 = vmatmul.mubr.msk.bf16.vlgmr.msra.gmra.mrb[44].mxu1 %vm249_vm2, %v5693_v54  ;;  %5698 = vmatprep.subr.msk.bf16.mxu0 %vm253_vm1, %v1517_v55  ;;  %v1852_v58 = vpop.permute.xlu0 %1851 }
  0xe2   : > { %6026 = vmatpush3.bf16.msra.mxu1 %v1528_v56  ;;  %6027 = vmatprep.mubr.msk.bf16.mxu1 %vm6328_vm0, %v6327_v0  ;;  %v1856_v21 = vsel %vm1853_vm4, %v6727_v51, %v1852_v58  ;;  %v5721_v51 = vld [vmem:[%s7449_s1 + $0x44] sm:$0xf]  ;;  %vm2953_vm4 = vcmask 474112  }
  0xe3   : > { %3171 = vrot.lane.b32.xlu0 %v6487_v8, %s6356_s30  ;;  %6031 = vmatprep.subr.bf16.mxu1 %v6327_v0  ;;  %v6756_v60 = vpop.permute.xlu1 %1959  ;;  %v1867_v27 = vsel %vm253_vm1, %v1856_v21, 0  ;;  %s6363_s30 = smov 34  }
  0xe4   : > { %3275 = vrot.lane.b32.xlu1 %v6430_v4, %s6357_s8 }
  0xe5   : > { %v6759_v62 = vpop.permute.xlu0 %1957 }
  0xe6   : > { %v1965_v34 = vsel %vm1963_vm5, %v6759_v62, %v6756_v60  ;;  %v1964_v38 = vsel %vm1963_vm5, %v6744_v57, %v6759_v62 }
  0xe7   : > { %5695 = vmatmul.mubr.msk.bf16.vlgmr.msra.gmra.mrb[44].mxu0 %vm249_vm2, %v5693_v54  ;;  %3277 = vrot.lane.b32.xlu0 %v6433_v5, %s6357_s8  ;;  %v6771_v6 = vpop.permute.xlu1 %2065  ;;  %v1971_v40 = vsel %vm253_vm1, %v1964_v38, 0 }
  0xe8   : > { %1531 = vmatpush1.bf16.msra.mxu0 %v1522_v61  ;;  %1562 = vmatprep.mubr.bf16.mxu0 %v6329_v1 }
  0xe9   : > { %6028 = vmatmul.mubr.msk.bf16.vlgmr.msra.gmra.mrb[48].mxu1 %vm249_vm2, %v5697_v63  ;;  %5702 = vmatprep.subr.msk.bf16.mxu0 %vm253_vm1, %v1624_v2  ;;  %v1962_v9 = vpop.permute.xlu0 %1961 }
  0xea   : > { %6032 = vmatpush3.bf16.msra.mxu1 %v1635_v3  ;;  %3279 = vrot.lane.b32.xlu1 %v6482_v7, %s6357_s8  ;;  %v1966_v31 = vsel %vm1963_vm5, %v6756_v60, %v1962_v9  ;;  %v5725_v60 = vld [vmem:[%s7449_s1 + $0x48] sm:$0xf]  ;;  %vm3063_vm5 = vcmask 465920  }
  0xeb   : > { %6033 = vmatprep.mubr.msk.bf16.mxu1 %vm6328_vm0, %v6327_v0  ;;  %3281 = vrot.lane.b32.xlu0 %v6487_v8, %s6357_s8  ;;  %v6785_v12 = vpop.permute.xlu1 %2069  ;;  %v1977_v35 = vsel %vm253_vm1, %v1966_v31, 0  ;;  %s6364_s8 = smov 18  }
  0xec   : > { %6037 = vmatprep.subr.bf16.mxu1 %v6327_v0 }
  0xed   : > { %v6788_v14 = vpop.permute.xlu0 %2067 }
  0xee   : > { %3385 = vrot.lane.b32.xlu1 %v6430_v4, %s6358_s11  ;;  %v2075_v43 = vsel %vm2073_vm9, %v6788_v14, %v6785_v12  ;;  %v2074_v47 = vsel %vm2073_vm9, %v6771_v6, %v6788_v14 }
  0xef   : > { %5699 = vmatmul.mubr.msk.bf16.vlgmr.msra.gmra.mrb[48].mxu0 %vm249_vm2, %v5697_v63  ;;  %3387 = vrot.lane.b32.xlu0 %v6433_v5, %s6358_s11  ;;  %v6801_v18 = vpop.permute.xlu1 %2175  ;;  %v2081_v49 = vsel %vm253_vm1, %v2074_v47, 0 }
  0xf0   : > { %1638 = vmatpush1.bf16.msra.mxu0 %v1629_v13  ;;  %1669 = vmatprep.mubr.bf16.mxu0 %v6329_v1 }
  0xf1   : > { %6034 = vmatmul.mubr.msk.bf16.vlgmr.msra.gmra.mrb[52].mxu1 %vm249_vm2, %v5701_v15  ;;  %5710 = vmatprep.subr.msk.bf16.mxu0 %vm253_vm1, %v1745_v16  ;;  %v2072_v19 = vpop.permute.xlu0 %2071 }
  0xf2   : > { %6038 = vmatpush3.bf16.msra.mxu1 %v1757_v17  ;;  %3389 = vrot.lane.b32.xlu1 %v6482_v7, %s6358_s11  ;;  %v2076_v39 = vsel %vm2073_vm9, %v6785_v12, %v2072_v19  ;;  %vm3173_vm9 = vcmask 457728  }
  0xf3   : > { %6039 = vmatprep.mubr.msk.bf16.mxu1 %vm6328_vm0, %v6327_v0  ;;  %3391 = vrot.lane.b32.xlu0 %v6487_v8, %s6358_s11  ;;  %v6818_v24 = vpop.permute.xlu1 %2179  ;;  %v2087_v44 = vsel %vm253_vm1, %v2076_v39, 0  ;;  %s6365_s11 = smov 17   ;;  %v5741_v39 = vld [vmem:[%s7449_s1 + $0x58] sm:$0xf] }
  0xf4   : > { %6043 = vmatprep.subr.bf16.mxu1 %v6327_v0 }
  0xf5   : > { %v6816_v23 = vpop.permute.xlu0 %2177 }
  0xf6   : > { %3495 = vrot.lane.b32.xlu1 %v6430_v4, %s6359_s14  ;;  %v2185_v52 = vsel %vm2183_vm10, %v6816_v23, %v6818_v24  ;;  %v2184_v56 = vsel %vm2183_vm10, %v6801_v18, %v6816_v23 }
  0xf7   : > { %5703 = vmatmul.mubr.msk.bf16.vlgmr.msra.gmra.mrb[52].mxu0 %vm249_vm2, %v5701_v15  ;;  %3497 = vrot.lane.b32.xlu0 %v6433_v5, %s6359_s14  ;;  %v6840_v30 = vpop.permute.xlu1 %2285  ;;  %v2191_v58 = vsel %vm253_vm1, %v2184_v56, 0  ;;  %v5749_v56 = vld [vmem:[%s7449_s1 + $0x60] sm:$0xf] }
  0xf8   : > { %1760 = vmatpush1.bf16.msra.mxu0 %v1751_v22  ;;  %1791 = vmatprep.mubr.bf16.mxu0 %v6329_v1 }
  0xf9   : > { %6040 = vmatmul.mubr.msk.bf16.vlgmr.msra.gmra.mrb[56].mxu1 %vm249_vm2, %v5705_v25  ;;  %5714 = vmatprep.subr.msk.bf16.mxu0 %vm253_vm1, %v1855_v26  ;;  %v2182_v28 = vpop.permute.xlu0 %2181 }
  0xfa   : > { %6044 = vmatpush3.bf16.msra.mxu1 %v1867_v27  ;;  %3499 = vrot.lane.b32.xlu1 %v6482_v7, %s6359_s14  ;;  %v2186_v48 = vsel %vm2183_vm10, %v6818_v24, %v2182_v28  ;;  %vm3283_vm10 = vcmask 326656  }
  0xfb   : > { %6045 = vmatprep.mubr.msk.bf16.mxu1 %vm6328_vm0, %v6327_v0  ;;  %3501 = vrot.lane.b32.xlu0 %v6487_v8, %s6359_s14  ;;  %v2197_v53 = vsel %vm253_vm1, %v2186_v48, 0  ;;  %s6366_s14 = smov 16   ;;  %v5745_v48 = vld [vmem:[%s7449_s1 + $0x5c] sm:$0xf] }
  0xfc   : > { %6049 = vmatprep.subr.bf16.mxu1 %v6327_v0  ;;  %v2290_v37 = vpop.permute.xlu1 %2289 }
  0xfd   : > { %v6856_v36 = vpop.permute.xlu0 %2287 }
  0xfe   : > { %3605 = vrot.lane.b32.xlu1 %v6430_v4, %s6360_s17  ;;  %v2295_v61 = vsel %vm2293_vm11, %v6856_v36, %v2290_v37  ;;  %v2294_v3 = vsel %vm2293_vm11, %v6840_v30, %v6856_v36 }
  0xff   : > { %5711 = vmatmul.mubr.msk.bf16.vlgmr.msra.gmra.mrb[56].mxu0 %vm249_vm2, %v5705_v25  ;;  %3607 = vrot.lane.b32.xlu0 %v6433_v5, %s6360_s17  ;;  %v2301_v9 = vsel %vm253_vm1, %v2294_v3, 0 }
 0x100   : > { %1870 = vmatpush1.bf16.msra.mxu0 %v1861_v32  ;;  %1901 = vmatprep.mubr.bf16.mxu0 %v6329_v1  ;;  %v6882_v45 = vpop.permute.xlu1 %2395 }
 0x101   : > { %6046 = vmatmul.mubr.msk.bf16.vlgmr.msra.gmra.mrb[60].mxu1 %vm249_vm2, %v5713_v33  ;;  %5718 = vmatprep.subr.msk.bf16.mxu0 %vm253_vm1, %v1965_v34  ;;  %v2292_v41 = vpop.permute.xlu0 %2291 }
 0x102   : > { %6050 = vmatpush3.bf16.msra.mxu1 %v1977_v35  ;;  %3609 = vrot.lane.b32.xlu1 %v6482_v7, %s6360_s17  ;;  %v2296_v57 = vsel %vm2293_vm11, %v2290_v37, %v2292_v41  ;;  %vm3393_vm11 = vcmask 318464  }
 0x103   : > { %6051 = vmatprep.mubr.msk.bf16.mxu1 %vm6328_vm0, %v6327_v0  ;;  %3611 = vrot.lane.b32.xlu0 %v6487_v8, %s6360_s17  ;;  %v2307_v62 = vsel %vm253_vm1, %v2296_v57, 0  ;;  %s6367_s17 = smov 15  }
 0x104   : > { %6055 = vmatprep.subr.bf16.mxu1 %v6327_v0 }
 0x105   : > { %v6887_v46 = vpop.permute.xlu0 %2397 }
 0x106   : > { %3715 = vrot.lane.b32.xlu1 %v6430_v4, %s6361_s20  ;;  %v2400_v50 = vpop.permute.xlu1 %2399  ;;  %v2404_v16 = vsel %vm2403_vm12, %v6882_v45, %v6887_v46 }
 0x107   : > { %5715 = vmatmul.mubr.msk.bf16.vlgmr.msra.gmra.mrb[60].mxu0 %vm249_vm2, %v5713_v33  ;;  %3717 = vrot.lane.b32.xlu0 %v6433_v5, %s6361_s20  ;;  %v2405_v12 = vsel %vm2403_vm12, %v6887_v46, %v2400_v50  ;;  %v2411_v18 = vsel %vm253_vm1, %v2404_v16, 0 }
 0x108   : > { %1980 = vmatpush1.bf16.msra.mxu0 %v1971_v40  ;;  %2011 = vmatprep.mubr.bf16.mxu0 %v6329_v1 }
 0x109   : > { %6052 = vmatmul.mubr.msk.bf16.vlgmr.msra.gmra.mrb[64].mxu1 %vm249_vm2, %v5717_v42  ;;  %5722 = vmatprep.subr.msk.bf16.mxu0 %vm253_vm1, %v2075_v43  ;;  %v2402_v54 = vpop.permute.xlu0 %2401 }
 0x10a   : > { %6056 = vmatpush3.bf16.msra.mxu1 %v2087_v44  ;;  %3719 = vrot.lane.b32.xlu1 %v6482_v7, %s6361_s20  ;;  %v2406_v6 = vsel %vm2403_vm12, %v2400_v50, %v2402_v54  ;;  %vm3503_vm12 = vcmask 310272  }
 0x10b   : > { %6057 = vmatprep.mubr.msk.bf16.mxu1 %vm6328_vm0, %v6327_v0  ;;  %3721 = vrot.lane.b32.xlu0 %v6487_v8, %s6361_s20  ;;  %v2417_v13 = vsel %vm253_vm1, %v2406_v6, 0  ;;  %s6368_s20 = smov 14   ;;  %v5753_v6 = vld [vmem:[%s7449_s1 + $0x64] sm:$0xf] }
 0x10c   : > { %6061 = vmatprep.subr.bf16.mxu1 %v6327_v0 }
 0x10d   : > { %v6913_v55 = vpop.permute.xlu1 %2505 }
 0x10e   : > { %3825 = vrot.lane.b32.xlu1 %v6430_v4, %s6362_s24  ;;  %v2508_v59 = vpop.permute.xlu0 %2507 }
 0x10f   : > { %5719 = vmatmul.mubr.msk.bf16.vlgmr.msra.gmra.mrb[64].mxu0 %vm249_vm2, %v5717_v42  ;;  %3827 = vrot.lane.b32.xlu0 %v6433_v5, %s6362_s24  ;;  %v2514_v25 = vsel %vm2513_vm13, %v6913_v55, %v2508_v59 }
 0x110   : > { %2090 = vmatpush1.bf16.msra.mxu0 %v2081_v49  ;;  %2121 = vmatprep.mubr.bf16.mxu0 %v6329_v1  ;;  %v2521_v27 = vsel %vm253_vm1, %v2514_v25, 0 }
 0x111   : > { %6058 = vmatmul.mubr.msk.bf16.vlgmr.msra.gmra.mrb[68].mxu1 %vm249_vm2, %v5721_v51  ;;  %5726 = vmatprep.subr.msk.bf16.mxu0 %vm253_vm1, %v2185_v52  ;;  %v2510_v63 = vpop.permute.xlu1 %2509 }
 0x112   : > { %6062 = vmatpush3.bf16.msra.mxu1 %v2197_v53  ;;  %3829 = vrot.lane.b32.xlu1 %v6482_v7, %s6362_s24  ;;  %v2515_v21 = vsel %vm2513_vm13, %v2508_v59, %v2510_v63 }
 0x113   : > { %6063 = vmatprep.mubr.msk.bf16.mxu1 %vm6328_vm0, %v6327_v0  ;;  %3831 = vrot.lane.b32.xlu0 %v6487_v8, %s6362_s24  ;;  %s6369_s24 = smov 13  }
 0x114   : > { %6067 = vmatprep.subr.bf16.mxu1 %v6327_v0 }
 0x115   : > { %v2512_v2 = vpop.permute.xlu0 %2511 }
 0x116   : > { %3935 = vrot.lane.b32.xlu1 %v6430_v4, %s6363_s30  ;;  %v2616_v10 = vpop.permute.xlu1 %2615  ;;  %v2516_v17 = vsel %vm2513_vm13, %v2510_v63, %v2512_v2  ;;  %vm3613_vm13 = vcmask 302080  }
 0x117   : > { %5723 = vmatmul.mubr.msk.bf16.vlgmr.msra.gmra.mrb[68].mxu0 %vm249_vm2, %v5721_v51  ;;  %3937 = vrot.lane.b32.xlu0 %v6433_v5, %s6363_s30  ;;  %v2527_v22 = vsel %vm253_vm1, %v2516_v17, 0 }
 0x118   : > { %2200 = vmatpush1.bf16.msra.mxu0 %v2191_v58  ;;  %2231 = vmatprep.mubr.bf16.mxu0 %v6329_v1 }
 0x119   : > { %6064 = vmatmul.mubr.msk.bf16.vlgmr.msra.gmra.mrb[72].mxu1 %vm249_vm2, %v5725_v60  ;;  %5730 = vmatprep.subr.msk.bf16.mxu0 %vm253_vm1, %v2295_v61  ;;  %v2618_v14 = vpop.permute.xlu0 %2617 }
 0x11a   : > { %6068 = vmatpush3.bf16.msra.mxu1 %v2307_v62  ;;  %3939 = vrot.lane.b32.xlu1 %v6482_v7, %s6363_s30  ;;  %v2624_v34 = vsel %vm2623_vm14, %v2616_v10, %v2618_v14 }
 0x11b   : > { %6069 = vmatprep.mubr.msk.bf16.mxu1 %vm6328_vm0, %v6327_v0  ;;  %3941 = vrot.lane.b32.xlu0 %v6487_v8, %s6363_s30  ;;  %v2631_v36 = vsel %vm253_vm1, %v2624_v34, 0  ;;  %s6370_s30 = smov 12  }
 0x11c   : > { %6073 = vmatprep.subr.bf16.mxu1 %v6327_v0 }
 0x11d   : > { %v2620_v15 = vpop.permute.xlu1 %2619 }
 0x11e   : > { %4045 = vrot.lane.b32.xlu1 %v6430_v4, %s6364_s8  ;;  %v2622_v19 = vpop.permute.xlu0 %2621  ;;  %v2625_v30 = vsel %vm2623_vm14, %v2618_v14, %v2620_v15 }
 0x11f   : > { %5727 = vmatmul.mubr.msk.bf16.vlgmr.msra.gmra.mrb[72].mxu0 %vm249_vm2, %v5725_v60  ;;  %4047 = vrot.lane.b32.xlu0 %v6433_v5, %s6364_s8  ;;  %v2626_v26 = vsel %vm2623_vm14, %v2620_v15, %v2622_v19  ;;  %vm3723_vm14 = vcmask 293888  }
 0x120   : > { %2310 = vmatpush1.bf16.msra.mxu0 %v2301_v9  ;;  %2341 = vmatprep.mubr.bf16.mxu0 %v6329_v1  ;;  %v2637_v31 = vsel %vm253_vm1, %v2626_v26, 0 }
 0x121   : > { %6070 = vmatmul.mubr.msk.bf16.vlgmr.msra.gmra.mrb[76].mxu1 %vm249_vm2, %v5729_v11  ;;  %5734 = vmatprep.subr.msk.bf16.mxu0 %vm253_vm1, %v2405_v12  ;;  %v2726_v23 = vpop.permute.xlu1 %2725 }
 0x122   : > { %6074 = vmatpush3.bf16.msra.mxu1 %v2417_v13  ;;  %4049 = vrot.lane.b32.xlu1 %v6482_v7, %s6364_s8 }
 0x123   : > { %6075 = vmatprep.mubr.msk.bf16.mxu1 %vm6328_vm0, %v6327_v0  ;;  %4051 = vrot.lane.b32.xlu0 %v6487_v8, %s6364_s8 }
 0x124   : > { %6079 = vmatprep.subr.bf16.mxu1 %v6327_v0 }
 0x125   : > { %v2728_v24 = vpop.permute.xlu0 %2727 }
 0x126   : > { %4155 = vrot.lane.b32.xlu1 %v6430_v4, %s6365_s11  ;;  %v2730_v28 = vpop.permute.xlu1 %2729  ;;  %v2734_v43 = vsel %vm2733_vm15, %v2726_v23, %v2728_v24 }
 0x127   : > { %5731 = vmatmul.mubr.msk.bf16.vlgmr.msra.gmra.mrb[76].mxu0 %vm249_vm2, %v5729_v11  ;;  %4157 = vrot.lane.b32.xlu0 %v6433_v5, %s6365_s11  ;;  %v2735_v38 = vsel %vm2733_vm15, %v2728_v24, %v2730_v28  ;;  %v2741_v45 = vsel %vm253_vm1, %v2734_v43, 0  ;;  %v4813_v11 = vld [vmem:[%s6424_s21 + $0x4] sm:$0xff] }
 0x128   : > { %2420 = vmatpush1.bf16.msra.mxu0 %v2411_v18  ;;  %2451 = vmatprep.mubr.bf16.mxu0 %v6329_v1  ;;  %v7079_v14 = vcombine.low %v4813_v11, %v4813_v11 }
 0x129   : > { %6076 = vmatmul.mubr.msk.bf16.vlgmr.msra.gmra.mrb[80].mxu1 %vm249_vm2, %v5733_v20  ;;  %5738 = vmatprep.subr.msk.bf16.mxu0 %vm253_vm1, %v2515_v21  ;;  %v2732_v32 = vpop.permute.xlu0 %2731 }
 0x12a   : > { %6080 = vmatpush3.bf16.msra.mxu1 %v2527_v22  ;;  %4159 = vrot.lane.b32.xlu1 %v6482_v7, %s6365_s11  ;;  %v2736_v35 = vsel %vm2733_vm15, %v2730_v28, %v2732_v32  ;;  %vm3833_vm15 = vcmask 285696  }
 0x12b   : > { %6081 = vmatprep.mubr.msk.bf16.mxu1 %vm6328_vm0, %v6327_v0  ;;  %4161 = vrot.lane.b32.xlu0 %v6487_v8, %s6365_s11  ;;  %v2747_v40 = vsel %vm253_vm1, %v2736_v35, 0 }
 0x12c   : > { %6085 = vmatprep.subr.bf16.mxu1 %v6327_v0 }
 0x12d   : > { %v2836_v33 = vpop.permute.xlu1 %2835 }
 0x12e   : > { %4265 = vrot.lane.b32.xlu1 %v6430_v4, %s6366_s14  ;;  %v2838_v37 = vpop.permute.xlu0 %2837 }
 0x12f   : > { %5735 = vmatmul.mubr.msk.bf16.vlgmr.msra.gmra.mrb[80].mxu0 %vm249_vm2, %v5733_v20  ;;  %4267 = vrot.lane.b32.xlu0 %v6433_v5, %s6366_s14  ;;  %v2844_v52 = vsel %vm2843_vm3, %v2836_v33, %v2838_v37  ;;  %v7100_v20 = vld [vmem:[%s6424_s21 + $0xc] ss:$0 sps:$4 sm:$0xff]   ;;  %s6247_s21 = smul.u32 24, %s7455_s2 }
 0x130   : > { %2530 = vmatpush1.bf16.msra.mxu0 %v2521_v27  ;;  %2561 = vmatprep.mubr.bf16.mxu0 %v6329_v1  ;;  %v2851_v53 = vsel %vm253_vm1, %v2844_v52, 0 }
 0x131   : > { %6082 = vmatmul.mubr.msk.bf16.vlgmr.msra.gmra.mrb[84].mxu1 %vm249_vm2, %v5737_v29  ;;  %5742 = vmatprep.subr.msk.bf16.mxu0 %vm253_vm1, %v2625_v30  ;;  %v2840_v41 = vpop.permute.xlu1 %2839  ;;  %v5761_v30 = vld [vmem:[%s7449_s1 + $0x6c] sm:$0xf]  ;;  %s224_s9 = scalar_lea.vmem %s7453_s5, %s6247_s21 }
 0x132   : > { %6086 = vmatpush3.bf16.msra.mxu1 %v2637_v31  ;;  %4269 = vrot.lane.b32.xlu1 %v6482_v7, %s6366_s14  ;;  %v2845_v47 = vsel %vm2843_vm3, %v2838_v37, %v2840_v41 }
 0x133   : > { %6087 = vmatprep.mubr.msk.bf16.mxu1 %vm6328_vm0, %v6327_v0  ;;  %4271 = vrot.lane.b32.xlu0 %v6487_v8, %s6366_s14  ;;  %s6373_s14 = smov 119  }
 0x134   : > { %6091 = vmatprep.subr.bf16.mxu1 %v6327_v0 }
 0x135   : > { %v2842_v42 = vpop.permute.xlu0 %2841 }
 0x136   : > { %4375 = vrot.lane.b32.xlu1 %v6430_v4, %s6367_s17  ;;  %v2846_v44 = vsel %vm2843_vm3, %v2840_v41, %v2842_v42  ;;  %v2946_v46 = vpop.permute.xlu1 %2945  ;;  %vm3943_vm3 = vcmask 277504  }
 0x137   : > { %5739 = vmatmul.mubr.msk.bf16.vlgmr.msra.gmra.mrb[84].mxu0 %vm249_vm2, %v5737_v29  ;;  %4377 = vrot.lane.b32.xlu0 %v6433_v5, %s6367_s17  ;;  %v2857_v49 = vsel %vm253_vm1, %v2846_v44, 0 }
 0x138   : > { %2640 = vmatpush1.bf16.msra.mxu0 %v2631_v36  ;;  %2671 = vmatprep.mubr.bf16.mxu0 %v6329_v1 }
 0x139   : > { %6088 = vmatmul.mubr.msk.bf16.vlgmr.msra.gmra.mrb[88].mxu1 %vm249_vm2, %v5741_v39  ;;  %5746 = vmatprep.subr.msk.bf16.mxu0 %vm253_vm1, %v2735_v38  ;;  %v2948_v50 = vpop.permute.xlu0 %2947 }
 0x13a   : > { %6092 = vmatpush3.bf16.msra.mxu1 %v2747_v40  ;;  %4379 = vrot.lane.b32.xlu1 %v6482_v7, %s6367_s17  ;;  %v2954_v61 = vsel %vm2953_vm4, %v2946_v46, %v2948_v50 }
 0x13b   : > { %6093 = vmatprep.mubr.msk.bf16.mxu1 %vm6328_vm0, %v6327_v0  ;;  %4381 = vrot.lane.b32.xlu0 %v6487_v8, %s6367_s17  ;;  %v2961_v63 = vsel %vm253_vm1, %v2954_v61, 0  ;;  %s6374_s17 = smov 118  }
 0x13c   : > { %6097 = vmatprep.subr.bf16.mxu1 %v6327_v0 }
 0x13d   : > { %v2950_v51 = vpop.permute.xlu1 %2949 }
 0x13e   : > { %4485 = vrot.lane.b32.xlu1 %v6430_v4, %s6368_s20  ;;  %v2952_v54 = vpop.permute.xlu0 %2951  ;;  %v2955_v55 = vsel %vm2953_vm4, %v2948_v50, %v2950_v51 }
 0x13f   : > { %5743 = vmatmul.mubr.msk.bf16.vlgmr.msra.gmra.mrb[88].mxu0 %vm249_vm2, %v5741_v39  ;;  %4487 = vrot.lane.b32.xlu0 %v6433_v5, %s6368_s20  ;;  %v2956_v57 = vsel %vm2953_vm4, %v2950_v51, %v2952_v54  ;;  %vm4053_vm4 = vcmask 146432  }
 0x140   : > { %2750 = vmatpush1.bf16.msra.mxu0 %v2741_v45  ;;  %2781 = vmatprep.mubr.bf16.mxu0 %v6329_v1  ;;  %v2967_v59 = vsel %vm253_vm1, %v2956_v57, 0 }
 0x141   : > { %6094 = vmatmul.mubr.msk.bf16.vlgmr.msra.gmra.mrb[92].mxu1 %vm249_vm2, %v5745_v48  ;;  %5750 = vmatprep.subr.msk.bf16.mxu0 %vm253_vm1, %v2845_v47  ;;  %v3056_v58 = vpop.permute.xlu1 %3055  ;;  %v5765_v47 = vld [vmem:[%s7449_s1 + $0x70] sm:$0xf] }
 0x142   : > { %6098 = vmatpush3.bf16.msra.mxu1 %v2857_v49  ;;  %4489 = vrot.lane.b32.xlu1 %v6482_v7, %s6368_s20 }
 0x143   : > { %6099 = vmatprep.mubr.msk.bf16.mxu1 %vm6328_vm0, %v6327_v0  ;;  %4491 = vrot.lane.b32.xlu0 %v6487_v8, %s6368_s20 }
 0x144   : > { %6103 = vmatprep.subr.bf16.mxu1 %v6327_v0 }
 0x145   : > { %v3058_v60 = vpop.permute.xlu0 %3057 }
 0x146   : > { %4595 = vrot.lane.b32.xlu1 %v6430_v4, %s6369_s24  ;;  %v3060_v62 = vpop.permute.xlu1 %3059 }
 0x147   : > { %5747 = vmatmul.mubr.msk.bf16.vlgmr.msra.gmra.mrb[92].mxu0 %vm249_vm2, %v5745_v48  ;;  %4597 = vrot.lane.b32.xlu0 %v6433_v5, %s6369_s24  ;;  %v3065_v3 = vsel %vm3063_vm5, %v3058_v60, %v3060_v62 }
 0x148   : > { %2860 = vmatpush1.bf16.msra.mxu0 %v2851_v53  ;;  %2891 = vmatprep.mubr.bf16.mxu0 %v6329_v1 }
 0x149   : > { %6100 = vmatmul.mubr.msk.bf16.vlgmr.msra.gmra.mrb[96].mxu1 %vm249_vm2, %v5749_v56  ;;  %5754 = vmatprep.subr.msk.bf16.mxu0 %vm253_vm1, %v2955_v55  ;;  %v3062_v2 = vpop.permute.xlu0 %3061 }
 0x14a   : > { %6104 = vmatpush3.bf16.msra.mxu1 %v2967_v59  ;;  %4599 = vrot.lane.b32.xlu1 %v6482_v7, %s6369_s24  ;;  %v3066_v9 = vsel %vm3063_vm5, %v3060_v62, %v3062_v2 }
 0x14b   : > { %6105 = vmatprep.mubr.msk.bf16.mxu1 %vm6328_vm0, %v6327_v0  ;;  %4601 = vrot.lane.b32.xlu0 %v6487_v8, %s6369_s24  ;;  %v3077_v10 = vsel %vm253_vm1, %v3066_v9, 0 }
 0x14c   : > { %6109 = vmatprep.subr.bf16.mxu1 %v6327_v0 }
 0x14d   : > { %v3166_v12 = vpop.permute.xlu1 %3165 }
 0x14e   : > { %4705 = vrot.lane.b32.xlu1 %v6430_v4, %s6370_s30  ;;  %v3168_v13 = vpop.permute.xlu0 %3167  ;;  %v3064_v4 = vsel %vm3063_vm5, %v3056_v58, %v3058_v60  ;;  %vm4163_vm5 = vcmask 138240  }
 0x14f   : > { %5751 = vmatmul.mubr.msk.bf16.vlgmr.msra.gmra.mrb[96].mxu0 %vm249_vm2, %v5749_v56  ;;  %4707 = vrot.lane.b32.xlu0 %v6433_v5, %s6370_s30  ;;  %v7084_v5 = vcombine.high %v4813_v11, %v4813_v11  ;;  %v3071_v16 = vsel %vm253_vm1, %v3064_v4, 0  ;;  %v3174_v23 = vsel %vm3173_vm9, %v3166_v12, %v3168_v13 }
 0x150   : > { %2970 = vmatpush1.bf16.msra.mxu0 %v2961_v63  ;;  %3001 = vmatprep.mubr.bf16.mxu0 %v6329_v1  ;;  %v3181_v26 = vsel %vm253_vm1, %v3174_v23, 0 }
 0x151   : > { %6106 = vmatmul.mubr.msk.bf16.vlgmr.msra.gmra.mrb[100].mxu1 %vm249_vm2, %v5753_v6  ;;  %5758 = vmatprep.subr.msk.bf16.mxu0 %vm253_vm1, %v3065_v3  ;;  %v3170_v15 = vpop.permute.xlu1 %3169 }
 0x152   : > { %6110 = vmatpush3.bf16.msra.mxu1 %v3077_v10  ;;  %4709 = vrot.lane.b32.xlu1 %v6482_v7, %s6370_s30  ;;  %v3175_v18 = vsel %vm3173_vm9, %v3168_v13, %v3170_v15  ;;  %v5757_v7 = vld [vmem:[%s7449_s1 + $0x68] sm:$0xf]  ;;  %v5769_v10 = vld [vmem:[%s7449_s1 + $0x74] sm:$0xf] }
 0x153   : > { %6111 = vmatprep.mubr.msk.bf16.mxu1 %vm6328_vm0, %v6327_v0  ;;  %4711 = vrot.lane.b32.xlu0 %v6487_v8, %s6370_s30 }
 0x154   : > { %6115 = vmatprep.subr.bf16.mxu1 %v6327_v0 }
 0x155   : > { %v3172_v17 = vpop.permute.xlu0 %3171 }
 0x156   : > { %v3176_v19 = vsel %vm3173_vm9, %v3170_v15, %v3172_v17  ;;  %4825 = vrot.lane.b32.xlu1 %v7079_v14, %s6333_s25  ;;  %v3276_v21 = vpop.permute.xlu1 %3275  ;;  %vm4273_vm9 = vcmask 130048  }
 0x157   : > { %5755 = vmatmul.mubr.msk.bf16.vlgmr.msra.gmra.mrb[100].mxu0 %vm249_vm2, %v5753_v6  ;;  %v3187_v8 = vsel %vm253_vm1, %v3176_v19, 0  ;;  %4827 = vrot.lane.b32.xlu0 %v7084_v5, %s6333_s25 }
 0x158   : > { %3080 = vmatpush1.bf16.msra.mxu0 %v3071_v16  ;;  %3111 = vmatprep.mubr.bf16.mxu0 %v6329_v1 }
 0x159   : > { %6112 = vmatmul.mubr.msk.bf16.vlgmr.msra.gmra.mrb[104].mxu1 %vm249_vm2, %v5757_v7  ;;  %5762 = vmatprep.subr.msk.bf16.mxu0 %vm253_vm1, %v3175_v18  ;;  %v3278_v22 = vpop.permute.xlu0 %3277 }
 0x15a   : > { %6116 = vmatpush3.bf16.msra.mxu1 %v3187_v8  ;;  %6117 = vmatprep.mubr.msk.bf16.mxu1 %vm6328_vm0, %v6327_v0  ;;  %v3284_v37 = vsel %vm3283_vm10, %v3276_v21, %v3278_v22 }
 0x15b   : > { %4829 = vrot.lane.b32.xlu1 %v7100_v20, %s6333_s25  ;;  %4931 = vrot.lane.b32.xlu0 %v7079_v14, %s6334_s26  ;;  %v338_v24 = vpop.f32.mrb[0].mxu1  ;;  %v3291_v42 = vsel %vm253_vm1, %v3284_v37, 0 }
 0x15c   : > { %v3280_v25 = vpop.permute.xlu1 %3279  ;;  %6121 = vmatprep.subr.bf16.mxu1 %v6327_v0  ;;  %v5957_v27 = vpop.f32.mrb[1].mxu1 }
 0x15d   : > { %v3282_v28 = vpop.permute.xlu0 %3281  ;;  %v3285_v29 = vsel %vm3283_vm10, %v3278_v22, %v3280_v25  ;;  %v341_v31 = vpop.f32.mrb[2].mxu1 }
 0x15e   : > { %v3286_v32 = vsel %vm3283_vm10, %v3280_v25, %v3282_v28  ;;  %v5958_v33 = vpop.f32.mrb[3].mxu1  ;;  %vm4383_vm10 = vcmask 121856  }
 0x15f   : > { %5759 = vmatmul.mubr.msk.bf16.vlgmr.msra.gmra.mrb[104].mxu0 %vm249_vm2, %v5757_v7  ;;  %v3297_v34 = vsel %vm253_vm1, %v3286_v32, 0  ;;  %4933 = vrot.lane.b32.xlu1 %v7084_v5, %s6334_s26 }
 0x160   : > { %3190 = vmatpush1.bf16.msra.mxu0 %v3181_v26  ;;  %v3386_v35 = vpop.permute.xlu1 %3385  ;;  %3221 = vmatprep.mubr.bf16.mxu0 %v6329_v1 }
 0x161   : > { %6118 = vmatmul.mubr.msk.bf16.vlgmr.msra.gmra.mrb[108].mxu1 %vm249_vm2, %v5761_v30  ;;  %5766 = vmatprep.subr.msk.bf16.mxu0 %vm253_vm1, %v3285_v29  ;;  %v3388_v36 = vpop.permute.xlu0 %3387 }
 0x162   : > { %v297_v38 = vpop.f32.mrb[0].mxu0  ;;  %6122 = vmatpush3.bf16.msra.mxu1 %v3297_v34  ;;  %6123 = vmatprep.mubr.msk.bf16.mxu1 %vm6328_vm0, %v6327_v0  ;;  %v3394_v54 = vsel %vm3393_vm11, %v3386_v35, %v3388_v36 }
 0x163   : > { %v299_v39 = vpop.f32.mrb[1].mxu0  ;;  %4935 = vrot.lane.b32.xlu0 %v7100_v20, %s6334_s26  ;;  %5037 = vrot.lane.b32.xlu1 %v7079_v14, %s6335_s27  ;;  %s6371_s26 = smov 121   ;;  %v3401_v63 = vsel %vm253_vm1, %v3394_v54, 0 }
 0x164   : > { %v301_v40 = vpop.f32.mrb[2].mxu0  ;;  %v431_v41 = vpop.f32.mrb[4].mxu1  ;;  %6127 = vmatprep.subr.bf16.mxu1 %v6327_v0 }
 0x165   : > { %v302_v43 = vpop.f32.mrb[3].mxu0  ;;  %v432_v44 = vadd.f32 %v431_v41, %v338_v24  ;;  %v5963_v45 = vpop.f32.mrb[5].mxu1 }
 0x166   : > { %v3390_v46 = vpop.permute.xlu1 %3389  ;;  %v434_v48 = vpop.f32.mrb[6].mxu1 }
 0x167   : > { %5763 = vmatmul.mubr.msk.bf16.vlgmr.msra.gmra.mrb[108].mxu0 %vm249_vm2, %v5761_v30  ;;  %v3395_v49 = vsel %vm3393_vm11, %v3388_v36, %v3390_v46  ;;  %v5964_v50 = vpop.f32.mrb[7].mxu1  ;;  %v3392_v51 = vpop.permute.xlu0 %3391  ;;  %5039 = vrot.lane.b32.xlu0 %v7084_v5, %s6335_s27  ;;  %v5773_v30 = vld [vmem:[%s7449_s1 + $0x78] sm:$0xf] }
 0x168   : > { %3300 = vmatpush1.bf16.msra.mxu0 %v3291_v42  ;;  %v3396_v52 = vsel %vm3393_vm11, %v3390_v46, %v3392_v51  ;;  %3331 = vmatprep.mubr.bf16.mxu0 %v6329_v1  ;;  %v5777_v51 = vld [vmem:[%s7449_s1 + $0x7c] sm:$0xf]  ;;  %vm4493_vm11 = vcmask 113664  }
 0x169   : > { %6124 = vmatmul.mubr.msk.bf16.vlgmr.msra.gmra.mrb[112].mxu1 %vm249_vm2, %v5765_v47  ;;  %v3407_v53 = vsel %vm253_vm1, %v3396_v52, 0  ;;  %5770 = vmatprep.subr.msk.bf16.mxu0 %vm253_vm1, %v3395_v49 }
 0x16a   : > { %v390_v55 = vpop.f32.mrb[4].mxu0  ;;  %v3496_v56 = vpop.permute.xlu1 %3495  ;;  %6128 = vmatpush3.bf16.msra.mxu1 %v3407_v53  ;;  %6129 = vmatprep.mubr.msk.bf16.mxu1 %vm6328_vm0, %v6327_v0 }
 0x16b   : > { %v391_v57 = vadd.f32 %v390_v55, %v297_v38  ;;  %v392_v58 = vpop.f32.mrb[5].mxu0  ;;  %v3498_v59 = vpop.permute.xlu0 %3497  ;;  %5041 = vrot.lane.b32.xlu1 %v7100_v20, %s6335_s27  ;;  %5143 = vrot.lane.b32.xlu0 %v7079_v14, %s6371_s26  ;;  %s6372_s27 = smov 120  }
 0x16c   : > { %v393_v60 = vadd.f32 %v392_v58, %v299_v39  ;;  %v394_v61 = vpop.f32.mrb[6].mxu0  ;;  %v535_v62 = vpop.f32.mrb[8].mxu1  ;;  %6133 = vmatprep.subr.bf16.mxu1 %v6327_v0  ;;  %v3504_v17 = vsel %vm3503_vm12, %v3496_v56, %v3498_v59 }
 0x16d   : > { %v395_v2 = vpop.f32.mrb[7].mxu0  ;;  %v543_v3 = vadd.f32 %v535_v62, %v432_v44  ;;  %v5969_v6 = vpop.f32.mrb[9].mxu1  ;;  %v3511_v25 = vsel %vm253_vm1, %v3504_v17, 0 }
 0x16e   : > { %v3500_v9 = vpop.permute.xlu1 %3499  ;;  %v538_v11 = vpop.f32.mrb[10].mxu1 }
 0x16f   : > { %5767 = vmatmul.mubr.msk.bf16.vlgmr.msra.gmra.mrb[112].mxu0 %vm249_vm2, %v5765_v47  ;;  %v3505_v12 = vsel %vm3503_vm12, %v3498_v59, %v3500_v9  ;;  %v5970_v13 = vpop.f32.mrb[11].mxu1  ;;  %v3502_v4 = vpop.permute.xlu0 %3501  ;;  %5145 = vrot.lane.b32.xlu1 %v7084_v5, %s6371_s26 }
 0x170   : > { %3410 = vmatpush1.bf16.msra.mxu0 %v3401_v63  ;;  %v3506_v15 = vsel %vm3503_vm12, %v3500_v9, %v3502_v4  ;;  %3441 = vmatprep.mubr.bf16.mxu0 %v6329_v1  ;;  %v5781_v4 = vld [vmem:[%s7449_s1 + $0x80] sm:$0xf]  ;;  %vm4603_vm12 = vcmask 105472  }
 0x171   : > { %6130 = vmatmul.mubr.msk.bf16.vlgmr.msra.gmra.mrb[116].mxu1 %vm249_vm2, %v5769_v10  ;;  %v3517_v16 = vsel %vm253_vm1, %v3506_v15, 0  ;;  %5774 = vmatprep.subr.msk.bf16.mxu0 %vm253_vm1, %v3505_v12 }
 0x172   : > { %v494_v18 = vpop.f32.mrb[8].mxu0  ;;  %v3606_v7 = vpop.permute.xlu1 %3605  ;;  %6134 = vmatpush3.bf16.msra.mxu1 %v3517_v16  ;;  %6135 = vmatprep.mubr.msk.bf16.mxu1 %vm6328_vm0, %v6327_v0 }
 0x173   : > { %v541_v19 = vadd.f32 %v494_v18, %v391_v57  ;;  %v496_v8 = vpop.f32.mrb[9].mxu0  ;;  %v3608_v21 = vpop.permute.xlu0 %3607  ;;  %5147 = vrot.lane.b32.xlu0 %v7100_v20, %s6371_s26  ;;  %5250 = vrot.lane.b32.xlu1 %v7079_v14, %s6372_s27 }
 0x174   : > { %v542_v22 = vadd.f32 %v496_v8, %v393_v60  ;;  %v498_v23 = vpop.f32.mrb[10].mxu0  ;;  %v642_v24 = vpop.f32.mrb[12].mxu1  ;;  %6139 = vmatprep.subr.bf16.mxu1 %v6327_v0  ;;  %v3614_v37 = vsel %vm3613_vm13, %v3606_v7, %v3608_v21 }
 0x175   : > { %v499_v26 = vpop.f32.mrb[11].mxu0  ;;  %v650_v27 = vadd.f32 %v642_v24, %v543_v3  ;;  %v5975_v28 = vpop.f32.mrb[13].mxu1  ;;  %v3621_v46 = vsel %vm253_vm1, %v3614_v37, 0 }
 0x176   : > { %v3610_v29 = vpop.permute.xlu1 %3609  ;;  %v645_v31 = vpop.f32.mrb[14].mxu1 }
 0x177   : > { %5771 = vmatmul.mubr.msk.bf16.vlgmr.msra.gmra.mrb[116].mxu0 %vm249_vm2, %v5769_v10  ;;  %v3615_v32 = vsel %vm3613_vm13, %v3608_v21, %v3610_v29  ;;  %v5976_v33 = vpop.f32.mrb[15].mxu1  ;;  %v3612_v34 = vpop.permute.xlu0 %3611  ;;  %5252 = vrot.lane.b32.xlu0 %v7084_v5, %s6372_s27 }
 0x178   : > { %3520 = vmatpush1.bf16.msra.mxu0 %v3511_v25  ;;  %v3616_v35 = vsel %vm3613_vm13, %v3610_v29, %v3612_v34  ;;  %3551 = vmatprep.mubr.bf16.mxu0 %v6329_v1  ;;  %vm4713_vm13 = vcmask 97280  }
 0x179   : > { %6136 = vmatmul.mubr.msk.bf16.vlgmr.msra.gmra.mrb[120].mxu1 %vm249_vm2, %v5773_v30  ;;  %v3627_v36 = vsel %vm253_vm1, %v3616_v35, 0  ;;  %5778 = vmatprep.subr.msk.bf16.mxu0 %vm253_vm1, %v3615_v32  ;;  %v5785_v32 = vld [vmem:[%s7449_s1 + $0x84] sm:$0xf] }
 0x17a   : > { %v601_v38 = vpop.f32.mrb[12].mxu0  ;;  %v3716_v39 = vpop.permute.xlu1 %3715  ;;  %6140 = vmatpush3.bf16.msra.mxu1 %v3627_v36  ;;  %6141 = vmatprep.mubr.msk.bf16.mxu1 %vm6328_vm0, %v6327_v0 }
 0x17b   : > { %v648_v40 = vadd.f32 %v601_v38, %v541_v19  ;;  %v603_v41 = vpop.f32.mrb[13].mxu0  ;;  %v3718_v42 = vpop.permute.xlu0 %3717  ;;  %5254 = vrot.lane.b32.xlu1 %v7100_v20, %s6372_s27  ;;  %5357 = vrot.lane.b32.xlu0 %v7079_v14, %s6373_s14 }
 0x17c   : > { %v649_v43 = vadd.f32 %v603_v41, %v542_v22  ;;  %v605_v44 = vpop.f32.mrb[14].mxu0  ;;  %v749_v45 = vpop.f32.mrb[16].mxu1  ;;  %6145 = vmatprep.subr.bf16.mxu1 %v6327_v0  ;;  %v3724_v58 = vsel %vm3723_vm14, %v3716_v39, %v3718_v42 }
 0x17d   : > { %v606_v47 = vpop.f32.mrb[15].mxu0  ;;  %v757_v48 = vadd.f32 %v749_v45, %v650_v27  ;;  %v5981_v49 = vpop.f32.mrb[17].mxu1  ;;  %v3731_v9 = vsel %vm253_vm1, %v3724_v58, 0 }
 0x17e   : > { %v3720_v50 = vpop.permute.xlu1 %3719  ;;  %v752_v52 = vpop.f32.mrb[18].mxu1 }
 0x17f   : > { %5775 = vmatmul.mubr.msk.bf16.vlgmr.msra.gmra.mrb[120].mxu0 %vm249_vm2, %v5773_v30  ;;  %v3725_v53 = vsel %vm3723_vm14, %v3718_v42, %v3720_v50  ;;  %v5982_v54 = vpop.f32.mrb[19].mxu1  ;;  %v3722_v55 = vpop.permute.xlu0 %3721  ;;  %5359 = vrot.lane.b32.xlu1 %v7084_v5, %s6373_s14  ;;  %v5789_v52 = vld [vmem:[%s7449_s1 + $0x88] sm:$0xf] }
 0x180   : > { %3630 = vmatpush1.bf16.msra.mxu0 %v3621_v46  ;;  %v3726_v56 = vsel %vm3723_vm14, %v3720_v50, %v3722_v55  ;;  %3661 = vmatprep.mubr.bf16.mxu0 %v6329_v1  ;;  %vm5470_vm14 = vcmask 965632  }
 0x181   : > { %6142 = vmatmul.mubr.msk.bf16.vlgmr.msra.gmra.mrb[124].mxu1 %vm249_vm2, %v5777_v51  ;;  %v3737_v57 = vsel %vm253_vm1, %v3726_v56, 0  ;;  %5782 = vmatprep.subr.msk.bf16.mxu0 %vm253_vm1, %v3725_v53 }
 0x182   : > { %v708_v59 = vpop.f32.mrb[16].mxu0  ;;  %v3826_v60 = vpop.permute.xlu1 %3825  ;;  %6146 = vmatpush3.bf16.msra.mxu1 %v3737_v57  ;;  %6147 = vmatprep.mubr.msk.bf16.mxu1 %vm6328_vm0, %v6327_v0 }
 0x183   : > { %v755_v61 = vadd.f32 %v708_v59, %v648_v40  ;;  %v710_v62 = vpop.f32.mrb[17].mxu0  ;;  %v3828_v63 = vpop.permute.xlu0 %3827  ;;  %5361 = vrot.lane.b32.xlu0 %v7100_v20, %s6373_s14  ;;  %5464 = vrot.lane.b32.xlu1 %v7079_v14, %s6374_s17 }
 0x184   : > { %v756_v2 = vadd.f32 %v710_v62, %v649_v43  ;;  %v712_v3 = vpop.f32.mrb[18].mxu0  ;;  %v856_v6 = vpop.f32.mrb[20].mxu1  ;;  %6151 = vmatprep.subr.bf16.mxu1 %v6327_v0  ;;  %v3834_v19 = vsel %vm3833_vm15, %v3826_v60, %v3828_v63 }
 0x185   : > { %v713_v10 = vpop.f32.mrb[19].mxu0  ;;  %v864_v11 = vadd.f32 %v856_v6, %v757_v48  ;;  %v5987_v12 = vpop.f32.mrb[21].mxu1  ;;  %v3841_v27 = vsel %vm253_vm1, %v3834_v19, 0 }
 0x186   : > { %v3830_v13 = vpop.permute.xlu1 %3829  ;;  %v859_v15 = vpop.f32.mrb[22].mxu1 }
 0x187   : > { %5779 = vmatmul.mubr.msk.bf16.vlgmr.msra.gmra.mrb[124].mxu0 %vm249_vm2, %v5777_v51  ;;  %v3835_v14 = vsel %vm3833_vm15, %v3828_v63, %v3830_v13  ;;  %v5988_v16 = vpop.f32.mrb[23].mxu1  ;;  %v3832_v17 = vpop.permute.xlu0 %3831  ;;  %5466 = vrot.lane.b32.xlu0 %v7084_v5, %s6374_s17  ;;  %v5793_v15 = vld [vmem:[%s7449_s1 + $0x8c] sm:$0xf] }
 0x188   : > { %3740 = vmatpush1.bf16.msra.mxu0 %v3731_v9  ;;  %v3836_v18 = vsel %vm3833_vm15, %v3830_v13, %v3832_v17  ;;  %3771 = vmatprep.mubr.bf16.mxu0 %v6329_v1 }
 0x189   : > { %6148 = vmatmul.mubr.msk.bf16.vlgmr.msra.gmra.mrb[128].mxu1 %vm249_vm2, %v5781_v4  ;;  %v3847_v7 = vsel %vm253_vm1, %v3836_v18, 0  ;;  %5786 = vmatprep.subr.msk.bf16.mxu0 %vm253_vm1, %v3835_v14 }
 0x18a   : > { %v815_v8 = vpop.f32.mrb[20].mxu0  ;;  %v3936_v21 = vpop.permute.xlu1 %3935  ;;  %6152 = vmatpush3.bf16.msra.mxu1 %v3847_v7  ;;  %6153 = vmatprep.mubr.msk.bf16.mxu1 %vm6328_vm0, %v6327_v0 }
 0x18b   : > { %v862_v5 = vadd.f32 %v815_v8, %v755_v61  ;;  %v817_v22 = vpop.f32.mrb[21].mxu0  ;;  %v3938_v23 = vpop.permute.xlu0 %3937  ;;  %5468 = vrot.lane.b32.xlu1 %v7100_v20, %s6374_s17  ;;  %6157 = vmatprep.subr.bf16.mxu1 %v6327_v0 }
 0x18c   : > { %v863_v24 = vadd.f32 %v817_v22, %v756_v2  ;;  %v819_v25 = vpop.f32.mrb[22].mxu0  ;;  %v963_v26 = vpop.f32.mrb[24].mxu1  ;;  %v3944_v38 = vsel %vm3943_vm3, %v3936_v21, %v3938_v23 }
 0x18d   : > { %v820_v28 = vpop.f32.mrb[23].mxu0  ;;  %v971_v29 = vadd.f32 %v963_v26, %v864_v11  ;;  %v5993_v30 = vpop.f32.mrb[25].mxu1  ;;  %v3951_v47 = vsel %vm253_vm1, %v3944_v38, 0 }
 0x18e   : > { %v3940_v31 = vpop.permute.xlu1 %3939  ;;  %v966_v33 = vpop.f32.mrb[26].mxu1 }
 0x18f   : > { %5783 = vmatmul.mubr.msk.bf16.vlgmr.msra.gmra.mrb[128].mxu0 %vm249_vm2, %v5781_v4  ;;  %v3945_v20 = vsel %vm3943_vm3, %v3938_v23, %v3940_v31  ;;  %v5994_v34 = vpop.f32.mrb[27].mxu1  ;;  %v3942_v35 = vpop.permute.xlu0 %3941  ;;  %v5797_v33 = vld [vmem:[%s7449_s1 + $0x90] sm:$0xf] }
 0x190   : > { %3850 = vmatpush1.bf16.msra.mxu0 %v3841_v27  ;;  %v3946_v36 = vsel %vm3943_vm3, %v3940_v31, %v3942_v35  ;;  %3881 = vmatprep.mubr.bf16.mxu0 %v6329_v1 }
 0x191   : > { %6154 = vmatmul.mubr.msk.bf16.vlgmr.msra.gmra.mrb[132].mxu1 %vm249_vm2, %v5785_v32  ;;  %v3957_v37 = vsel %vm253_vm1, %v3946_v36, 0  ;;  %5790 = vmatprep.subr.msk.bf16.mxu0 %vm253_vm1, %v3945_v20 }
 0x192   : > { %v922_v39 = vpop.f32.mrb[24].mxu0  ;;  %v4046_v40 = vpop.permute.xlu1 %4045  ;;  %6158 = vmatpush3.bf16.msra.mxu1 %v3957_v37  ;;  %6159 = vmatprep.mubr.msk.bf16.mxu1 %vm6328_vm0, %v6327_v0 }
 0x193   : > { %v969_v41 = vadd.f32 %v922_v39, %v862_v5  ;;  %v924_v42 = vpop.f32.mrb[25].mxu0  ;;  %v4048_v43 = vpop.permute.xlu0 %4047  ;;  %6163 = vmatprep.subr.bf16.mxu1 %v6327_v0 }
 0x194   : > { %v970_v44 = vadd.f32 %v924_v42, %v863_v24  ;;  %v926_v45 = vpop.f32.mrb[26].mxu0  ;;  %v1070_v46 = vpop.f32.mrb[28].mxu1  ;;  %v4054_v59 = vsel %vm4053_vm4, %v4046_v40, %v4048_v43 }
 0x195   : > { %v927_v48 = vpop.f32.mrb[27].mxu0  ;;  %v1078_v49 = vadd.f32 %v1070_v46, %v971_v29  ;;  %v5999_v50 = vpop.f32.mrb[29].mxu1  ;;  %v4061_v10 = vsel %vm253_vm1, %v4054_v59, 0 }
 0x196   : > { %v4050_v51 = vpop.permute.xlu1 %4049  ;;  %v1073_v53 = vpop.f32.mrb[30].mxu1 }
 0x197   : > { %5787 = vmatmul.mubr.msk.bf16.vlgmr.msra.gmra.mrb[132].mxu0 %vm249_vm2, %v5785_v32  ;;  %v4055_v54 = vsel %vm4053_vm4, %v4048_v43, %v4050_v51  ;;  %v6000_v55 = vpop.f32.mrb[31].mxu1  ;;  %v4052_v56 = vpop.permute.xlu0 %4051  ;;  %v5801_v53 = vld [vmem:[%s7449_s1 + $0x94] sm:$0xf] }
 0x198   : > { %3960 = vmatpush1.bf16.msra.mxu0 %v3951_v47  ;;  %v4056_v57 = vsel %vm4053_vm4, %v4050_v51, %v4052_v56  ;;  %3991 = vmatprep.mubr.bf16.mxu0 %v6329_v1 }
 0x199   : > { %6160 = vmatmul.mubr.msk.bf16.vlgmr.msra.gmra.mrb[136].mxu1 %vm249_vm2, %v5789_v52  ;;  %v4067_v58 = vsel %vm253_vm1, %v4056_v57, 0  ;;  %5794 = vmatprep.subr.msk.bf16.mxu0 %vm253_vm1, %v4055_v54 }
 0x19a   : > { %v1029_v60 = vpop.f32.mrb[28].mxu0  ;;  %v4156_v61 = vpop.permute.xlu1 %4155  ;;  %6164 = vmatpush3.bf16.msra.mxu1 %v4067_v58  ;;  %6165 = vmatprep.mubr.msk.bf16.mxu1 %vm6328_vm0, %v6327_v0 }
 0x19b   : > { %v1076_v62 = vadd.f32 %v1029_v60, %v969_v41  ;;  %v1031_v63 = vpop.f32.mrb[29].mxu0  ;;  %v4158_v2 = vpop.permute.xlu0 %4157  ;;  %6169 = vmatprep.subr.bf16.mxu1 %v6327_v0 }
 0x19c   : > { %v1077_v3 = vadd.f32 %v1031_v63, %v970_v44  ;;  %v1033_v6 = vpop.f32.mrb[30].mxu0  ;;  %v1177_v9 = vpop.f32.mrb[32].mxu1  ;;  %v4164_v8 = vsel %vm4163_vm5, %v4156_v61, %v4158_v2 }
 0x19d   : > { %v1034_v11 = vpop.f32.mrb[31].mxu0  ;;  %v1185_v12 = vadd.f32 %v1177_v9, %v1078_v49  ;;  %v6005_v13 = vpop.f32.mrb[33].mxu1  ;;  %v4171_v28 = vsel %vm253_vm1, %v4164_v8, 0 }
 0x19e   : > { %v4160_v4 = vpop.permute.xlu1 %4159  ;;  %v1180_v14 = vpop.f32.mrb[34].mxu1 }
 0x19f   : > { %5791 = vmatmul.mubr.msk.bf16.vlgmr.msra.gmra.mrb[136].mxu0 %vm249_vm2, %v5789_v52  ;;  %v4165_v16 = vsel %vm4163_vm5, %v4158_v2, %v4160_v4  ;;  %v6006_v17 = vpop.f32.mrb[35].mxu1  ;;  %v4162_v18 = vpop.permute.xlu0 %4161  ;;  %v5805_v14 = vld [vmem:[%s7449_s1 + $0x98] sm:$0xf] }
 0x1a0   : > { %4070 = vmatpush1.bf16.msra.mxu0 %v4061_v10  ;;  %v4166_v7 = vsel %vm4163_vm5, %v4160_v4, %v4162_v18  ;;  %4101 = vmatprep.mubr.bf16.mxu0 %v6329_v1 }
 0x1a1   : > { %6166 = vmatmul.mubr.msk.bf16.vlgmr.msra.gmra.mrb[140].mxu1 %vm249_vm2, %v5793_v15  ;;  %v4177_v19 = vsel %vm253_vm1, %v4166_v7, 0  ;;  %5798 = vmatprep.subr.msk.bf16.mxu0 %vm253_vm1, %v4165_v16 }
 0x1a2   : > { %v1136_v21 = vpop.f32.mrb[32].mxu0  ;;  %v4266_v5 = vpop.permute.xlu1 %4265  ;;  %6170 = vmatpush3.bf16.msra.mxu1 %v4177_v19  ;;  %6171 = vmatprep.mubr.msk.bf16.mxu1 %vm6328_vm0, %v6327_v0 }
 0x1a3   : > { %v1183_v22 = vadd.f32 %v1136_v21, %v1076_v62  ;;  %v1138_v23 = vpop.f32.mrb[33].mxu0  ;;  %v4268_v24 = vpop.permute.xlu0 %4267  ;;  %6175 = vmatprep.subr.bf16.mxu1 %v6327_v0 }
 0x1a4   : > { %v1184_v25 = vadd.f32 %v1138_v23, %v1077_v3  ;;  %v1140_v26 = vpop.f32.mrb[34].mxu0  ;;  %v1284_v27 = vpop.f32.mrb[36].mxu1  ;;  %v4274_v39 = vsel %vm4273_vm9, %v4266_v5, %v4268_v24 }
 0x1a5   : > { %v1141_v29 = vpop.f32.mrb[35].mxu0  ;;  %v1292_v30 = vadd.f32 %v1284_v27, %v1185_v12  ;;  %v6011_v31 = vpop.f32.mrb[37].mxu1  ;;  %v4281_v48 = vsel %vm253_vm1, %v4274_v39, 0 }
 0x1a6   : > { %v4270_v32 = vpop.permute.xlu1 %4269  ;;  %v1287_v20 = vpop.f32.mrb[38].mxu1 }
 0x1a7   : > { %5795 = vmatmul.mubr.msk.bf16.vlgmr.msra.gmra.mrb[140].mxu0 %vm249_vm2, %v5793_v15  ;;  %v4275_v34 = vsel %vm4273_vm9, %v4268_v24, %v4270_v32  ;;  %v6012_v35 = vpop.f32.mrb[39].mxu1  ;;  %v4272_v36 = vpop.permute.xlu0 %4271  ;;  %v5809_v20 = vld [vmem:[%s7449_s1 + $0x9c] sm:$0xf] }
 0x1a8   : > { %4180 = vmatpush1.bf16.msra.mxu0 %v4171_v28  ;;  %v4276_v37 = vsel %vm4273_vm9, %v4270_v32, %v4272_v36  ;;  %4211 = vmatprep.mubr.bf16.mxu0 %v6329_v1 }
 0x1a9   : > { %6172 = vmatmul.mubr.msk.bf16.vlgmr.msra.gmra.mrb[144].mxu1 %vm249_vm2, %v5797_v33  ;;  %v4287_v38 = vsel %vm253_vm1, %v4276_v37, 0  ;;  %5802 = vmatprep.subr.msk.bf16.mxu0 %vm253_vm1, %v4275_v34 }
 0x1aa   : > { %v1243_v40 = vpop.f32.mrb[36].mxu0  ;;  %v4376_v41 = vpop.permute.xlu1 %4375  ;;  %6176 = vmatpush3.bf16.msra.mxu1 %v4287_v38  ;;  %6177 = vmatprep.mubr.msk.bf16.mxu1 %vm6328_vm0, %v6327_v0 }
 0x1ab   : > { %v1290_v42 = vadd.f32 %v1243_v40, %v1183_v22  ;;  %v1245_v43 = vpop.f32.mrb[37].mxu0  ;;  %v4378_v44 = vpop.permute.xlu0 %4377  ;;  %6181 = vmatprep.subr.bf16.mxu1 %v6327_v0 }
 0x1ac   : > { %v1291_v45 = vadd.f32 %v1245_v43, %v1184_v25  ;;  %v1247_v46 = vpop.f32.mrb[38].mxu0  ;;  %v1391_v47 = vpop.f32.mrb[40].mxu1  ;;  %v4384_v60 = vsel %vm4383_vm10, %v4376_v41, %v4378_v44 }
 0x1ad   : > { %v1248_v49 = vpop.f32.mrb[39].mxu0  ;;  %v1399_v50 = vadd.f32 %v1391_v47, %v1292_v30  ;;  %v6017_v51 = vpop.f32.mrb[41].mxu1  ;;  %v4391_v11 = vsel %vm253_vm1, %v4384_v60, 0 }
 0x1ae   : > { %v4380_v52 = vpop.permute.xlu1 %4379  ;;  %v1394_v54 = vpop.f32.mrb[42].mxu1 }
 0x1af   : > { %5799 = vmatmul.mubr.msk.bf16.vlgmr.msra.gmra.mrb[144].mxu0 %vm249_vm2, %v5797_v33  ;;  %v4385_v55 = vsel %vm4383_vm10, %v4378_v44, %v4380_v52  ;;  %v6018_v56 = vpop.f32.mrb[43].mxu1  ;;  %v4382_v57 = vpop.permute.xlu0 %4381  ;;  %v5813_v54 = vld [vmem:[%s7449_s1 + $0xa0] sm:$0xf] }
 0x1b0   : > { %4290 = vmatpush1.bf16.msra.mxu0 %v4281_v48  ;;  %v4386_v58 = vsel %vm4383_vm10, %v4380_v52, %v4382_v57  ;;  %4321 = vmatprep.mubr.bf16.mxu0 %v6329_v1 }
 0x1b1   : > { %6178 = vmatmul.mubr.msk.bf16.vlgmr.msra.gmra.mrb[148].mxu1 %vm249_vm2, %v5801_v53  ;;  %v4397_v59 = vsel %vm253_vm1, %v4386_v58, 0  ;;  %5806 = vmatprep.subr.msk.bf16.mxu0 %vm253_vm1, %v4385_v55 }
 0x1b2   : > { %v1350_v61 = vpop.f32.mrb[40].mxu0  ;;  %v4486_v62 = vpop.permute.xlu1 %4485  ;;  %6182 = vmatpush3.bf16.msra.mxu1 %v4397_v59  ;;  %6183 = vmatprep.mubr.msk.bf16.mxu1 %vm6328_vm0, %v6327_v0 }
 0x1b3   : > { %v1397_v63 = vadd.f32 %v1350_v61, %v1290_v42  ;;  %v1352_v2 = vpop.f32.mrb[41].mxu0  ;;  %v4488_v3 = vpop.permute.xlu0 %4487  ;;  %6187 = vmatprep.subr.bf16.mxu1 %v6327_v0 }
 0x1b4   : > { %v1398_v6 = vadd.f32 %v1352_v2, %v1291_v45  ;;  %v1354_v9 = vpop.f32.mrb[42].mxu0  ;;  %v1498_v10 = vpop.f32.mrb[44].mxu1  ;;  %v4494_v21 = vsel %vm4493_vm11, %v4486_v62, %v4488_v3 }
 0x1b5   : > { %v1355_v12 = vpop.f32.mrb[43].mxu0  ;;  %v1506_v13 = vadd.f32 %v1498_v10, %v1399_v50  ;;  %v6023_v4 = vpop.f32.mrb[45].mxu1  ;;  %v4501_v29 = vsel %vm253_vm1, %v4494_v21, 0 }
 0x1b6   : > { %v4490_v15 = vpop.permute.xlu1 %4489  ;;  %v1501_v16 = vpop.f32.mrb[46].mxu1 }
 0x1b7   : > { %5803 = vmatmul.mubr.msk.bf16.vlgmr.msra.gmra.mrb[148].mxu0 %vm249_vm2, %v5801_v53  ;;  %v4495_v17 = vsel %vm4493_vm11, %v4488_v3, %v4490_v15  ;;  %v6024_v18 = vpop.f32.mrb[47].mxu1  ;;  %v4492_v7 = vpop.permute.xlu0 %4491 }
 0x1b8   : > { %4400 = vmatpush1.bf16.msra.mxu0 %v4391_v11  ;;  %v4496_v19 = vsel %vm4493_vm11, %v4490_v15, %v4492_v7  ;;  %4431 = vmatprep.mubr.bf16.mxu0 %v6329_v1 }
 0x1b9   : > { %6184 = vmatmul.mubr.msk.bf16.vlgmr.msra.gmra.mrb[152].mxu1 %vm249_vm2, %v5805_v14  ;;  %v4507_v8 = vsel %vm253_vm1, %v4496_v19, 0  ;;  %5810 = vmatprep.subr.msk.bf16.mxu0 %vm253_vm1, %v4495_v17 }
 0x1ba   : > { %v1457_v5 = vpop.f32.mrb[44].mxu0  ;;  %v4596_v22 = vpop.permute.xlu1 %4595  ;;  %6188 = vmatpush3.bf16.msra.mxu1 %v4507_v8  ;;  %6189 = vmatprep.mubr.msk.bf16.mxu1 %vm6328_vm0, %v6327_v0 }
 0x1bb   : > { %v1504_v23 = vadd.f32 %v1457_v5, %v1397_v63  ;;  %v1459_v24 = vpop.f32.mrb[45].mxu0  ;;  %v4598_v25 = vpop.permute.xlu0 %4597  ;;  %6193 = vmatprep.subr.bf16.mxu1 %v6327_v0 }
 0x1bc   : > { %v1505_v26 = vadd.f32 %v1459_v24, %v1398_v6  ;;  %v1461_v27 = vpop.f32.mrb[46].mxu0  ;;  %v1605_v28 = vpop.f32.mrb[48].mxu1  ;;  %v4604_v40 = vsel %vm4603_vm12, %v4596_v22, %v4598_v25 }
 0x1bd   : > { %v1462_v30 = vpop.f32.mrb[47].mxu0  ;;  %v1613_v31 = vadd.f32 %v1605_v28, %v1506_v13  ;;  %v6029_v32 = vpop.f32.mrb[49].mxu1  ;;  %v4611_v49 = vsel %vm253_vm1, %v4604_v40, 0 }
 0x1be   : > { %v4600_v33 = vpop.permute.xlu1 %4599  ;;  %v1608_v34 = vpop.f32.mrb[50].mxu1  ;;  %v5821_v32 = vld [vmem:[%s7449_s1 + $0xa8] sm:$0xf] }
 0x1bf   : > { %5807 = vmatmul.mubr.msk.bf16.vlgmr.msra.gmra.mrb[152].mxu0 %vm249_vm2, %v5805_v14  ;;  %v4605_v35 = vsel %vm4603_vm12, %v4598_v25, %v4600_v33  ;;  %v6030_v36 = vpop.f32.mrb[51].mxu1  ;;  %v4602_v37 = vpop.permute.xlu0 %4601  ;;  %v5817_v14 = vld [vmem:[%s7449_s1 + $0xa4] sm:$0xf] }
 0x1c0   : > { %4510 = vmatpush1.bf16.msra.mxu0 %v4501_v29  ;;  %v4606_v38 = vsel %vm4603_vm12, %v4600_v33, %v4602_v37  ;;  %4541 = vmatprep.mubr.bf16.mxu0 %v6329_v1 }
 0x1c1   : > { %6190 = vmatmul.mubr.msk.bf16.vlgmr.msra.gmra.mrb[156].mxu1 %vm249_vm2, %v5809_v20  ;;  %v4617_v39 = vsel %vm253_vm1, %v4606_v38, 0  ;;  %5814 = vmatprep.subr.msk.bf16.mxu0 %vm253_vm1, %v4605_v35 }
 0x1c2   : > { %v1564_v41 = vpop.f32.mrb[48].mxu0  ;;  %v4706_v42 = vpop.permute.xlu1 %4705  ;;  %6194 = vmatpush3.bf16.msra.mxu1 %v4617_v39  ;;  %6195 = vmatprep.mubr.msk.bf16.mxu1 %vm6328_vm0, %v6327_v0 }
 0x1c3   : > { %v1611_v43 = vadd.f32 %v1564_v41, %v1504_v23  ;;  %v1566_v44 = vpop.f32.mrb[49].mxu0  ;;  %v4708_v45 = vpop.permute.xlu0 %4707  ;;  %6199 = vmatprep.subr.bf16.mxu1 %v6327_v0 }
 0x1c4   : > { %v1612_v46 = vadd.f32 %v1566_v44, %v1505_v26  ;;  %v1568_v47 = vpop.f32.mrb[50].mxu0  ;;  %v1712_v48 = vpop.f32.mrb[52].mxu1  ;;  %v4714_v61 = vsel %vm4713_vm13, %v4706_v42, %v4708_v45 }
 0x1c5   : > { %v1569_v50 = vpop.f32.mrb[51].mxu0  ;;  %v1720_v51 = vadd.f32 %v1712_v48, %v1613_v31  ;;  %v6035_v52 = vpop.f32.mrb[53].mxu1  ;;  %v4721_v12 = vsel %vm253_vm1, %v4714_v61, 0 }
 0x1c6   : > { %v4710_v53 = vpop.permute.xlu1 %4709  ;;  %v1715_v55 = vpop.f32.mrb[54].mxu1  ;;  %v226_v50 = vld [vmem:[%s7452_s4] sm:$0xff] }
 0x1c7   : > { %5811 = vmatmul.mubr.msk.bf16.vlgmr.msra.gmra.mrb[156].mxu0 %vm249_vm2, %v5809_v20  ;;  %v4715_v56 = vsel %vm4713_vm13, %v4708_v45, %v4710_v53  ;;  %v6036_v57 = vpop.f32.mrb[55].mxu1  ;;  %v4712_v58 = vpop.permute.xlu0 %4711  ;;  %5571 = vperm.xlu0 %6304, %v226_v50  }
 0x1c8   : > { %4620 = vmatpush1.bf16.msra.mxu0 %v4611_v49  ;;  %v4716_v59 = vsel %vm4713_vm13, %v4710_v53, %v4712_v58  ;;  %4651 = vmatprep.mubr.bf16.mxu0 %v6329_v1 }
 0x1c9   : > { %6196 = vmatmul.mubr.msk.bf16.vlgmr.msra.gmra.mrb[160].mxu1 %vm249_vm2, %v5813_v54  ;;  %v4727_v60 = vsel %vm253_vm1, %v4716_v59, 0  ;;  %5818 = vmatprep.subr.msk.bf16.mxu0 %vm253_vm1, %v4715_v56 }
 0x1ca   : > { %v1671_v62 = vpop.f32.mrb[52].mxu0  ;;  %6200 = vmatpush3.bf16.msra.mxu1 %v4727_v60  ;;  %v4826_v63 = vpop.permute.xlu1 %4825  ;;  %6201 = vmatprep.mubr.msk.bf16.mxu1 %vm6328_vm0, %v6327_v0 }
 0x1cb   : > { %v1718_v2 = vadd.f32 %v1671_v62, %v1611_v43  ;;  %v1673_v3 = vpop.f32.mrb[53].mxu0  ;;  %v4828_v6 = vpop.permute.xlu0 %4827  ;;  %6205 = vmatprep.subr.bf16.mxu1 %v6327_v0 }
 0x1cc   : > { %v1719_v9 = vadd.f32 %v1673_v3, %v1612_v46  ;;  %v1675_v10 = vpop.f32.mrb[54].mxu0  ;;  %v1834_v11 = vpop.f32.mrb[56].mxu1  ;;  %v4831_v21 = vsel %vm659_vm6, %v4826_v63, %v4828_v6 }
 0x1cd   : > { %v1676_v13 = vpop.f32.mrb[55].mxu0  ;;  %v1842_v4 = vadd.f32 %v1834_v11, %v1720_v51  ;;  %v6041_v15 = vpop.f32.mrb[57].mxu1  ;;  %v4837_v28 = vsel %vm253_vm1, %v4831_v21, 0  ;;  %v5828_v51 = vld [vmem:[%s7449_s1 + $0xac] sm:$0xf] }
 0x1ce   : > { %v1837_v16 = vpop.f32.mrb[58].mxu1  ;;  %v4830_v17 = vpop.permute.xlu1 %4829 }
 0x1cf   : > { %5815 = vmatmul.mubr.msk.bf16.vlgmr.msra.gmra.mrb[160].mxu0 %vm249_vm2, %v5813_v54  ;;  %v4832_v18 = vsel %vm659_vm6, %v4828_v6, %v4830_v17  ;;  %v4843_v7 = vsel %vm253_vm1, %v4830_v17, 0  ;;  %v6042_v19 = vpop.f32.mrb[59].mxu1  ;;  %v4932_v8 = vpop.permute.xlu0 %4931  ;;  %vm5149_vm6 = vcmask 990208  }
 0x1d0   : > { %4730 = vmatpush1.bf16.msra.mxu0 %v4721_v12  ;;  %4761 = vmatprep.mubr.bf16.mxu0 %v6329_v1  ;;  %v5832_v12 = vld [vmem:[%s7449_s1 + $0xb0] sm:$0xf] }
 0x1d1   : > { %6202 = vmatmul.mubr.msk.bf16.vlgmr.msra.gmra.mrb[164].mxu1 %vm249_vm2, %v5817_v14  ;;  %5825 = vmatprep.subr.msk.bf16.mxu0 %vm253_vm1, %v4832_v18 }
 0x1d2   : > { %v1793_v5 = vpop.f32.mrb[56].mxu0  ;;  %6206 = vmatpush3.bf16.msra.mxu1 %v4843_v7  ;;  %v4934_v22 = vpop.permute.xlu1 %4933  ;;  %6207 = vmatprep.mubr.msk.bf16.mxu1 %vm6328_vm0, %v6327_v0 }
 0x1d3   : > { %v1840_v23 = vadd.f32 %v1793_v5, %v1718_v2  ;;  %v1795_v24 = vpop.f32.mrb[57].mxu0  ;;  %6211 = vmatprep.subr.bf16.mxu1 %v6327_v0  ;;  %v4937_v38 = vsel %vm766_vm7, %v4932_v8, %v4934_v22 }
 0x1d4   : > { %v1841_v25 = vadd.f32 %v1795_v24, %v1719_v9  ;;  %v1797_v26 = vpop.f32.mrb[58].mxu0  ;;  %v1944_v27 = vpop.f32.mrb[60].mxu1  ;;  %v4943_v46 = vsel %vm253_vm1, %v4937_v38, 0 }
 0x1d5   : > { %v1798_v29 = vpop.f32.mrb[59].mxu0  ;;  %v1952_v30 = vadd.f32 %v1944_v27, %v1842_v4  ;;  %v6047_v31 = vpop.f32.mrb[61].mxu1 }
 0x1d6   : > { %v1947_v33 = vpop.f32.mrb[62].mxu1  ;;  %v4936_v20 = vpop.permute.xlu0 %4935 }
 0x1d7   : > { %5819 = vmatmul.mubr.msk.bf16.vlgmr.msra.gmra.mrb[164].mxu0 %vm249_vm2, %v5817_v14  ;;  %v6048_v34 = vpop.f32.mrb[63].mxu1  ;;  %v4938_v35 = vsel %vm766_vm7, %v4934_v22, %v4936_v20  ;;  %v4949_v36 = vsel %vm253_vm1, %v4936_v20, 0  ;;  %v5038_v37 = vpop.permute.xlu1 %5037  ;;  %vm5256_vm7 = vcmask 982016  }
 0x1d8   : > { %4846 = vmatpush1.bf16.msra.mxu0 %v4837_v28  ;;  %4877 = vmatprep.mubr.bf16.mxu0 %v6329_v1  ;;  %v5836_v28 = vld [vmem:[%s7449_s1 + $0xb4] sm:$0xf] }
 0x1d9   : > { %6208 = vmatmul.mubr.msk.bf16.vlgmr.msra.gmra.mrb[168].mxu1 %vm249_vm2, %v5821_v32  ;;  %5829 = vmatprep.subr.msk.bf16.mxu0 %vm253_vm1, %v4938_v35 }
 0x1da   : > { %v1903_v39 = vpop.f32.mrb[60].mxu0  ;;  %6212 = vmatpush3.bf16.msra.mxu1 %v4949_v36  ;;  %6213 = vmatprep.mubr.msk.bf16.mxu1 %vm6328_vm0, %v6327_v0  ;;  %v5040_v40 = vpop.permute.xlu0 %5039 }
 0x1db   : > { %v1950_v41 = vadd.f32 %v1903_v39, %v1840_v23  ;;  %v1905_v42 = vpop.f32.mrb[61].mxu0  ;;  %6217 = vmatprep.subr.bf16.mxu1 %v6327_v0  ;;  %v5043_v58 = vsel %vm873_vm8, %v5038_v37, %v5040_v40 }
 0x1dc   : > { %v1951_v43 = vadd.f32 %v1905_v42, %v1841_v25  ;;  %v1907_v44 = vpop.f32.mrb[62].mxu0  ;;  %v2054_v45 = vpop.f32.mrb[64].mxu1  ;;  %v5049_v6 = vsel %vm253_vm1, %v5043_v58, 0 }
 0x1dd   : > { %v1908_v47 = vpop.f32.mrb[63].mxu0  ;;  %v2062_v48 = vadd.f32 %v2054_v45, %v1952_v30  ;;  %v6053_v49 = vpop.f32.mrb[65].mxu1 }
 0x1de   : > { %v2057_v52 = vpop.f32.mrb[66].mxu1  ;;  %v5042_v53 = vpop.permute.xlu1 %5041 }
 0x1df   : > { %5826 = vmatmul.mubr.msk.bf16.vlgmr.msra.gmra.mrb[168].mxu0 %vm249_vm2, %v5821_v32  ;;  %v5044_v54 = vsel %vm873_vm8, %v5040_v40, %v5042_v53  ;;  %v5055_v55 = vsel %vm253_vm1, %v5042_v53, 0  ;;  %v6054_v56 = vpop.f32.mrb[67].mxu1  ;;  %v5144_v57 = vpop.permute.xlu0 %5143  ;;  %vm5363_vm8 = vcmask 973824  }
 0x1e0   : > { %4952 = vmatpush1.bf16.msra.mxu0 %v4943_v46  ;;  %4983 = vmatprep.mubr.bf16.mxu0 %v6329_v1  ;;  %v5840_v46 = vld [vmem:[%s7449_s1 + $0xb8] sm:$0xf] }
 0x1e1   : > { %6214 = vmatmul.mubr.msk.bf16.vlgmr.msra.gmra.mrb[172].mxu1 %vm249_vm2, %v5828_v51  ;;  %5833 = vmatprep.subr.msk.bf16.mxu0 %vm253_vm1, %v5044_v54 }
 0x1e2   : > { %v2013_v59 = vpop.f32.mrb[64].mxu0  ;;  %6218 = vmatpush3.bf16.msra.mxu1 %v5055_v55  ;;  %v5146_v60 = vpop.permute.xlu1 %5145  ;;  %6219 = vmatprep.mubr.msk.bf16.mxu1 %vm6328_vm0, %v6327_v0 }
 0x1e3   : > { %v2060_v61 = vadd.f32 %v2013_v59, %v1950_v41  ;;  %v2015_v62 = vpop.f32.mrb[65].mxu0  ;;  %6223 = vmatprep.subr.bf16.mxu1 %v6327_v0  ;;  %v5150_v18 = vsel %vm5149_vm6, %v5144_v57, %v5146_v60 }
 0x1e4   : > { %v2061_v63 = vadd.f32 %v2015_v62, %v1951_v43  ;;  %v2017_v2 = vpop.f32.mrb[66].mxu0  ;;  %v2164_v3 = vpop.f32.mrb[68].mxu1  ;;  %v5156_v24 = vsel %vm253_vm1, %v5150_v18, 0 }
 0x1e5   : > { %v2018_v9 = vpop.f32.mrb[67].mxu0  ;;  %v2172_v10 = vadd.f32 %v2164_v3, %v2062_v48  ;;  %v6059_v11 = vpop.f32.mrb[69].mxu1  ;;  %v5844_v3 = vld [vmem:[%s7449_s1 + $0xbc] sm:$0xf] }
 0x1e6   : > { %v2167_v13 = vpop.f32.mrb[70].mxu1  ;;  %v5148_v4 = vpop.permute.xlu0 %5147 }
 0x1e7   : > { %5830 = vmatmul.mubr.msk.bf16.vlgmr.msra.gmra.mrb[172].mxu0 %vm249_vm2, %v5828_v51  ;;  %v6060_v15 = vpop.f32.mrb[71].mxu1  ;;  %v5151_v14 = vsel %vm5149_vm6, %v5146_v60, %v5148_v4  ;;  %v5162_v16 = vsel %vm253_vm1, %v5148_v4, 0  ;;  %v5251_v17 = vpop.permute.xlu1 %5250 }
 0x1e8   : > { %5058 = vmatpush1.bf16.msra.mxu0 %v5049_v6  ;;  %5089 = vmatprep.mubr.bf16.mxu0 %v6329_v1 }
 0x1e9   : > { %6220 = vmatmul.mubr.msk.bf16.vlgmr.msra.gmra.mrb[176].mxu1 %vm249_vm2, %v5832_v12  ;;  %5837 = vmatprep.subr.msk.bf16.mxu0 %vm253_vm1, %v5151_v14 }
 0x1ea   : > { %v2123_v7 = vpop.f32.mrb[68].mxu0  ;;  %6224 = vmatpush3.bf16.msra.mxu1 %v5162_v16  ;;  %6225 = vmatprep.mubr.msk.bf16.mxu1 %vm6328_vm0, %v6327_v0  ;;  %v5253_v19 = vpop.permute.xlu0 %5252 }
 0x1eb   : > { %v2170_v8 = vadd.f32 %v2123_v7, %v2060_v61  ;;  %v2125_v21 = vpop.f32.mrb[69].mxu0  ;;  %6229 = vmatprep.subr.bf16.mxu1 %v6327_v0  ;;  %v5257_v34 = vsel %vm5256_vm7, %v5251_v17, %v5253_v19 }
 0x1ec   : > { %v2171_v5 = vadd.f32 %v2125_v21, %v2061_v63  ;;  %v2127_v22 = vpop.f32.mrb[70].mxu0  ;;  %v2274_v23 = vpop.f32.mrb[72].mxu1  ;;  %v5263_v42 = vsel %vm253_vm1, %v5257_v34, 0 }
 0x1ed   : > { %v2128_v25 = vpop.f32.mrb[71].mxu0  ;;  %v2282_v26 = vadd.f32 %v2274_v23, %v2172_v10  ;;  %v6065_v27 = vpop.f32.mrb[73].mxu1 }
 0x1ee   : > { %v2277_v29 = vpop.f32.mrb[74].mxu1  ;;  %v5255_v30 = vpop.permute.xlu1 %5254 }
 0x1ef   : > { %5834 = vmatmul.mubr.msk.bf16.vlgmr.msra.gmra.mrb[176].mxu0 %vm249_vm2, %v5832_v12  ;;  %v5258_v31 = vsel %vm5256_vm7, %v5253_v19, %v5255_v30  ;;  %v5269_v32 = vsel %vm253_vm1, %v5255_v30, 0  ;;  %v6066_v33 = vpop.f32.mrb[75].mxu1  ;;  %v5358_v20 = vpop.permute.xlu0 %5357 }
 0x1f0   : > { %5165 = vmatpush1.bf16.msra.mxu0 %v5156_v24  ;;  %5196 = vmatprep.mubr.bf16.mxu0 %v6329_v1 }
 0x1f1   : > { %6226 = vmatmul.mubr.msk.bf16.vlgmr.msra.gmra.mrb[180].mxu1 %vm249_vm2, %v5836_v28  ;;  %5841 = vmatprep.subr.msk.bf16.mxu0 %vm253_vm1, %v5258_v31 }
 0x1f2   : > { %v2233_v35 = vpop.f32.mrb[72].mxu0  ;;  %6230 = vmatpush3.bf16.msra.mxu1 %v5269_v32  ;;  %v5360_v36 = vpop.permute.xlu1 %5359  ;;  %6231 = vmatprep.mubr.msk.bf16.mxu1 %vm6328_vm0, %v6327_v0 }
 0x1f3   : > { %v2280_v37 = vadd.f32 %v2233_v35, %v2170_v8  ;;  %v2235_v38 = vpop.f32.mrb[73].mxu0  ;;  %6235 = vmatprep.subr.bf16.mxu1 %v6327_v0  ;;  %v5364_v53 = vsel %vm5363_vm8, %v5358_v20, %v5360_v36 }
 0x1f4   : > { %v2281_v39 = vadd.f32 %v2235_v38, %v2171_v5  ;;  %v2237_v40 = vpop.f32.mrb[74].mxu0  ;;  %v2384_v41 = vpop.f32.mrb[76].mxu1  ;;  %v5370_v61 = vsel %vm253_vm1, %v5364_v53, 0  ;;  %v5848_v5 = vld [vmem:[%s7449_s1 + $0xc0] sm:$0xf] }
 0x1f5   : > { %v2238_v43 = vpop.f32.mrb[75].mxu0  ;;  %v2392_v44 = vadd.f32 %v2384_v41, %v2282_v26  ;;  %v6071_v45 = vpop.f32.mrb[77].mxu1 }
 0x1f6   : > { %v2387_v47 = vpop.f32.mrb[78].mxu1  ;;  %v5362_v48 = vpop.permute.xlu0 %5361 }
 0x1f7   : > { %5838 = vmatmul.mubr.msk.bf16.vlgmr.msra.gmra.mrb[180].mxu0 %vm249_vm2, %v5836_v28  ;;  %v6072_v49 = vpop.f32.mrb[79].mxu1  ;;  %v5365_v50 = vsel %vm5363_vm8, %v5360_v36, %v5362_v48  ;;  %v5376_v51 = vsel %vm253_vm1, %v5362_v48, 0  ;;  %v5465_v52 = vpop.permute.xlu1 %5464 }
 0x1f8   : > { %5272 = vmatpush1.bf16.msra.mxu0 %v5263_v42  ;;  %5303 = vmatprep.mubr.bf16.mxu0 %v6329_v1 }
 0x1f9   : > { %6232 = vmatmul.mubr.msk.bf16.vlgmr.msra.gmra.mrb[184].mxu1 %vm249_vm2, %v5840_v46  ;;  %5845 = vmatprep.subr.msk.bf16.mxu0 %vm253_vm1, %v5365_v50 }
 0x1fa   : > { %v2343_v54 = vpop.f32.mrb[76].mxu0  ;;  %6236 = vmatpush3.bf16.msra.mxu1 %v5376_v51  ;;  %6237 = vmatprep.mubr.msk.bf16.mxu1 %vm6328_vm0, %v6327_v0  ;;  %v5467_v57 = vpop.permute.xlu0 %5466 }
 0x1fb   : > { %v2390_v55 = vadd.f32 %v2343_v54, %v2280_v37  ;;  %v2345_v56 = vpop.f32.mrb[77].mxu0  ;;  %6241 = vmatprep.subr.bf16.mxu1 %v6327_v0  ;;  %v5471_v13 = vsel %vm5470_vm14, %v5465_v52, %v5467_v57 }
 0x1fc   : > { %v2391_v58 = vadd.f32 %v2345_v56, %v2281_v39  ;;  %v2347_v59 = vpop.f32.mrb[78].mxu0  ;;  %v2494_v60 = vpop.f32.mrb[80].mxu1  ;;  %v5477_v7 = vsel %vm253_vm1, %v5471_v13, 0 }
 0x1fd   : > { %v2348_v62 = vpop.f32.mrb[79].mxu0  ;;  %v2502_v63 = vadd.f32 %v2494_v60, %v2392_v44  ;;  %v6077_v2 = vpop.f32.mrb[81].mxu1 }
 0x1fe   : > { %v2497_v6 = vpop.f32.mrb[82].mxu1  ;;  %v5469_v9 = vpop.permute.xlu1 %5468 }
 0x1ff   : > { %5842 = vmatmul.mubr.msk.bf16.vlgmr.msra.gmra.mrb[184].mxu0 %vm249_vm2, %v5840_v46  ;;  %v5472_v10 = vsel %vm5470_vm14, %v5467_v57, %v5469_v9  ;;  %v5483_v11 = vsel %vm253_vm1, %v5469_v9, 0  ;;  %v6078_v12 = vpop.f32.mrb[83].mxu1 }
 0x200   : > { %5379 = vmatpush1.bf16.msra.mxu0 %v5370_v61  ;;  %5410 = vmatprep.mubr.bf16.mxu0 %v6329_v1 }
 0x201   : > { %6238 = vmatmul.mubr.msk.bf16.vlgmr.msra.gmra.mrb[188].mxu1 %vm249_vm2, %v5844_v3  ;;  %5849 = vmatprep.subr.msk.bf16.mxu0 %vm253_vm1, %v5472_v10 }
 0x202   : > { %v2453_v4 = vpop.f32.mrb[80].mxu0  ;;  %6242 = vmatpush3.bf16.msra.mxu1 %v5483_v11  ;;  %6243 = vmatprep.mubr.msk.bf16.mxu1 %vm6328_vm0, %v6327_v0  ;;  %vm5582_vm0 = vcmask 785408  }
 0x203   : > { %v2500_v15 = vadd.f32 %v2453_v4, %v2390_v55  ;;  %v2455_v14 = vpop.f32.mrb[81].mxu0 }
 0x204   : > { %v2501_v16 = vadd.f32 %v2455_v14, %v2391_v58  ;;  %v2457_v17 = vpop.f32.mrb[82].mxu0  ;;  %v2604_v18 = vpop.f32.mrb[84].mxu1 }
 0x205   : > { %v2458_v19 = vpop.f32.mrb[83].mxu0  ;;  %v2612_v8 = vadd.f32 %v2604_v18, %v2502_v63  ;;  %v6083_v21 = vpop.f32.mrb[85].mxu1 }
 0x206   : > { %v2607_v22 = vpop.f32.mrb[86].mxu1 }
 0x207   : > { %5846 = vmatmul.mubr.msk.bf16.vlgmr.msra.gmra.mrb[188].mxu0 %vm249_vm2, %v5844_v3  ;;  %v6084_v23 = vpop.f32.mrb[87].mxu1 }
 0x208   : > { %5486 = vmatpush1.bf16.msra.mxu0 %v5477_v7  ;;  %5517 = vmatprep.mubr.bf16.mxu0 %v6329_v1 }
 0x209   : > { %6244 = vmatmul.mubr.msk.bf16.vlgmr.msra.gmra.mrb[192].mxu1 %vm249_vm2, %v5848_v5 }
 0x20a   : > { %v2563_v0 = vpop.f32.mrb[84].mxu0 }
 0x20b   : > { %v2610_v24 = vadd.f32 %v2563_v0, %v2500_v15  ;;  %v2565_v25 = vpop.f32.mrb[85].mxu0 }
 0x20c   : > { %v2611_v26 = vadd.f32 %v2565_v25, %v2501_v16  ;;  %v2567_v27 = vpop.f32.mrb[86].mxu0  ;;  %v2714_v28 = vpop.f32.mrb[88].mxu1 }
 0x20d   : > { %v2568_v29 = vpop.f32.mrb[87].mxu0  ;;  %v2722_v30 = vadd.f32 %v2714_v28, %v2612_v8  ;;  %v6089_v31 = vpop.f32.mrb[89].mxu1 }
 0x20e   : > { %v2717_v32 = vpop.f32.mrb[90].mxu1 }
 0x20f   : > { %5850 = vmatmul.mubr.msk.bf16.vlgmr.msra.gmra.mrb[192].mxu0 %vm249_vm2, %v5848_v5  ;;  %v6090_v33 = vpop.f32.mrb[91].mxu1 }
 0x212   : > { %v2673_v20 = vpop.f32.mrb[88].mxu0 }
 0x213   : > { %v2720_v34 = vadd.f32 %v2673_v20, %v2610_v24  ;;  %v2675_v35 = vpop.f32.mrb[89].mxu0 }
 0x214   : > { %v2721_v36 = vadd.f32 %v2675_v35, %v2611_v26  ;;  %v2677_v1 = vpop.f32.mrb[90].mxu0  ;;  %v2824_v37 = vpop.f32.mrb[92].mxu1 }
 0x215   : > { %v2678_v38 = vpop.f32.mrb[91].mxu0  ;;  %v2832_v39 = vadd.f32 %v2824_v37, %v2722_v30  ;;  %v6095_v40 = vpop.f32.mrb[93].mxu1 }
 0x216   : > { %v2827_v41 = vpop.f32.mrb[94].mxu1 }
 0x217   : > { %v6096_v42 = vpop.f32.mrb[95].mxu1 }
 0x21a   : > { %v2783_v43 = vpop.f32.mrb[92].mxu0 }
 0x21b   : > { %v2830_v44 = vadd.f32 %v2783_v43, %v2720_v34  ;;  %v2785_v45 = vpop.f32.mrb[93].mxu0 }
 0x21c   : > { %v2831_v46 = vadd.f32 %v2785_v45, %v2721_v36  ;;  %v2787_v47 = vpop.f32.mrb[94].mxu0  ;;  %v2934_v48 = vpop.f32.mrb[96].mxu1 }
 0x21d   : > { %v2788_v49 = vpop.f32.mrb[95].mxu0  ;;  %v2942_v50 = vadd.f32 %v2934_v48, %v2832_v39  ;;  %v6101_v51 = vpop.f32.mrb[97].mxu1 }
 0x21e   : > { %v2937_v52 = vpop.f32.mrb[98].mxu1 }
 0x21f   : > { %v6102_v53 = vpop.f32.mrb[99].mxu1 }
 0x222   : > { %v2893_v54 = vpop.f32.mrb[96].mxu0 }
 0x223   : > { %v2940_v55 = vadd.f32 %v2893_v54, %v2830_v44  ;;  %v2895_v56 = vpop.f32.mrb[97].mxu0 }
 0x224   : > { %v2941_v57 = vadd.f32 %v2895_v56, %v2831_v46  ;;  %v2897_v58 = vpop.f32.mrb[98].mxu0  ;;  %v3044_v59 = vpop.f32.mrb[100].mxu1 }
 0x225   : > { %v2898_v60 = vpop.f32.mrb[99].mxu0  ;;  %v3052_v61 = vadd.f32 %v3044_v59, %v2942_v50  ;;  %v6107_v62 = vpop.f32.mrb[101].mxu1 }
 0x226   : > { %v3047_v63 = vpop.f32.mrb[102].mxu1 }
 0x227   : > { %v6108_v2 = vpop.f32.mrb[103].mxu1 }
 0x22a   : > { %v3003_v3 = vpop.f32.mrb[100].mxu0 }
 0x22b   : > { %v3050_v6 = vadd.f32 %v3003_v3, %v2940_v55  ;;  %v3005_v9 = vpop.f32.mrb[101].mxu0 }
 0x22c   : > { %v3051_v10 = vadd.f32 %v3005_v9, %v2941_v57  ;;  %v3007_v11 = vpop.f32.mrb[102].mxu0  ;;  %v3154_v12 = vpop.f32.mrb[104].mxu1 }
 0x22d   : > { %v3008_v13 = vpop.f32.mrb[103].mxu0  ;;  %v3162_v4 = vadd.f32 %v3154_v12, %v3052_v61  ;;  %v6113_v15 = vpop.f32.mrb[105].mxu1 }
 0x22e   : > { %v3157_v14 = vpop.f32.mrb[106].mxu1 }
 0x22f   : > { %v6114_v16 = vpop.f32.mrb[107].mxu1 }
 0x232   : > { %v3113_v17 = vpop.f32.mrb[104].mxu0 }
 0x233   : > { %v3160_v18 = vadd.f32 %v3113_v17, %v3050_v6  ;;  %v3115_v7 = vpop.f32.mrb[105].mxu0 }
 0x234   : > { %v3161_v19 = vadd.f32 %v3115_v7, %v3051_v10  ;;  %v3117_v8 = vpop.f32.mrb[106].mxu0  ;;  %v3264_v21 = vpop.f32.mrb[108].mxu1 }
 0x235   : > { %v3118_v5 = vpop.f32.mrb[107].mxu0  ;;  %v3272_v22 = vadd.f32 %v3264_v21, %v3162_v4  ;;  %v6119_v23 = vpop.f32.mrb[109].mxu1 }
 0x236   : > { %v3267_v0 = vpop.f32.mrb[110].mxu1 }
 0x237   : > { %v6120_v24 = vpop.f32.mrb[111].mxu1 }
 0x23a   : > { %v3223_v25 = vpop.f32.mrb[108].mxu0 }
 0x23b   : > { %v3270_v26 = vadd.f32 %v3223_v25, %v3160_v18  ;;  %v3225_v27 = vpop.f32.mrb[109].mxu0 }
 0x23c   : > { %v3271_v28 = vadd.f32 %v3225_v27, %v3161_v19  ;;  %v3227_v29 = vpop.f32.mrb[110].mxu0  ;;  %v3374_v30 = vpop.f32.mrb[112].mxu1 }
 0x23d   : > { %v3228_v31 = vpop.f32.mrb[111].mxu0  ;;  %v3382_v32 = vadd.f32 %v3374_v30, %v3272_v22  ;;  %v6125_v33 = vpop.f32.mrb[113].mxu1 }
 0x23e   : > { %v3377_v20 = vpop.f32.mrb[114].mxu1 }
 0x23f   : > { %v6126_v34 = vpop.f32.mrb[115].mxu1 }
 0x242   : > { %v3333_v35 = vpop.f32.mrb[112].mxu0 }
 0x243   : > { %v3380_v36 = vadd.f32 %v3333_v35, %v3270_v26  ;;  %v3335_v1 = vpop.f32.mrb[113].mxu0 }
 0x244   : > { %v3381_v37 = vadd.f32 %v3335_v1, %v3271_v28  ;;  %v3337_v38 = vpop.f32.mrb[114].mxu0  ;;  %v3484_v39 = vpop.f32.mrb[116].mxu1 }
 0x245   : > { %v3338_v40 = vpop.f32.mrb[115].mxu0  ;;  %v3492_v41 = vadd.f32 %v3484_v39, %v3382_v32  ;;  %v6131_v42 = vpop.f32.mrb[117].mxu1 }
 0x246   : > { %v3487_v43 = vpop.f32.mrb[118].mxu1 }
 0x247   : > { %v6132_v44 = vpop.f32.mrb[119].mxu1 }
 0x24a   : > { %v3443_v45 = vpop.f32.mrb[116].mxu0 }
 0x24b   : > { %v3490_v46 = vadd.f32 %v3443_v45, %v3380_v36  ;;  %v3445_v47 = vpop.f32.mrb[117].mxu0 }
 0x24c   : > { %v3491_v48 = vadd.f32 %v3445_v47, %v3381_v37  ;;  %v3447_v49 = vpop.f32.mrb[118].mxu0  ;;  %v3594_v50 = vpop.f32.mrb[120].mxu1 }
 0x24d   : > { %v3448_v51 = vpop.f32.mrb[119].mxu0  ;;  %v3602_v52 = vadd.f32 %v3594_v50, %v3492_v41  ;;  %v6137_v53 = vpop.f32.mrb[121].mxu1 }
 0x24e   : > { %v3597_v54 = vpop.f32.mrb[122].mxu1 }
 0x24f   : > { %v6138_v55 = vpop.f32.mrb[123].mxu1 }
 0x252   : > { %v3553_v56 = vpop.f32.mrb[120].mxu0 }
 0x253   : > { %v3600_v57 = vadd.f32 %v3553_v56, %v3490_v46  ;;  %v3555_v58 = vpop.f32.mrb[121].mxu0 }
 0x254   : > { %v3601_v59 = vadd.f32 %v3555_v58, %v3491_v48  ;;  %v3557_v60 = vpop.f32.mrb[122].mxu0  ;;  %v3704_v61 = vpop.f32.mrb[124].mxu1 }
 0x255   : > { %v3558_v62 = vpop.f32.mrb[123].mxu0  ;;  %v3712_v63 = vadd.f32 %v3704_v61, %v3602_v52  ;;  %v6143_v2 = vpop.f32.mrb[125].mxu1 }
 0x256   : > { %v3707_v3 = vpop.f32.mrb[126].mxu1 }
 0x257   : > { %v6144_v6 = vpop.f32.mrb[127].mxu1 }
 0x25a   : > { %v3663_v9 = vpop.f32.mrb[124].mxu0 }
 0x25b   : > { %v3710_v10 = vadd.f32 %v3663_v9, %v3600_v57  ;;  %v3665_v11 = vpop.f32.mrb[125].mxu0 }
 0x25c   : > { %v3711_v12 = vadd.f32 %v3665_v11, %v3601_v59  ;;  %v3667_v13 = vpop.f32.mrb[126].mxu0  ;;  %v3814_v4 = vpop.f32.mrb[128].mxu1 }
 0x25d   : > { %v3668_v15 = vpop.f32.mrb[127].mxu0  ;;  %v3822_v14 = vadd.f32 %v3814_v4, %v3712_v63  ;;  %v6149_v16 = vpop.f32.mrb[129].mxu1 }
 0x25e   : > { %v3817_v17 = vpop.f32.mrb[130].mxu1 }
 0x25f   : > { %v6150_v18 = vpop.f32.mrb[131].mxu1 }
 0x262   : > { %v3773_v7 = vpop.f32.mrb[128].mxu0 }
 0x263   : > { %v3820_v19 = vadd.f32 %v3773_v7, %v3710_v10  ;;  %v3775_v8 = vpop.f32.mrb[129].mxu0 }
 0x264   : > { %v3821_v21 = vadd.f32 %v3775_v8, %v3711_v12  ;;  %v3777_v5 = vpop.f32.mrb[130].mxu0  ;;  %v3924_v22 = vpop.f32.mrb[132].mxu1 }
 0x265   : > { %v3778_v23 = vpop.f32.mrb[131].mxu0  ;;  %v3932_v0 = vadd.f32 %v3924_v22, %v3822_v14  ;;  %v6155_v24 = vpop.f32.mrb[133].mxu1 }
 0x266   : > { %v3927_v25 = vpop.f32.mrb[134].mxu1 }
 0x267   : > { %v6156_v26 = vpop.f32.mrb[135].mxu1 }
 0x26a   : > { %v3883_v27 = vpop.f32.mrb[132].mxu0 }
 0x26b   : > { %v3930_v28 = vadd.f32 %v3883_v27, %v3820_v19  ;;  %v3885_v29 = vpop.f32.mrb[133].mxu0 }
 0x26c   : > { %v3931_v30 = vadd.f32 %v3885_v29, %v3821_v21  ;;  %v3887_v31 = vpop.f32.mrb[134].mxu0  ;;  %v4034_v32 = vpop.f32.mrb[136].mxu1 }
 0x26d   : > { %v3888_v33 = vpop.f32.mrb[135].mxu0  ;;  %v4042_v20 = vadd.f32 %v4034_v32, %v3932_v0  ;;  %v6161_v34 = vpop.f32.mrb[137].mxu1 }
 0x26e   : > { %v4037_v35 = vpop.f32.mrb[138].mxu1 }
 0x26f   : > { %v6162_v36 = vpop.f32.mrb[139].mxu1 }
 0x272   : > { %v3993_v1 = vpop.f32.mrb[136].mxu0 }
 0x273   : > { %v4040_v37 = vadd.f32 %v3993_v1, %v3930_v28  ;;  %v3995_v38 = vpop.f32.mrb[137].mxu0 }
 0x274   : > { %v4041_v39 = vadd.f32 %v3995_v38, %v3931_v30  ;;  %v3997_v40 = vpop.f32.mrb[138].mxu0  ;;  %v4144_v41 = vpop.f32.mrb[140].mxu1 }
 0x275   : > { %v3998_v42 = vpop.f32.mrb[139].mxu0  ;;  %v4152_v43 = vadd.f32 %v4144_v41, %v4042_v20  ;;  %v6167_v44 = vpop.f32.mrb[141].mxu1 }
 0x276   : > { %v4147_v45 = vpop.f32.mrb[142].mxu1 }
 0x277   : > { %v6168_v46 = vpop.f32.mrb[143].mxu1 }
 0x27a   : > { %v4103_v47 = vpop.f32.mrb[140].mxu0 }
 0x27b   : > { %v4150_v48 = vadd.f32 %v4103_v47, %v4040_v37  ;;  %v4105_v49 = vpop.f32.mrb[141].mxu0 }
 0x27c   : > { %v4151_v50 = vadd.f32 %v4105_v49, %v4041_v39  ;;  %v4107_v51 = vpop.f32.mrb[142].mxu0  ;;  %v4254_v52 = vpop.f32.mrb[144].mxu1 }
 0x27d   : > { %v4108_v53 = vpop.f32.mrb[143].mxu0  ;;  %v4262_v54 = vadd.f32 %v4254_v52, %v4152_v43  ;;  %v6173_v55 = vpop.f32.mrb[145].mxu1 }
 0x27e   : > { %v4257_v56 = vpop.f32.mrb[146].mxu1 }
 0x27f   : > { %v6174_v57 = vpop.f32.mrb[147].mxu1 }
 0x282   : > { %v4213_v58 = vpop.f32.mrb[144].mxu0 }
 0x283   : > { %v4260_v59 = vadd.f32 %v4213_v58, %v4150_v48  ;;  %v4215_v60 = vpop.f32.mrb[145].mxu0 }
 0x284   : > { %v4261_v61 = vadd.f32 %v4215_v60, %v4151_v50  ;;  %v4217_v62 = vpop.f32.mrb[146].mxu0  ;;  %v4364_v63 = vpop.f32.mrb[148].mxu1 }
 0x285   : > { %v4218_v2 = vpop.f32.mrb[147].mxu0  ;;  %v4372_v3 = vadd.f32 %v4364_v63, %v4262_v54  ;;  %v6179_v6 = vpop.f32.mrb[149].mxu1 }
 0x286   : > { %v4367_v9 = vpop.f32.mrb[150].mxu1 }
 0x287   : > { %v6180_v10 = vpop.f32.mrb[151].mxu1 }
 0x28a   : > { %v4323_v11 = vpop.f32.mrb[148].mxu0 }
 0x28b   : > { %v4370_v12 = vadd.f32 %v4323_v11, %v4260_v59  ;;  %v4325_v13 = vpop.f32.mrb[149].mxu0 }
 0x28c   : > { %v4371_v4 = vadd.f32 %v4325_v13, %v4261_v61  ;;  %v4327_v15 = vpop.f32.mrb[150].mxu0  ;;  %v4474_v14 = vpop.f32.mrb[152].mxu1 }
 0x28d   : > { %v4328_v16 = vpop.f32.mrb[151].mxu0  ;;  %v4482_v17 = vadd.f32 %v4474_v14, %v4372_v3  ;;  %v6185_v18 = vpop.f32.mrb[153].mxu1 }
 0x28e   : > { %v4477_v7 = vpop.f32.mrb[154].mxu1 }
 0x28f   : > { %v6186_v19 = vpop.f32.mrb[155].mxu1 }
 0x292   : > { %v4433_v8 = vpop.f32.mrb[152].mxu0 }
 0x293   : > { %v4480_v21 = vadd.f32 %v4433_v8, %v4370_v12  ;;  %v4435_v5 = vpop.f32.mrb[153].mxu0 }
 0x294   : > { %v4481_v22 = vadd.f32 %v4435_v5, %v4371_v4  ;;  %v4437_v23 = vpop.f32.mrb[154].mxu0  ;;  %v4584_v0 = vpop.f32.mrb[156].mxu1 }
 0x295   : > { %v4438_v24 = vpop.f32.mrb[155].mxu0  ;;  %v4592_v25 = vadd.f32 %v4584_v0, %v4482_v17  ;;  %v6191_v26 = vpop.f32.mrb[157].mxu1 }
 0x296   : > { %v4587_v27 = vpop.f32.mrb[158].mxu1 }
 0x297   : > { %v6192_v28 = vpop.f32.mrb[159].mxu1 }
 0x29a   : > { %v4543_v29 = vpop.f32.mrb[156].mxu0 }
 0x29b   : > { %v4590_v30 = vadd.f32 %v4543_v29, %v4480_v21  ;;  %v4545_v31 = vpop.f32.mrb[157].mxu0 }
 0x29c   : > { %v4591_v32 = vadd.f32 %v4545_v31, %v4481_v22  ;;  %v4547_v33 = vpop.f32.mrb[158].mxu0  ;;  %v4694_v20 = vpop.f32.mrb[160].mxu1 }
 0x29d   : > { %v4548_v34 = vpop.f32.mrb[159].mxu0  ;;  %v4702_v35 = vadd.f32 %v4694_v20, %v4592_v25  ;;  %v6197_v36 = vpop.f32.mrb[161].mxu1 }
 0x29e   : > { %v4697_v1 = vpop.f32.mrb[162].mxu1 }
 0x29f   : > { %v6198_v37 = vpop.f32.mrb[163].mxu1 }
 0x2a2   : > { %v4653_v38 = vpop.f32.mrb[160].mxu0 }
 0x2a3   : > { %v4700_v39 = vadd.f32 %v4653_v38, %v4590_v30  ;;  %v4655_v40 = vpop.f32.mrb[161].mxu0 }
 0x2a4   : > { %v4701_v41 = vadd.f32 %v4655_v40, %v4591_v32  ;;  %v4657_v42 = vpop.f32.mrb[162].mxu0  ;;  %v4804_v43 = vpop.f32.mrb[164].mxu1 }
 0x2a5   : > { %v4658_v44 = vpop.f32.mrb[163].mxu0  ;;  %v4812_v45 = vadd.f32 %v4804_v43, %v4702_v35  ;;  %v6203_v46 = vpop.f32.mrb[165].mxu1 }
 0x2a6   : > { %v4807_v47 = vpop.f32.mrb[166].mxu1 }
 0x2a7   : > { %v6204_v48 = vpop.f32.mrb[167].mxu1 }
 0x2aa   : > { %v4763_v49 = vpop.f32.mrb[164].mxu0 }
 0x2ab   : > { %v4810_v50 = vadd.f32 %v4763_v49, %v4700_v39  ;;  %v4765_v51 = vpop.f32.mrb[165].mxu0 }
 0x2ac   : > { %v4811_v52 = vadd.f32 %v4765_v51, %v4701_v41  ;;  %v4767_v53 = vpop.f32.mrb[166].mxu0  ;;  %v4920_v54 = vpop.f32.mrb[168].mxu1 }
 0x2ad   : > { %v4768_v55 = vpop.f32.mrb[167].mxu0  ;;  %v4928_v56 = vadd.f32 %v4920_v54, %v4812_v45  ;;  %v6209_v57 = vpop.f32.mrb[169].mxu1 }
 0x2ae   : > { %v4923_v58 = vpop.f32.mrb[170].mxu1  ;;  %v5572_v54 = vpop.permute.xlu0 %5571 }
 0x2af   : > { %v6210_v59 = vpop.f32.mrb[171].mxu1 }
 0x2b2   : > { %v4879_v60 = vpop.f32.mrb[168].mxu0 }
 0x2b3   : > { %v4926_v61 = vadd.f32 %v4879_v60, %v4810_v50  ;;  %v4881_v62 = vpop.f32.mrb[169].mxu0 }
 0x2b4   : > { %v4927_v63 = vadd.f32 %v4881_v62, %v4811_v52  ;;  %v4883_v2 = vpop.f32.mrb[170].mxu0  ;;  %v5026_v3 = vpop.f32.mrb[172].mxu1 }
 0x2b5   : > { %v4884_v6 = vpop.f32.mrb[171].mxu0  ;;  %v5034_v9 = vadd.f32 %v5026_v3, %v4928_v56  ;;  %v6215_v10 = vpop.f32.mrb[173].mxu1 }
 0x2b6   : > { %v5029_v11 = vpop.f32.mrb[174].mxu1 }
 0x2b7   : > { %v6216_v12 = vpop.f32.mrb[175].mxu1 }
 0x2ba   : > { %v4985_v13 = vpop.f32.mrb[172].mxu0 }
 0x2bb   : > { %v5032_v4 = vadd.f32 %v4985_v13, %v4926_v61  ;;  %v4987_v15 = vpop.f32.mrb[173].mxu0 }
 0x2bc   : > { %v5033_v14 = vadd.f32 %v4987_v15, %v4927_v63  ;;  %v4989_v16 = vpop.f32.mrb[174].mxu0  ;;  %v5132_v17 = vpop.f32.mrb[176].mxu1 }
 0x2bd   : > { %v4990_v18 = vpop.f32.mrb[175].mxu0  ;;  %v5140_v7 = vadd.f32 %v5132_v17, %v5034_v9  ;;  %v6221_v19 = vpop.f32.mrb[177].mxu1 }
 0x2be   : > { %v5135_v8 = vpop.f32.mrb[178].mxu1 }
 0x2bf   : > { %v6222_v21 = vpop.f32.mrb[179].mxu1 }
 0x2c2   : > { %v5091_v5 = vpop.f32.mrb[176].mxu0 }
 0x2c3   : > { %v5138_v22 = vadd.f32 %v5091_v5, %v5032_v4  ;;  %v5093_v23 = vpop.f32.mrb[177].mxu0 }
 0x2c4   : > { %v5139_v0 = vadd.f32 %v5093_v23, %v5033_v14  ;;  %v5095_v24 = vpop.f32.mrb[178].mxu0  ;;  %v5239_v25 = vpop.f32.mrb[180].mxu1 }
 0x2c5   : > { %v5096_v26 = vpop.f32.mrb[179].mxu0  ;;  %v5247_v27 = vadd.f32 %v5239_v25, %v5140_v7  ;;  %v6227_v28 = vpop.f32.mrb[181].mxu1 }
 0x2c6   : > { %v5242_v29 = vpop.f32.mrb[182].mxu1 }
 0x2c7   : > { %v6228_v30 = vpop.f32.mrb[183].mxu1 }
 0x2ca   : > { %v5198_v31 = vpop.f32.mrb[180].mxu0 }
 0x2cb   : > { %v5245_v32 = vadd.f32 %v5198_v31, %v5138_v22  ;;  %v5200_v33 = vpop.f32.mrb[181].mxu0 }
 0x2cc   : > { %v5246_v20 = vadd.f32 %v5200_v33, %v5139_v0  ;;  %v5202_v34 = vpop.f32.mrb[182].mxu0  ;;  %v5346_v35 = vpop.f32.mrb[184].mxu1 }
 0x2cd   : > { %v5203_v36 = vpop.f32.mrb[183].mxu0  ;;  %v5354_v1 = vadd.f32 %v5346_v35, %v5247_v27  ;;  %v6233_v37 = vpop.f32.mrb[185].mxu1 }
 0x2ce   : > { %v5349_v38 = vpop.f32.mrb[186].mxu1 }
 0x2cf   : > { %v6234_v39 = vpop.f32.mrb[187].mxu1 }
 0x2d2   : > { %v5305_v40 = vpop.f32.mrb[184].mxu0 }
 0x2d3   : > { %v5352_v41 = vadd.f32 %v5305_v40, %v5245_v32  ;;  %v5307_v42 = vpop.f32.mrb[185].mxu0 }
 0x2d4   : > { %v5353_v43 = vadd.f32 %v5307_v42, %v5246_v20  ;;  %v5309_v44 = vpop.f32.mrb[186].mxu0  ;;  %v5453_v45 = vpop.f32.mrb[188].mxu1 }
 0x2d5   : > { %v5310_v46 = vpop.f32.mrb[187].mxu0  ;;  %v5461_v47 = vadd.f32 %v5453_v45, %v5354_v1  ;;  %v6239_v48 = vpop.f32.mrb[189].mxu1 }
 0x2d6   : > { %v5456_v49 = vpop.f32.mrb[190].mxu1 }
 0x2d7   : > { %v6240_v50 = vpop.f32.mrb[191].mxu1 }
 0x2da   : > { %v5412_v51 = vpop.f32.mrb[188].mxu0 }
 0x2db   : > { %v5459_v52 = vadd.f32 %v5412_v51, %v5352_v41  ;;  %v5414_v53 = vpop.f32.mrb[189].mxu0 }
 0x2dc   : > { %v5460_v55 = vadd.f32 %v5414_v53, %v5353_v43  ;;  %v5416_v56 = vpop.f32.mrb[190].mxu0  ;;  %v5560_v57 = vpop.f32.mrb[192].mxu1 }
 0x2dd   : > { %v5417_v58 = vpop.f32.mrb[191].mxu0  ;;  %v5568_v59 = vadd.f32 %v5560_v57, %v5461_v47  ;;  %v6245_v60 = vpop.f32.mrb[193].mxu1 }
 0x2de   : > { %v5563_v61 = vpop.f32.mrb[194].mxu1 }
 0x2df   : > { %v5576_v62 = vadd.f32 %v5572_v54, %v5568_v59  ;;  %v6246_v63 = vpop.f32.mrb[195].mxu1 }
 0x2e1   : > { %6313 = vtanh.f32 %v5576_v62 }
 0x2e2   : > { %v5519_v2 = vpop.f32.mrb[192].mxu0 }
 0x2e3   : > { %v5566_v3 = vadd.f32 %v5519_v2, %v5459_v52  ;;  %v5521_v6 = vpop.f32.mrb[193].mxu0 }
 0x2e4   : > { %v5567_v9 = vadd.f32 %v5521_v6, %v5460_v55  ;;  %v5523_v10 = vpop.f32.mrb[194].mxu0 }
 0x2e5   : > { %v5574_v11 = vadd.f32 %v5572_v54, %v5566_v3  ;;  %v5524_v12 = vpop.f32.mrb[195].mxu0 }
 0x2e6   : > { %v5575_v13 = vadd.f32 %v5572_v54, %v5567_v9 }
 0x2e7   : > { %6315 = vtanh.f32 %v5574_v11 }
 0x2e8   : > { %6317 = vtanh.f32 %v5575_v13 }
 0x2eb   : > { %v6314_v4 = vpop.eup %6313 }
 0x2ec   : > { %5583 = vst.msk [vmem:[%s224_s9 + $0x10] sm:$0xff] %vm5582_vm0, %v6314_v4 }
 0x2f1   : > { %v6316_v15 = vpop.eup %6315 }
 0x2f2   : > { %v6318_v14 = vpop.eup %6317  ;;  %5580 = vst [vmem:[%s224_s9] sm:$0xff] %v6316_v15 }
 0x2f3   : > { %5581 = vst [vmem:[%s224_s9 + $0x8] sm:$0xff] %v6318_v14 }
 0x2f4 PF: > { %s15_s18 = sadd.s32 1, %s6325_s18  }
 0x2f5   : > { %p12_p4 = scmp.ge.s32.totalorder %s15_s18, 4  }
 0x2f7   :  { %14 = sbr.rel (!%p12_p4) target bundleno = 1 (0x1), region = 118 }

</bundles_post_ra>
